<compile_context>
chip_gen: v6e
topology: v6e:2x2x1
jax: 0.10.0
libtpu: 0.0.40
codegen_flags: <defaults>
</compile_context>

<pallas_src>
import math
import functools

import jax
import jax.numpy as jnp
from jax.experimental import pallas as pl
from jax.experimental.pallas import tpu as pltpu

D_MODEL = 512
NUM_HEADS = 4
HEAD_DIM = D_MODEL // NUM_HEADS        # 128, lane-aligned
LANE = 128
LN_EPS = 1e-6

# Order in which weight/bias arrays are passed to the kernel (must match signature).
WEIGHT_ORDER = (
    "wqkv1", "bqkv1", "wo1", "bo1", "ln1_g", "ln1_b",
    "wq2", "bq2", "wkv2", "bkv2", "wo2", "bo2",
    "wc", "bc", "ln2_g", "ln2_b",
    "pff_w1", "pff_b1", "pff_w2", "pff_b2", "ln3_g", "ln3_b",
    "fc_w", "fc_b",
)


# ------------------------------ In-kernel helpers ------------------------------ #

def _layer_norm(y, g, b):
    # standard last-dim LayerNorm (biased variance, eps=1e-6); all f32
    mu = jnp.mean(y, axis=-1, keepdims=True)
    var = jnp.mean((y - mu) ** 2, axis=-1, keepdims=True)
    return (y - mu) * jax.lax.rsqrt(var + LN_EPS) * g + b


# --------------------------------- Fused kernel -------------------------------- #

def _rec_head_kernel(
    x_ref, f_ref,
    wqkv1_ref, bqkv1_ref, wo1_ref, bo1_ref, ln1g_ref, ln1b_ref,
    wq2_ref, bq2_ref, wkv2_ref, bkv2_ref, wo2_ref, bo2_ref,
    wc_ref, bc_ref, ln2g_ref, ln2b_ref,
    w1_ref, b1_ref, w2_ref, b2_ref, ln3g_ref, ln3b_ref,
    fcw_ref, fcb_ref,
    logits_ref, amap_ref,
    *, bB, T, S, S_pad,
):
    scale = 1.0 / math.sqrt(HEAD_DIM)

    x = x_ref[...]            # (bB*T, D) bf16  label-embedding rows of this block
    feat = f_ref[...]         # (bB*S, D) bf16  conv-feature token rows of this block
    x32 = x.astype(jnp.float32)

    # causal (subsequent) mask built in-kernel: 0 on/below diagonal, -1e30 above
    row = jax.lax.broadcasted_iota(jnp.int32, (T, T), 0)
    col = jax.lax.broadcasted_iota(jnp.int32, (T, T), 1)
    causal_bias = jnp.where(col <= row, 0.0, -1e30)

    # ---- masked self-attention: one fused QKV matmul for all rows in the block ----
    qkv = jnp.dot(x, wqkv1_ref[...],
                  preferred_element_type=jnp.float32) + bqkv1_ref[...]
    ctx1_rows = []
    for b in range(bB):
        qkv_b = qkv[b * T:(b + 1) * T, :]                  # (T, 3D) f32
        heads = []
        for h in range(NUM_HEADS):
            qh = qkv_b[:, h * HEAD_DIM:(h + 1) * HEAD_DIM].astype(jnp.bfloat16)
            kh = qkv_b[:, D_MODEL + h * HEAD_DIM:
                       D_MODEL + (h + 1) * HEAD_DIM].astype(jnp.bfloat16)
            vh = qkv_b[:, 2 * D_MODEL + h * HEAD_DIM:
                       2 * D_MODEL + (h + 1) * HEAD_DIM].astype(jnp.bfloat16)
            s = jax.lax.dot_general(qh, kh, (((1,), (1,)), ((), ())),
                                    preferred_element_type=jnp.float32) * scale
            s = s + causal_bias
            m = jnp.max(s, axis=-1, keepdims=True)
            e = jnp.exp(s - m)
            # internal-only probabilities -> approx reciprocal is fine (EUP slot)
            p = e * pl.reciprocal(jnp.sum(e, axis=-1, keepdims=True), approx=True)
            heads.append(jnp.dot(p.astype(jnp.bfloat16), vh,
                                 preferred_element_type=jnp.float32))
        ctx1_rows.append(jnp.concatenate(heads, axis=-1))
    ctx1 = jnp.concatenate(ctx1_rows, axis=0) if bB > 1 else ctx1_rows[0]

    attn1 = jnp.dot(ctx1.astype(jnp.bfloat16), wo1_ref[...],
                    preferred_element_type=jnp.float32) + bo1_ref[...]
    out = _layer_norm(x32 + attn1, ln1g_ref[...], ln1b_ref[...])

    # ---- cross attention: fused KV matmul over the whole block, head compressor fused ----
    q2 = jnp.dot(out.astype(jnp.bfloat16), wq2_ref[...],
                 preferred_element_type=jnp.float32) + bq2_ref[...]
    kv2 = jnp.dot(feat, wkv2_ref[...],
                  preferred_element_type=jnp.float32) + bkv2_ref[...]

    pad_keys = S_pad > S
    if pad_keys:
        # mask padded key columns so their softmax weight is exactly 0
        kcol = jax.lax.broadcasted_iota(jnp.int32, (T, S_pad), 1)
        key_bias = jnp.where(kcol < S, 0.0, -1e30)

    ctx2_rows = []
    for b in range(bB):
        q2_b = q2[b * T:(b + 1) * T, :]                    # (T, D) f32
        kv_b = kv2[b * S:(b + 1) * S, :]                   # (S, 2D) f32
        if pad_keys:
            # aligned sublane concat (S is a multiple of 8) -> lane-dense (S_pad, 2D)
            kv_b = jnp.concatenate(
                [kv_b, jnp.zeros((S_pad - S, 2 * D_MODEL), jnp.float32)], axis=0)
        heads = []
        amap = None
        for h in range(NUM_HEADS):
            qh = q2_b[:, h * HEAD_DIM:(h + 1) * HEAD_DIM].astype(jnp.bfloat16)
            kh = kv_b[:, h * HEAD_DIM:(h + 1) * HEAD_DIM].astype(jnp.bfloat16)
            vh = kv_b[:, D_MODEL + h * HEAD_DIM:
                      D_MODEL + (h + 1) * HEAD_DIM].astype(jnp.bfloat16)
            s = jax.lax.dot_general(qh, kh, (((1,), (1,)), ((), ())),
                                    preferred_element_type=jnp.float32) * scale
            if pad_keys:
                s = s + key_bias
            m = jnp.max(s, axis=-1, keepdims=True)
            e = jnp.exp(s - m)
            # exact reciprocal: these probabilities are externally visible via amap
            p = e / jnp.sum(e, axis=-1, keepdims=True)
            heads.append(jnp.dot(p.astype(jnp.bfloat16), vh,
                                 preferred_element_type=jnp.float32))
            term = p * wc_ref[h]          # Linear(num_heads -> 1), fused in-regs
            amap = term if amap is None else amap + term
        amap = amap + bc_ref[0]
        # full-width (T, S_pad) store -> unmasked lane-dense vst
        amap_ref[b * T:(b + 1) * T, :] = amap
        ctx2_rows.append(jnp.concatenate(heads, axis=-1))
    ctx2 = jnp.concatenate(ctx2_rows, axis=0) if bB > 1 else ctx2_rows[0]

    attn2 = jnp.dot(ctx2.astype(jnp.bfloat16), wo2_ref[...],
                    preferred_element_type=jnp.float32) + bo2_ref[...]
    out = _layer_norm(out + attn2, ln2g_ref[...], ln2b_ref[...])

    # ---- position-wise feed-forward + residual + LayerNorm ----
    h1 = jnp.dot(out.astype(jnp.bfloat16), w1_ref[...],
                 preferred_element_type=jnp.float32) + b1_ref[...]
    h1 = jnp.maximum(h1, 0.0)
    h2 = jnp.dot(h1.astype(jnp.bfloat16), w2_ref[...],
                 preferred_element_type=jnp.float32) + b2_ref[...]
    out = _layer_norm(out + h2, ln3g_ref[...], ln3b_ref[...])

    # ---- final classifier (zero-padded to a lane-dense width) ----
    logits_ref[...] = jnp.dot(out.astype(jnp.bfloat16), fcw_ref[...],
                              preferred_element_type=jnp.float32) + fcb_ref[...]


# --------------------------------- Wrapper -------------------------------------- #

def rec_head_forward(params, label_embeddings, conv_feature, *, num_chars, block_b=None):
    B, T, D = label_embeddings.shape
    _, C, Hf, Wf = conv_feature.shape
    S = Hf * Wf
    assert D == D_MODEL and C == D_MODEL

    if block_b is None:
        # largest divisor of B that is <= 8 examples per grid step
        block_b = max(d for d in range(1, min(B, 8) + 1) if B % d == 0)
    assert B % block_b == 0
    nb = B // block_b

    S_pad = ((S + LANE - 1) // LANE) * LANE
    nc_pad = params["fc_w"].shape[1]

    # Flatten + cast activations to bf16 rows (halves activation DMA; in a real
    # pipeline the cast/transpose fuses with the backbone producer).
    x2d = label_embeddings.astype(jnp.bfloat16).reshape(B * T, D)
    # NCHW -> [B*S, C] tokens (same as .view + .permute(0, 2, 1) + flatten)
    f2d = (conv_feature.astype(jnp.bfloat16)
           .reshape(B, C, S).transpose(0, 2, 1).reshape(B * S, C))

    in_specs = [
        pl.BlockSpec((block_b * T, D_MODEL), lambda i: (i, 0)),   # label-embedding rows
        pl.BlockSpec((block_b * S, D_MODEL), lambda i: (i, 0)),   # conv-token rows
    ]
    args = [x2d, f2d]
    for name in WEIGHT_ORDER:
        arr = params[name]
        if name in ("wc", "bc"):
            in_specs.append(pl.BlockSpec(memory_space=pltpu.MemorySpace.SMEM))
        else:
            # constant index_map -> weight block is DMA'd once per grid step and,
            # with a single-block grid, exactly once per call.
            in_specs.append(pl.BlockSpec(arr.shape, lambda i: (0, 0)))
        args.append(arr)

    kernel = functools.partial(_rec_head_kernel, bB=block_b, T=T, S=S, S_pad=S_pad)

    logits2d, amap2d = pl.pallas_call(
        kernel,
        out_shape=(jax.ShapeDtypeStruct((B * T, nc_pad), jnp.float32),
                   jax.ShapeDtypeStruct((B * T, S_pad), jnp.float32)),
        grid=(nb,),
        in_specs=in_specs,
        out_specs=(pl.BlockSpec((block_b * T, nc_pad), lambda i: (i, 0)),
                   pl.BlockSpec((block_b * T, S_pad), lambda i: (i, 0))),
        compiler_params=pltpu.CompilerParams(
            # single-block grid: keep it on one core (avoid duplicating the weight
            # fetch on v7x); shard across cores only when there are multiple blocks.
            dimension_semantics=("parallel",) if nb > 1 else ("arbitrary",),
            vmem_limit_bytes=24 * 1024 * 1024),
    )(*args)

    logits = logits2d.reshape(B, T, nc_pad)[..., :num_chars]
    attention_map = amap2d.reshape(B, T, S_pad)[:, :, :S][:, None, :, :]
    return logits, attention_map


# --------------------------- Parameter creation ---------------------------------- #

def init_params(key, num_chars):
    keys = jax.random.split(key, 64)
    kit = iter(keys)

    def w(shape, scale=0.02):
        return (scale * jax.random.normal(next(kit), shape)).astype(jnp.float32)

    def row(shape, scale=0.02):
        return w(shape, scale).reshape(1, -1)

    def bf(x):
        return x.astype(jnp.bfloat16)

    nc_pad = ((num_chars + LANE - 1) // LANE) * LANE
    fc_w = jnp.zeros((D_MODEL, nc_pad), jnp.float32).at[:, :num_chars].set(
        w((D_MODEL, num_chars)))
    fc_b = jnp.zeros((1, nc_pad), jnp.float32).at[:, :num_chars].set(
        w((num_chars,)).reshape(1, num_chars))

    return {
        # masked self-attention: fused Wq|Wk|Wv
        "wqkv1": bf(w((D_MODEL, 3 * D_MODEL))), "bqkv1": row((3 * D_MODEL,)),
        "wo1": bf(w((D_MODEL, D_MODEL))), "bo1": row((D_MODEL,)),
        "ln1_g": jnp.ones((1, D_MODEL), jnp.float32),
        "ln1_b": jnp.zeros((1, D_MODEL), jnp.float32),
        # cross attention: Wq separate, fused Wk|Wv, head compressor Linear(H -> 1)
        "wq2": bf(w((D_MODEL, D_MODEL))), "bq2": row((D_MODEL,)),
        "wkv2": bf(w((D_MODEL, 2 * D_MODEL))), "bkv2": row((2 * D_MODEL,)),
        "wo2": bf(w((D_MODEL, D_MODEL))), "bo2": row((D_MODEL,)),
        "wc": w((NUM_HEADS,), scale=0.5), "bc": w((1,), scale=0.1),
        "ln2_g": jnp.ones((1, D_MODEL), jnp.float32),
        "ln2_b": jnp.zeros((1, D_MODEL), jnp.float32),
        # position-wise feed-forward (d_ff = 2 * d_model)
        "pff_w1": bf(w((D_MODEL, 2 * D_MODEL))), "pff_b1": row((2 * D_MODEL,)),
        "pff_w2": bf(w((2 * D_MODEL, D_MODEL))), "pff_b2": row((D_MODEL,)),
        "ln3_g": jnp.ones((1, D_MODEL), jnp.float32),
        "ln3_b": jnp.zeros((1, D_MODEL), jnp.float32),
        # final classifier, zero-padded to lane-dense width
        "fc_w": bf(fc_w), "fc_b": fc_b,
    }


# ----------------------------------- Main ---------------------------------------- #

if __name__ == "__main__":
    key = jax.random.PRNGKey(0)
    kp, kx, kf = jax.random.split(key, 3)

    B, T = 2, 8            # batch, label sequence length
    Hf, Wf = 4, 4          # conv feature spatial dims -> 16 tokens
    NUM_CHARS = 40

    params = init_params(kp, NUM_CHARS)
    label_embeddings = jax.random.normal(kx, (B, T, D_MODEL), jnp.float32)
    conv_feature = jax.random.normal(kf, (B, D_MODEL, Hf, Wf), jnp.float32)

    fwd = jax.jit(rec_head_forward, static_argnames=("num_chars",))
    logits, attention_map = fwd(params, label_embeddings, conv_feature,
                                num_chars=NUM_CHARS)
    logits = jax.block_until_ready(logits)
    attention_map = jax.block_until_ready(attention_map)

    assert logits.shape == (B, T, NUM_CHARS)
    assert attention_map.shape == (B, 1, T, Hf * Wf)
    assert bool(jnp.all(jnp.isfinite(logits)))
    assert bool(jnp.all(jnp.isfinite(attention_map)))
    print("KERNEL_OK")
</pallas_src>

<mosaic_0001>
module attributes {stable_mosaic.version = 11 : i64} {
  func.func @_rec_head_kernel(%arg0: i32, %arg1: memref<16x512xbf16, #tpu.memory_space<vmem>>, %arg2: memref<32x512xbf16, #tpu.memory_space<vmem>>, %arg3: memref<512x1536xbf16, #tpu.memory_space<vmem>>, %arg4: memref<1x1536xf32, #tpu.memory_space<vmem>>, %arg5: memref<512x512xbf16, #tpu.memory_space<vmem>>, %arg6: memref<1x512xf32, #tpu.memory_space<vmem>>, %arg7: memref<1x512xf32, #tpu.memory_space<vmem>>, %arg8: memref<1x512xf32, #tpu.memory_space<vmem>>, %arg9: memref<512x512xbf16, #tpu.memory_space<vmem>>, %arg10: memref<1x512xf32, #tpu.memory_space<vmem>>, %arg11: memref<512x1024xbf16, #tpu.memory_space<vmem>>, %arg12: memref<1x1024xf32, #tpu.memory_space<vmem>>, %arg13: memref<512x512xbf16, #tpu.memory_space<vmem>>, %arg14: memref<1x512xf32, #tpu.memory_space<vmem>>, %arg15: memref<4xf32, #tpu.memory_space<smem>>, %arg16: memref<1xf32, #tpu.memory_space<smem>>, %arg17: memref<1x512xf32, #tpu.memory_space<vmem>>, %arg18: memref<1x512xf32, #tpu.memory_space<vmem>>, %arg19: memref<512x1024xbf16, #tpu.memory_space<vmem>>, %arg20: memref<1x1024xf32, #tpu.memory_space<vmem>>, %arg21: memref<1024x512xbf16, #tpu.memory_space<vmem>>, %arg22: memref<1x512xf32, #tpu.memory_space<vmem>>, %arg23: memref<1x512xf32, #tpu.memory_space<vmem>>, %arg24: memref<1x512xf32, #tpu.memory_space<vmem>>, %arg25: memref<512x128xbf16, #tpu.memory_space<vmem>>, %arg26: memref<1x128xf32, #tpu.memory_space<vmem>>, %arg27: memref<16x128xf32, #tpu.memory_space<vmem>>, %arg28: memref<16x128xf32, #tpu.memory_space<vmem>>) attributes {dimension_semantics = [#tpu.dimension_semantics<arbitrary>], iteration_bounds = array<i64: 1>, scalar_prefetch = 0 : i64, scratch_operands = 0 : i64, tpu.core_type = #tpu.core_type<tc>, window_params = [{transform_indices = @transform_0, window_bounds = array<i64: 16, 512>}, {transform_indices = @transform_1, window_bounds = array<i64: 32, 512>}, {pipeline_mode = #tpu.pipeline_mode<synchronous>, transform_indices = @transform_2, window_bounds = array<i64: 512, 1536>}, {pipeline_mode = #tpu.pipeline_mode<synchronous>, transform_indices = @transform_3, window_bounds = array<i64: 1, 1536>}, {pipeline_mode = #tpu.pipeline_mode<synchronous>, transform_indices = @transform_4, window_bounds = array<i64: 512, 512>}, {pipeline_mode = #tpu.pipeline_mode<synchronous>, transform_indices = @transform_5, window_bounds = array<i64: 1, 512>}, {pipeline_mode = #tpu.pipeline_mode<synchronous>, transform_indices = @transform_6, window_bounds = array<i64: 1, 512>}, {pipeline_mode = #tpu.pipeline_mode<synchronous>, transform_indices = @transform_7, window_bounds = array<i64: 1, 512>}, {pipeline_mode = #tpu.pipeline_mode<synchronous>, transform_indices = @transform_8, window_bounds = array<i64: 512, 512>}, {pipeline_mode = #tpu.pipeline_mode<synchronous>, transform_indices = @transform_9, window_bounds = array<i64: 1, 512>}, {pipeline_mode = #tpu.pipeline_mode<synchronous>, transform_indices = @transform_10, window_bounds = array<i64: 512, 1024>}, {pipeline_mode = #tpu.pipeline_mode<synchronous>, transform_indices = @transform_11, window_bounds = array<i64: 1, 1024>}, {pipeline_mode = #tpu.pipeline_mode<synchronous>, transform_indices = @transform_12, window_bounds = array<i64: 512, 512>}, {pipeline_mode = #tpu.pipeline_mode<synchronous>, transform_indices = @transform_13, window_bounds = array<i64: 1, 512>}, {transform_indices = @transform_14, window_bounds = array<i64: 4>}, {transform_indices = @transform_15, window_bounds = array<i64: 1>}, {pipeline_mode = #tpu.pipeline_mode<synchronous>, transform_indices = @transform_16, window_bounds = array<i64: 1, 512>}, {pipeline_mode = #tpu.pipeline_mode<synchronous>, transform_indices = @transform_17, window_bounds = array<i64: 1, 512>}, {pipeline_mode = #tpu.pipeline_mode<synchronous>, transform_indices = @transform_18, window_bounds = array<i64: 512, 1024>}, {pipeline_mode = #tpu.pipeline_mode<synchronous>, transform_indices = @transform_19, window_bounds = array<i64: 1, 1024>}, {pipeline_mode = #tpu.pipeline_mode<synchronous>, transform_indices = @transform_20, window_bounds = array<i64: 1024, 512>}, {pipeline_mode = #tpu.pipeline_mode<synchronous>, transform_indices = @transform_21, window_bounds = array<i64: 1, 512>}, {pipeline_mode = #tpu.pipeline_mode<synchronous>, transform_indices = @transform_22, window_bounds = array<i64: 1, 512>}, {pipeline_mode = #tpu.pipeline_mode<synchronous>, transform_indices = @transform_23, window_bounds = array<i64: 1, 512>}, {pipeline_mode = #tpu.pipeline_mode<synchronous>, transform_indices = @transform_24, window_bounds = array<i64: 512, 128>}, {pipeline_mode = #tpu.pipeline_mode<synchronous>, transform_indices = @transform_25, window_bounds = array<i64: 1, 128>}, {transform_indices = @transform_26, window_bounds = array<i64: 16, 128>}, {transform_indices = @transform_27, window_bounds = array<i64: 16, 128>}]} {
    %c0 = arith.constant 0 : index
    %c0_0 = arith.constant 0 : index
    %0 = vector.load %arg1[%c0, %c0_0] : memref<16x512xbf16, #tpu.memory_space<vmem>>, vector<16x512xbf16>
    %c0_1 = arith.constant 0 : index
    %c0_2 = arith.constant 0 : index
    %1 = vector.load %arg2[%c0_1, %c0_2] : memref<32x512xbf16, #tpu.memory_space<vmem>>, vector<32x512xbf16>
    %2 = arith.extf %0 : vector<16x512xbf16> to vector<16x512xf32>
    %3 = tpu.iota {dimensions = array<i32: 0>} : vector<8x8xi32>
    %4 = tpu.iota {dimensions = array<i32: 1>} : vector<8x8xi32>
    %5 = arith.cmpi sle, %4, %3 : vector<8x8xi32>
    %cst = arith.constant 0.000000e+00 : f32
    %cst_3 = arith.constant -1.000000e+30 : f32
    %6 = vector.broadcast %cst : f32 to vector<8x8xf32>
    %7 = vector.broadcast %cst_3 : f32 to vector<8x8xf32>
    %8 = arith.select %5, %6, %7 : vector<8x8xi1>, vector<8x8xf32>
    %c0_4 = arith.constant 0 : index
    %c0_5 = arith.constant 0 : index
    %9 = vector.load %arg3[%c0_4, %c0_5] : memref<512x1536xbf16, #tpu.memory_space<vmem>>, vector<512x1536xbf16>
    %cst_6 = arith.constant dense<0.000000e+00> : vector<16x1536xf32>
    %10 = tpu.matmul %0, %9, %cst_6 {dimension_numbers = #tpu.dot_dimension_numbers<[1], [0], [0], [1], [0, 0, 1, 1], [], []>} : vector<16x512xbf16>, vector<512x1536xbf16>, vector<16x1536xf32> -> vector<16x1536xf32>
    %c0_7 = arith.constant 0 : index
    %c0_8 = arith.constant 0 : index
    %11 = vector.load %arg4[%c0_7, %c0_8] : memref<1x1536xf32, #tpu.memory_space<vmem>>, vector<1x1536xf32>
    %12 = vector.broadcast %11 : vector<1x1536xf32> to vector<16x1536xf32>
    %13 = arith.addf %10, %12 : vector<16x1536xf32>
    %14 = vector.extract_strided_slice %13 {offsets = [0, 0], sizes = [8, 1536], strides = [1, 1]} : vector<16x1536xf32> to vector<8x1536xf32>
    %15 = vector.extract_strided_slice %14 {offsets = [0, 0], sizes = [8, 128], strides = [1, 1]} : vector<8x1536xf32> to vector<8x128xf32>
    %16 = arith.truncf %15 : vector<8x128xf32> to vector<8x128xbf16>
    %17 = vector.extract_strided_slice %14 {offsets = [0, 512], sizes = [8, 128], strides = [1, 1]} : vector<8x1536xf32> to vector<8x128xf32>
    %18 = arith.truncf %17 : vector<8x128xf32> to vector<8x128xbf16>
    %19 = vector.extract_strided_slice %14 {offsets = [0, 1024], sizes = [8, 128], strides = [1, 1]} : vector<8x1536xf32> to vector<8x128xf32>
    %20 = arith.truncf %19 : vector<8x128xf32> to vector<8x128xbf16>
    %cst_9 = arith.constant dense<0.000000e+00> : vector<8x8xf32>
    %21 = tpu.matmul %16, %18, %cst_9 {dimension_numbers = #tpu.dot_dimension_numbers<[1], [1], [0], [0], [0, 0, 1, 0], [], []>} : vector<8x128xbf16>, vector<8x128xbf16>, vector<8x8xf32> -> vector<8x8xf32>
    %cst_10 = arith.constant 0.0883883461 : f32
    %22 = vector.broadcast %cst_10 : f32 to vector<8x8xf32>
    %23 = arith.mulf %21, %22 : vector<8x8xf32>
    %24 = arith.addf %23, %8 : vector<8x8xf32>
    %cst_11 = arith.constant dense<0xFF800000> : vector<8xf32>
    %25 = vector.multi_reduction <maximumf>, %24, %cst_11 [1] : vector<8x8xf32> to vector<8xf32>
    %26 = vector.shape_cast %25 : vector<8xf32> to vector<8x1xf32>
    %27 = vector.broadcast %26 : vector<8x1xf32> to vector<8x8xf32>
    %28 = arith.subf %24, %27 : vector<8x8xf32>
    %29 = math.exp %28 : vector<8x8xf32>
    %cst_12 = arith.constant dense<0.000000e+00> : vector<8xf32>
    %30 = vector.multi_reduction <add>, %29, %cst_12 [1] : vector<8x8xf32> to vector<8xf32>
    %31 = vector.shape_cast %30 : vector<8xf32> to vector<8x1xf32>
    %32 = tpu.reciprocal %31 {approx = true} : vector<8x1xf32> -> vector<8x1xf32>
    %33 = vector.broadcast %32 : vector<8x1xf32> to vector<8x8xf32>
    %34 = arith.mulf %29, %33 : vector<8x8xf32>
    %35 = arith.truncf %34 : vector<8x8xf32> to vector<8x8xbf16>
    %cst_13 = arith.constant dense<0.000000e+00> : vector<8x128xf32>
    %36 = tpu.matmul %35, %20, %cst_13 {dimension_numbers = #tpu.dot_dimension_numbers<[1], [0], [0], [1], [0, 0, 1, 1], [], []>} : vector<8x8xbf16>, vector<8x128xbf16>, vector<8x128xf32> -> vector<8x128xf32>
    %37 = vector.extract_strided_slice %14 {offsets = [0, 128], sizes = [8, 128], strides = [1, 1]} : vector<8x1536xf32> to vector<8x128xf32>
    %38 = arith.truncf %37 : vector<8x128xf32> to vector<8x128xbf16>
    %39 = vector.extract_strided_slice %14 {offsets = [0, 640], sizes = [8, 128], strides = [1, 1]} : vector<8x1536xf32> to vector<8x128xf32>
    %40 = arith.truncf %39 : vector<8x128xf32> to vector<8x128xbf16>
    %41 = vector.extract_strided_slice %14 {offsets = [0, 1152], sizes = [8, 128], strides = [1, 1]} : vector<8x1536xf32> to vector<8x128xf32>
    %42 = arith.truncf %41 : vector<8x128xf32> to vector<8x128xbf16>
    %cst_14 = arith.constant dense<0.000000e+00> : vector<8x8xf32>
    %43 = tpu.matmul %38, %40, %cst_14 {dimension_numbers = #tpu.dot_dimension_numbers<[1], [1], [0], [0], [0, 0, 1, 0], [], []>} : vector<8x128xbf16>, vector<8x128xbf16>, vector<8x8xf32> -> vector<8x8xf32>
    %cst_15 = arith.constant 0.0883883461 : f32
    %44 = vector.broadcast %cst_15 : f32 to vector<8x8xf32>
    %45 = arith.mulf %43, %44 : vector<8x8xf32>
    %46 = arith.addf %45, %8 : vector<8x8xf32>
    %cst_16 = arith.constant dense<0xFF800000> : vector<8xf32>
    %47 = vector.multi_reduction <maximumf>, %46, %cst_16 [1] : vector<8x8xf32> to vector<8xf32>
    %48 = vector.shape_cast %47 : vector<8xf32> to vector<8x1xf32>
    %49 = vector.broadcast %48 : vector<8x1xf32> to vector<8x8xf32>
    %50 = arith.subf %46, %49 : vector<8x8xf32>
    %51 = math.exp %50 : vector<8x8xf32>
    %cst_17 = arith.constant dense<0.000000e+00> : vector<8xf32>
    %52 = vector.multi_reduction <add>, %51, %cst_17 [1] : vector<8x8xf32> to vector<8xf32>
    %53 = vector.shape_cast %52 : vector<8xf32> to vector<8x1xf32>
    %54 = tpu.reciprocal %53 {approx = true} : vector<8x1xf32> -> vector<8x1xf32>
    %55 = vector.broadcast %54 : vector<8x1xf32> to vector<8x8xf32>
    %56 = arith.mulf %51, %55 : vector<8x8xf32>
    %57 = arith.truncf %56 : vector<8x8xf32> to vector<8x8xbf16>
    %cst_18 = arith.constant dense<0.000000e+00> : vector<8x128xf32>
    %58 = tpu.matmul %57, %42, %cst_18 {dimension_numbers = #tpu.dot_dimension_numbers<[1], [0], [0], [1], [0, 0, 1, 1], [], []>} : vector<8x8xbf16>, vector<8x128xbf16>, vector<8x128xf32> -> vector<8x128xf32>
    %59 = vector.extract_strided_slice %14 {offsets = [0, 256], sizes = [8, 128], strides = [1, 1]} : vector<8x1536xf32> to vector<8x128xf32>
    %60 = arith.truncf %59 : vector<8x128xf32> to vector<8x128xbf16>
    %61 = vector.extract_strided_slice %14 {offsets = [0, 768], sizes = [8, 128], strides = [1, 1]} : vector<8x1536xf32> to vector<8x128xf32>
    %62 = arith.truncf %61 : vector<8x128xf32> to vector<8x128xbf16>
    %63 = vector.extract_strided_slice %14 {offsets = [0, 1280], sizes = [8, 128], strides = [1, 1]} : vector<8x1536xf32> to vector<8x128xf32>
    %64 = arith.truncf %63 : vector<8x128xf32> to vector<8x128xbf16>
    %cst_19 = arith.constant dense<0.000000e+00> : vector<8x8xf32>
    %65 = tpu.matmul %60, %62, %cst_19 {dimension_numbers = #tpu.dot_dimension_numbers<[1], [1], [0], [0], [0, 0, 1, 0], [], []>} : vector<8x128xbf16>, vector<8x128xbf16>, vector<8x8xf32> -> vector<8x8xf32>
    %cst_20 = arith.constant 0.0883883461 : f32
    %66 = vector.broadcast %cst_20 : f32 to vector<8x8xf32>
    %67 = arith.mulf %65, %66 : vector<8x8xf32>
    %68 = arith.addf %67, %8 : vector<8x8xf32>
    %cst_21 = arith.constant dense<0xFF800000> : vector<8xf32>
    %69 = vector.multi_reduction <maximumf>, %68, %cst_21 [1] : vector<8x8xf32> to vector<8xf32>
    %70 = vector.shape_cast %69 : vector<8xf32> to vector<8x1xf32>
    %71 = vector.broadcast %70 : vector<8x1xf32> to vector<8x8xf32>
    %72 = arith.subf %68, %71 : vector<8x8xf32>
    %73 = math.exp %72 : vector<8x8xf32>
    %cst_22 = arith.constant dense<0.000000e+00> : vector<8xf32>
    %74 = vector.multi_reduction <add>, %73, %cst_22 [1] : vector<8x8xf32> to vector<8xf32>
    %75 = vector.shape_cast %74 : vector<8xf32> to vector<8x1xf32>
    %76 = tpu.reciprocal %75 {approx = true} : vector<8x1xf32> -> vector<8x1xf32>
    %77 = vector.broadcast %76 : vector<8x1xf32> to vector<8x8xf32>
    %78 = arith.mulf %73, %77 : vector<8x8xf32>
    %79 = arith.truncf %78 : vector<8x8xf32> to vector<8x8xbf16>
    %cst_23 = arith.constant dense<0.000000e+00> : vector<8x128xf32>
    %80 = tpu.matmul %79, %64, %cst_23 {dimension_numbers = #tpu.dot_dimension_numbers<[1], [0], [0], [1], [0, 0, 1, 1], [], []>} : vector<8x8xbf16>, vector<8x128xbf16>, vector<8x128xf32> -> vector<8x128xf32>
    %81 = vector.extract_strided_slice %14 {offsets = [0, 384], sizes = [8, 128], strides = [1, 1]} : vector<8x1536xf32> to vector<8x128xf32>
    %82 = arith.truncf %81 : vector<8x128xf32> to vector<8x128xbf16>
    %83 = vector.extract_strided_slice %14 {offsets = [0, 896], sizes = [8, 128], strides = [1, 1]} : vector<8x1536xf32> to vector<8x128xf32>
    %84 = arith.truncf %83 : vector<8x128xf32> to vector<8x128xbf16>
    %85 = vector.extract_strided_slice %14 {offsets = [0, 1408], sizes = [8, 128], strides = [1, 1]} : vector<8x1536xf32> to vector<8x128xf32>
    %86 = arith.truncf %85 : vector<8x128xf32> to vector<8x128xbf16>
    %cst_24 = arith.constant dense<0.000000e+00> : vector<8x8xf32>
    %87 = tpu.matmul %82, %84, %cst_24 {dimension_numbers = #tpu.dot_dimension_numbers<[1], [1], [0], [0], [0, 0, 1, 0], [], []>} : vector<8x128xbf16>, vector<8x128xbf16>, vector<8x8xf32> -> vector<8x8xf32>
    %cst_25 = arith.constant 0.0883883461 : f32
    %88 = vector.broadcast %cst_25 : f32 to vector<8x8xf32>
    %89 = arith.mulf %87, %88 : vector<8x8xf32>
    %90 = arith.addf %89, %8 : vector<8x8xf32>
    %cst_26 = arith.constant dense<0xFF800000> : vector<8xf32>
    %91 = vector.multi_reduction <maximumf>, %90, %cst_26 [1] : vector<8x8xf32> to vector<8xf32>
    %92 = vector.shape_cast %91 : vector<8xf32> to vector<8x1xf32>
    %93 = vector.broadcast %92 : vector<8x1xf32> to vector<8x8xf32>
    %94 = arith.subf %90, %93 : vector<8x8xf32>
    %95 = math.exp %94 : vector<8x8xf32>
    %cst_27 = arith.constant dense<0.000000e+00> : vector<8xf32>
    %96 = vector.multi_reduction <add>, %95, %cst_27 [1] : vector<8x8xf32> to vector<8xf32>
    %97 = vector.shape_cast %96 : vector<8xf32> to vector<8x1xf32>
    %98 = tpu.reciprocal %97 {approx = true} : vector<8x1xf32> -> vector<8x1xf32>
    %99 = vector.broadcast %98 : vector<8x1xf32> to vector<8x8xf32>
    %100 = arith.mulf %95, %99 : vector<8x8xf32>
    %101 = arith.truncf %100 : vector<8x8xf32> to vector<8x8xbf16>
    %cst_28 = arith.constant dense<0.000000e+00> : vector<8x128xf32>
    %102 = tpu.matmul %101, %86, %cst_28 {dimension_numbers = #tpu.dot_dimension_numbers<[1], [0], [0], [1], [0, 0, 1, 1], [], []>} : vector<8x8xbf16>, vector<8x128xbf16>, vector<8x128xf32> -> vector<8x128xf32>
    %103 = tpu.concatenate %36, %58, %80, %102 in 1 : vector<8x128xf32>, vector<8x128xf32>, vector<8x128xf32>, vector<8x128xf32> -> vector<8x512xf32>
    %104 = vector.extract_strided_slice %13 {offsets = [8, 0], sizes = [8, 1536], strides = [1, 1]} : vector<16x1536xf32> to vector<8x1536xf32>
    %105 = vector.extract_strided_slice %104 {offsets = [0, 0], sizes = [8, 128], strides = [1, 1]} : vector<8x1536xf32> to vector<8x128xf32>
    %106 = arith.truncf %105 : vector<8x128xf32> to vector<8x128xbf16>
    %107 = vector.extract_strided_slice %104 {offsets = [0, 512], sizes = [8, 128], strides = [1, 1]} : vector<8x1536xf32> to vector<8x128xf32>
    %108 = arith.truncf %107 : vector<8x128xf32> to vector<8x128xbf16>
    %109 = vector.extract_strided_slice %104 {offsets = [0, 1024], sizes = [8, 128], strides = [1, 1]} : vector<8x1536xf32> to vector<8x128xf32>
    %110 = arith.truncf %109 : vector<8x128xf32> to vector<8x128xbf16>
    %cst_29 = arith.constant dense<0.000000e+00> : vector<8x8xf32>
    %111 = tpu.matmul %106, %108, %cst_29 {dimension_numbers = #tpu.dot_dimension_numbers<[1], [1], [0], [0], [0, 0, 1, 0], [], []>} : vector<8x128xbf16>, vector<8x128xbf16>, vector<8x8xf32> -> vector<8x8xf32>
    %cst_30 = arith.constant 0.0883883461 : f32
    %112 = vector.broadcast %cst_30 : f32 to vector<8x8xf32>
    %113 = arith.mulf %111, %112 : vector<8x8xf32>
    %114 = arith.addf %113, %8 : vector<8x8xf32>
    %cst_31 = arith.constant dense<0xFF800000> : vector<8xf32>
    %115 = vector.multi_reduction <maximumf>, %114, %cst_31 [1] : vector<8x8xf32> to vector<8xf32>
    %116 = vector.shape_cast %115 : vector<8xf32> to vector<8x1xf32>
    %117 = vector.broadcast %116 : vector<8x1xf32> to vector<8x8xf32>
    %118 = arith.subf %114, %117 : vector<8x8xf32>
    %119 = math.exp %118 : vector<8x8xf32>
    %cst_32 = arith.constant dense<0.000000e+00> : vector<8xf32>
    %120 = vector.multi_reduction <add>, %119, %cst_32 [1] : vector<8x8xf32> to vector<8xf32>
    %121 = vector.shape_cast %120 : vector<8xf32> to vector<8x1xf32>
    %122 = tpu.reciprocal %121 {approx = true} : vector<8x1xf32> -> vector<8x1xf32>
    %123 = vector.broadcast %122 : vector<8x1xf32> to vector<8x8xf32>
    %124 = arith.mulf %119, %123 : vector<8x8xf32>
    %125 = arith.truncf %124 : vector<8x8xf32> to vector<8x8xbf16>
    %cst_33 = arith.constant dense<0.000000e+00> : vector<8x128xf32>
    %126 = tpu.matmul %125, %110, %cst_33 {dimension_numbers = #tpu.dot_dimension_numbers<[1], [0], [0], [1], [0, 0, 1, 1], [], []>} : vector<8x8xbf16>, vector<8x128xbf16>, vector<8x128xf32> -> vector<8x128xf32>
    %127 = vector.extract_strided_slice %104 {offsets = [0, 128], sizes = [8, 128], strides = [1, 1]} : vector<8x1536xf32> to vector<8x128xf32>
    %128 = arith.truncf %127 : vector<8x128xf32> to vector<8x128xbf16>
    %129 = vector.extract_strided_slice %104 {offsets = [0, 640], sizes = [8, 128], strides = [1, 1]} : vector<8x1536xf32> to vector<8x128xf32>
    %130 = arith.truncf %129 : vector<8x128xf32> to vector<8x128xbf16>
    %131 = vector.extract_strided_slice %104 {offsets = [0, 1152], sizes = [8, 128], strides = [1, 1]} : vector<8x1536xf32> to vector<8x128xf32>
    %132 = arith.truncf %131 : vector<8x128xf32> to vector<8x128xbf16>
    %cst_34 = arith.constant dense<0.000000e+00> : vector<8x8xf32>
    %133 = tpu.matmul %128, %130, %cst_34 {dimension_numbers = #tpu.dot_dimension_numbers<[1], [1], [0], [0], [0, 0, 1, 0], [], []>} : vector<8x128xbf16>, vector<8x128xbf16>, vector<8x8xf32> -> vector<8x8xf32>
    %cst_35 = arith.constant 0.0883883461 : f32
    %134 = vector.broadcast %cst_35 : f32 to vector<8x8xf32>
    %135 = arith.mulf %133, %134 : vector<8x8xf32>
    %136 = arith.addf %135, %8 : vector<8x8xf32>
    %cst_36 = arith.constant dense<0xFF800000> : vector<8xf32>
    %137 = vector.multi_reduction <maximumf>, %136, %cst_36 [1] : vector<8x8xf32> to vector<8xf32>
    %138 = vector.shape_cast %137 : vector<8xf32> to vector<8x1xf32>
    %139 = vector.broadcast %138 : vector<8x1xf32> to vector<8x8xf32>
    %140 = arith.subf %136, %139 : vector<8x8xf32>
    %141 = math.exp %140 : vector<8x8xf32>
    %cst_37 = arith.constant dense<0.000000e+00> : vector<8xf32>
    %142 = vector.multi_reduction <add>, %141, %cst_37 [1] : vector<8x8xf32> to vector<8xf32>
    %143 = vector.shape_cast %142 : vector<8xf32> to vector<8x1xf32>
    %144 = tpu.reciprocal %143 {approx = true} : vector<8x1xf32> -> vector<8x1xf32>
    %145 = vector.broadcast %144 : vector<8x1xf32> to vector<8x8xf32>
    %146 = arith.mulf %141, %145 : vector<8x8xf32>
    %147 = arith.truncf %146 : vector<8x8xf32> to vector<8x8xbf16>
    %cst_38 = arith.constant dense<0.000000e+00> : vector<8x128xf32>
    %148 = tpu.matmul %147, %132, %cst_38 {dimension_numbers = #tpu.dot_dimension_numbers<[1], [0], [0], [1], [0, 0, 1, 1], [], []>} : vector<8x8xbf16>, vector<8x128xbf16>, vector<8x128xf32> -> vector<8x128xf32>
    %149 = vector.extract_strided_slice %104 {offsets = [0, 256], sizes = [8, 128], strides = [1, 1]} : vector<8x1536xf32> to vector<8x128xf32>
    %150 = arith.truncf %149 : vector<8x128xf32> to vector<8x128xbf16>
    %151 = vector.extract_strided_slice %104 {offsets = [0, 768], sizes = [8, 128], strides = [1, 1]} : vector<8x1536xf32> to vector<8x128xf32>
    %152 = arith.truncf %151 : vector<8x128xf32> to vector<8x128xbf16>
    %153 = vector.extract_strided_slice %104 {offsets = [0, 1280], sizes = [8, 128], strides = [1, 1]} : vector<8x1536xf32> to vector<8x128xf32>
    %154 = arith.truncf %153 : vector<8x128xf32> to vector<8x128xbf16>
    %cst_39 = arith.constant dense<0.000000e+00> : vector<8x8xf32>
    %155 = tpu.matmul %150, %152, %cst_39 {dimension_numbers = #tpu.dot_dimension_numbers<[1], [1], [0], [0], [0, 0, 1, 0], [], []>} : vector<8x128xbf16>, vector<8x128xbf16>, vector<8x8xf32> -> vector<8x8xf32>
    %cst_40 = arith.constant 0.0883883461 : f32
    %156 = vector.broadcast %cst_40 : f32 to vector<8x8xf32>
    %157 = arith.mulf %155, %156 : vector<8x8xf32>
    %158 = arith.addf %157, %8 : vector<8x8xf32>
    %cst_41 = arith.constant dense<0xFF800000> : vector<8xf32>
    %159 = vector.multi_reduction <maximumf>, %158, %cst_41 [1] : vector<8x8xf32> to vector<8xf32>
    %160 = vector.shape_cast %159 : vector<8xf32> to vector<8x1xf32>
    %161 = vector.broadcast %160 : vector<8x1xf32> to vector<8x8xf32>
    %162 = arith.subf %158, %161 : vector<8x8xf32>
    %163 = math.exp %162 : vector<8x8xf32>
    %cst_42 = arith.constant dense<0.000000e+00> : vector<8xf32>
    %164 = vector.multi_reduction <add>, %163, %cst_42 [1] : vector<8x8xf32> to vector<8xf32>
    %165 = vector.shape_cast %164 : vector<8xf32> to vector<8x1xf32>
    %166 = tpu.reciprocal %165 {approx = true} : vector<8x1xf32> -> vector<8x1xf32>
    %167 = vector.broadcast %166 : vector<8x1xf32> to vector<8x8xf32>
    %168 = arith.mulf %163, %167 : vector<8x8xf32>
    %169 = arith.truncf %168 : vector<8x8xf32> to vector<8x8xbf16>
    %cst_43 = arith.constant dense<0.000000e+00> : vector<8x128xf32>
    %170 = tpu.matmul %169, %154, %cst_43 {dimension_numbers = #tpu.dot_dimension_numbers<[1], [0], [0], [1], [0, 0, 1, 1], [], []>} : vector<8x8xbf16>, vector<8x128xbf16>, vector<8x128xf32> -> vector<8x128xf32>
    %171 = vector.extract_strided_slice %104 {offsets = [0, 384], sizes = [8, 128], strides = [1, 1]} : vector<8x1536xf32> to vector<8x128xf32>
    %172 = arith.truncf %171 : vector<8x128xf32> to vector<8x128xbf16>
    %173 = vector.extract_strided_slice %104 {offsets = [0, 896], sizes = [8, 128], strides = [1, 1]} : vector<8x1536xf32> to vector<8x128xf32>
    %174 = arith.truncf %173 : vector<8x128xf32> to vector<8x128xbf16>
    %175 = vector.extract_strided_slice %104 {offsets = [0, 1408], sizes = [8, 128], strides = [1, 1]} : vector<8x1536xf32> to vector<8x128xf32>
    %176 = arith.truncf %175 : vector<8x128xf32> to vector<8x128xbf16>
    %cst_44 = arith.constant dense<0.000000e+00> : vector<8x8xf32>
    %177 = tpu.matmul %172, %174, %cst_44 {dimension_numbers = #tpu.dot_dimension_numbers<[1], [1], [0], [0], [0, 0, 1, 0], [], []>} : vector<8x128xbf16>, vector<8x128xbf16>, vector<8x8xf32> -> vector<8x8xf32>
    %cst_45 = arith.constant 0.0883883461 : f32
    %178 = vector.broadcast %cst_45 : f32 to vector<8x8xf32>
    %179 = arith.mulf %177, %178 : vector<8x8xf32>
    %180 = arith.addf %179, %8 : vector<8x8xf32>
    %cst_46 = arith.constant dense<0xFF800000> : vector<8xf32>
    %181 = vector.multi_reduction <maximumf>, %180, %cst_46 [1] : vector<8x8xf32> to vector<8xf32>
    %182 = vector.shape_cast %181 : vector<8xf32> to vector<8x1xf32>
    %183 = vector.broadcast %182 : vector<8x1xf32> to vector<8x8xf32>
    %184 = arith.subf %180, %183 : vector<8x8xf32>
    %185 = math.exp %184 : vector<8x8xf32>
    %cst_47 = arith.constant dense<0.000000e+00> : vector<8xf32>
    %186 = vector.multi_reduction <add>, %185, %cst_47 [1] : vector<8x8xf32> to vector<8xf32>
    %187 = vector.shape_cast %186 : vector<8xf32> to vector<8x1xf32>
    %188 = tpu.reciprocal %187 {approx = true} : vector<8x1xf32> -> vector<8x1xf32>
    %189 = vector.broadcast %188 : vector<8x1xf32> to vector<8x8xf32>
    %190 = arith.mulf %185, %189 : vector<8x8xf32>
    %191 = arith.truncf %190 : vector<8x8xf32> to vector<8x8xbf16>
    %cst_48 = arith.constant dense<0.000000e+00> : vector<8x128xf32>
    %192 = tpu.matmul %191, %176, %cst_48 {dimension_numbers = #tpu.dot_dimension_numbers<[1], [0], [0], [1], [0, 0, 1, 1], [], []>} : vector<8x8xbf16>, vector<8x128xbf16>, vector<8x128xf32> -> vector<8x128xf32>
    %193 = tpu.concatenate %126, %148, %170, %192 in 1 : vector<8x128xf32>, vector<8x128xf32>, vector<8x128xf32>, vector<8x128xf32> -> vector<8x512xf32>
    %194 = tpu.concatenate %103, %193 in 0 : vector<8x512xf32>, vector<8x512xf32> -> vector<16x512xf32>
    %195 = arith.truncf %194 : vector<16x512xf32> to vector<16x512xbf16>
    %c0_49 = arith.constant 0 : index
    %c0_50 = arith.constant 0 : index
    %196 = vector.load %arg5[%c0_49, %c0_50] : memref<512x512xbf16, #tpu.memory_space<vmem>>, vector<512x512xbf16>
    %cst_51 = arith.constant dense<0.000000e+00> : vector<16x512xf32>
    %197 = tpu.matmul %195, %196, %cst_51 {dimension_numbers = #tpu.dot_dimension_numbers<[1], [0], [0], [1], [0, 0, 1, 1], [], []>} : vector<16x512xbf16>, vector<512x512xbf16>, vector<16x512xf32> -> vector<16x512xf32>
    %c0_52 = arith.constant 0 : index
    %c0_53 = arith.constant 0 : index
    %198 = vector.load %arg6[%c0_52, %c0_53] : memref<1x512xf32, #tpu.memory_space<vmem>>, vector<1x512xf32>
    %199 = vector.broadcast %198 : vector<1x512xf32> to vector<16x512xf32>
    %200 = arith.addf %197, %199 : vector<16x512xf32>
    %201 = arith.addf %2, %200 : vector<16x512xf32>
    %c0_54 = arith.constant 0 : index
    %c0_55 = arith.constant 0 : index
    %202 = vector.load %arg7[%c0_54, %c0_55] : memref<1x512xf32, #tpu.memory_space<vmem>>, vector<1x512xf32>
    %c0_56 = arith.constant 0 : index
    %c0_57 = arith.constant 0 : index
    %203 = vector.load %arg8[%c0_56, %c0_57] : memref<1x512xf32, #tpu.memory_space<vmem>>, vector<1x512xf32>
    %cst_58 = arith.constant dense<0.000000e+00> : vector<16xf32>
    %204 = vector.multi_reduction <add>, %201, %cst_58 [1] : vector<16x512xf32> to vector<16xf32>
    %205 = vector.shape_cast %204 : vector<16xf32> to vector<16x1xf32>
    %cst_59 = arith.constant 5.120000e+02 : f32
    %206 = vector.broadcast %cst_59 : f32 to vector<16x1xf32>
    %207 = arith.divf %205, %206 : vector<16x1xf32>
    %208 = vector.broadcast %207 : vector<16x1xf32> to vector<16x512xf32>
    %209 = arith.subf %201, %208 : vector<16x512xf32>
    %210 = arith.mulf %209, %209 : vector<16x512xf32>
    %cst_60 = arith.constant dense<0.000000e+00> : vector<16xf32>
    %211 = vector.multi_reduction <add>, %210, %cst_60 [1] : vector<16x512xf32> to vector<16xf32>
    %212 = vector.shape_cast %211 : vector<16xf32> to vector<16x1xf32>
    %cst_61 = arith.constant 5.120000e+02 : f32
    %213 = vector.broadcast %cst_61 : f32 to vector<16x1xf32>
    %214 = arith.divf %212, %213 : vector<16x1xf32>
    %215 = vector.broadcast %207 : vector<16x1xf32> to vector<16x512xf32>
    %216 = arith.subf %201, %215 : vector<16x512xf32>
    %cst_62 = arith.constant 9.99999997E-7 : f32
    %217 = vector.broadcast %cst_62 : f32 to vector<16x1xf32>
    %218 = arith.addf %214, %217 : vector<16x1xf32>
    %219 = math.rsqrt %218 : vector<16x1xf32>
    %220 = vector.broadcast %219 : vector<16x1xf32> to vector<16x512xf32>
    %221 = arith.mulf %216, %220 : vector<16x512xf32>
    %222 = vector.broadcast %202 : vector<1x512xf32> to vector<16x512xf32>
    %223 = arith.mulf %221, %222 : vector<16x512xf32>
    %224 = vector.broadcast %203 : vector<1x512xf32> to vector<16x512xf32>
    %225 = arith.addf %223, %224 : vector<16x512xf32>
    %226 = arith.truncf %225 : vector<16x512xf32> to vector<16x512xbf16>
    %c0_63 = arith.constant 0 : index
    %c0_64 = arith.constant 0 : index
    %227 = vector.load %arg9[%c0_63, %c0_64] : memref<512x512xbf16, #tpu.memory_space<vmem>>, vector<512x512xbf16>
    %cst_65 = arith.constant dense<0.000000e+00> : vector<16x512xf32>
    %228 = tpu.matmul %226, %227, %cst_65 {dimension_numbers = #tpu.dot_dimension_numbers<[1], [0], [0], [1], [0, 0, 1, 1], [], []>} : vector<16x512xbf16>, vector<512x512xbf16>, vector<16x512xf32> -> vector<16x512xf32>
    %c0_66 = arith.constant 0 : index
    %c0_67 = arith.constant 0 : index
    %229 = vector.load %arg10[%c0_66, %c0_67] : memref<1x512xf32, #tpu.memory_space<vmem>>, vector<1x512xf32>
    %230 = vector.broadcast %229 : vector<1x512xf32> to vector<16x512xf32>
    %231 = arith.addf %228, %230 : vector<16x512xf32>
    %c0_68 = arith.constant 0 : index
    %c0_69 = arith.constant 0 : index
    %232 = vector.load %arg11[%c0_68, %c0_69] : memref<512x1024xbf16, #tpu.memory_space<vmem>>, vector<512x1024xbf16>
    %cst_70 = arith.constant dense<0.000000e+00> : vector<32x1024xf32>
    %233 = tpu.matmul %1, %232, %cst_70 {dimension_numbers = #tpu.dot_dimension_numbers<[1], [0], [0], [1], [0, 0, 1, 1], [], []>} : vector<32x512xbf16>, vector<512x1024xbf16>, vector<32x1024xf32> -> vector<32x1024xf32>
    %c0_71 = arith.constant 0 : index
    %c0_72 = arith.constant 0 : index
    %234 = vector.load %arg12[%c0_71, %c0_72] : memref<1x1024xf32, #tpu.memory_space<vmem>>, vector<1x1024xf32>
    %235 = vector.broadcast %234 : vector<1x1024xf32> to vector<32x1024xf32>
    %236 = arith.addf %233, %235 : vector<32x1024xf32>
    %237 = tpu.iota {dimensions = array<i32: 1>} : vector<8x128xi32>
    %c16_i32 = arith.constant 16 : i32
    %238 = vector.broadcast %c16_i32 : i32 to vector<8x128xi32>
    %239 = arith.cmpi slt, %237, %238 : vector<8x128xi32>
    %cst_73 = arith.constant 0.000000e+00 : f32
    %cst_74 = arith.constant -1.000000e+30 : f32
    %240 = vector.broadcast %cst_73 : f32 to vector<8x128xf32>
    %241 = vector.broadcast %cst_74 : f32 to vector<8x128xf32>
    %242 = arith.select %239, %240, %241 : vector<8x128xi1>, vector<8x128xf32>
    %243 = vector.extract_strided_slice %231 {offsets = [0, 0], sizes = [8, 512], strides = [1, 1]} : vector<16x512xf32> to vector<8x512xf32>
    %244 = vector.extract_strided_slice %236 {offsets = [0, 0], sizes = [16, 1024], strides = [1, 1]} : vector<32x1024xf32> to vector<16x1024xf32>
    %cst_75 = arith.constant 0.000000e+00 : f32
    %245 = vector.broadcast %cst_75 : f32 to vector<112x1024xf32>
    %246 = tpu.concatenate %244, %245 in 0 : vector<16x1024xf32>, vector<112x1024xf32> -> vector<128x1024xf32>
    %247 = vector.extract_strided_slice %243 {offsets = [0, 0], sizes = [8, 128], strides = [1, 1]} : vector<8x512xf32> to vector<8x128xf32>
    %248 = arith.truncf %247 : vector<8x128xf32> to vector<8x128xbf16>
    %249 = vector.extract_strided_slice %246 {offsets = [0, 0], sizes = [128, 128], strides = [1, 1]} : vector<128x1024xf32> to vector<128x128xf32>
    %250 = arith.truncf %249 : vector<128x128xf32> to vector<128x128xbf16>
    %251 = vector.extract_strided_slice %246 {offsets = [0, 512], sizes = [128, 128], strides = [1, 1]} : vector<128x1024xf32> to vector<128x128xf32>
    %252 = arith.truncf %251 : vector<128x128xf32> to vector<128x128xbf16>
    %cst_76 = arith.constant dense<0.000000e+00> : vector<8x128xf32>
    %253 = tpu.matmul %248, %250, %cst_76 {dimension_numbers = #tpu.dot_dimension_numbers<[1], [1], [0], [0], [0, 0, 1, 0], [], []>} : vector<8x128xbf16>, vector<128x128xbf16>, vector<8x128xf32> -> vector<8x128xf32>
    %cst_77 = arith.constant 0.0883883461 : f32
    %254 = vector.broadcast %cst_77 : f32 to vector<8x128xf32>
    %255 = arith.mulf %253, %254 : vector<8x128xf32>
    %256 = arith.addf %255, %242 : vector<8x128xf32>
    %cst_78 = arith.constant dense<0xFF800000> : vector<8xf32>
    %257 = vector.multi_reduction <maximumf>, %256, %cst_78 [1] : vector<8x128xf32> to vector<8xf32>
    %258 = vector.shape_cast %257 : vector<8xf32> to vector<8x1xf32>
    %259 = vector.broadcast %258 : vector<8x1xf32> to vector<8x128xf32>
    %260 = arith.subf %256, %259 : vector<8x128xf32>
    %261 = math.exp %260 : vector<8x128xf32>
    %cst_79 = arith.constant dense<0.000000e+00> : vector<8xf32>
    %262 = vector.multi_reduction <add>, %261, %cst_79 [1] : vector<8x128xf32> to vector<8xf32>
    %263 = vector.shape_cast %262 : vector<8xf32> to vector<8x1xf32>
    %264 = vector.broadcast %263 : vector<8x1xf32> to vector<8x128xf32>
    %265 = arith.divf %261, %264 : vector<8x128xf32>
    %266 = arith.truncf %265 : vector<8x128xf32> to vector<8x128xbf16>
    %cst_80 = arith.constant dense<0.000000e+00> : vector<8x128xf32>
    %267 = tpu.matmul %266, %252, %cst_80 {dimension_numbers = #tpu.dot_dimension_numbers<[1], [0], [0], [1], [0, 0, 1, 1], [], []>} : vector<8x128xbf16>, vector<128x128xbf16>, vector<8x128xf32> -> vector<8x128xf32>
    %c0_81 = arith.constant 0 : index
    %268 = memref.load %arg15[%c0_81] : memref<4xf32, #tpu.memory_space<smem>>
    %269 = vector.broadcast %268 : f32 to vector<8x128xf32>
    %270 = arith.mulf %265, %269 : vector<8x128xf32>
    %271 = vector.extract_strided_slice %243 {offsets = [0, 128], sizes = [8, 128], strides = [1, 1]} : vector<8x512xf32> to vector<8x128xf32>
    %272 = arith.truncf %271 : vector<8x128xf32> to vector<8x128xbf16>
    %273 = vector.extract_strided_slice %246 {offsets = [0, 128], sizes = [128, 128], strides = [1, 1]} : vector<128x1024xf32> to vector<128x128xf32>
    %274 = arith.truncf %273 : vector<128x128xf32> to vector<128x128xbf16>
    %275 = vector.extract_strided_slice %246 {offsets = [0, 640], sizes = [128, 128], strides = [1, 1]} : vector<128x1024xf32> to vector<128x128xf32>
    %276 = arith.truncf %275 : vector<128x128xf32> to vector<128x128xbf16>
    %cst_82 = arith.constant dense<0.000000e+00> : vector<8x128xf32>
    %277 = tpu.matmul %272, %274, %cst_82 {dimension_numbers = #tpu.dot_dimension_numbers<[1], [1], [0], [0], [0, 0, 1, 0], [], []>} : vector<8x128xbf16>, vector<128x128xbf16>, vector<8x128xf32> -> vector<8x128xf32>
    %cst_83 = arith.constant 0.0883883461 : f32
    %278 = vector.broadcast %cst_83 : f32 to vector<8x128xf32>
    %279 = arith.mulf %277, %278 : vector<8x128xf32>
    %280 = arith.addf %279, %242 : vector<8x128xf32>
    %cst_84 = arith.constant dense<0xFF800000> : vector<8xf32>
    %281 = vector.multi_reduction <maximumf>, %280, %cst_84 [1] : vector<8x128xf32> to vector<8xf32>
    %282 = vector.shape_cast %281 : vector<8xf32> to vector<8x1xf32>
    %283 = vector.broadcast %282 : vector<8x1xf32> to vector<8x128xf32>
    %284 = arith.subf %280, %283 : vector<8x128xf32>
    %285 = math.exp %284 : vector<8x128xf32>
    %cst_85 = arith.constant dense<0.000000e+00> : vector<8xf32>
    %286 = vector.multi_reduction <add>, %285, %cst_85 [1] : vector<8x128xf32> to vector<8xf32>
    %287 = vector.shape_cast %286 : vector<8xf32> to vector<8x1xf32>
    %288 = vector.broadcast %287 : vector<8x1xf32> to vector<8x128xf32>
    %289 = arith.divf %285, %288 : vector<8x128xf32>
    %290 = arith.truncf %289 : vector<8x128xf32> to vector<8x128xbf16>
    %cst_86 = arith.constant dense<0.000000e+00> : vector<8x128xf32>
    %291 = tpu.matmul %290, %276, %cst_86 {dimension_numbers = #tpu.dot_dimension_numbers<[1], [0], [0], [1], [0, 0, 1, 1], [], []>} : vector<8x128xbf16>, vector<128x128xbf16>, vector<8x128xf32> -> vector<8x128xf32>
    %c1 = arith.constant 1 : index
    %292 = memref.load %arg15[%c1] : memref<4xf32, #tpu.memory_space<smem>>
    %293 = vector.broadcast %292 : f32 to vector<8x128xf32>
    %294 = arith.mulf %289, %293 : vector<8x128xf32>
    %295 = arith.addf %270, %294 : vector<8x128xf32>
    %296 = vector.extract_strided_slice %243 {offsets = [0, 256], sizes = [8, 128], strides = [1, 1]} : vector<8x512xf32> to vector<8x128xf32>
    %297 = arith.truncf %296 : vector<8x128xf32> to vector<8x128xbf16>
    %298 = vector.extract_strided_slice %246 {offsets = [0, 256], sizes = [128, 128], strides = [1, 1]} : vector<128x1024xf32> to vector<128x128xf32>
    %299 = arith.truncf %298 : vector<128x128xf32> to vector<128x128xbf16>
    %300 = vector.extract_strided_slice %246 {offsets = [0, 768], sizes = [128, 128], strides = [1, 1]} : vector<128x1024xf32> to vector<128x128xf32>
    %301 = arith.truncf %300 : vector<128x128xf32> to vector<128x128xbf16>
    %cst_87 = arith.constant dense<0.000000e+00> : vector<8x128xf32>
    %302 = tpu.matmul %297, %299, %cst_87 {dimension_numbers = #tpu.dot_dimension_numbers<[1], [1], [0], [0], [0, 0, 1, 0], [], []>} : vector<8x128xbf16>, vector<128x128xbf16>, vector<8x128xf32> -> vector<8x128xf32>
    %cst_88 = arith.constant 0.0883883461 : f32
    %303 = vector.broadcast %cst_88 : f32 to vector<8x128xf32>
    %304 = arith.mulf %302, %303 : vector<8x128xf32>
    %305 = arith.addf %304, %242 : vector<8x128xf32>
    %cst_89 = arith.constant dense<0xFF800000> : vector<8xf32>
    %306 = vector.multi_reduction <maximumf>, %305, %cst_89 [1] : vector<8x128xf32> to vector<8xf32>
    %307 = vector.shape_cast %306 : vector<8xf32> to vector<8x1xf32>
    %308 = vector.broadcast %307 : vector<8x1xf32> to vector<8x128xf32>
    %309 = arith.subf %305, %308 : vector<8x128xf32>
    %310 = math.exp %309 : vector<8x128xf32>
    %cst_90 = arith.constant dense<0.000000e+00> : vector<8xf32>
    %311 = vector.multi_reduction <add>, %310, %cst_90 [1] : vector<8x128xf32> to vector<8xf32>
    %312 = vector.shape_cast %311 : vector<8xf32> to vector<8x1xf32>
    %313 = vector.broadcast %312 : vector<8x1xf32> to vector<8x128xf32>
    %314 = arith.divf %310, %313 : vector<8x128xf32>
    %315 = arith.truncf %314 : vector<8x128xf32> to vector<8x128xbf16>
    %cst_91 = arith.constant dense<0.000000e+00> : vector<8x128xf32>
    %316 = tpu.matmul %315, %301, %cst_91 {dimension_numbers = #tpu.dot_dimension_numbers<[1], [0], [0], [1], [0, 0, 1, 1], [], []>} : vector<8x128xbf16>, vector<128x128xbf16>, vector<8x128xf32> -> vector<8x128xf32>
    %c2 = arith.constant 2 : index
    %317 = memref.load %arg15[%c2] : memref<4xf32, #tpu.memory_space<smem>>
    %318 = vector.broadcast %317 : f32 to vector<8x128xf32>
    %319 = arith.mulf %314, %318 : vector<8x128xf32>
    %320 = arith.addf %295, %319 : vector<8x128xf32>
    %321 = vector.extract_strided_slice %243 {offsets = [0, 384], sizes = [8, 128], strides = [1, 1]} : vector<8x512xf32> to vector<8x128xf32>
    %322 = arith.truncf %321 : vector<8x128xf32> to vector<8x128xbf16>
    %323 = vector.extract_strided_slice %246 {offsets = [0, 384], sizes = [128, 128], strides = [1, 1]} : vector<128x1024xf32> to vector<128x128xf32>
    %324 = arith.truncf %323 : vector<128x128xf32> to vector<128x128xbf16>
    %325 = vector.extract_strided_slice %246 {offsets = [0, 896], sizes = [128, 128], strides = [1, 1]} : vector<128x1024xf32> to vector<128x128xf32>
    %326 = arith.truncf %325 : vector<128x128xf32> to vector<128x128xbf16>
    %cst_92 = arith.constant dense<0.000000e+00> : vector<8x128xf32>
    %327 = tpu.matmul %322, %324, %cst_92 {dimension_numbers = #tpu.dot_dimension_numbers<[1], [1], [0], [0], [0, 0, 1, 0], [], []>} : vector<8x128xbf16>, vector<128x128xbf16>, vector<8x128xf32> -> vector<8x128xf32>
    %cst_93 = arith.constant 0.0883883461 : f32
    %328 = vector.broadcast %cst_93 : f32 to vector<8x128xf32>
    %329 = arith.mulf %327, %328 : vector<8x128xf32>
    %330 = arith.addf %329, %242 : vector<8x128xf32>
    %cst_94 = arith.constant dense<0xFF800000> : vector<8xf32>
    %331 = vector.multi_reduction <maximumf>, %330, %cst_94 [1] : vector<8x128xf32> to vector<8xf32>
    %332 = vector.shape_cast %331 : vector<8xf32> to vector<8x1xf32>
    %333 = vector.broadcast %332 : vector<8x1xf32> to vector<8x128xf32>
    %334 = arith.subf %330, %333 : vector<8x128xf32>
    %335 = math.exp %334 : vector<8x128xf32>
    %cst_95 = arith.constant dense<0.000000e+00> : vector<8xf32>
    %336 = vector.multi_reduction <add>, %335, %cst_95 [1] : vector<8x128xf32> to vector<8xf32>
    %337 = vector.shape_cast %336 : vector<8xf32> to vector<8x1xf32>
    %338 = vector.broadcast %337 : vector<8x1xf32> to vector<8x128xf32>
    %339 = arith.divf %335, %338 : vector<8x128xf32>
    %340 = arith.truncf %339 : vector<8x128xf32> to vector<8x128xbf16>
    %cst_96 = arith.constant dense<0.000000e+00> : vector<8x128xf32>
    %341 = tpu.matmul %340, %326, %cst_96 {dimension_numbers = #tpu.dot_dimension_numbers<[1], [0], [0], [1], [0, 0, 1, 1], [], []>} : vector<8x128xbf16>, vector<128x128xbf16>, vector<8x128xf32> -> vector<8x128xf32>
    %c3 = arith.constant 3 : index
    %342 = memref.load %arg15[%c3] : memref<4xf32, #tpu.memory_space<smem>>
    %343 = vector.broadcast %342 : f32 to vector<8x128xf32>
    %344 = arith.mulf %339, %343 : vector<8x128xf32>
    %345 = arith.addf %320, %344 : vector<8x128xf32>
    %c0_97 = arith.constant 0 : index
    %346 = memref.load %arg16[%c0_97] : memref<1xf32, #tpu.memory_space<smem>>
    %347 = vector.broadcast %346 : f32 to vector<8x128xf32>
    %348 = arith.addf %345, %347 : vector<8x128xf32>
    %c0_98 = arith.constant 0 : index
    %c0_99 = arith.constant 0 : index
    %349 = vector.load %arg28[%c0_98, %c0_99] : memref<16x128xf32, #tpu.memory_space<vmem>>, vector<8x128xf32>
    tpu.vector_store %arg28[%c0_98, %c0_99], %348 {strides = array<i32>} : memref<16x128xf32, #tpu.memory_space<vmem>>, vector<8x128xf32>,
    %350 = tpu.concatenate %267, %291, %316, %341 in 1 : vector<8x128xf32>, vector<8x128xf32>, vector<8x128xf32>, vector<8x128xf32> -> vector<8x512xf32>
    %351 = vector.extract_strided_slice %231 {offsets = [8, 0], sizes = [8, 512], strides = [1, 1]} : vector<16x512xf32> to vector<8x512xf32>
    %352 = vector.extract_strided_slice %236 {offsets = [16, 0], sizes = [16, 1024], strides = [1, 1]} : vector<32x1024xf32> to vector<16x1024xf32>
    %cst_100 = arith.constant 0.000000e+00 : f32
    %353 = vector.broadcast %cst_100 : f32 to vector<112x1024xf32>
    %354 = tpu.concatenate %352, %353 in 0 : vector<16x1024xf32>, vector<112x1024xf32> -> vector<128x1024xf32>
    %355 = vector.extract_strided_slice %351 {offsets = [0, 0], sizes = [8, 128], strides = [1, 1]} : vector<8x512xf32> to vector<8x128xf32>
    %356 = arith.truncf %355 : vector<8x128xf32> to vector<8x128xbf16>
    %357 = vector.extract_strided_slice %354 {offsets = [0, 0], sizes = [128, 128], strides = [1, 1]} : vector<128x1024xf32> to vector<128x128xf32>
    %358 = arith.truncf %357 : vector<128x128xf32> to vector<128x128xbf16>
    %359 = vector.extract_strided_slice %354 {offsets = [0, 512], sizes = [128, 128], strides = [1, 1]} : vector<128x1024xf32> to vector<128x128xf32>
    %360 = arith.truncf %359 : vector<128x128xf32> to vector<128x128xbf16>
    %cst_101 = arith.constant dense<0.000000e+00> : vector<8x128xf32>
    %361 = tpu.matmul %356, %358, %cst_101 {dimension_numbers = #tpu.dot_dimension_numbers<[1], [1], [0], [0], [0, 0, 1, 0], [], []>} : vector<8x128xbf16>, vector<128x128xbf16>, vector<8x128xf32> -> vector<8x128xf32>
    %cst_102 = arith.constant 0.0883883461 : f32
    %362 = vector.broadcast %cst_102 : f32 to vector<8x128xf32>
    %363 = arith.mulf %361, %362 : vector<8x128xf32>
    %364 = arith.addf %363, %242 : vector<8x128xf32>
    %cst_103 = arith.constant dense<0xFF800000> : vector<8xf32>
    %365 = vector.multi_reduction <maximumf>, %364, %cst_103 [1] : vector<8x128xf32> to vector<8xf32>
    %366 = vector.shape_cast %365 : vector<8xf32> to vector<8x1xf32>
    %367 = vector.broadcast %366 : vector<8x1xf32> to vector<8x128xf32>
    %368 = arith.subf %364, %367 : vector<8x128xf32>
    %369 = math.exp %368 : vector<8x128xf32>
    %cst_104 = arith.constant dense<0.000000e+00> : vector<8xf32>
    %370 = vector.multi_reduction <add>, %369, %cst_104 [1] : vector<8x128xf32> to vector<8xf32>
    %371 = vector.shape_cast %370 : vector<8xf32> to vector<8x1xf32>
    %372 = vector.broadcast %371 : vector<8x1xf32> to vector<8x128xf32>
    %373 = arith.divf %369, %372 : vector<8x128xf32>
    %374 = arith.truncf %373 : vector<8x128xf32> to vector<8x128xbf16>
    %cst_105 = arith.constant dense<0.000000e+00> : vector<8x128xf32>
    %375 = tpu.matmul %374, %360, %cst_105 {dimension_numbers = #tpu.dot_dimension_numbers<[1], [0], [0], [1], [0, 0, 1, 1], [], []>} : vector<8x128xbf16>, vector<128x128xbf16>, vector<8x128xf32> -> vector<8x128xf32>
    %c0_106 = arith.constant 0 : index
    %376 = memref.load %arg15[%c0_106] : memref<4xf32, #tpu.memory_space<smem>>
    %377 = vector.broadcast %376 : f32 to vector<8x128xf32>
    %378 = arith.mulf %373, %377 : vector<8x128xf32>
    %379 = vector.extract_strided_slice %351 {offsets = [0, 128], sizes = [8, 128], strides = [1, 1]} : vector<8x512xf32> to vector<8x128xf32>
    %380 = arith.truncf %379 : vector<8x128xf32> to vector<8x128xbf16>
    %381 = vector.extract_strided_slice %354 {offsets = [0, 128], sizes = [128, 128], strides = [1, 1]} : vector<128x1024xf32> to vector<128x128xf32>
    %382 = arith.truncf %381 : vector<128x128xf32> to vector<128x128xbf16>
    %383 = vector.extract_strided_slice %354 {offsets = [0, 640], sizes = [128, 128], strides = [1, 1]} : vector<128x1024xf32> to vector<128x128xf32>
    %384 = arith.truncf %383 : vector<128x128xf32> to vector<128x128xbf16>
    %cst_107 = arith.constant dense<0.000000e+00> : vector<8x128xf32>
    %385 = tpu.matmul %380, %382, %cst_107 {dimension_numbers = #tpu.dot_dimension_numbers<[1], [1], [0], [0], [0, 0, 1, 0], [], []>} : vector<8x128xbf16>, vector<128x128xbf16>, vector<8x128xf32> -> vector<8x128xf32>
    %cst_108 = arith.constant 0.0883883461 : f32
    %386 = vector.broadcast %cst_108 : f32 to vector<8x128xf32>
    %387 = arith.mulf %385, %386 : vector<8x128xf32>
    %388 = arith.addf %387, %242 : vector<8x128xf32>
    %cst_109 = arith.constant dense<0xFF800000> : vector<8xf32>
    %389 = vector.multi_reduction <maximumf>, %388, %cst_109 [1] : vector<8x128xf32> to vector<8xf32>
    %390 = vector.shape_cast %389 : vector<8xf32> to vector<8x1xf32>
    %391 = vector.broadcast %390 : vector<8x1xf32> to vector<8x128xf32>
    %392 = arith.subf %388, %391 : vector<8x128xf32>
    %393 = math.exp %392 : vector<8x128xf32>
    %cst_110 = arith.constant dense<0.000000e+00> : vector<8xf32>
    %394 = vector.multi_reduction <add>, %393, %cst_110 [1] : vector<8x128xf32> to vector<8xf32>
    %395 = vector.shape_cast %394 : vector<8xf32> to vector<8x1xf32>
    %396 = vector.broadcast %395 : vector<8x1xf32> to vector<8x128xf32>
    %397 = arith.divf %393, %396 : vector<8x128xf32>
    %398 = arith.truncf %397 : vector<8x128xf32> to vector<8x128xbf16>
    %cst_111 = arith.constant dense<0.000000e+00> : vector<8x128xf32>
    %399 = tpu.matmul %398, %384, %cst_111 {dimension_numbers = #tpu.dot_dimension_numbers<[1], [0], [0], [1], [0, 0, 1, 1], [], []>} : vector<8x128xbf16>, vector<128x128xbf16>, vector<8x128xf32> -> vector<8x128xf32>
    %c1_112 = arith.constant 1 : index
    %400 = memref.load %arg15[%c1_112] : memref<4xf32, #tpu.memory_space<smem>>
    %401 = vector.broadcast %400 : f32 to vector<8x128xf32>
    %402 = arith.mulf %397, %401 : vector<8x128xf32>
    %403 = arith.addf %378, %402 : vector<8x128xf32>
    %404 = vector.extract_strided_slice %351 {offsets = [0, 256], sizes = [8, 128], strides = [1, 1]} : vector<8x512xf32> to vector<8x128xf32>
    %405 = arith.truncf %404 : vector<8x128xf32> to vector<8x128xbf16>
    %406 = vector.extract_strided_slice %354 {offsets = [0, 256], sizes = [128, 128], strides = [1, 1]} : vector<128x1024xf32> to vector<128x128xf32>
    %407 = arith.truncf %406 : vector<128x128xf32> to vector<128x128xbf16>
    %408 = vector.extract_strided_slice %354 {offsets = [0, 768], sizes = [128, 128], strides = [1, 1]} : vector<128x1024xf32> to vector<128x128xf32>
    %409 = arith.truncf %408 : vector<128x128xf32> to vector<128x128xbf16>
    %cst_113 = arith.constant dense<0.000000e+00> : vector<8x128xf32>
    %410 = tpu.matmul %405, %407, %cst_113 {dimension_numbers = #tpu.dot_dimension_numbers<[1], [1], [0], [0], [0, 0, 1, 0], [], []>} : vector<8x128xbf16>, vector<128x128xbf16>, vector<8x128xf32> -> vector<8x128xf32>
    %cst_114 = arith.constant 0.0883883461 : f32
    %411 = vector.broadcast %cst_114 : f32 to vector<8x128xf32>
    %412 = arith.mulf %410, %411 : vector<8x128xf32>
    %413 = arith.addf %412, %242 : vector<8x128xf32>
    %cst_115 = arith.constant dense<0xFF800000> : vector<8xf32>
    %414 = vector.multi_reduction <maximumf>, %413, %cst_115 [1] : vector<8x128xf32> to vector<8xf32>
    %415 = vector.shape_cast %414 : vector<8xf32> to vector<8x1xf32>
    %416 = vector.broadcast %415 : vector<8x1xf32> to vector<8x128xf32>
    %417 = arith.subf %413, %416 : vector<8x128xf32>
    %418 = math.exp %417 : vector<8x128xf32>
    %cst_116 = arith.constant dense<0.000000e+00> : vector<8xf32>
    %419 = vector.multi_reduction <add>, %418, %cst_116 [1] : vector<8x128xf32> to vector<8xf32>
    %420 = vector.shape_cast %419 : vector<8xf32> to vector<8x1xf32>
    %421 = vector.broadcast %420 : vector<8x1xf32> to vector<8x128xf32>
    %422 = arith.divf %418, %421 : vector<8x128xf32>
    %423 = arith.truncf %422 : vector<8x128xf32> to vector<8x128xbf16>
    %cst_117 = arith.constant dense<0.000000e+00> : vector<8x128xf32>
    %424 = tpu.matmul %423, %409, %cst_117 {dimension_numbers = #tpu.dot_dimension_numbers<[1], [0], [0], [1], [0, 0, 1, 1], [], []>} : vector<8x128xbf16>, vector<128x128xbf16>, vector<8x128xf32> -> vector<8x128xf32>
    %c2_118 = arith.constant 2 : index
    %425 = memref.load %arg15[%c2_118] : memref<4xf32, #tpu.memory_space<smem>>
    %426 = vector.broadcast %425 : f32 to vector<8x128xf32>
    %427 = arith.mulf %422, %426 : vector<8x128xf32>
    %428 = arith.addf %403, %427 : vector<8x128xf32>
    %429 = vector.extract_strided_slice %351 {offsets = [0, 384], sizes = [8, 128], strides = [1, 1]} : vector<8x512xf32> to vector<8x128xf32>
    %430 = arith.truncf %429 : vector<8x128xf32> to vector<8x128xbf16>
    %431 = vector.extract_strided_slice %354 {offsets = [0, 384], sizes = [128, 128], strides = [1, 1]} : vector<128x1024xf32> to vector<128x128xf32>
    %432 = arith.truncf %431 : vector<128x128xf32> to vector<128x128xbf16>
    %433 = vector.extract_strided_slice %354 {offsets = [0, 896], sizes = [128, 128], strides = [1, 1]} : vector<128x1024xf32> to vector<128x128xf32>
    %434 = arith.truncf %433 : vector<128x128xf32> to vector<128x128xbf16>
    %cst_119 = arith.constant dense<0.000000e+00> : vector<8x128xf32>
    %435 = tpu.matmul %430, %432, %cst_119 {dimension_numbers = #tpu.dot_dimension_numbers<[1], [1], [0], [0], [0, 0, 1, 0], [], []>} : vector<8x128xbf16>, vector<128x128xbf16>, vector<8x128xf32> -> vector<8x128xf32>
    %cst_120 = arith.constant 0.0883883461 : f32
    %436 = vector.broadcast %cst_120 : f32 to vector<8x128xf32>
    %437 = arith.mulf %435, %436 : vector<8x128xf32>
    %438 = arith.addf %437, %242 : vector<8x128xf32>
    %cst_121 = arith.constant dense<0xFF800000> : vector<8xf32>
    %439 = vector.multi_reduction <maximumf>, %438, %cst_121 [1] : vector<8x128xf32> to vector<8xf32>
    %440 = vector.shape_cast %439 : vector<8xf32> to vector<8x1xf32>
    %441 = vector.broadcast %440 : vector<8x1xf32> to vector<8x128xf32>
    %442 = arith.subf %438, %441 : vector<8x128xf32>
    %443 = math.exp %442 : vector<8x128xf32>
    %cst_122 = arith.constant dense<0.000000e+00> : vector<8xf32>
    %444 = vector.multi_reduction <add>, %443, %cst_122 [1] : vector<8x128xf32> to vector<8xf32>
    %445 = vector.shape_cast %444 : vector<8xf32> to vector<8x1xf32>
    %446 = vector.broadcast %445 : vector<8x1xf32> to vector<8x128xf32>
    %447 = arith.divf %443, %446 : vector<8x128xf32>
    %448 = arith.truncf %447 : vector<8x128xf32> to vector<8x128xbf16>
    %cst_123 = arith.constant dense<0.000000e+00> : vector<8x128xf32>
    %449 = tpu.matmul %448, %434, %cst_123 {dimension_numbers = #tpu.dot_dimension_numbers<[1], [0], [0], [1], [0, 0, 1, 1], [], []>} : vector<8x128xbf16>, vector<128x128xbf16>, vector<8x128xf32> -> vector<8x128xf32>
    %c3_124 = arith.constant 3 : index
    %450 = memref.load %arg15[%c3_124] : memref<4xf32, #tpu.memory_space<smem>>
    %451 = vector.broadcast %450 : f32 to vector<8x128xf32>
    %452 = arith.mulf %447, %451 : vector<8x128xf32>
    %453 = arith.addf %428, %452 : vector<8x128xf32>
    %c0_125 = arith.constant 0 : index
    %454 = memref.load %arg16[%c0_125] : memref<1xf32, #tpu.memory_space<smem>>
    %455 = vector.broadcast %454 : f32 to vector<8x128xf32>
    %456 = arith.addf %453, %455 : vector<8x128xf32>
    %c8 = arith.constant 8 : index
    %c0_126 = arith.constant 0 : index
    %457 = vector.load %arg28[%c8, %c0_126] : memref<16x128xf32, #tpu.memory_space<vmem>>, vector<8x128xf32>
    tpu.vector_store %arg28[%c8, %c0_126], %456 {strides = array<i32>} : memref<16x128xf32, #tpu.memory_space<vmem>>, vector<8x128xf32>,
    %458 = tpu.concatenate %375, %399, %424, %449 in 1 : vector<8x128xf32>, vector<8x128xf32>, vector<8x128xf32>, vector<8x128xf32> -> vector<8x512xf32>
    %459 = tpu.concatenate %350, %458 in 0 : vector<8x512xf32>, vector<8x512xf32> -> vector<16x512xf32>
    %460 = arith.truncf %459 : vector<16x512xf32> to vector<16x512xbf16>
    %c0_127 = arith.constant 0 : index
    %c0_128 = arith.constant 0 : index
    %461 = vector.load %arg13[%c0_127, %c0_128] : memref<512x512xbf16, #tpu.memory_space<vmem>>, vector<512x512xbf16>
    %cst_129 = arith.constant dense<0.000000e+00> : vector<16x512xf32>
    %462 = tpu.matmul %460, %461, %cst_129 {dimension_numbers = #tpu.dot_dimension_numbers<[1], [0], [0], [1], [0, 0, 1, 1], [], []>} : vector<16x512xbf16>, vector<512x512xbf16>, vector<16x512xf32> -> vector<16x512xf32>
    %c0_130 = arith.constant 0 : index
    %c0_131 = arith.constant 0 : index
    %463 = vector.load %arg14[%c0_130, %c0_131] : memref<1x512xf32, #tpu.memory_space<vmem>>, vector<1x512xf32>
    %464 = vector.broadcast %463 : vector<1x512xf32> to vector<16x512xf32>
    %465 = arith.addf %462, %464 : vector<16x512xf32>
    %466 = arith.addf %225, %465 : vector<16x512xf32>
    %c0_132 = arith.constant 0 : index
    %c0_133 = arith.constant 0 : index
    %467 = vector.load %arg17[%c0_132, %c0_133] : memref<1x512xf32, #tpu.memory_space<vmem>>, vector<1x512xf32>
    %c0_134 = arith.constant 0 : index
    %c0_135 = arith.constant 0 : index
    %468 = vector.load %arg18[%c0_134, %c0_135] : memref<1x512xf32, #tpu.memory_space<vmem>>, vector<1x512xf32>
    %cst_136 = arith.constant dense<0.000000e+00> : vector<16xf32>
    %469 = vector.multi_reduction <add>, %466, %cst_136 [1] : vector<16x512xf32> to vector<16xf32>
    %470 = vector.shape_cast %469 : vector<16xf32> to vector<16x1xf32>
    %cst_137 = arith.constant 5.120000e+02 : f32
    %471 = vector.broadcast %cst_137 : f32 to vector<16x1xf32>
    %472 = arith.divf %470, %471 : vector<16x1xf32>
    %473 = vector.broadcast %472 : vector<16x1xf32> to vector<16x512xf32>
    %474 = arith.subf %466, %473 : vector<16x512xf32>
    %475 = arith.mulf %474, %474 : vector<16x512xf32>
    %cst_138 = arith.constant dense<0.000000e+00> : vector<16xf32>
    %476 = vector.multi_reduction <add>, %475, %cst_138 [1] : vector<16x512xf32> to vector<16xf32>
    %477 = vector.shape_cast %476 : vector<16xf32> to vector<16x1xf32>
    %cst_139 = arith.constant 5.120000e+02 : f32
    %478 = vector.broadcast %cst_139 : f32 to vector<16x1xf32>
    %479 = arith.divf %477, %478 : vector<16x1xf32>
    %480 = vector.broadcast %472 : vector<16x1xf32> to vector<16x512xf32>
    %481 = arith.subf %466, %480 : vector<16x512xf32>
    %cst_140 = arith.constant 9.99999997E-7 : f32
    %482 = vector.broadcast %cst_140 : f32 to vector<16x1xf32>
    %483 = arith.addf %479, %482 : vector<16x1xf32>
    %484 = math.rsqrt %483 : vector<16x1xf32>
    %485 = vector.broadcast %484 : vector<16x1xf32> to vector<16x512xf32>
    %486 = arith.mulf %481, %485 : vector<16x512xf32>
    %487 = vector.broadcast %467 : vector<1x512xf32> to vector<16x512xf32>
    %488 = arith.mulf %486, %487 : vector<16x512xf32>
    %489 = vector.broadcast %468 : vector<1x512xf32> to vector<16x512xf32>
    %490 = arith.addf %488, %489 : vector<16x512xf32>
    %491 = arith.truncf %490 : vector<16x512xf32> to vector<16x512xbf16>
    %c0_141 = arith.constant 0 : index
    %c0_142 = arith.constant 0 : index
    %492 = vector.load %arg19[%c0_141, %c0_142] : memref<512x1024xbf16, #tpu.memory_space<vmem>>, vector<512x1024xbf16>
    %cst_143 = arith.constant dense<0.000000e+00> : vector<16x1024xf32>
    %493 = tpu.matmul %491, %492, %cst_143 {dimension_numbers = #tpu.dot_dimension_numbers<[1], [0], [0], [1], [0, 0, 1, 1], [], []>} : vector<16x512xbf16>, vector<512x1024xbf16>, vector<16x1024xf32> -> vector<16x1024xf32>
    %c0_144 = arith.constant 0 : index
    %c0_145 = arith.constant 0 : index
    %494 = vector.load %arg20[%c0_144, %c0_145] : memref<1x1024xf32, #tpu.memory_space<vmem>>, vector<1x1024xf32>
    %495 = vector.broadcast %494 : vector<1x1024xf32> to vector<16x1024xf32>
    %496 = arith.addf %493, %495 : vector<16x1024xf32>
    %cst_146 = arith.constant 0.000000e+00 : f32
    %497 = vector.broadcast %cst_146 : f32 to vector<16x1024xf32>
    %498 = arith.maximumf %496, %497 : vector<16x1024xf32>
    %499 = arith.truncf %498 : vector<16x1024xf32> to vector<16x1024xbf16>
    %c0_147 = arith.constant 0 : index
    %c0_148 = arith.constant 0 : index
    %500 = vector.load %arg21[%c0_147, %c0_148] : memref<1024x512xbf16, #tpu.memory_space<vmem>>, vector<1024x512xbf16>
    %cst_149 = arith.constant dense<0.000000e+00> : vector<16x512xf32>
    %501 = tpu.matmul %499, %500, %cst_149 {dimension_numbers = #tpu.dot_dimension_numbers<[1], [0], [0], [1], [0, 0, 1, 1], [], []>} : vector<16x1024xbf16>, vector<1024x512xbf16>, vector<16x512xf32> -> vector<16x512xf32>
    %c0_150 = arith.constant 0 : index
    %c0_151 = arith.constant 0 : index
    %502 = vector.load %arg22[%c0_150, %c0_151] : memref<1x512xf32, #tpu.memory_space<vmem>>, vector<1x512xf32>
    %503 = vector.broadcast %502 : vector<1x512xf32> to vector<16x512xf32>
    %504 = arith.addf %501, %503 : vector<16x512xf32>
    %505 = arith.addf %490, %504 : vector<16x512xf32>
    %c0_152 = arith.constant 0 : index
    %c0_153 = arith.constant 0 : index
    %506 = vector.load %arg23[%c0_152, %c0_153] : memref<1x512xf32, #tpu.memory_space<vmem>>, vector<1x512xf32>
    %c0_154 = arith.constant 0 : index
    %c0_155 = arith.constant 0 : index
    %507 = vector.load %arg24[%c0_154, %c0_155] : memref<1x512xf32, #tpu.memory_space<vmem>>, vector<1x512xf32>
    %cst_156 = arith.constant dense<0.000000e+00> : vector<16xf32>
    %508 = vector.multi_reduction <add>, %505, %cst_156 [1] : vector<16x512xf32> to vector<16xf32>
    %509 = vector.shape_cast %508 : vector<16xf32> to vector<16x1xf32>
    %cst_157 = arith.constant 5.120000e+02 : f32
    %510 = vector.broadcast %cst_157 : f32 to vector<16x1xf32>
    %511 = arith.divf %509, %510 : vector<16x1xf32>
    %512 = vector.broadcast %511 : vector<16x1xf32> to vector<16x512xf32>
    %513 = arith.subf %505, %512 : vector<16x512xf32>
    %514 = arith.mulf %513, %513 : vector<16x512xf32>
    %cst_158 = arith.constant dense<0.000000e+00> : vector<16xf32>
    %515 = vector.multi_reduction <add>, %514, %cst_158 [1] : vector<16x512xf32> to vector<16xf32>
    %516 = vector.shape_cast %515 : vector<16xf32> to vector<16x1xf32>
    %cst_159 = arith.constant 5.120000e+02 : f32
    %517 = vector.broadcast %cst_159 : f32 to vector<16x1xf32>
    %518 = arith.divf %516, %517 : vector<16x1xf32>
    %519 = vector.broadcast %511 : vector<16x1xf32> to vector<16x512xf32>
    %520 = arith.subf %505, %519 : vector<16x512xf32>
    %cst_160 = arith.constant 9.99999997E-7 : f32
    %521 = vector.broadcast %cst_160 : f32 to vector<16x1xf32>
    %522 = arith.addf %518, %521 : vector<16x1xf32>
    %523 = math.rsqrt %522 : vector<16x1xf32>
    %524 = vector.broadcast %523 : vector<16x1xf32> to vector<16x512xf32>
    %525 = arith.mulf %520, %524 : vector<16x512xf32>
    %526 = vector.broadcast %506 : vector<1x512xf32> to vector<16x512xf32>
    %527 = arith.mulf %525, %526 : vector<16x512xf32>
    %528 = vector.broadcast %507 : vector<1x512xf32> to vector<16x512xf32>
    %529 = arith.addf %527, %528 : vector<16x512xf32>
    %530 = arith.truncf %529 : vector<16x512xf32> to vector<16x512xbf16>
    %c0_161 = arith.constant 0 : index
    %c0_162 = arith.constant 0 : index
    %531 = vector.load %arg25[%c0_161, %c0_162] : memref<512x128xbf16, #tpu.memory_space<vmem>>, vector<512x128xbf16>
    %cst_163 = arith.constant dense<0.000000e+00> : vector<16x128xf32>
    %532 = tpu.matmul %530, %531, %cst_163 {dimension_numbers = #tpu.dot_dimension_numbers<[1], [0], [0], [1], [0, 0, 1, 1], [], []>} : vector<16x512xbf16>, vector<512x128xbf16>, vector<16x128xf32> -> vector<16x128xf32>
    %c0_164 = arith.constant 0 : index
    %c0_165 = arith.constant 0 : index
    %533 = vector.load %arg26[%c0_164, %c0_165] : memref<1x128xf32, #tpu.memory_space<vmem>>, vector<1x128xf32>
    %534 = vector.broadcast %533 : vector<1x128xf32> to vector<16x128xf32>
    %535 = arith.addf %532, %534 : vector<16x128xf32>
    %c0_166 = arith.constant 0 : index
    %c0_167 = arith.constant 0 : index
    %536 = vector.load %arg27[%c0_166, %c0_167] : memref<16x128xf32, #tpu.memory_space<vmem>>, vector<16x128xf32>
    tpu.vector_store %arg27[%c0_166, %c0_167], %535 {strides = array<i32>} : memref<16x128xf32, #tpu.memory_space<vmem>>, vector<16x128xf32>,
    return
  }
  func.func @transform_0(%arg0: i32) -> (i32, i32) {
    %c0_i32 = arith.constant 0 : i32
    %c0_i32_0 = arith.constant 0 : i32
    return %arg0, %c0_i32 : i32, i32
  }
  func.func @transform_1(%arg0: i32) -> (i32, i32) {
    %c0_i32 = arith.constant 0 : i32
    %c0_i32_0 = arith.constant 0 : i32
    return %arg0, %c0_i32 : i32, i32
  }
  func.func @transform_2(%arg0: i32) -> (i32, i32) {
    %c0_i32 = arith.constant 0 : i32
    %c0_i32_0 = arith.constant 0 : i32
    %c0_i32_1 = arith.constant 0 : i32
    return %c0_i32, %c0_i32_0 : i32, i32
  }
  func.func @transform_3(%arg0: i32) -> (i32, i32) {
    %c0_i32 = arith.constant 0 : i32
    %c0_i32_0 = arith.constant 0 : i32
    %c0_i32_1 = arith.constant 0 : i32
    return %c0_i32, %c0_i32_0 : i32, i32
  }
  func.func @transform_4(%arg0: i32) -> (i32, i32) {
    %c0_i32 = arith.constant 0 : i32
    %c0_i32_0 = arith.constant 0 : i32
    %c0_i32_1 = arith.constant 0 : i32
    return %c0_i32, %c0_i32_0 : i32, i32
  }
  func.func @transform_5(%arg0: i32) -> (i32, i32) {
    %c0_i32 = arith.constant 0 : i32
    %c0_i32_0 = arith.constant 0 : i32
    %c0_i32_1 = arith.constant 0 : i32
    return %c0_i32, %c0_i32_0 : i32, i32
  }
  func.func @transform_6(%arg0: i32) -> (i32, i32) {
    %c0_i32 = arith.constant 0 : i32
    %c0_i32_0 = arith.constant 0 : i32
    %c0_i32_1 = arith.constant 0 : i32
    return %c0_i32, %c0_i32_0 : i32, i32
  }
  func.func @transform_7(%arg0: i32) -> (i32, i32) {
    %c0_i32 = arith.constant 0 : i32
    %c0_i32_0 = arith.constant 0 : i32
    %c0_i32_1 = arith.constant 0 : i32
    return %c0_i32, %c0_i32_0 : i32, i32
  }
  func.func @transform_8(%arg0: i32) -> (i32, i32) {
    %c0_i32 = arith.constant 0 : i32
    %c0_i32_0 = arith.constant 0 : i32
    %c0_i32_1 = arith.constant 0 : i32
    return %c0_i32, %c0_i32_0 : i32, i32
  }
  func.func @transform_9(%arg0: i32) -> (i32, i32) {
    %c0_i32 = arith.constant 0 : i32
    %c0_i32_0 = arith.constant 0 : i32
    %c0_i32_1 = arith.constant 0 : i32
    return %c0_i32, %c0_i32_0 : i32, i32
  }
  func.func @transform_10(%arg0: i32) -> (i32, i32) {
    %c0_i32 = arith.constant 0 : i32
    %c0_i32_0 = arith.constant 0 : i32
    %c0_i32_1 = arith.constant 0 : i32
    return %c0_i32, %c0_i32_0 : i32, i32
  }
  func.func @transform_11(%arg0: i32) -> (i32, i32) {
    %c0_i32 = arith.constant 0 : i32
    %c0_i32_0 = arith.constant 0 : i32
    %c0_i32_1 = arith.constant 0 : i32
    return %c0_i32, %c0_i32_0 : i32, i32
  }
  func.func @transform_12(%arg0: i32) -> (i32, i32) {
    %c0_i32 = arith.constant 0 : i32
    %c0_i32_0 = arith.constant 0 : i32
    %c0_i32_1 = arith.constant 0 : i32
    return %c0_i32, %c0_i32_0 : i32, i32
  }
  func.func @transform_13(%arg0: i32) -> (i32, i32) {
    %c0_i32 = arith.constant 0 : i32
    %c0_i32_0 = arith.constant 0 : i32
    %c0_i32_1 = arith.constant 0 : i32
    return %c0_i32, %c0_i32_0 : i32, i32
  }
  func.func @transform_14(%arg0: i32) -> i32 {
    %c0_i32 = arith.constant 0 : i32
    %c0_i32_0 = arith.constant 0 : i32
    return %c0_i32 : i32
  }
  func.func @transform_15(%arg0: i32) -> i32 {
    %c0_i32 = arith.constant 0 : i32
    %c0_i32_0 = arith.constant 0 : i32
    return %c0_i32 : i32
  }
  func.func @transform_16(%arg0: i32) -> (i32, i32) {
    %c0_i32 = arith.constant 0 : i32
    %c0_i32_0 = arith.constant 0 : i32
    %c0_i32_1 = arith.constant 0 : i32
    return %c0_i32, %c0_i32_0 : i32, i32
  }
  func.func @transform_17(%arg0: i32) -> (i32, i32) {
    %c0_i32 = arith.constant 0 : i32
    %c0_i32_0 = arith.constant 0 : i32
    %c0_i32_1 = arith.constant 0 : i32
    return %c0_i32, %c0_i32_0 : i32, i32
  }
  func.func @transform_18(%arg0: i32) -> (i32, i32) {
    %c0_i32 = arith.constant 0 : i32
    %c0_i32_0 = arith.constant 0 : i32
    %c0_i32_1 = arith.constant 0 : i32
    return %c0_i32, %c0_i32_0 : i32, i32
  }
  func.func @transform_19(%arg0: i32) -> (i32, i32) {
    %c0_i32 = arith.constant 0 : i32
    %c0_i32_0 = arith.constant 0 : i32
    %c0_i32_1 = arith.constant 0 : i32
    return %c0_i32, %c0_i32_0 : i32, i32
  }
  func.func @transform_20(%arg0: i32) -> (i32, i32) {
    %c0_i32 = arith.constant 0 : i32
    %c0_i32_0 = arith.constant 0 : i32
    %c0_i32_1 = arith.constant 0 : i32
    return %c0_i32, %c0_i32_0 : i32, i32
  }
  func.func @transform_21(%arg0: i32) -> (i32, i32) {
    %c0_i32 = arith.constant 0 : i32
    %c0_i32_0 = arith.constant 0 : i32
    %c0_i32_1 = arith.constant 0 : i32
    return %c0_i32, %c0_i32_0 : i32, i32
  }
  func.func @transform_22(%arg0: i32) -> (i32, i32) {
    %c0_i32 = arith.constant 0 : i32
    %c0_i32_0 = arith.constant 0 : i32
    %c0_i32_1 = arith.constant 0 : i32
    return %c0_i32, %c0_i32_0 : i32, i32
  }
  func.func @transform_23(%arg0: i32) -> (i32, i32) {
    %c0_i32 = arith.constant 0 : i32
    %c0_i32_0 = arith.constant 0 : i32
    %c0_i32_1 = arith.constant 0 : i32
    return %c0_i32, %c0_i32_0 : i32, i32
  }
  func.func @transform_24(%arg0: i32) -> (i32, i32) {
    %c0_i32 = arith.constant 0 : i32
    %c0_i32_0 = arith.constant 0 : i32
    %c0_i32_1 = arith.constant 0 : i32
    return %c0_i32, %c0_i32_0 : i32, i32
  }
  func.func @transform_25(%arg0: i32) -> (i32, i32) {
    %c0_i32 = arith.constant 0 : i32
    %c0_i32_0 = arith.constant 0 : i32
    %c0_i32_1 = arith.constant 0 : i32
    return %c0_i32, %c0_i32_0 : i32, i32
  }
  func.func @transform_26(%arg0: i32) -> (i32, i32) {
    %c0_i32 = arith.constant 0 : i32
    %c0_i32_0 = arith.constant 0 : i32
    return %arg0, %c0_i32 : i32, i32
  }
  func.func @transform_27(%arg0: i32) -> (i32, i32) {
    %c0_i32 = arith.constant 0 : i32
    %c0_i32_0 = arith.constant 0 : i32
    return %arg0, %c0_i32 : i32, i32
  }
}

</mosaic_0001>

<bundles_post_ra>
// kernel: rec_head_forward.1
= control target key start
LH: loop header
LB: loop body
LE: loop exit
PB: predicated region body
PF: predicated region fallthrough
CT: control target
= control target key end

     0   :  { %s19902_s0 = inlined_call_operand.vmem [shape: bf16[16,512], index: 0, kind: input, shape index: {}]   ;;  %s19903_s1 = inlined_call_operand.vmem [shape: bf16[32,512], index: 1, kind: input, shape index: {}]   ;;  %s19904_s2 = inlined_call_operand.hbm [shape: bf16[512,1536], index: 2, kind: input, shape index: {}]   ;;  %s19905_s3 = inlined_call_operand.hbm [shape: f32[1,1536], index: 3, kind: input, shape index: {}]   ;;  %s19906_s4 = inlined_call_operand.hbm [shape: bf16[512,512], index: 4, kind: input, shape index: {}]   ;;  %s19907_s5 = inlined_call_operand.hbm [shape: f32[1,512], index: 5, kind: input, shape index: {}]   ;;  %s19908_s6 = inlined_call_operand.hbm [shape: f32[1,512], index: 6, kind: input, shape index: {}]   ;;  %s19909_s7 = inlined_call_operand.hbm [shape: f32[1,512], index: 7, kind: input, shape index: {}]   ;;  %s19910_s8 = inlined_call_operand.hbm [shape: bf16[512,512], index: 8, kind: input, shape index: {}]   ;;  %s19911_s9 = inlined_call_operand.hbm [shape: f32[1,512], index: 9, kind: input, shape index: {}]   ;;  %s19912_s10 = inlined_call_operand.hbm [shape: bf16[512,1024], index: 10, kind: input, shape index: {}]   ;;  %s19913_s11 = inlined_call_operand.hbm [shape: f32[1,1024], index: 11, kind: input, shape index: {}]   ;;  %s19914_s12 = inlined_call_operand.hbm [shape: bf16[512,512], index: 12, kind: input, shape index: {}]   ;;  %s19915_s13 = inlined_call_operand.hbm [shape: f32[1,512], index: 13, kind: input, shape index: {}]   ;;  %s19916_s14 = inlined_call_operand.hbm [shape: f32[4], index: 14, kind: input, shape index: {}]   ;;  %s19917_s15 = inlined_call_operand.<no memory space> [shape: f32[1], index: 15, kind: input, shape index: {}]   ;;  %s19918_s16 = inlined_call_operand.hbm [shape: f32[1,512], index: 16, kind: input, shape index: {}]   ;;  %s19919_s17 = inlined_call_operand.hbm [shape: f32[1,512], index: 17, kind: input, shape index: {}]   ;;  %s19920_s18 = inlined_call_operand.hbm [shape: bf16[512,1024], index: 18, kind: input, shape index: {}]   ;;  %s19921_s19 = inlined_call_operand.hbm [shape: f32[1,1024], index: 19, kind: input, shape index: {}]   ;;  %s19922_s20 = inlined_call_operand.hbm [shape: bf16[1024,512], index: 20, kind: input, shape index: {}]   ;;  %s19923_s21 = inlined_call_operand.hbm [shape: f32[1,512], index: 21, kind: input, shape index: {}]   ;;  %s19924_s22 = inlined_call_operand.hbm [shape: f32[1,512], index: 22, kind: input, shape index: {}]   ;;  %s19925_s23 = inlined_call_operand.hbm [shape: f32[1,512], index: 23, kind: input, shape index: {}]   ;;  %s19926_s24 = inlined_call_operand.hbm [shape: bf16[512,128], index: 24, kind: input, shape index: {}]   ;;  %s19927_s25 = inlined_call_operand.hbm [shape: f32[1,128], index: 25, kind: input, shape index: {}]   ;;  %s19928_s26 = inlined_call_operand.hbm [shape: f32[16,128], index: 26, kind: output, shape index: {0}]   ;;  %s19929_s27 = inlined_call_operand.vmem [shape: f32[16,128], index: 27, kind: output, shape index: {1}]  }
   0x1   :  { %19932 = sst [smem:[#allocation56_spill]] %s19902_s0 }
   0x2   :  { %19933 = sst [smem:[#allocation57_spill]] %s19903_s1 }
   0x3   :  { %19934 = sst [smem:[#allocation58_spill]] %s19904_s2 }
   0x4   :  { %19935 = sst [smem:[#allocation59_spill]] %s19905_s3 }
   0x5   :  { %19936 = sst [smem:[#allocation60_spill]] %s19906_s4 }
   0x6   :  { %19937 = sst [smem:[#allocation61_spill]] %s19907_s5 }
   0x7   :  { %19938 = sst [smem:[#allocation62_spill]] %s19908_s6 }
   0x8   :  { %19939 = sst [smem:[#allocation63_spill]] %s19909_s7 }
   0x9   :  { %19940 = sst [smem:[#allocation64_spill]] %s19910_s8 }
   0xa   :  { %19941 = sst [smem:[#allocation65_spill]] %s19911_s9 }
   0xb   :  { %19942 = sst [smem:[#allocation66_spill]] %s19912_s10 }
   0xc   :  { %19943 = sst [smem:[#allocation67_spill]] %s19913_s11 }
   0xd   :  { %34 = vsyncpa [#allocation4], 0 }
   0xe   :  { %35 = vsyncpa [#allocation8], 0 }
   0xf   :  { %36 = vsyncpa [#allocation11], 0 }
  0x10   :  { %37 = vsyncpa [#allocation14], 0 }
  0x11   :  { %38 = vsyncpa [#allocation17], 0 }
  0x12   :  { %39 = vsyncpa [#allocation20], 0 }
  0x13   :  { %40 = vsyncpa [#allocation23], 0 }
  0x14   :  { %41 = vsyncpa [#allocation6], 0 }
  0x15   :  { %42 = vsyncpa [#allocation27], 0 }
  0x16   :  { %43 = vsyncpa [#allocation30], 0 }
  0x17   :  { %44 = vsyncpa [#allocation33], 0 }
  0x18   :  { %45 = vsyncpa [#allocation36], 0 }
  0x19   :  { %46 = vsyncpa [#allocation39], 0 }
  0x1a   :  { %47 = vsyncpa [#allocation5], 0  ;;  %s18566_s7 = smov [#allocation7]   ;;  %s18567_s8 = smov [#allocation10]  }
  0x1b   :  { %s70_s4 = sshll.u32 %s18566_s7, 4  ;;  %s92_s30 = sshll.u32 %s18567_s8, 4  ;;  %s71_s4 = int_to_ptr.vmem [resolvable:$true] %s70_s4  ;;  %s93_s30 = int_to_ptr.vmem [resolvable:$true] %s92_s30 }
  0x1c   :  { %s18076_s9 = scalar_lea.vmem %s71_s4, 192  ;;  %p18081_p1 = scmp.lt.s32.totalorder %s71_s4, %s71_s4 }
  0x1d   :  { %p18077_p0 = scmp.ne.s32.totalorder %s71_s4, %s18076_s9  ;;  %p18082_p2 = scmp.lt.s32.totalorder %s18076_s9, %s18076_s9 }
  0x1f   :  { %p18083_p3 = por %p18082_p2, %p18081_p1 }
  0x21   :  { %p18084_p4 = pnand %p18083_p3, %p18077_p0 }
  0x23   :  { %18087 = shalt.err (!%p18084_p4)
}
  0x24   :  { %s19944_s0 = sld [smem:[#allocation59_spill]]  ;;  %s18096_s10 = scalar_lea.vmem %s93_s30, 64 }
  0x25   :  { %p18097_p5 = scmp.ne.s32.totalorder %s93_s30, %s18096_s10  ;;  %p18101_p6 = scmp.lt.s32.totalorder %s93_s30, %s93_s30 }
  0x26   :  { %p18102_p7 = scmp.lt.s32.totalorder %s18096_s10, %s18096_s10 }
  0x28   :  { %p18103_p8 = por %p18102_p7, %p18101_p6 }
  0x2a   :  { %73 = dma.hbm_to_vmem [thread:$0]  %s19944_s0, 192, %s71_s4, [#allocation8]  }
  0x2b   :  { %p18104_p9 = pnand %p18103_p8, %p18097_p5 }
  0x2d   :  { %18107 = shalt.err (!%p18104_p9)
}
  0x2e   :  { %s19945_s6 = sld [smem:[#allocation61_spill]]  ;;  %s18568_s11 = smov [#allocation13]  }
  0x2f   :  { %s112_s2 = sshll.u32 %s18568_s11, 4  ;;  %s18569_s3 = smov [#allocation16]   ;;  %s113_s2 = int_to_ptr.vmem [resolvable:$true] %s112_s2 }
  0x30   :  { %s134_s7 = sshll.u32 %s18569_s3, 4  ;;  %s18116_s8 = scalar_lea.vmem %s113_s2, 64  ;;  %s135_s7 = int_to_ptr.vmem [resolvable:$true] %s134_s7 }
  0x31   :  { %p18117_p10 = scmp.ne.s32.totalorder %s113_s2, %s18116_s8  ;;  %p18121_p11 = scmp.lt.s32.totalorder %s113_s2, %s113_s2 }
  0x32   :  { %p18122_p12 = scmp.lt.s32.totalorder %s18116_s8, %s18116_s8 }
  0x34   :  { %95 = dma.hbm_to_vmem [thread:$0]  %s19945_s6, 64, %s93_s30, [#allocation11]  }
  0x35   :  { %p18123_p13 = por %p18122_p12, %p18121_p11 }
  0x37   :  { %p18124_p0 = pnand %p18123_p13, %p18117_p10 }
  0x39   :  { %18127 = shalt.err (!%p18124_p0)
}
  0x3a   :  { %s19946_s5 = sld [smem:[#allocation63_spill]]  ;;  %s18136_s28 = scalar_lea.vmem %s135_s7, 64 }
  0x3b   :  { %p18137_p1 = scmp.ne.s32.totalorder %s135_s7, %s18136_s28  ;;  %p18141_p2 = scmp.lt.s32.totalorder %s135_s7, %s135_s7 }
  0x3c   :  { %p18142_p3 = scmp.lt.s32.totalorder %s18136_s28, %s18136_s28 }
  0x3e   :  { %p18143_p4 = por %p18142_p3, %p18141_p2 }
  0x40   :  { %115 = dma.hbm_to_vmem [thread:$0]  %s19946_s5, 64, %s113_s2, [#allocation14]  }
  0x41   :  { %p18144_p5 = pnand %p18143_p4, %p18137_p1 }
  0x43   :  { %18147 = shalt.err (!%p18144_p5)
}
  0x44   :  { %s19947_s10 = sld [smem:[#allocation65_spill]]  ;;  %s18570_s29 = smov [#allocation19]  }
  0x45   :  { %s156_s1 = sshll.u32 %s18570_s29, 4  ;;  %s18571_s6 = smov [#allocation22]   ;;  %s157_s1 = int_to_ptr.vmem [resolvable:$true] %s156_s1 }
  0x46   :  { %s178_s11 = sshll.u32 %s18571_s6, 4  ;;  %s18156_s3 = scalar_lea.vmem %s157_s1, 128  ;;  %s179_s11 = int_to_ptr.vmem [resolvable:$true] %s178_s11 }
  0x47   :  { %p18157_p6 = scmp.ne.s32.totalorder %s157_s1, %s18156_s3  ;;  %p18161_p7 = scmp.lt.s32.totalorder %s157_s1, %s157_s1 }
  0x48   :  { %p18162_p8 = scmp.lt.s32.totalorder %s18156_s3, %s18156_s3 }
  0x4a   :  { %137 = dma.hbm_to_vmem [thread:$0]  %s19947_s10, 64, %s135_s7, [#allocation17]  }
  0x4b   :  { %p18163_p9 = por %p18162_p8, %p18161_p7 }
  0x4d   :  { %p18164_p10 = pnand %p18163_p9, %p18157_p6 }
  0x4f   :  { %18167 = shalt.err (!%p18164_p10)
}
  0x50   :  { %s19948_s4 = sld [smem:[#allocation67_spill]]  ;;  %s18176_s9 = scalar_lea.vmem %s179_s11, 64 }
  0x51   :  { %p18177_p11 = scmp.ne.s32.totalorder %s179_s11, %s18176_s9  ;;  %p18181_p12 = scmp.lt.s32.totalorder %s179_s11, %s179_s11 }
  0x52   :  { %p18182_p13 = scmp.lt.s32.totalorder %s18176_s9, %s18176_s9 }
  0x54   :  { %p18183_p0 = por %p18182_p13, %p18181_p12 }
  0x56   :  { %159 = dma.hbm_to_vmem [thread:$0]  %s19948_s4, 128, %s157_s1, [#allocation20]  }
  0x57   :  { %p18184_p1 = pnand %p18183_p0, %p18177_p11 }
  0x59   :  { %18187 = shalt.err (!%p18184_p1)
}
  0x5a   :  { %181 = dma.hbm_to_vmem [thread:$0]  %s19915_s13, 64, %s179_s11, [#allocation23]  }
  0x5b   :  { %s18572_s28 = smov [#allocation26]   ;;  %s18573_s0 = smov [#allocation29]  }
  0x5c   :  { %s208_s30 = sshll.u32 %s18572_s28, 4  ;;  %s230_s10 = sshll.u32 %s18573_s0, 4  ;;  %s209_s30 = int_to_ptr.vmem [resolvable:$true] %s208_s30  ;;  %s231_s10 = int_to_ptr.vmem [resolvable:$true] %s230_s10 }
  0x5d   :  { %s18196_s29 = scalar_lea.vmem %s209_s30, 64  ;;  %p18201_p3 = scmp.lt.s32.totalorder %s209_s30, %s209_s30 }
  0x5e   :  { %p18197_p2 = scmp.ne.s32.totalorder %s209_s30, %s18196_s29  ;;  %p18202_p4 = scmp.lt.s32.totalorder %s18196_s29, %s18196_s29 }
  0x60   :  { %p18203_p5 = por %p18202_p4, %p18201_p3 }
  0x62   :  { %p18204_p6 = pnand %p18203_p5, %p18197_p2 }
  0x64   :  { %18207 = shalt.err (!%p18204_p6)
}
  0x65   :  { %211 = dma.hbm_to_vmem [thread:$0]  %s19919_s17, 64, %s209_s30, [#allocation27]  }
  0x66   :  { %s18216_s3 = scalar_lea.vmem %s231_s10, 128  ;;  %p18221_p8 = scmp.lt.s32.totalorder %s231_s10, %s231_s10 }
  0x67   :  { %p18217_p7 = scmp.ne.s32.totalorder %s231_s10, %s18216_s3  ;;  %p18222_p9 = scmp.lt.s32.totalorder %s18216_s3, %s18216_s3 }
  0x69   :  { %p18223_p10 = por %p18222_p9, %p18221_p8 }
  0x6b   :  { %p18224_p11 = pnand %p18223_p10, %p18217_p7 }
  0x6d   :  { %18227 = shalt.err (!%p18224_p11)
}
  0x6e   :  { %233 = dma.hbm_to_vmem [thread:$0]  %s19921_s19, 128, %s231_s10, [#allocation30]  }
  0x6f   :  { %s18574_s2 = smov [#allocation32]   ;;  %s18575_s4 = smov [#allocation35]  }
  0x70   :  { %s252_s8 = sshll.u32 %s18574_s2, 4  ;;  %s272_s9 = sshll.u32 %s18575_s4, 4  ;;  %s253_s8 = int_to_ptr.vmem [resolvable:$true] %s252_s8  ;;  %s273_s9 = int_to_ptr.vmem [resolvable:$true] %s272_s9 }
  0x71   :  { %s18236_s7 = scalar_lea.vmem %s253_s8, 64  ;;  %p18241_p13 = scmp.lt.s32.totalorder %s253_s8, %s253_s8 }
  0x72   :  { %p18237_p12 = scmp.ne.s32.totalorder %s253_s8, %s18236_s7  ;;  %p18242_p0 = scmp.lt.s32.totalorder %s18236_s7, %s18236_s7 }
  0x74   :  { %p18243_p1 = por %p18242_p0, %p18241_p13 }
  0x76   :  { %p18244_p2 = pnand %p18243_p1, %p18237_p12 }
  0x78   :  { %18247 = shalt.err (!%p18244_p2)
}
  0x79   :  { %255 = dma.hbm_to_vmem [thread:$0]  %s19923_s21, 64, %s253_s8, [#allocation33]  }
  0x7a   :  { %s18256_s28 = scalar_lea.vmem %s273_s9, 64  ;;  %p18261_p4 = scmp.lt.s32.totalorder %s273_s9, %s273_s9 }
  0x7b   :  { %p18257_p3 = scmp.ne.s32.totalorder %s273_s9, %s18256_s28  ;;  %p18262_p5 = scmp.lt.s32.totalorder %s18256_s28, %s18256_s28 }
  0x7d   :  { %p18263_p6 = por %p18262_p5, %p18261_p4 }
  0x7f   :  { %p18264_p7 = pnand %p18263_p6, %p18257_p3 }
  0x81   :  { %18267 = shalt.err (!%p18264_p7)
}
  0x82   :  { %275 = dma.hbm_to_vmem [thread:$0]  %s19925_s23, 64, %s273_s9, [#allocation36]  }
  0x83   :  { %s18576_s0 = smov [#allocation3]  }
  0x84   :  { %s57_s10 = sshll.u32 %s18576_s0, 4  ;;  %s58_s10 = int_to_ptr.vmem [resolvable:$true] %s57_s10 }
  0x85   :  { %s18276_s29 = scalar_lea.vmem %s58_s10, 49152  ;;  %p18281_p9 = scmp.lt.s32.totalorder %s58_s10, %s58_s10 }
  0x86   :  { %p18277_p8 = scmp.ne.s32.totalorder %s58_s10, %s18276_s29  ;;  %p18282_p10 = scmp.lt.s32.totalorder %s18276_s29, %s18276_s29 }
  0x88   :  { %p18283_p11 = por %p18282_p10, %p18281_p9 }
  0x8a   :  { %p18284_p12 = pnand %p18283_p11, %p18277_p8 }
  0x8c   :  { %18287 = shalt.err (!%p18284_p12)
}
  0x8d   :  { %s18577_s21 = smov 768   ;;  %s18578_s1 = smov 48  }
  0x8e   :  { %s19949_s13 = sld [smem:[#allocation58_spill]]  ;;  %s18579_s11 = smov [#allocation9]  }
  0x8f   :  { %s79_s2 = sshll.u32 %s18579_s11, 4  ;;  %s80_s2 = int_to_ptr.vmem [resolvable:$true] %s79_s2 }
  0x90   :  { %s18296_s23 = scalar_lea.vmem %s80_s2, 16384  ;;  %p18301_p0 = scmp.lt.s32.totalorder %s80_s2, %s80_s2 }
  0x91   :  { %p18297_p13 = scmp.ne.s32.totalorder %s80_s2, %s18296_s23  ;;  %p18302_p1 = scmp.lt.s32.totalorder %s18296_s23, %s18296_s23 }
  0x93   :  { %p18303_p2 = por %p18302_p1, %p18301_p0 }
  0x94   :  { %63 = dma.hbm_to_vmem [thread:$0]  %s19949_s13, 49152, %s58_s10, [#allocation4], %s18577_s21, %s18577_s21, %s18578_s1  }
  0x95   :  { %p18304_p3 = pnand %p18303_p2, %p18297_p13 }
  0x97   :  { %18307 = shalt.err (!%p18304_p3)
}
  0x98   :  { %s18580_s8 = smov 256   ;;  %s18581_s4 = smov 16  }
  0x99   :  { %s19950_s17 = sld [smem:[#allocation60_spill]]  ;;  %s18582_s5 = smov [#allocation12]  }
  0x9a   :  { %s102_s28 = sshll.u32 %s18582_s5, 4  ;;  %s18583_s19 = smov [#allocation15]   ;;  %s103_s28 = int_to_ptr.vmem [resolvable:$true] %s102_s28 }
  0x9b   :  { %s121_s30 = sshll.u32 %s18583_s19, 4  ;;  %s18316_s0 = scalar_lea.vmem %s103_s28, 64  ;;  %s122_s30 = int_to_ptr.vmem [resolvable:$true] %s121_s30 }
  0x9c   :  { %p18317_p4 = scmp.ne.s32.totalorder %s103_s28, %s18316_s0  ;;  %p18321_p5 = scmp.lt.s32.totalorder %s103_s28, %s103_s28 }
  0x9d   :  { %p18322_p6 = scmp.lt.s32.totalorder %s18316_s0, %s18316_s0 }
  0x9f   :  { %85 = dma.hbm_to_vmem [thread:$0]  %s19950_s17, 16384, %s80_s2, [#allocation8], %s18580_s8, %s18580_s8, %s18581_s4  }
  0xa0   :  { %p18323_p7 = por %p18322_p6, %p18321_p5 }
  0xa2   :  { %p18324_p8 = pnand %p18323_p7, %p18317_p4 }
  0xa4   :  { %18327 = shalt.err (!%p18324_p8)
}
  0xa5   :  { %s19951_s21 = sld [smem:[#allocation62_spill]]  ;;  %s18336_s1 = scalar_lea.vmem %s122_s30, 16384 }
  0xa6   :  { %p18337_p9 = scmp.ne.s32.totalorder %s122_s30, %s18336_s1  ;;  %p18341_p10 = scmp.lt.s32.totalorder %s122_s30, %s122_s30 }
  0xa7   :  { %p18342_p11 = scmp.lt.s32.totalorder %s18336_s1, %s18336_s1 }
  0xa9   :  { %p18343_p12 = por %p18342_p11, %p18341_p10 }
  0xab   :  { %105 = dma.hbm_to_vmem [thread:$0]  %s19951_s21, 64, %s103_s28, [#allocation11]  }
  0xac   :  { %p18344_p13 = pnand %p18343_p12, %p18337_p9 }
  0xae   :  { %18347 = shalt.err (!%p18344_p13)
}
  0xaf   :  { %s19952_s13 = sld [smem:[#allocation64_spill]]  ;;  %s18584_s11 = smov [#allocation18]  }
  0xb0   :  { %s143_s2 = sshll.u32 %s18584_s11, 4  ;;  %s144_s2 = int_to_ptr.vmem [resolvable:$true] %s143_s2 }
  0xb1   :  { %s18356_s23 = scalar_lea.vmem %s144_s2, 32768  ;;  %p18361_p1 = scmp.lt.s32.totalorder %s144_s2, %s144_s2 }
  0xb2   :  { %p18357_p0 = scmp.ne.s32.totalorder %s144_s2, %s18356_s23  ;;  %p18362_p2 = scmp.lt.s32.totalorder %s18356_s23, %s18356_s23 }
  0xb4   :  { %p18363_p3 = por %p18362_p2, %p18361_p1 }
  0xb5   :  { %127 = dma.hbm_to_vmem [thread:$0]  %s19952_s13, 16384, %s122_s30, [#allocation14], %s18580_s8, %s18580_s8, %s18581_s4  }
  0xb6   :  { %p18364_p4 = pnand %p18363_p3, %p18357_p0 }
  0xb8   :  { %18367 = shalt.err (!%p18364_p4)
}
  0xb9   :  { %s18585_s9 = smov 512   ;;  %s18586_s7 = smov 32  }
  0xba   :  { %s19953_s28 = sld [smem:[#allocation66_spill]]  ;;  %s18587_s19 = smov [#allocation21]  }
  0xbb   :  { %s165_s30 = sshll.u32 %s18587_s19, 4  ;;  %s166_s30 = int_to_ptr.vmem [resolvable:$true] %s165_s30 }
  0xbc   :  { %s18376_s0 = scalar_lea.vmem %s166_s30, 16384  ;;  %p18381_p6 = scmp.lt.s32.totalorder %s166_s30, %s166_s30 }
  0xbd   :  { %p18377_p5 = scmp.ne.s32.totalorder %s166_s30, %s18376_s0  ;;  %p18382_p7 = scmp.lt.s32.totalorder %s18376_s0, %s18376_s0 }
  0xbf   :  { %p18383_p8 = por %p18382_p7, %p18381_p6 }
  0xc0   :  { %149 = dma.hbm_to_vmem [thread:$0]  %s19953_s28, 32768, %s144_s2, [#allocation17], %s18585_s9, %s18585_s9, %s18586_s7  }
  0xc1   :  { %p18384_p9 = pnand %p18383_p8, %p18377_p5 }
  0xc3   :  { %18387 = shalt.err (!%p18384_p9)
}
  0xc4   :  { %171 = dma.hbm_to_vmem [thread:$0]  %s19914_s12, 16384, %s166_s30, [#allocation20], %s18580_s8, %s18580_s8, %s18581_s4  }
  0xc5   :  { %s18588_s21 = smov [#allocation24]   ;;  %s18589_s3 = smov [#allocation25]  }
  0xc6   :  { %189 = dma.hbm_to_smem %s19916_s14, 16, %s18588_s21, [#allocation6]  }
  0xc7   :  { %s198_s13 = sshll.u32 %s18589_s3, 4  ;;  %s18590_s11 = smov [#allocation28]   ;;  %s199_s13 = int_to_ptr.vmem [resolvable:$true] %s198_s13 }
  0xc8   :  { %s217_s2 = sshll.u32 %s18590_s11, 4  ;;  %s18404_s23 = scalar_lea.vmem %s199_s13, 64  ;;  %s218_s2 = int_to_ptr.vmem [resolvable:$true] %s217_s2 }
  0xc9   :  { %p18405_p10 = scmp.ne.s32.totalorder %s199_s13, %s18404_s23  ;;  %p18409_p11 = scmp.lt.s32.totalorder %s199_s13, %s199_s13 }
  0xca   :  { %p18410_p12 = scmp.lt.s32.totalorder %s18404_s23, %s18404_s23 }
  0xcc   :  { %p18411_p13 = por %p18410_p12, %p18409_p11 }
  0xce   :  { %p18412_p0 = pnand %p18411_p13, %p18405_p10 }
  0xd0   :  { %18415 = shalt.err (!%p18412_p0)
}
  0xd1   :  { %201 = dma.hbm_to_vmem [thread:$0]  %s19918_s16, 64, %s199_s13, [#allocation23]  }
  0xd2   :  { %s18424_s12 = scalar_lea.vmem %s218_s2, 32768  ;;  %p18429_p2 = scmp.lt.s32.totalorder %s218_s2, %s218_s2 }
  0xd3   :  { %p18425_p1 = scmp.ne.s32.totalorder %s218_s2, %s18424_s12  ;;  %p18430_p3 = scmp.lt.s32.totalorder %s18424_s12, %s18424_s12 }
  0xd5   :  { %p18431_p4 = por %p18430_p3, %p18429_p2 }
  0xd7   :  { %p18432_p5 = pnand %p18431_p4, %p18425_p1 }
  0xd9   :  { %18435 = shalt.err (!%p18432_p5)
}
  0xda   :  { %223 = dma.hbm_to_vmem [thread:$0]  %s19920_s18, 32768, %s218_s2, [#allocation27], %s18585_s9, %s18585_s9, %s18586_s7  }
  0xdb   :  { %s18591_s19 = smov [#allocation31]   ;;  %s18592_s0 = smov [#allocation34]  }
  0xdc   :  { %s239_s30 = sshll.u32 %s18591_s19, 4  ;;  %s262_s16 = sshll.u32 %s18592_s0, 4  ;;  %s240_s30 = int_to_ptr.vmem [resolvable:$true] %s239_s30  ;;  %s263_s16 = int_to_ptr.vmem [resolvable:$true] %s262_s16 }
  0xdd   :  { %s18444_s10 = scalar_lea.vmem %s240_s30, 32768  ;;  %p18449_p7 = scmp.lt.s32.totalorder %s240_s30, %s240_s30 }
  0xde   :  { %p18445_p6 = scmp.ne.s32.totalorder %s240_s30, %s18444_s10  ;;  %p18450_p8 = scmp.lt.s32.totalorder %s18444_s10, %s18444_s10 }
  0xe0   :  { %p18451_p9 = por %p18450_p8, %p18449_p7 }
  0xe2   :  { %p18452_p10 = pnand %p18451_p9, %p18445_p6 }
  0xe4   :  { %18455 = shalt.err (!%p18452_p10)
}
  0xe5   :  { %245 = dma.hbm_to_vmem [thread:$0]  %s19922_s20, 32768, %s240_s30, [#allocation30], %s18580_s8, %s18580_s8, %s18581_s4  }
  0xe6   :  { %s18464_s18 = scalar_lea.vmem %s263_s16, 64  ;;  %p18469_p12 = scmp.lt.s32.totalorder %s263_s16, %s263_s16 }
  0xe7   :  { %p18465_p11 = scmp.ne.s32.totalorder %s263_s16, %s18464_s18  ;;  %p18470_p13 = scmp.lt.s32.totalorder %s18464_s18, %s18464_s18 }
  0xe9   :  { %p18471_p0 = por %p18470_p13, %p18469_p12 }
  0xeb   :  { %p18472_p1 = pnand %p18471_p0, %p18465_p11 }
  0xed   :  { %18475 = shalt.err (!%p18472_p1)
}
  0xee   :  { %265 = dma.hbm_to_vmem [thread:$0]  %s19924_s22, 64, %s263_s16, [#allocation33]  }
  0xef   :  { %s18593_s1 = smov [#allocation37]  }
  0xf0   :  { %s281_s6 = sshll.u32 %s18593_s1, 4  ;;  %s282_s6 = int_to_ptr.vmem [resolvable:$true] %s281_s6 }
  0xf1   :  { %s18484_s3 = scalar_lea.vmem %s282_s6, 4096  ;;  %p18489_p3 = scmp.lt.s32.totalorder %s282_s6, %s282_s6 }
  0xf2   :  { %p18485_p2 = scmp.ne.s32.totalorder %s282_s6, %s18484_s3  ;;  %p18490_p4 = scmp.lt.s32.totalorder %s18484_s3, %s18484_s3 }
  0xf4   :  { %p18491_p5 = por %p18490_p4, %p18489_p3 }
  0xf6   :  { %p18492_p6 = pnand %p18491_p5, %p18485_p2 }
  0xf8   :  { %18495 = shalt.err (!%p18492_p6)
}
  0xf9   :  { %s18594_s20 = smov 64   ;;  %s18595_s8 = smov 4  }
  0xfa   :  { %287 = dma.hbm_to_vmem [thread:$0]  %s19926_s24, 4096, %s282_s6, [#allocation36], %s18594_s20, %s18594_s20, %s18595_s8  }
  0xfb   :  { %s18596_s11 = smov [#allocation38]  }
  0xfc   :  { %s294_s2 = sshll.u32 %s18596_s11, 4  ;;  %s295_s2 = int_to_ptr.vmem [resolvable:$true] %s294_s2 }
  0xfd   :  { %s18504_s22 = scalar_lea.vmem %s295_s2, 16  ;;  %s18508_s23 = scalar_lea.vmem %s295_s2, 32 }
  0xfe   :  { %p18505_p7 = scmp.ne.s32.totalorder %s295_s2, %s18504_s22  ;;  %p18509_p8 = scmp.lt.s32.totalorder %s295_s2, %s295_s2 }
  0xff   :  { %p18510_p9 = scmp.lt.s32.totalorder %s18508_s23, %s18504_s22 }
 0x101   :  { %p18511_p10 = por %p18510_p9, %p18509_p8 }
 0x103   :  { %p18512_p11 = pnand %p18511_p10, %p18505_p7 }
 0x105   :  { %18515 = shalt.err (!%p18512_p11)
}
 0x106   :  { %297 = dma.hbm_to_vmem [thread:$0]  %s19927_s25, 16, %s295_s2, [#allocation39]  }
 0x107   :  { %18536 = dma.done.wait [#allocation4], 49152  }
 0x108   :  { %18537 = vsyncadd [#allocation4], 4294918144 }
 0x109   :  { %18538 = dma.done.wait [#allocation8], 16576  }
 0x10a   :  { %18539 = vsyncadd [#allocation8], 4294950720 }
 0x10b   :  { %18540 = dma.done.wait [#allocation11], 128  }
 0x10c   :  { %18541 = vsyncadd [#allocation11], 4294967168 }
 0x10d   :  { %18542 = dma.done.wait [#allocation14], 16448  }
 0x10e   :  { %18543 = vsyncadd [#allocation14], 4294950848 }
 0x10f   :  { %18544 = dma.done.wait [#allocation17], 32832  }
 0x110   :  { %18545 = vsyncadd [#allocation17], 4294934464 }
 0x111   :  { %18546 = dma.done.wait [#allocation20], 16512  }
 0x112   :  { %18547 = vsyncadd [#allocation20], 4294950784 }
 0x113   :  { %18548 = dma.done.wait [#allocation23], 64  }
 0x114   :  { %18549 = vsyncadd [#allocation23], 4294967232 }
 0x115   :  { %18550 = dma.done.wait [#allocation6], 16  }
 0x116   :  { %18551 = vsyncadd [#allocation6], 4294967280 }
 0x117   :  { %18552 = dma.done.wait [#allocation23], 64  }
 0x118   :  { %18553 = vsyncadd [#allocation23], 4294967232 }
 0x119   :  { %18554 = dma.done.wait [#allocation27], 32832  }
 0x11a   :  { %18555 = vsyncadd [#allocation27], 4294934464 }
 0x11b   :  { %18556 = dma.done.wait [#allocation30], 32896  }
 0x11c   :  { %18557 = vsyncadd [#allocation30], 4294934400 }
 0x11d   :  { %18558 = dma.done.wait [#allocation33], 128  }
 0x11e   :  { %18559 = vsyncadd [#allocation33], 4294967168 }
 0x11f   :  { %18560 = dma.done.wait [#allocation36], 4160  }
 0x120   :  { %18561 = vsyncadd [#allocation36], 4294963136 }
 0x121   :  { %18562 = dma.done.wait [#allocation39], 16  }
 0x122   :  { %18563 = vsyncadd [#allocation39], 4294967280 }
 0x123   :  { %367 = sfence }
 0x124   :  { %v16395_v0 = vld [vmem:[#allocation3 + $0x2a4] ss:$48 sps:$4 sm:$0xff]   ;;  %v16399_v2 = vld [vmem:[#allocation3 + $0x2a0] ss:$48 sps:$4 sm:$0xff]   ;;  %s19954_s12 = sld [smem:[#allocation56_spill]]  ;;  %vm18598_vm0 = vmmov 0  }
 0x125   :  { %v16397_v1 = vld [vmem:[#allocation3 + $0x8a4] ss:$48 sps:$4 sm:$0xff]   ;;  %2783 = vmatprep.subr.bf16.mxu0 %v16395_v0  ;;  %v16400_v3 = vld [vmem:[#allocation3 + $0x8a0] ss:$48 sps:$4 sm:$0xff]   ;;  %vm3360_vm1 = vcmask 1043456   ;;  %vm3344_vm3 = vcmask 64512  }
 0x126   :  { %2826 = vmatprep.subr.bf16.mxu1 %v16397_v1  ;;  %v16401_v4 = vld [vmem:[#allocation3 + $0x244] ss:$48 sps:$4 sm:$0xff]   ;;  %2784 = vmatpush1.bf16.msra.mxu0 %v16399_v2  ;;  %v16405_v6 = vld [vmem:[#allocation3 + $0x240] ss:$48 sps:$4 sm:$0xff]   ;;  %s19955_s8 = sld [smem:[#allocation57_spill]] }
 0x127   :  { %2827 = vmatpush1.bf16.msra.mxu1 %v16400_v3  ;;  %v16403_v5 = vld [vmem:[#allocation3 + $0x844] ss:$48 sps:$4 sm:$0xff]   ;;  %2785 = vmatprep.subr.bf16.mxu0 %v16401_v4  ;;  %v16406_v7 = vld [vmem:[#allocation3 + $0x840] ss:$48 sps:$4 sm:$0xff]   ;;  %s19530_s2 = sld [smem:[#allocation24]] }
 0x128   :  { %2828 = vmatprep.subr.bf16.mxu1 %v16403_v5  ;;  %v16407_v8 = vld [vmem:[#allocation3 + $0x1e4] ss:$48 sps:$4 sm:$0xff]   ;;  %v16411_v10 = vld [vmem:[#allocation3 + $0x1e0] ss:$48 sps:$4 sm:$0xff]   ;;  %s19532_s22 = sld [smem:[#allocation24 + $0x2]] }
 0x129   :  { %v16409_v9 = vld [vmem:[#allocation3 + $0x7e4] ss:$48 sps:$4 sm:$0xff]   ;;  %v16412_v11 = vld [vmem:[#allocation3 + $0x7e0] ss:$48 sps:$4 sm:$0xff]   ;;  %s19534_s23 = sld [smem:[#allocation24 + $0x3]] }
 0x12a   :  { %2786 = vmatpush1.bf16.msra.mxu0 %v16405_v6  ;;  %v16413_v12 = vld [vmem:[#allocation3 + $0x184] ss:$48 sps:$4 sm:$0xff]   ;;  %v16417_v14 = vld [vmem:[#allocation3 + $0x180] ss:$48 sps:$4 sm:$0xff]   ;;  %v370_v50 = vld [vmem:[%s19954_s12 + $0x8] sm:$0xff] }
 0x12b   :  { %2829 = vmatpush1.bf16.msra.mxu1 %v16406_v7  ;;  %2787 = vmatprep.subr.bf16.mxu0 %v16407_v8  ;;  %v16415_v13 = vld [vmem:[#allocation3 + $0x784] ss:$48 sps:$4 sm:$0xff]   ;;  %v16418_v15 = vld [vmem:[#allocation3 + $0x780] ss:$48 sps:$4 sm:$0xff]   ;;  %v372_v51 = vld [vmem:[%s19954_s12 + $0x18] sm:$0xff] }
 0x12c   :  { %2830 = vmatprep.subr.bf16.mxu1 %v16409_v9  ;;  %v16419_v16 = vld [vmem:[#allocation3 + $0x124] ss:$48 sps:$4 sm:$0xff]   ;;  %v16423_v18 = vld [vmem:[#allocation3 + $0x120] ss:$48 sps:$4 sm:$0xff]   ;;  %v18844_v54 = vcombine.high %v370_v50, %v372_v51  ;;  %v16497_v6 = vld [vmem:[#allocation3 + $0x2ac] ss:$48 sps:$4 sm:$0xff]   ;;  %v18850_v9 = vcombine.low %v370_v50, %v372_v51 }
 0x12d   :  { %v16421_v17 = vld [vmem:[#allocation3 + $0x724] ss:$48 sps:$4 sm:$0xff]   ;;  %v16424_v19 = vld [vmem:[#allocation3 + $0x720] ss:$48 sps:$4 sm:$0xff]   ;;  %v16500_v7 = vld [vmem:[#allocation3 + $0x8ac] ss:$48 sps:$4 sm:$0xff]  }
 0x12e   :  { %2788 = vmatpush1.bf16.msra.mxu0 %v16411_v10  ;;  %v16425_v20 = vld [vmem:[#allocation3 + $0xc4] ss:$48 sps:$4 sm:$0xff]   ;;  %v16429_v22 = vld [vmem:[#allocation3 + $0xc0] ss:$48 sps:$4 sm:$0xff]   ;;  %2858 = vmatprep.mubr.bf16.mxu1 %v18844_v54  ;;  %v16495_v10 = vld [vmem:[#allocation3 + $0x2a8] ss:$48 sps:$4 sm:$0xff]  }
 0x12f   :  { %2831 = vmatpush1.bf16.msra.mxu1 %v16412_v11  ;;  %2789 = vmatprep.subr.bf16.mxu0 %v16413_v12  ;;  %v16427_v21 = vld [vmem:[#allocation3 + $0x6c4] ss:$48 sps:$4 sm:$0xff]   ;;  %v16430_v23 = vld [vmem:[#allocation3 + $0x6c0] ss:$48 sps:$4 sm:$0xff]   ;;  %v16498_v11 = vld [vmem:[#allocation3 + $0x8a8] ss:$48 sps:$4 sm:$0xff]  }
 0x130   :  { %2832 = vmatprep.subr.bf16.mxu1 %v16415_v13  ;;  %v16431_v24 = vld [vmem:[#allocation3 + $0x64] ss:$48 sps:$4 sm:$0xff]   ;;  %v16435_v26 = vld [vmem:[#allocation3 + $0x60] ss:$48 sps:$4 sm:$0xff]   ;;  %v16503_v12 = vld [vmem:[#allocation3 + $0x24c] ss:$48 sps:$4 sm:$0xff]  }
 0x131   :  { %v16433_v25 = vld [vmem:[#allocation3 + $0x664] ss:$48 sps:$4 sm:$0xff]   ;;  %v16436_v27 = vld [vmem:[#allocation3 + $0x660] ss:$48 sps:$4 sm:$0xff]   ;;  %v16506_v13 = vld [vmem:[#allocation3 + $0x84c] ss:$48 sps:$4 sm:$0xff]  }
 0x132   :  { %2790 = vmatpush1.bf16.msra.mxu0 %v16417_v14  ;;  %v16437_v28 = vld [vmem:[#allocation3 + $0x4] ss:$48 sps:$4 sm:$0xff]   ;;  %v16441_v30 = vld [vmem:[#allocation3] ss:$48 sps:$4 sm:$0xff]   ;;  %v16501_v14 = vld [vmem:[#allocation3 + $0x248] ss:$48 sps:$4 sm:$0xff]  }
 0x133   :  { %2833 = vmatpush1.bf16.msra.mxu1 %v16418_v15  ;;  %2791 = vmatprep.subr.bf16.mxu0 %v16419_v16  ;;  %v16439_v29 = vld [vmem:[#allocation3 + $0x604] ss:$48 sps:$4 sm:$0xff]   ;;  %v16442_v31 = vld [vmem:[#allocation3 + $0x600] ss:$48 sps:$4 sm:$0xff]   ;;  %v16504_v15 = vld [vmem:[#allocation3 + $0x848] ss:$48 sps:$4 sm:$0xff]  }
 0x134   :  { %2834 = vmatprep.subr.bf16.mxu1 %v16421_v17  ;;  %v16443_v32 = vld [vmem:[#allocation3 + $0x5a4] ss:$48 sps:$4 sm:$0xff]   ;;  %v16447_v34 = vld [vmem:[#allocation3 + $0x5a0] ss:$48 sps:$4 sm:$0xff]   ;;  %v16509_v16 = vld [vmem:[#allocation3 + $0x1ec] ss:$48 sps:$4 sm:$0xff]  }
 0x135   :  { %v16445_v33 = vld [vmem:[#allocation3 + $0xba4] ss:$48 sps:$4 sm:$0xff]   ;;  %v16448_v35 = vld [vmem:[#allocation3 + $0xba0] ss:$48 sps:$4 sm:$0xff]   ;;  %v16512_v17 = vld [vmem:[#allocation3 + $0x7ec] ss:$48 sps:$4 sm:$0xff]  }
 0x136   :  { %2792 = vmatpush1.bf16.msra.mxu0 %v16423_v18  ;;  %v16449_v36 = vld [vmem:[#allocation3 + $0x544] ss:$48 sps:$4 sm:$0xff]   ;;  %v16453_v38 = vld [vmem:[#allocation3 + $0x540] ss:$48 sps:$4 sm:$0xff]   ;;  %v16507_v18 = vld [vmem:[#allocation3 + $0x1e8] ss:$48 sps:$4 sm:$0xff]  }
 0x137   :  { %2835 = vmatpush1.bf16.msra.mxu1 %v16424_v19  ;;  %2793 = vmatprep.subr.bf16.mxu0 %v16425_v20  ;;  %v16451_v37 = vld [vmem:[#allocation3 + $0xb44] ss:$48 sps:$4 sm:$0xff]   ;;  %v16454_v39 = vld [vmem:[#allocation3 + $0xb40] ss:$48 sps:$4 sm:$0xff]   ;;  %v16510_v19 = vld [vmem:[#allocation3 + $0x7e8] ss:$48 sps:$4 sm:$0xff]  }
 0x138   :  { %2836 = vmatprep.subr.bf16.mxu1 %v16427_v21  ;;  %v16455_v40 = vld [vmem:[#allocation3 + $0x4e4] ss:$48 sps:$4 sm:$0xff]   ;;  %v16459_v42 = vld [vmem:[#allocation3 + $0x4e0] ss:$48 sps:$4 sm:$0xff]   ;;  %v16515_v20 = vld [vmem:[#allocation3 + $0x18c] ss:$48 sps:$4 sm:$0xff]  }
 0x139   :  { %v16457_v41 = vld [vmem:[#allocation3 + $0xae4] ss:$48 sps:$4 sm:$0xff]   ;;  %v16460_v43 = vld [vmem:[#allocation3 + $0xae0] ss:$48 sps:$4 sm:$0xff]   ;;  %v16518_v21 = vld [vmem:[#allocation3 + $0x78c] ss:$48 sps:$4 sm:$0xff]  }
 0x13a   :  { %2794 = vmatpush1.bf16.msra.mxu0 %v16429_v22  ;;  %v16461_v44 = vld [vmem:[#allocation3 + $0x484] ss:$48 sps:$4 sm:$0xff]   ;;  %v16465_v46 = vld [vmem:[#allocation3 + $0x480] ss:$48 sps:$4 sm:$0xff]   ;;  %v16513_v22 = vld [vmem:[#allocation3 + $0x188] ss:$48 sps:$4 sm:$0xff]  }
 0x13b   :  { %2837 = vmatpush1.bf16.msra.mxu1 %v16430_v23  ;;  %2795 = vmatprep.subr.bf16.mxu0 %v16431_v24  ;;  %v16463_v45 = vld [vmem:[#allocation3 + $0xa84] ss:$48 sps:$4 sm:$0xff]   ;;  %v16466_v47 = vld [vmem:[#allocation3 + $0xa80] ss:$48 sps:$4 sm:$0xff]   ;;  %v16516_v23 = vld [vmem:[#allocation3 + $0x788] ss:$48 sps:$4 sm:$0xff]  }
 0x13c   :  { %2838 = vmatprep.subr.bf16.mxu1 %v16433_v25  ;;  %v369_v48 = vld [vmem:[%s19954_s12] sm:$0xff]  ;;  %v371_v49 = vld [vmem:[%s19954_s12 + $0x10] sm:$0xff]  ;;  %v16521_v24 = vld [vmem:[#allocation3 + $0x12c] ss:$48 sps:$4 sm:$0xff]  }
 0x13d   :  { %v16467_v52 = vld [vmem:[#allocation3 + $0x424] ss:$48 sps:$4 sm:$0xff]   ;;  %v18842_v53 = vcombine.high %v369_v48, %v371_v49  ;;  %v16471_v56 = vld [vmem:[#allocation3 + $0x420] ss:$48 sps:$4 sm:$0xff]   ;;  %v18848_v8 = vcombine.low %v369_v48, %v371_v49  ;;  %v16524_v25 = vld [vmem:[#allocation3 + $0x72c] ss:$48 sps:$4 sm:$0xff]  }
 0x13e   :  { %2796 = vmatpush1.bf16.msra.mxu0 %v16435_v26  ;;  %v16469_v55 = vld [vmem:[#allocation3 + $0xa24] ss:$48 sps:$4 sm:$0xff]   ;;  %v16472_v57 = vld [vmem:[#allocation3 + $0xa20] ss:$48 sps:$4 sm:$0xff]   ;;  %v16519_v26 = vld [vmem:[#allocation3 + $0x128] ss:$48 sps:$4 sm:$0xff]  }
 0x13f   :  { %2839 = vmatpush1.bf16.msra.mxu1 %v16436_v27  ;;  %2797 = vmatprep.subr.bf16.mxu0 %v16437_v28  ;;  %v16473_v58 = vld [vmem:[#allocation3 + $0x3c4] ss:$48 sps:$4 sm:$0xff]   ;;  %v16477_v60 = vld [vmem:[#allocation3 + $0x3c0] ss:$48 sps:$4 sm:$0xff]   ;;  %v16522_v27 = vld [vmem:[#allocation3 + $0x728] ss:$48 sps:$4 sm:$0xff]  }
 0x140   :  { %2840 = vmatprep.subr.bf16.mxu1 %v16439_v29  ;;  %2815 = vmatprep.mubr.bf16.mxu0 %v18842_v53  ;;  %v16475_v59 = vld [vmem:[#allocation3 + $0x9c4] ss:$48 sps:$4 sm:$0xff]   ;;  %v16478_v61 = vld [vmem:[#allocation3 + $0x9c0] ss:$48 sps:$4 sm:$0xff]   ;;  %v16527_v28 = vld [vmem:[#allocation3 + $0xcc] ss:$48 sps:$4 sm:$0xff]  }
 0x141   :  { %v16479_v62 = vld [vmem:[#allocation3 + $0x364] ss:$48 sps:$4 sm:$0xff]   ;;  %v16483_v0 = vld [vmem:[#allocation3 + $0x360] ss:$48 sps:$4 sm:$0xff]   ;;  %v16530_v29 = vld [vmem:[#allocation3 + $0x6cc] ss:$48 sps:$4 sm:$0xff]  }
 0x142   :  { %2798 = vmatpush1.bf16.msra.mxu0 %v16441_v30  ;;  %v16481_v63 = vld [vmem:[#allocation3 + $0x964] ss:$48 sps:$4 sm:$0xff]   ;;  %v16484_v1 = vld [vmem:[#allocation3 + $0x960] ss:$48 sps:$4 sm:$0xff]   ;;  %v16525_v30 = vld [vmem:[#allocation3 + $0xc8] ss:$48 sps:$4 sm:$0xff]  }
 0x143   :  { %2841 = vmatpush1.bf16.msra.mxu1 %v16442_v31  ;;  %2799 = vmatprep.subr.bf16.mxu0 %v16443_v32  ;;  %v16485_v2 = vld [vmem:[#allocation3 + $0x304] ss:$48 sps:$4 sm:$0xff]   ;;  %v16489_v4 = vld [vmem:[#allocation3 + $0x300] ss:$48 sps:$4 sm:$0xff]   ;;  %v16528_v31 = vld [vmem:[#allocation3 + $0x6c8] ss:$48 sps:$4 sm:$0xff]  }
 0x144   :  { %2842 = vmatprep.subr.bf16.mxu1 %v16445_v33  ;;  %v16487_v3 = vld [vmem:[#allocation3 + $0x904] ss:$48 sps:$4 sm:$0xff]   ;;  %v16490_v5 = vld [vmem:[#allocation3 + $0x900] ss:$48 sps:$4 sm:$0xff]   ;;  %v16533_v32 = vld [vmem:[#allocation3 + $0x6c] ss:$48 sps:$4 sm:$0xff]  }
 0x145   :  { %v16536_v33 = vld [vmem:[#allocation3 + $0x66c] ss:$48 sps:$4 sm:$0xff]   ;;  %v16555_v50 = vld [vmem:[#allocation3 + $0x4e8] ss:$48 sps:$4 sm:$0xff]  }
 0x146   :  { %2800 = vmatpush2.bf16.msra.mxu0 %v16447_v34  ;;  %v16531_v34 = vld [vmem:[#allocation3 + $0x68] ss:$48 sps:$4 sm:$0xff]   ;;  %v16557_v48 = vld [vmem:[#allocation3 + $0x4ec] ss:$48 sps:$4 sm:$0xff]  }
 0x147   :  { %2843 = vmatpush2.bf16.msra.mxu1 %v16448_v35  ;;  %2801 = vmatprep.subr.bf16.mxu0 %v16449_v36  ;;  %v16534_v35 = vld [vmem:[#allocation3 + $0x668] ss:$48 sps:$4 sm:$0xff]   ;;  %v16539_v36 = vld [vmem:[#allocation3 + $0xc] ss:$48 sps:$4 sm:$0xff]  }
 0x148   :  { %2844 = vmatprep.subr.bf16.mxu1 %v16451_v37  ;;  %v16542_v37 = vld [vmem:[#allocation3 + $0x60c] ss:$48 sps:$4 sm:$0xff]   ;;  %v16558_v51 = vld [vmem:[#allocation3 + $0xae8] ss:$48 sps:$4 sm:$0xff]  }
 0x149   :  { %v16560_v49 = vld [vmem:[#allocation3 + $0xaec] ss:$48 sps:$4 sm:$0xff]  }
 0x14a   :  { %2802 = vmatpush2.bf16.msra.mxu0 %v16453_v38  ;;  %v16537_v38 = vld [vmem:[#allocation3 + $0x8] ss:$48 sps:$4 sm:$0xff]  }
 0x14b   :  { %2845 = vmatpush2.bf16.msra.mxu1 %v16454_v39  ;;  %2803 = vmatprep.subr.bf16.mxu0 %v16455_v40  ;;  %v16540_v39 = vld [vmem:[#allocation3 + $0x608] ss:$48 sps:$4 sm:$0xff]   ;;  %v16545_v40 = vld [vmem:[#allocation3 + $0x5ac] ss:$48 sps:$4 sm:$0xff]  }
 0x14c   :  { %2846 = vmatprep.subr.bf16.mxu1 %v16457_v41  ;;  %v16548_v41 = vld [vmem:[#allocation3 + $0xbac] ss:$48 sps:$4 sm:$0xff]  }
 0x14e   :  { %2804 = vmatpush2.bf16.msra.mxu0 %v16459_v42  ;;  %v16543_v42 = vld [vmem:[#allocation3 + $0x5a8] ss:$48 sps:$4 sm:$0xff]  }
 0x14f   :  { %2847 = vmatpush2.bf16.msra.mxu1 %v16460_v43  ;;  %2805 = vmatprep.subr.bf16.mxu0 %v16461_v44  ;;  %v16546_v43 = vld [vmem:[#allocation3 + $0xba8] ss:$48 sps:$4 sm:$0xff]   ;;  %v16551_v44 = vld [vmem:[#allocation3 + $0x54c] ss:$48 sps:$4 sm:$0xff]  }
 0x150   :  { %2848 = vmatprep.subr.bf16.mxu1 %v16463_v45  ;;  %v16554_v45 = vld [vmem:[#allocation3 + $0xb4c] ss:$48 sps:$4 sm:$0xff]  }
 0x152   :  { %2806 = vmatpush2.bf16.msra.mxu0 %v16465_v46  ;;  %v16549_v46 = vld [vmem:[#allocation3 + $0x548] ss:$48 sps:$4 sm:$0xff]  }
 0x153   :  { %2849 = vmatpush2.bf16.msra.mxu1 %v16466_v47  ;;  %2807 = vmatprep.subr.bf16.mxu0 %v16467_v52  ;;  %v16552_v47 = vld [vmem:[#allocation3 + $0xb48] ss:$48 sps:$4 sm:$0xff]   ;;  %v16563_v52 = vld [vmem:[#allocation3 + $0x48c] ss:$48 sps:$4 sm:$0xff]  }
 0x154   :  { %2850 = vmatprep.subr.bf16.mxu1 %v16469_v55  ;;  %v16566_v55 = vld [vmem:[#allocation3 + $0xa8c] ss:$48 sps:$4 sm:$0xff]  }
 0x156   :  { %2808 = vmatpush2.bf16.msra.mxu0 %v16471_v56  ;;  %v16561_v56 = vld [vmem:[#allocation3 + $0x488] ss:$48 sps:$4 sm:$0xff]  }
 0x157   :  { %2851 = vmatpush2.bf16.msra.mxu1 %v16472_v57  ;;  %2809 = vmatprep.subr.bf16.mxu0 %v16473_v58  ;;  %v16564_v57 = vld [vmem:[#allocation3 + $0xa88] ss:$48 sps:$4 sm:$0xff]   ;;  %v16569_v58 = vld [vmem:[#allocation3 + $0x42c] ss:$48 sps:$4 sm:$0xff]  }
 0x158   :  { %2852 = vmatprep.subr.bf16.mxu1 %v16475_v59  ;;  %v16572_v59 = vld [vmem:[#allocation3 + $0xa2c] ss:$48 sps:$4 sm:$0xff]  }
 0x15a   :  { %2810 = vmatpush2.bf16.msra.mxu0 %v16477_v60  ;;  %v16567_v60 = vld [vmem:[#allocation3 + $0x428] ss:$48 sps:$4 sm:$0xff]  }
 0x15b   :  { %2853 = vmatpush2.bf16.msra.mxu1 %v16478_v61  ;;  %2811 = vmatprep.subr.bf16.mxu0 %v16479_v62  ;;  %v16570_v61 = vld [vmem:[#allocation3 + $0xa28] ss:$48 sps:$4 sm:$0xff]   ;;  %v16575_v62 = vld [vmem:[#allocation3 + $0x3cc] ss:$48 sps:$4 sm:$0xff]  }
 0x15c   :  { %2854 = vmatprep.subr.bf16.mxu1 %v16481_v63  ;;  %v16578_v63 = vld [vmem:[#allocation3 + $0x9cc] ss:$48 sps:$4 sm:$0xff]  }
 0x15e   :  { %2812 = vmatpush2.bf16.msra.mxu0 %v16483_v0  ;;  %v16573_v0 = vld [vmem:[#allocation3 + $0x3c8] ss:$48 sps:$4 sm:$0xff]  }
 0x15f   :  { %2855 = vmatpush2.bf16.msra.mxu1 %v16484_v1  ;;  %2813 = vmatprep.subr.bf16.mxu0 %v16485_v2  ;;  %v16576_v1 = vld [vmem:[#allocation3 + $0x9c8] ss:$48 sps:$4 sm:$0xff]   ;;  %v16581_v2 = vld [vmem:[#allocation3 + $0x36c] ss:$48 sps:$4 sm:$0xff]  }
 0x160   :  { %2856 = vmatprep.subr.bf16.mxu1 %v16487_v3  ;;  %v16584_v3 = vld [vmem:[#allocation3 + $0x96c] ss:$48 sps:$4 sm:$0xff]  }
 0x162   :  { %2814 = vmatpush2.bf16.msra.mxu0 %v16489_v4  ;;  %v16579_v4 = vld [vmem:[#allocation3 + $0x368] ss:$48 sps:$4 sm:$0xff]  }
 0x163   :  { %2857 = vmatpush2.bf16.msra.mxu1 %v16490_v5  ;;  %2869 = vmatprep.subr.bf16.mxu0 %v16497_v6  ;;  %v16582_v5 = vld [vmem:[#allocation3 + $0x968] ss:$48 sps:$4 sm:$0xff]   ;;  %v16587_v6 = vld [vmem:[#allocation3 + $0x30c] ss:$48 sps:$4 sm:$0xff]  }
 0x164   :  { %2912 = vmatprep.subr.bf16.mxu1 %v16500_v7  ;;  %v16590_v7 = vld [vmem:[#allocation3 + $0x90c] ss:$48 sps:$4 sm:$0xff]  }
 0x165   :  { %2816 = vmatmul.mubr.bf16.vlgmr.msra.gmra.mxu0 %v18848_v8 }
 0x166   :  { %2859 = vmatmul.mubr.bf16.vlgmr.msra.gmra.mxu1 %v18850_v9  ;;  %2870 = vmatpush1.bf16.msra.mxu0 %v16495_v10  ;;  %v16585_v10 = vld [vmem:[#allocation3 + $0x308] ss:$48 sps:$4 sm:$0xff]  }
 0x167   :  { %2913 = vmatpush1.bf16.msra.mxu1 %v16498_v11  ;;  %2871 = vmatprep.subr.bf16.mxu0 %v16503_v12  ;;  %v16588_v11 = vld [vmem:[#allocation3 + $0x908] ss:$48 sps:$4 sm:$0xff]   ;;  %v16593_v12 = vld [vmem:[#allocation3 + $0x2b4] ss:$48 sps:$4 sm:$0xff]  }
 0x168   :  { %2914 = vmatprep.subr.bf16.mxu1 %v16506_v13  ;;  %2901 = vmatprep.mubr.bf16.mxu0 %v18842_v53  ;;  %v16596_v13 = vld [vmem:[#allocation3 + $0x8b4] ss:$48 sps:$4 sm:$0xff]  }
 0x169   :  { %2944 = vmatprep.mubr.bf16.mxu1 %v18844_v54 }
 0x16a   :  { %2872 = vmatpush1.bf16.msra.mxu0 %v16501_v14  ;;  %v16591_v14 = vld [vmem:[#allocation3 + $0x2b0] ss:$48 sps:$4 sm:$0xff]  }
 0x16b   :  { %2915 = vmatpush1.bf16.msra.mxu1 %v16504_v15  ;;  %2873 = vmatprep.subr.bf16.mxu0 %v16509_v16  ;;  %v16594_v15 = vld [vmem:[#allocation3 + $0x8b0] ss:$48 sps:$4 sm:$0xff]   ;;  %v16599_v16 = vld [vmem:[#allocation3 + $0x254] ss:$48 sps:$4 sm:$0xff]  }
 0x16c   :  { %2916 = vmatprep.subr.bf16.mxu1 %v16512_v17  ;;  %v16602_v17 = vld [vmem:[#allocation3 + $0x854] ss:$48 sps:$4 sm:$0xff]  }
 0x16e   :  { %2874 = vmatpush1.bf16.msra.mxu0 %v16507_v18  ;;  %v16597_v18 = vld [vmem:[#allocation3 + $0x250] ss:$48 sps:$4 sm:$0xff]  }
 0x16f   :  { %2917 = vmatpush1.bf16.msra.mxu1 %v16510_v19  ;;  %2875 = vmatprep.subr.bf16.mxu0 %v16515_v20  ;;  %v16600_v19 = vld [vmem:[#allocation3 + $0x850] ss:$48 sps:$4 sm:$0xff]   ;;  %v16605_v20 = vld [vmem:[#allocation3 + $0x1f4] ss:$48 sps:$4 sm:$0xff]  }
 0x170   :  { %2918 = vmatprep.subr.bf16.mxu1 %v16518_v21  ;;  %v16608_v21 = vld [vmem:[#allocation3 + $0x7f4] ss:$48 sps:$4 sm:$0xff]  }
 0x172   :  { %2876 = vmatpush1.bf16.msra.mxu0 %v16513_v22  ;;  %v16603_v22 = vld [vmem:[#allocation3 + $0x1f0] ss:$48 sps:$4 sm:$0xff]  }
 0x173   :  { %2919 = vmatpush1.bf16.msra.mxu1 %v16516_v23  ;;  %2877 = vmatprep.subr.bf16.mxu0 %v16521_v24  ;;  %v16606_v23 = vld [vmem:[#allocation3 + $0x7f0] ss:$48 sps:$4 sm:$0xff]   ;;  %v16611_v24 = vld [vmem:[#allocation3 + $0x194] ss:$48 sps:$4 sm:$0xff]  }
 0x174   :  { %2920 = vmatprep.subr.bf16.mxu1 %v16524_v25  ;;  %v16614_v25 = vld [vmem:[#allocation3 + $0x794] ss:$48 sps:$4 sm:$0xff]  }
 0x176   :  { %2878 = vmatpush1.bf16.msra.mxu0 %v16519_v26  ;;  %v16609_v26 = vld [vmem:[#allocation3 + $0x190] ss:$48 sps:$4 sm:$0xff]  }
 0x177   :  { %2921 = vmatpush1.bf16.msra.mxu1 %v16522_v27  ;;  %2879 = vmatprep.subr.bf16.mxu0 %v16527_v28  ;;  %v16612_v27 = vld [vmem:[#allocation3 + $0x790] ss:$48 sps:$4 sm:$0xff]   ;;  %v16617_v28 = vld [vmem:[#allocation3 + $0x134] ss:$48 sps:$4 sm:$0xff]  }
 0x178   :  { %2922 = vmatprep.subr.bf16.mxu1 %v16530_v29  ;;  %v16620_v29 = vld [vmem:[#allocation3 + $0x734] ss:$48 sps:$4 sm:$0xff]  }
 0x17a   :  { %2880 = vmatpush1.bf16.msra.mxu0 %v16525_v30  ;;  %v16615_v30 = vld [vmem:[#allocation3 + $0x130] ss:$48 sps:$4 sm:$0xff]  }
 0x17b   :  { %2923 = vmatpush1.bf16.msra.mxu1 %v16528_v31  ;;  %2881 = vmatprep.subr.bf16.mxu0 %v16533_v32  ;;  %v16618_v31 = vld [vmem:[#allocation3 + $0x730] ss:$48 sps:$4 sm:$0xff]   ;;  %v16623_v32 = vld [vmem:[#allocation3 + $0xd4] ss:$48 sps:$4 sm:$0xff]  }
 0x17c   :  { %2924 = vmatprep.subr.bf16.mxu1 %v16536_v33  ;;  %v16626_v33 = vld [vmem:[#allocation3 + $0x6d4] ss:$48 sps:$4 sm:$0xff]  }
 0x17e   :  { %2882 = vmatpush1.bf16.msra.mxu0 %v16531_v34  ;;  %v16621_v34 = vld [vmem:[#allocation3 + $0xd0] ss:$48 sps:$4 sm:$0xff]  }
 0x17f   :  { %2925 = vmatpush1.bf16.msra.mxu1 %v16534_v35  ;;  %2883 = vmatprep.subr.bf16.mxu0 %v16539_v36  ;;  %v16624_v35 = vld [vmem:[#allocation3 + $0x6d0] ss:$48 sps:$4 sm:$0xff]   ;;  %v16629_v36 = vld [vmem:[#allocation3 + $0x74] ss:$48 sps:$4 sm:$0xff]  }
 0x180   :  { %2926 = vmatprep.subr.bf16.mxu1 %v16542_v37  ;;  %v16632_v37 = vld [vmem:[#allocation3 + $0x674] ss:$48 sps:$4 sm:$0xff]  }
 0x182   :  { %2884 = vmatpush1.bf16.msra.mxu0 %v16537_v38  ;;  %v16627_v38 = vld [vmem:[#allocation3 + $0x70] ss:$48 sps:$4 sm:$0xff]  }
 0x183   :  { %2927 = vmatpush1.bf16.msra.mxu1 %v16540_v39  ;;  %2885 = vmatprep.subr.bf16.mxu0 %v16545_v40  ;;  %v16630_v39 = vld [vmem:[#allocation3 + $0x670] ss:$48 sps:$4 sm:$0xff]   ;;  %v16635_v40 = vld [vmem:[#allocation3 + $0x14] ss:$48 sps:$4 sm:$0xff]  }
 0x184   :  { %2928 = vmatprep.subr.bf16.mxu1 %v16548_v41  ;;  %v16638_v41 = vld [vmem:[#allocation3 + $0x614] ss:$48 sps:$4 sm:$0xff]  }
 0x186   :  { %2886 = vmatpush2.bf16.msra.mxu0 %v16543_v42  ;;  %v16633_v42 = vld [vmem:[#allocation3 + $0x10] ss:$48 sps:$4 sm:$0xff]  }
 0x187   :  { %2929 = vmatpush2.bf16.msra.mxu1 %v16546_v43  ;;  %2887 = vmatprep.subr.bf16.mxu0 %v16551_v44  ;;  %v16636_v43 = vld [vmem:[#allocation3 + $0x610] ss:$48 sps:$4 sm:$0xff]   ;;  %v16641_v44 = vld [vmem:[#allocation3 + $0x5b4] ss:$48 sps:$4 sm:$0xff]  }
 0x188   :  { %2930 = vmatprep.subr.bf16.mxu1 %v16554_v45  ;;  %v16644_v45 = vld [vmem:[#allocation3 + $0xbb4] ss:$48 sps:$4 sm:$0xff]  }
 0x18a   :  { %2888 = vmatpush2.bf16.msra.mxu0 %v16549_v46  ;;  %v16639_v46 = vld [vmem:[#allocation3 + $0x5b0] ss:$48 sps:$4 sm:$0xff]  }
 0x18b   :  { %2931 = vmatpush2.bf16.msra.mxu1 %v16552_v47  ;;  %2889 = vmatprep.subr.bf16.mxu0 %v16557_v48  ;;  %v16642_v47 = vld [vmem:[#allocation3 + $0xbb0] ss:$48 sps:$4 sm:$0xff]   ;;  %v16647_v48 = vld [vmem:[#allocation3 + $0x554] ss:$48 sps:$4 sm:$0xff]  }
 0x18c   :  { %2932 = vmatprep.subr.bf16.mxu1 %v16560_v49  ;;  %v16650_v49 = vld [vmem:[#allocation3 + $0xb54] ss:$48 sps:$4 sm:$0xff]  }
 0x18e   :  { %2890 = vmatpush2.bf16.msra.mxu0 %v16555_v50  ;;  %v16645_v50 = vld [vmem:[#allocation3 + $0x550] ss:$48 sps:$4 sm:$0xff]  }
 0x18f   :  { %2933 = vmatpush2.bf16.msra.mxu1 %v16558_v51  ;;  %2891 = vmatprep.subr.bf16.mxu0 %v16563_v52  ;;  %v16648_v51 = vld [vmem:[#allocation3 + $0xb50] ss:$48 sps:$4 sm:$0xff]   ;;  %v16653_v52 = vld [vmem:[#allocation3 + $0x4f4] ss:$48 sps:$4 sm:$0xff]  }
 0x190   :  { %2934 = vmatprep.subr.bf16.mxu1 %v16566_v55  ;;  %v16656_v55 = vld [vmem:[#allocation3 + $0xaf4] ss:$48 sps:$4 sm:$0xff]  }
 0x192   :  { %2892 = vmatpush2.bf16.msra.mxu0 %v16561_v56  ;;  %v16651_v56 = vld [vmem:[#allocation3 + $0x4f0] ss:$48 sps:$4 sm:$0xff]  }
 0x193   :  { %2935 = vmatpush2.bf16.msra.mxu1 %v16564_v57  ;;  %2893 = vmatprep.subr.bf16.mxu0 %v16569_v58  ;;  %v16654_v57 = vld [vmem:[#allocation3 + $0xaf0] ss:$48 sps:$4 sm:$0xff]   ;;  %v16659_v58 = vld [vmem:[#allocation3 + $0x494] ss:$48 sps:$4 sm:$0xff]  }
 0x194   :  { %2936 = vmatprep.subr.bf16.mxu1 %v16572_v59  ;;  %v16662_v59 = vld [vmem:[#allocation3 + $0xa94] ss:$48 sps:$4 sm:$0xff]  }
 0x196   :  { %2894 = vmatpush2.bf16.msra.mxu0 %v16567_v60  ;;  %v16657_v60 = vld [vmem:[#allocation3 + $0x490] ss:$48 sps:$4 sm:$0xff]  }
 0x197   :  { %2937 = vmatpush2.bf16.msra.mxu1 %v16570_v61  ;;  %2895 = vmatprep.subr.bf16.mxu0 %v16575_v62  ;;  %v16660_v61 = vld [vmem:[#allocation3 + $0xa90] ss:$48 sps:$4 sm:$0xff]   ;;  %v16665_v62 = vld [vmem:[#allocation3 + $0x434] ss:$48 sps:$4 sm:$0xff]  }
 0x198   :  { %2938 = vmatprep.subr.bf16.mxu1 %v16578_v63  ;;  %v16668_v63 = vld [vmem:[#allocation3 + $0xa34] ss:$48 sps:$4 sm:$0xff]  }
 0x19a   :  { %2896 = vmatpush2.bf16.msra.mxu0 %v16573_v0  ;;  %v16663_v0 = vld [vmem:[#allocation3 + $0x430] ss:$48 sps:$4 sm:$0xff]  }
 0x19b   :  { %2939 = vmatpush2.bf16.msra.mxu1 %v16576_v1  ;;  %2897 = vmatprep.subr.bf16.mxu0 %v16581_v2  ;;  %v16666_v1 = vld [vmem:[#allocation3 + $0xa30] ss:$48 sps:$4 sm:$0xff]   ;;  %v16671_v2 = vld [vmem:[#allocation3 + $0x3d4] ss:$48 sps:$4 sm:$0xff]  }
 0x19c   :  { %2940 = vmatprep.subr.bf16.mxu1 %v16584_v3  ;;  %v16674_v3 = vld [vmem:[#allocation3 + $0x9d4] ss:$48 sps:$4 sm:$0xff]  }
 0x19e   :  { %2898 = vmatpush2.bf16.msra.mxu0 %v16579_v4  ;;  %v16669_v4 = vld [vmem:[#allocation3 + $0x3d0] ss:$48 sps:$4 sm:$0xff]  }
 0x19f   :  { %2941 = vmatpush2.bf16.msra.mxu1 %v16582_v5  ;;  %2899 = vmatprep.subr.bf16.mxu0 %v16587_v6  ;;  %v16672_v5 = vld [vmem:[#allocation3 + $0x9d0] ss:$48 sps:$4 sm:$0xff]   ;;  %v16677_v6 = vld [vmem:[#allocation3 + $0x374] ss:$48 sps:$4 sm:$0xff]  }
 0x1a0   :  { %2942 = vmatprep.subr.bf16.mxu1 %v16590_v7  ;;  %v16680_v7 = vld [vmem:[#allocation3 + $0x974] ss:$48 sps:$4 sm:$0xff]  }
 0x1a2   :  { %2900 = vmatpush2.bf16.msra.mxu0 %v16585_v10  ;;  %v16675_v10 = vld [vmem:[#allocation3 + $0x370] ss:$48 sps:$4 sm:$0xff]  }
 0x1a3   :  { %2943 = vmatpush2.bf16.msra.mxu1 %v16588_v11  ;;  %2955 = vmatprep.subr.bf16.mxu0 %v16593_v12  ;;  %v16678_v11 = vld [vmem:[#allocation3 + $0x970] ss:$48 sps:$4 sm:$0xff]   ;;  %v16683_v12 = vld [vmem:[#allocation3 + $0x314] ss:$48 sps:$4 sm:$0xff]  }
 0x1a4   :  { %2998 = vmatprep.subr.bf16.mxu1 %v16596_v13  ;;  %v16686_v13 = vld [vmem:[#allocation3 + $0x914] ss:$48 sps:$4 sm:$0xff]  }
 0x1a5   :  { %2902 = vmatmul.mubr.bf16.vlgmr.msra.gmra.mxu0 %v18848_v8 }
 0x1a6   :  { %2945 = vmatmul.mubr.bf16.vlgmr.msra.gmra.mxu1 %v18850_v9  ;;  %2956 = vmatpush1.bf16.msra.mxu0 %v16591_v14  ;;  %v16681_v14 = vld [vmem:[#allocation3 + $0x310] ss:$48 sps:$4 sm:$0xff]  }
 0x1a7   :  { %2999 = vmatpush1.bf16.msra.mxu1 %v16594_v15  ;;  %2957 = vmatprep.subr.bf16.mxu0 %v16599_v16  ;;  %v16684_v15 = vld [vmem:[#allocation3 + $0x910] ss:$48 sps:$4 sm:$0xff]   ;;  %v16689_v16 = vld [vmem:[#allocation3 + $0x2bc] ss:$48 sps:$4 sm:$0xff]  }
 0x1a8   :  { %3000 = vmatprep.subr.bf16.mxu1 %v16602_v17  ;;  %2987 = vmatprep.mubr.bf16.mxu0 %v18842_v53  ;;  %v16692_v17 = vld [vmem:[#allocation3 + $0x8bc] ss:$48 sps:$4 sm:$0xff]  }
 0x1a9   :  { %3030 = vmatprep.mubr.bf16.mxu1 %v18844_v54 }
 0x1aa   :  { %2958 = vmatpush1.bf16.msra.mxu0 %v16597_v18  ;;  %v16687_v18 = vld [vmem:[#allocation3 + $0x2b8] ss:$48 sps:$4 sm:$0xff]  }
 0x1ab   :  { %3001 = vmatpush1.bf16.msra.mxu1 %v16600_v19  ;;  %2959 = vmatprep.subr.bf16.mxu0 %v16605_v20  ;;  %v16690_v19 = vld [vmem:[#allocation3 + $0x8b8] ss:$48 sps:$4 sm:$0xff]   ;;  %v16695_v20 = vld [vmem:[#allocation3 + $0x25c] ss:$48 sps:$4 sm:$0xff]  }
 0x1ac   :  { %3002 = vmatprep.subr.bf16.mxu1 %v16608_v21  ;;  %v16698_v21 = vld [vmem:[#allocation3 + $0x85c] ss:$48 sps:$4 sm:$0xff]  }
 0x1ae   :  { %2960 = vmatpush1.bf16.msra.mxu0 %v16603_v22  ;;  %v16693_v22 = vld [vmem:[#allocation3 + $0x258] ss:$48 sps:$4 sm:$0xff]  }
 0x1af   :  { %3003 = vmatpush1.bf16.msra.mxu1 %v16606_v23  ;;  %2961 = vmatprep.subr.bf16.mxu0 %v16611_v24  ;;  %v16696_v23 = vld [vmem:[#allocation3 + $0x858] ss:$48 sps:$4 sm:$0xff]   ;;  %v16701_v24 = vld [vmem:[#allocation3 + $0x1fc] ss:$48 sps:$4 sm:$0xff]  }
 0x1b0   :  { %3004 = vmatprep.subr.bf16.mxu1 %v16614_v25  ;;  %v16704_v25 = vld [vmem:[#allocation3 + $0x7fc] ss:$48 sps:$4 sm:$0xff]  }
 0x1b2   :  { %2962 = vmatpush1.bf16.msra.mxu0 %v16609_v26  ;;  %v16699_v26 = vld [vmem:[#allocation3 + $0x1f8] ss:$48 sps:$4 sm:$0xff]  }
 0x1b3   :  { %3005 = vmatpush1.bf16.msra.mxu1 %v16612_v27  ;;  %2963 = vmatprep.subr.bf16.mxu0 %v16617_v28  ;;  %v16702_v27 = vld [vmem:[#allocation3 + $0x7f8] ss:$48 sps:$4 sm:$0xff]   ;;  %v16707_v28 = vld [vmem:[#allocation3 + $0x19c] ss:$48 sps:$4 sm:$0xff]  }
 0x1b4   :  { %3006 = vmatprep.subr.bf16.mxu1 %v16620_v29  ;;  %v16710_v29 = vld [vmem:[#allocation3 + $0x79c] ss:$48 sps:$4 sm:$0xff]  }
 0x1b6   :  { %2964 = vmatpush1.bf16.msra.mxu0 %v16615_v30  ;;  %v16705_v30 = vld [vmem:[#allocation3 + $0x198] ss:$48 sps:$4 sm:$0xff]  }
 0x1b7   :  { %3007 = vmatpush1.bf16.msra.mxu1 %v16618_v31  ;;  %2965 = vmatprep.subr.bf16.mxu0 %v16623_v32  ;;  %v16708_v31 = vld [vmem:[#allocation3 + $0x798] ss:$48 sps:$4 sm:$0xff]   ;;  %v16713_v32 = vld [vmem:[#allocation3 + $0x13c] ss:$48 sps:$4 sm:$0xff]  }
 0x1b8   :  { %3008 = vmatprep.subr.bf16.mxu1 %v16626_v33  ;;  %v16716_v33 = vld [vmem:[#allocation3 + $0x73c] ss:$48 sps:$4 sm:$0xff]  }
 0x1ba   :  { %2966 = vmatpush1.bf16.msra.mxu0 %v16621_v34  ;;  %v16711_v34 = vld [vmem:[#allocation3 + $0x138] ss:$48 sps:$4 sm:$0xff]  }
 0x1bb   :  { %3009 = vmatpush1.bf16.msra.mxu1 %v16624_v35  ;;  %2967 = vmatprep.subr.bf16.mxu0 %v16629_v36  ;;  %v16714_v35 = vld [vmem:[#allocation3 + $0x738] ss:$48 sps:$4 sm:$0xff]   ;;  %v16719_v36 = vld [vmem:[#allocation3 + $0xdc] ss:$48 sps:$4 sm:$0xff]  }
 0x1bc   :  { %3010 = vmatprep.subr.bf16.mxu1 %v16632_v37  ;;  %v16722_v37 = vld [vmem:[#allocation3 + $0x6dc] ss:$48 sps:$4 sm:$0xff]  }
 0x1be   :  { %2968 = vmatpush1.bf16.msra.mxu0 %v16627_v38  ;;  %v16717_v38 = vld [vmem:[#allocation3 + $0xd8] ss:$48 sps:$4 sm:$0xff]  }
 0x1bf   :  { %3011 = vmatpush1.bf16.msra.mxu1 %v16630_v39  ;;  %2969 = vmatprep.subr.bf16.mxu0 %v16635_v40  ;;  %v16720_v39 = vld [vmem:[#allocation3 + $0x6d8] ss:$48 sps:$4 sm:$0xff]   ;;  %v16725_v40 = vld [vmem:[#allocation3 + $0x7c] ss:$48 sps:$4 sm:$0xff]  }
 0x1c0   :  { %3012 = vmatprep.subr.bf16.mxu1 %v16638_v41  ;;  %v16728_v41 = vld [vmem:[#allocation3 + $0x67c] ss:$48 sps:$4 sm:$0xff]  }
 0x1c2   :  { %2970 = vmatpush1.bf16.msra.mxu0 %v16633_v42  ;;  %v16723_v42 = vld [vmem:[#allocation3 + $0x78] ss:$48 sps:$4 sm:$0xff]  }
 0x1c3   :  { %3013 = vmatpush1.bf16.msra.mxu1 %v16636_v43  ;;  %2971 = vmatprep.subr.bf16.mxu0 %v16641_v44  ;;  %v16726_v43 = vld [vmem:[#allocation3 + $0x678] ss:$48 sps:$4 sm:$0xff]   ;;  %v16731_v44 = vld [vmem:[#allocation3 + $0x1c] ss:$48 sps:$4 sm:$0xff]  }
 0x1c4   :  { %3014 = vmatprep.subr.bf16.mxu1 %v16644_v45  ;;  %v16734_v45 = vld [vmem:[#allocation3 + $0x61c] ss:$48 sps:$4 sm:$0xff]  }
 0x1c6   :  { %2972 = vmatpush2.bf16.msra.mxu0 %v16639_v46  ;;  %v16729_v46 = vld [vmem:[#allocation3 + $0x18] ss:$48 sps:$4 sm:$0xff]  }
 0x1c7   :  { %3015 = vmatpush2.bf16.msra.mxu1 %v16642_v47  ;;  %2973 = vmatprep.subr.bf16.mxu0 %v16647_v48  ;;  %v16732_v47 = vld [vmem:[#allocation3 + $0x618] ss:$48 sps:$4 sm:$0xff]   ;;  %v16737_v48 = vld [vmem:[#allocation3 + $0x5bc] ss:$48 sps:$4 sm:$0xff]  }
 0x1c8   :  { %3016 = vmatprep.subr.bf16.mxu1 %v16650_v49  ;;  %v16740_v49 = vld [vmem:[#allocation3 + $0xbbc] ss:$48 sps:$4 sm:$0xff]  }
 0x1ca   :  { %2974 = vmatpush2.bf16.msra.mxu0 %v16645_v50  ;;  %v16735_v50 = vld [vmem:[#allocation3 + $0x5b8] ss:$48 sps:$4 sm:$0xff]  }
 0x1cb   :  { %3017 = vmatpush2.bf16.msra.mxu1 %v16648_v51  ;;  %2975 = vmatprep.subr.bf16.mxu0 %v16653_v52  ;;  %v16738_v51 = vld [vmem:[#allocation3 + $0xbb8] ss:$48 sps:$4 sm:$0xff]   ;;  %v16743_v52 = vld [vmem:[#allocation3 + $0x55c] ss:$48 sps:$4 sm:$0xff]  }
 0x1cc   :  { %3018 = vmatprep.subr.bf16.mxu1 %v16656_v55  ;;  %v16746_v55 = vld [vmem:[#allocation3 + $0xb5c] ss:$48 sps:$4 sm:$0xff]  }
 0x1ce   :  { %2976 = vmatpush2.bf16.msra.mxu0 %v16651_v56  ;;  %v16741_v56 = vld [vmem:[#allocation3 + $0x558] ss:$48 sps:$4 sm:$0xff]  }
 0x1cf   :  { %3019 = vmatpush2.bf16.msra.mxu1 %v16654_v57  ;;  %2977 = vmatprep.subr.bf16.mxu0 %v16659_v58  ;;  %v16744_v57 = vld [vmem:[#allocation3 + $0xb58] ss:$48 sps:$4 sm:$0xff]   ;;  %v16749_v58 = vld [vmem:[#allocation3 + $0x4fc] ss:$48 sps:$4 sm:$0xff]  }
 0x1d0   :  { %3020 = vmatprep.subr.bf16.mxu1 %v16662_v59  ;;  %v16752_v59 = vld [vmem:[#allocation3 + $0xafc] ss:$48 sps:$4 sm:$0xff]  }
 0x1d2   :  { %2978 = vmatpush2.bf16.msra.mxu0 %v16657_v60  ;;  %v16747_v60 = vld [vmem:[#allocation3 + $0x4f8] ss:$48 sps:$4 sm:$0xff]  }
 0x1d3   :  { %3021 = vmatpush2.bf16.msra.mxu1 %v16660_v61  ;;  %2979 = vmatprep.subr.bf16.mxu0 %v16665_v62  ;;  %v16750_v61 = vld [vmem:[#allocation3 + $0xaf8] ss:$48 sps:$4 sm:$0xff]   ;;  %v16755_v62 = vld [vmem:[#allocation3 + $0x49c] ss:$48 sps:$4 sm:$0xff]  }
 0x1d4   :  { %3022 = vmatprep.subr.bf16.mxu1 %v16668_v63  ;;  %v16758_v63 = vld [vmem:[#allocation3 + $0xa9c] ss:$48 sps:$4 sm:$0xff]  }
 0x1d6   :  { %2980 = vmatpush2.bf16.msra.mxu0 %v16663_v0  ;;  %v16753_v0 = vld [vmem:[#allocation3 + $0x498] ss:$48 sps:$4 sm:$0xff]  }
 0x1d7   :  { %3023 = vmatpush2.bf16.msra.mxu1 %v16666_v1  ;;  %2981 = vmatprep.subr.bf16.mxu0 %v16671_v2  ;;  %v16756_v1 = vld [vmem:[#allocation3 + $0xa98] ss:$48 sps:$4 sm:$0xff]   ;;  %v16761_v2 = vld [vmem:[#allocation3 + $0x43c] ss:$48 sps:$4 sm:$0xff]  }
 0x1d8   :  { %3024 = vmatprep.subr.bf16.mxu1 %v16674_v3  ;;  %v16764_v3 = vld [vmem:[#allocation3 + $0xa3c] ss:$48 sps:$4 sm:$0xff]  }
 0x1da   :  { %2982 = vmatpush2.bf16.msra.mxu0 %v16669_v4  ;;  %v16759_v4 = vld [vmem:[#allocation3 + $0x438] ss:$48 sps:$4 sm:$0xff]  }
 0x1db   :  { %3025 = vmatpush2.bf16.msra.mxu1 %v16672_v5  ;;  %2983 = vmatprep.subr.bf16.mxu0 %v16677_v6  ;;  %v16762_v5 = vld [vmem:[#allocation3 + $0xa38] ss:$48 sps:$4 sm:$0xff]   ;;  %v16767_v6 = vld [vmem:[#allocation3 + $0x3dc] ss:$48 sps:$4 sm:$0xff]  }
 0x1dc   :  { %3026 = vmatprep.subr.bf16.mxu1 %v16680_v7  ;;  %v16770_v7 = vld [vmem:[#allocation3 + $0x9dc] ss:$48 sps:$4 sm:$0xff]  }
 0x1de   :  { %2984 = vmatpush2.bf16.msra.mxu0 %v16675_v10  ;;  %v16765_v10 = vld [vmem:[#allocation3 + $0x3d8] ss:$48 sps:$4 sm:$0xff]  }
 0x1df   :  { %3027 = vmatpush2.bf16.msra.mxu1 %v16678_v11  ;;  %2985 = vmatprep.subr.bf16.mxu0 %v16683_v12  ;;  %v16768_v11 = vld [vmem:[#allocation3 + $0x9d8] ss:$48 sps:$4 sm:$0xff]   ;;  %v16773_v12 = vld [vmem:[#allocation3 + $0x37c] ss:$48 sps:$4 sm:$0xff]  }
 0x1e0   :  { %3028 = vmatprep.subr.bf16.mxu1 %v16686_v13  ;;  %v16776_v13 = vld [vmem:[#allocation3 + $0x97c] ss:$48 sps:$4 sm:$0xff]  }
 0x1e2   :  { %2986 = vmatpush2.bf16.msra.mxu0 %v16681_v14  ;;  %v16771_v14 = vld [vmem:[#allocation3 + $0x378] ss:$48 sps:$4 sm:$0xff]  }
 0x1e3   :  { %3029 = vmatpush2.bf16.msra.mxu1 %v16684_v15  ;;  %3041 = vmatprep.subr.bf16.mxu0 %v16689_v16  ;;  %v16774_v15 = vld [vmem:[#allocation3 + $0x978] ss:$48 sps:$4 sm:$0xff]   ;;  %v16779_v16 = vld [vmem:[#allocation3 + $0x31c] ss:$48 sps:$4 sm:$0xff]  }
 0x1e4   :  { %3084 = vmatprep.subr.bf16.mxu1 %v16692_v17  ;;  %v16782_v17 = vld [vmem:[#allocation3 + $0x91c] ss:$48 sps:$4 sm:$0xff]  }
 0x1e5   :  { %2988 = vmatmul.mubr.bf16.vlgmr.msra.gmra.mxu0 %v18848_v8 }
 0x1e6   :  { %3031 = vmatmul.mubr.bf16.vlgmr.msra.gmra.mxu1 %v18850_v9  ;;  %3042 = vmatpush1.bf16.msra.mxu0 %v16687_v18  ;;  %v16777_v18 = vld [vmem:[#allocation3 + $0x318] ss:$48 sps:$4 sm:$0xff]  }
 0x1e7   :  { %3085 = vmatpush1.bf16.msra.mxu1 %v16690_v19  ;;  %3043 = vmatprep.subr.bf16.mxu0 %v16695_v20  ;;  %v16780_v19 = vld [vmem:[#allocation3 + $0x918] ss:$48 sps:$4 sm:$0xff]   ;;  %v389_v20 = vlaneseq }
 0x1e8   :  { %3086 = vmatprep.subr.bf16.mxu1 %v16698_v21  ;;  %3073 = vmatprep.mubr.bf16.mxu0 %v18842_v53  ;;  %v16785_v21 = vld [vmem:[#allocation3 + $0x2c4] ss:$48 sps:$4 sm:$0xff]  }
 0x1e9   :  { %3116 = vmatprep.mubr.bf16.mxu1 %v18844_v54 }
 0x1ea   :  { %3044 = vmatpush1.bf16.msra.mxu0 %v16693_v22  ;;  %v16821_v22 = vld [vmem:[#allocation3 + $0x8c4] ss:$48 sps:$4 sm:$0xff]  }
 0x1eb   :  { %3087 = vmatpush1.bf16.msra.mxu1 %v16696_v23  ;;  %3045 = vmatprep.subr.bf16.mxu0 %v16701_v24  ;;  %v18865_v23 = vshrl.u32 %v389_v20, 7  ;;  %v16783_v24 = vld [vmem:[#allocation3 + $0x2c0] ss:$48 sps:$4 sm:$0xff]  }
 0x1ec   :  { %3088 = vmatprep.subr.bf16.mxu1 %v16704_v25  ;;  %v16819_v25 = vld [vmem:[#allocation3 + $0x8c0] ss:$48 sps:$4 sm:$0xff]  }
 0x1ee   :  { %3046 = vmatpush1.bf16.msra.mxu0 %v16699_v26  ;;  %v16788_v26 = vld [vmem:[#allocation3 + $0x264] ss:$48 sps:$4 sm:$0xff]  }
 0x1ef   :  { %3089 = vmatpush1.bf16.msra.mxu1 %v16702_v27  ;;  %3047 = vmatprep.subr.bf16.mxu0 %v16707_v28  ;;  %v16827_v27 = vld [vmem:[#allocation3 + $0x864] ss:$48 sps:$4 sm:$0xff]  }
 0x1f0   :  { %3090 = vmatprep.subr.bf16.mxu1 %v16710_v29  ;;  %v18867_v28 = vld [vmem:[#allocation7] sm:$0xff]  ;;  %v18870_v29 = vsub.s32 0, %v18865_v23 }
 0x1f2   :  { %3048 = vmatpush1.bf16.msra.mxu0 %v16705_v30 }
 0x1f3   :  { %3091 = vmatpush1.bf16.msra.mxu1 %v16708_v31  ;;  %3049 = vmatprep.subr.bf16.mxu0 %v16713_v32  ;;  %v16786_v32 = vld [vmem:[#allocation3 + $0x260] ss:$48 sps:$4 sm:$0xff]  }
 0x1f4   :  { %3092 = vmatprep.subr.bf16.mxu1 %v16716_v33  ;;  %v16791_v33 = vld [vmem:[#allocation3 + $0x204] ss:$48 sps:$4 sm:$0xff]  }
 0x1f6   :  { %3050 = vmatpush1.bf16.msra.mxu0 %v16711_v34  ;;  %v16825_v34 = vld [vmem:[#allocation3 + $0x860] ss:$48 sps:$4 sm:$0xff]  }
 0x1f7   :  { %3093 = vmatpush1.bf16.msra.mxu1 %v16714_v35  ;;  %3051 = vmatprep.subr.bf16.mxu0 %v16719_v36  ;;  %v16833_v35 = vld [vmem:[#allocation3 + $0x804] ss:$48 sps:$4 sm:$0xff]  }
 0x1f8   :  { %3094 = vmatprep.subr.bf16.mxu1 %v16722_v37 }
 0x1fa   :  { %3052 = vmatpush1.bf16.msra.mxu0 %v16717_v38  ;;  %v18884_v38 = vrot.slane %v18867_v28, %v18870_v29 }
 0x1fb   :  { %3095 = vmatpush1.bf16.msra.mxu1 %v16720_v39  ;;  %3053 = vmatprep.subr.bf16.mxu0 %v16725_v40  ;;  %v16789_v39 = vld [vmem:[#allocation3 + $0x200] ss:$48 sps:$4 sm:$0xff]  }
 0x1fc   :  { %3096 = vmatprep.subr.bf16.mxu1 %v16728_v41  ;;  %v16794_v41 = vld [vmem:[#allocation3 + $0x1a4] ss:$48 sps:$4 sm:$0xff]  }
 0x1fe   :  { %3054 = vmatpush1.bf16.msra.mxu0 %v16723_v42  ;;  %v16831_v42 = vld [vmem:[#allocation3 + $0x800] ss:$48 sps:$4 sm:$0xff]  }
 0x1ff   :  { %3097 = vmatpush1.bf16.msra.mxu1 %v16726_v43  ;;  %3055 = vmatprep.subr.bf16.mxu0 %v16731_v44  ;;  %v16839_v44 = vld [vmem:[#allocation3 + $0x7a4] ss:$48 sps:$4 sm:$0xff]  }
 0x200   :  { %3098 = vmatprep.subr.bf16.mxu1 %v16734_v45 }
 0x202   :  { %3056 = vmatpush1.bf16.msra.mxu0 %v16729_v46 }
 0x203   :  { %3099 = vmatpush1.bf16.msra.mxu1 %v16732_v47  ;;  %3057 = vmatprep.subr.bf16.mxu0 %v16737_v48  ;;  %v16792_v47 = vld [vmem:[#allocation3 + $0x1a0] ss:$48 sps:$4 sm:$0xff]   ;;  %v16797_v48 = vld [vmem:[#allocation3 + $0x144] ss:$48 sps:$4 sm:$0xff]  }
 0x204   :  { %3100 = vmatprep.subr.bf16.mxu1 %v16740_v49  ;;  %v16837_v49 = vld [vmem:[#allocation3 + $0x7a0] ss:$48 sps:$4 sm:$0xff]  }
 0x206   :  { %3058 = vmatpush2.bf16.msra.mxu0 %v16735_v50  ;;  %v16845_v50 = vld [vmem:[#allocation3 + $0x744] ss:$48 sps:$4 sm:$0xff]  }
 0x207   :  { %3101 = vmatpush2.bf16.msra.mxu1 %v16738_v51  ;;  %3059 = vmatprep.subr.bf16.mxu0 %v16743_v52  ;;  %v16795_v51 = vld [vmem:[#allocation3 + $0x140] ss:$48 sps:$4 sm:$0xff]  }
 0x208   :  { %3102 = vmatprep.subr.bf16.mxu1 %v16746_v55  ;;  %v16843_v52 = vld [vmem:[#allocation3 + $0x740] ss:$48 sps:$4 sm:$0xff]   ;;  %v16800_v55 = vld [vmem:[#allocation3 + $0xe4] ss:$48 sps:$4 sm:$0xff]  }
 0x20a   :  { %3060 = vmatpush2.bf16.msra.mxu0 %v16741_v56  ;;  %v16848_v56 = vld [vmem:[#allocation3 + $0x6e4] ss:$48 sps:$4 sm:$0xff]  }
 0x20b   :  { %3103 = vmatpush2.bf16.msra.mxu1 %v16744_v57  ;;  %3061 = vmatprep.subr.bf16.mxu0 %v16749_v58  ;;  %v16798_v57 = vld [vmem:[#allocation3 + $0xe0] ss:$48 sps:$4 sm:$0xff]  }
 0x20c   :  { %3104 = vmatprep.subr.bf16.mxu1 %v16752_v59  ;;  %v16846_v58 = vld [vmem:[#allocation3 + $0x6e0] ss:$48 sps:$4 sm:$0xff]   ;;  %v16803_v59 = vld [vmem:[#allocation3 + $0x84] ss:$48 sps:$4 sm:$0xff]  }
 0x20e   :  { %3062 = vmatpush2.bf16.msra.mxu0 %v16747_v60  ;;  %v16854_v60 = vld [vmem:[#allocation3 + $0x684] ss:$48 sps:$4 sm:$0xff]  }
 0x20f   :  { %3105 = vmatpush2.bf16.msra.mxu1 %v16750_v61  ;;  %3063 = vmatprep.subr.bf16.mxu0 %v16755_v62  ;;  %v16801_v61 = vld [vmem:[#allocation3 + $0x80] ss:$48 sps:$4 sm:$0xff]  }
 0x210   :  { %3106 = vmatprep.subr.bf16.mxu1 %v16758_v63  ;;  %v16852_v62 = vld [vmem:[#allocation3 + $0x680] ss:$48 sps:$4 sm:$0xff]   ;;  %v16806_v63 = vld [vmem:[#allocation3 + $0x24] ss:$48 sps:$4 sm:$0xff]  }
 0x212   :  { %3064 = vmatpush2.bf16.msra.mxu0 %v16753_v0  ;;  %v16860_v0 = vld [vmem:[#allocation3 + $0x624] ss:$48 sps:$4 sm:$0xff]  }
 0x213   :  { %3107 = vmatpush2.bf16.msra.mxu1 %v16756_v1  ;;  %3065 = vmatprep.subr.bf16.mxu0 %v16761_v2  ;;  %v16804_v1 = vld [vmem:[#allocation3 + $0x20] ss:$48 sps:$4 sm:$0xff]   ;;  %v16809_v2 = vld [vmem:[#allocation3 + $0x5c4] ss:$48 sps:$4 sm:$0xff]  }
 0x214   :  { %3108 = vmatprep.subr.bf16.mxu1 %v16764_v3  ;;  %v16858_v3 = vld [vmem:[#allocation3 + $0x620] ss:$48 sps:$4 sm:$0xff]  }
 0x216   :  { %3066 = vmatpush2.bf16.msra.mxu0 %v16759_v4  ;;  %v16866_v4 = vld [vmem:[#allocation3 + $0xbc4] ss:$48 sps:$4 sm:$0xff]  }
 0x217   :  { %3109 = vmatpush2.bf16.msra.mxu1 %v16762_v5  ;;  %3067 = vmatprep.subr.bf16.mxu0 %v16767_v6  ;;  %v16807_v5 = vld [vmem:[#allocation3 + $0x5c0] ss:$48 sps:$4 sm:$0xff]  }
 0x218   :  { %3110 = vmatprep.subr.bf16.mxu1 %v16770_v7  ;;  %v16864_v6 = vld [vmem:[#allocation3 + $0xbc0] ss:$48 sps:$4 sm:$0xff]   ;;  %v16812_v7 = vld [vmem:[#allocation3 + $0x564] ss:$48 sps:$4 sm:$0xff]  }
 0x21a   :  { %3068 = vmatpush2.bf16.msra.mxu0 %v16765_v10  ;;  %v16872_v10 = vld [vmem:[#allocation3 + $0xb64] ss:$48 sps:$4 sm:$0xff]  }
 0x21b   :  { %3111 = vmatpush2.bf16.msra.mxu1 %v16768_v11  ;;  %3069 = vmatprep.subr.bf16.mxu0 %v16773_v12  ;;  %v16810_v11 = vld [vmem:[#allocation3 + $0x560] ss:$48 sps:$4 sm:$0xff]  }
 0x21c   :  { %3112 = vmatprep.subr.bf16.mxu1 %v16776_v13  ;;  %v16870_v12 = vld [vmem:[#allocation3 + $0xb60] ss:$48 sps:$4 sm:$0xff]   ;;  %v16815_v13 = vld [vmem:[#allocation3 + $0x504] ss:$48 sps:$4 sm:$0xff]  }
 0x21e   :  { %3070 = vmatpush2.bf16.msra.mxu0 %v16771_v14  ;;  %v16878_v14 = vld [vmem:[#allocation3 + $0xb04] ss:$48 sps:$4 sm:$0xff]  }
 0x21f   :  { %3113 = vmatpush2.bf16.msra.mxu1 %v16774_v15  ;;  %3071 = vmatprep.subr.bf16.mxu0 %v16779_v16  ;;  %v16813_v15 = vld [vmem:[#allocation3 + $0x500] ss:$48 sps:$4 sm:$0xff]  }
 0x220   :  { %3114 = vmatprep.subr.bf16.mxu1 %v16782_v17  ;;  %v16876_v16 = vld [vmem:[#allocation3 + $0xb00] ss:$48 sps:$4 sm:$0xff]   ;;  %v16818_v17 = vld [vmem:[#allocation3 + $0x4a4] ss:$48 sps:$4 sm:$0xff]  }
 0x222   :  { %3072 = vmatpush2.bf16.msra.mxu0 %v16777_v18  ;;  %v16884_v18 = vld [vmem:[#allocation3 + $0xaa4] ss:$48 sps:$4 sm:$0xff]  }
 0x223   :  { %3115 = vmatpush2.bf16.msra.mxu1 %v16780_v19  ;;  %3127 = vmatprep.subr.bf16.mxu0 %v16785_v21  ;;  %v16816_v19 = vld [vmem:[#allocation3 + $0x4a0] ss:$48 sps:$4 sm:$0xff]  }
 0x224   :  { %3170 = vmatprep.subr.bf16.mxu1 %v16821_v22  ;;  %v16882_v21 = vld [vmem:[#allocation3 + $0xaa0] ss:$48 sps:$4 sm:$0xff]   ;;  %v16824_v22 = vld [vmem:[#allocation3 + $0x444] ss:$48 sps:$4 sm:$0xff]  }
 0x225   :  { %v18872_v30 = vpop.f32.mrf.mxu0  ;;  %3074 = vmatmul.mubr.bf16.vlgmr.msra.gmra.mxu0 %v18848_v8 }
 0x226   :  { %v18874_v31 = vpop.f32.mrf.mxu1  ;;  %3117 = vmatmul.mubr.bf16.vlgmr.msra.gmra.mxu1 %v18850_v9  ;;  %3128 = vmatpush1.bf16.msra.mxu0 %v16783_v24  ;;  %v16890_v24 = vld [vmem:[#allocation3 + $0xa44] ss:$48 sps:$4 sm:$0xff]  }
 0x227   :  { %3171 = vmatpush1.bf16.msra.mxu1 %v16819_v25  ;;  %v18878_v36 = vpop.f32.mrf.mxu0  ;;  %3129 = vmatprep.subr.bf16.mxu0 %v16788_v26  ;;  %v16822_v25 = vld [vmem:[#allocation3 + $0x440] ss:$48 sps:$4 sm:$0xff]  }
 0x228   :  { %v18880_v37 = vpop.f32.mrf.mxu1  ;;  %3172 = vmatprep.subr.bf16.mxu1 %v16827_v27  ;;  %3159 = vmatprep.mubr.bf16.mxu0 %v18842_v53  ;;  %v16888_v26 = vld [vmem:[#allocation3 + $0xa40] ss:$48 sps:$4 sm:$0xff]   ;;  %v16830_v27 = vld [vmem:[#allocation3 + $0x3e4] ss:$48 sps:$4 sm:$0xff]  }
 0x229   :  { %3202 = vmatprep.mubr.bf16.mxu1 %v18844_v54  ;;  %v2821_v40 = vpop.f32.mrf.mxu0 }
 0x22a   :  { %v2822_v43 = vadd.f32 %v2821_v40, %v18884_v38  ;;  %3130 = vmatpush1.bf16.msra.mxu0 %v16786_v32  ;;  %v2864_v45 = vpop.f32.mrf.mxu1  ;;  %v16896_v32 = vld [vmem:[#allocation3 + $0x9e4] ss:$48 sps:$4 sm:$0xff]   ;;  %v16834_v40 = vld [vmem:[#allocation3 + $0x380] ss:$48 sps:$4 sm:$0xff]  }
 0x22b   :  { %3173 = vmatpush1.bf16.msra.mxu1 %v16825_v34  ;;  %3131 = vmatprep.subr.bf16.mxu0 %v16791_v33  ;;  %v16828_v33 = vld [vmem:[#allocation3 + $0x3e0] ss:$48 sps:$4 sm:$0xff]  }
 0x22c   :  { %3174 = vmatprep.subr.bf16.mxu1 %v16833_v35  ;;  %v18889_v46 = vadd.f32 %v2864_v45, %v2822_v43  ;;  %v16894_v34 = vld [vmem:[#allocation3 + $0x9e0] ss:$48 sps:$4 sm:$0xff]   ;;  %v16836_v35 = vld [vmem:[#allocation3 + $0x384] ss:$48 sps:$4 sm:$0xff]  }
 0x22d   :  { %v16908_v43 = vld [vmem:[#allocation3 + $0x924] ss:$48 sps:$4 sm:$0xff]   ;;  %v16906_v45 = vld [vmem:[#allocation3 + $0x920] ss:$48 sps:$4 sm:$0xff]  }
 0x22e   :  { %3132 = vmatpush1.bf16.msra.mxu0 %v16789_v39  ;;  %v16902_v39 = vld [vmem:[#allocation3 + $0x984] ss:$48 sps:$4 sm:$0xff]  }
 0x22f   :  { %3175 = vmatpush1.bf16.msra.mxu1 %v16831_v42  ;;  %3133 = vmatprep.subr.bf16.mxu0 %v16794_v41  ;;  %v16900_v41 = vld [vmem:[#allocation3 + $0x980] ss:$48 sps:$4 sm:$0xff]   ;;  %v16842_v42 = vld [vmem:[#allocation3 + $0x324] ss:$48 sps:$4 sm:$0xff]  }
 0x230   :  { %3176 = vmatprep.subr.bf16.mxu1 %v16839_v44  ;;  %v16840_v44 = vld [vmem:[#allocation3 + $0x320] ss:$48 sps:$4 sm:$0xff]  }
 0x232   :  { %3134 = vmatpush1.bf16.msra.mxu0 %v16792_v47  ;;  %v16851_v47 = vld [vmem:[#allocation3 + $0x2cc] ss:$48 sps:$4 sm:$0xff]  }
 0x233   :  { %3177 = vmatpush1.bf16.msra.mxu1 %v16837_v49  ;;  %3135 = vmatprep.subr.bf16.mxu0 %v16797_v48  ;;  %v16917_v48 = vld [vmem:[#allocation3 + $0x8cc] ss:$48 sps:$4 sm:$0xff]   ;;  %v18892_v49 = vsub.s32 2, %v18865_v23 }
 0x234   :  { %3178 = vmatprep.subr.bf16.mxu1 %v16845_v50  ;;  %v18895_v50 = vsub.s32 3, %v18865_v23 }
 0x236   :  { %3136 = vmatpush1.bf16.msra.mxu0 %v16795_v51  ;;  %v16849_v51 = vld [vmem:[#allocation3 + $0x2c8] ss:$48 sps:$4 sm:$0xff]  }
 0x237   :  { %3179 = vmatpush1.bf16.msra.mxu1 %v16843_v52  ;;  %3137 = vmatprep.subr.bf16.mxu0 %v16800_v55  ;;  %v16915_v52 = vld [vmem:[#allocation3 + $0x8c8] ss:$48 sps:$4 sm:$0xff]   ;;  %v16857_v55 = vld [vmem:[#allocation3 + $0x26c] ss:$48 sps:$4 sm:$0xff]  }
 0x238   :  { %3180 = vmatprep.subr.bf16.mxu1 %v16848_v56  ;;  %v16923_v56 = vld [vmem:[#allocation3 + $0x86c] ss:$48 sps:$4 sm:$0xff]  }
 0x23a   :  { %3138 = vmatpush1.bf16.msra.mxu0 %v16798_v57  ;;  %v794_v57 = vrot.slane %v18867_v28, %v18892_v49 }
 0x23b   :  { %3181 = vmatpush1.bf16.msra.mxu1 %v16846_v58  ;;  %3139 = vmatprep.subr.bf16.mxu0 %v16803_v59  ;;  %v18899_v58 = vpop.f32.mrf.mxu0  ;;  %v18901_v59 = vpop.f32.mrf.mxu1 }
 0x23c   :  { %3182 = vmatprep.subr.bf16.mxu1 %v16854_v60  ;;  %v18905_v60 = vrot.slane %v18867_v28, %v18895_v50 }
 0x23e   :  { %3140 = vmatpush1.bf16.msra.mxu0 %v16801_v61  ;;  %v16855_v61 = vld [vmem:[#allocation3 + $0x268] ss:$48 sps:$4 sm:$0xff]  }
 0x23f   :  { %3183 = vmatpush1.bf16.msra.mxu1 %v16852_v62  ;;  %3141 = vmatprep.subr.bf16.mxu0 %v16806_v63  ;;  %v16921_v62 = vld [vmem:[#allocation3 + $0x868] ss:$48 sps:$4 sm:$0xff]  }
 0x240   :  { %3184 = vmatprep.subr.bf16.mxu1 %v16860_v0 }
 0x242   :  { %3142 = vmatpush1.bf16.msra.mxu0 %v16804_v1  ;;  %v16863_v1 = vld [vmem:[#allocation3 + $0x20c] ss:$48 sps:$4 sm:$0xff]  }
 0x243   :  { %3185 = vmatpush1.bf16.msra.mxu1 %v16858_v3  ;;  %3143 = vmatprep.subr.bf16.mxu0 %v16809_v2  ;;  %v16929_v2 = vld [vmem:[#allocation3 + $0x80c] ss:$48 sps:$4 sm:$0xff]  }
 0x244   :  { %3186 = vmatprep.subr.bf16.mxu1 %v16866_v4 }
 0x246   :  { %3144 = vmatpush2.bf16.msra.mxu0 %v16807_v5 }
 0x247   :  { %3187 = vmatpush2.bf16.msra.mxu1 %v16864_v6  ;;  %3145 = vmatprep.subr.bf16.mxu0 %v16812_v7  ;;  %v16861_v7 = vld [vmem:[#allocation3 + $0x208] ss:$48 sps:$4 sm:$0xff]  }
 0x248   :  { %3188 = vmatprep.subr.bf16.mxu1 %v16872_v10  ;;  %v16927_v10 = vld [vmem:[#allocation3 + $0x808] ss:$48 sps:$4 sm:$0xff]  }
 0x24a   :  { %3146 = vmatpush2.bf16.msra.mxu0 %v16810_v11 }
 0x24b   :  { %3189 = vmatpush2.bf16.msra.mxu1 %v16870_v12  ;;  %3147 = vmatprep.subr.bf16.mxu0 %v16815_v13  ;;  %v16869_v12 = vld [vmem:[#allocation3 + $0x1ac] ss:$48 sps:$4 sm:$0xff]  }
 0x24c   :  { %3190 = vmatprep.subr.bf16.mxu1 %v16878_v14  ;;  %v16935_v13 = vld [vmem:[#allocation3 + $0x7ac] ss:$48 sps:$4 sm:$0xff]  }
 0x24e   :  { %3148 = vmatpush2.bf16.msra.mxu0 %v16813_v15 }
 0x24f   :  { %3191 = vmatpush2.bf16.msra.mxu1 %v16876_v16  ;;  %3149 = vmatprep.subr.bf16.mxu0 %v16818_v17 }
 0x250   :  { %3192 = vmatprep.subr.bf16.mxu1 %v16884_v18  ;;  %v16867_v18 = vld [vmem:[#allocation3 + $0x1a8] ss:$48 sps:$4 sm:$0xff]  }
 0x252   :  { %3150 = vmatpush2.bf16.msra.mxu0 %v16816_v19  ;;  %v16933_v19 = vld [vmem:[#allocation3 + $0x7a8] ss:$48 sps:$4 sm:$0xff]  }
 0x253   :  { %3193 = vmatpush2.bf16.msra.mxu1 %v16882_v21  ;;  %3151 = vmatprep.subr.bf16.mxu0 %v16824_v22  ;;  %v16875_v21 = vld [vmem:[#allocation3 + $0x14c] ss:$48 sps:$4 sm:$0xff]  }
 0x254   :  { %3194 = vmatprep.subr.bf16.mxu1 %v16890_v24  ;;  %v16941_v22 = vld [vmem:[#allocation3 + $0x74c] ss:$48 sps:$4 sm:$0xff]  }
 0x255   :  { %v16881_v24 = vld [vmem:[#allocation3 + $0xec] ss:$48 sps:$4 sm:$0xff]  }
 0x256   :  { %3152 = vmatpush2.bf16.msra.mxu0 %v16822_v25  ;;  %v16944_v25 = vld [vmem:[#allocation3 + $0x6ec] ss:$48 sps:$4 sm:$0xff]  }
 0x257   :  { %3195 = vmatpush2.bf16.msra.mxu1 %v16888_v26  ;;  %3153 = vmatprep.subr.bf16.mxu0 %v16830_v27  ;;  %v16879_v26 = vld [vmem:[#allocation3 + $0xe8] ss:$48 sps:$4 sm:$0xff]  }
 0x258   :  { %3196 = vmatprep.subr.bf16.mxu1 %v16896_v32  ;;  %v16942_v27 = vld [vmem:[#allocation3 + $0x6e8] ss:$48 sps:$4 sm:$0xff]   ;;  %v16887_v32 = vld [vmem:[#allocation3 + $0x8c] ss:$48 sps:$4 sm:$0xff]  }
 0x25a   :  { %3154 = vmatpush2.bf16.msra.mxu0 %v16828_v33  ;;  %v16947_v33 = vld [vmem:[#allocation3 + $0x68c] ss:$48 sps:$4 sm:$0xff]  }
 0x25b   :  { %3197 = vmatpush2.bf16.msra.mxu1 %v16894_v34  ;;  %3155 = vmatprep.subr.bf16.mxu0 %v16836_v35  ;;  %v16885_v34 = vld [vmem:[#allocation3 + $0x88] ss:$48 sps:$4 sm:$0xff]  }
 0x25c   :  { %3198 = vmatprep.subr.bf16.mxu1 %v16902_v39  ;;  %v16945_v35 = vld [vmem:[#allocation3 + $0x688] ss:$48 sps:$4 sm:$0xff]   ;;  %v16893_v39 = vld [vmem:[#allocation3 + $0x2c] ss:$48 sps:$4 sm:$0xff]  }
 0x25e   :  { %3156 = vmatpush2.bf16.msra.mxu0 %v16834_v40  ;;  %v16950_v40 = vld [vmem:[#allocation3 + $0x62c] ss:$48 sps:$4 sm:$0xff]  }
 0x25f   :  { %3199 = vmatpush2.bf16.msra.mxu1 %v16900_v41  ;;  %3157 = vmatprep.subr.bf16.mxu0 %v16842_v42  ;;  %v16891_v41 = vld [vmem:[#allocation3 + $0x28] ss:$48 sps:$4 sm:$0xff]  }
 0x260   :  { %3200 = vmatprep.subr.bf16.mxu1 %v16908_v43  ;;  %v16948_v42 = vld [vmem:[#allocation3 + $0x628] ss:$48 sps:$4 sm:$0xff]   ;;  %v16899_v43 = vld [vmem:[#allocation3 + $0x5cc] ss:$48 sps:$4 sm:$0xff]  }
 0x262   :  { %3158 = vmatpush2.bf16.msra.mxu0 %v16840_v44  ;;  %v16953_v44 = vld [vmem:[#allocation3 + $0xbcc] ss:$48 sps:$4 sm:$0xff]  }
 0x263   :  { %3201 = vmatpush2.bf16.msra.mxu1 %v16906_v45  ;;  %3213 = vmatprep.subr.bf16.mxu0 %v16851_v47  ;;  %v16897_v45 = vld [vmem:[#allocation3 + $0x5c8] ss:$48 sps:$4 sm:$0xff]  }
 0x264   :  { %3256 = vmatprep.subr.bf16.mxu1 %v16917_v48  ;;  %v16951_v47 = vld [vmem:[#allocation3 + $0xbc8] ss:$48 sps:$4 sm:$0xff]   ;;  %v16905_v48 = vld [vmem:[#allocation3 + $0x56c] ss:$48 sps:$4 sm:$0xff]  }
 0x265   :  { %v2903_v63 = vpop.f32.mrf.mxu0  ;;  %3160 = vmatmul.mubr.bf16.vlgmr.msra.gmra.mxu0 %v18848_v8 }
 0x266   :  { %v2946_v0 = vpop.f32.mrf.mxu1  ;;  %3203 = vmatmul.mubr.bf16.vlgmr.msra.gmra.mxu1 %v18850_v9  ;;  %v2904_v3 = vadd.f32 %v2903_v63, %v794_v57  ;;  %3214 = vmatpush1.bf16.msra.mxu0 %v16849_v51  ;;  %v16956_v51 = vld [vmem:[#allocation3 + $0xb6c] ss:$48 sps:$4 sm:$0xff]  }
 0x267   :  { %3257 = vmatpush1.bf16.msra.mxu1 %v16915_v52  ;;  %v2905_v4 = vpop.f32.mrf.mxu0  ;;  %3215 = vmatprep.subr.bf16.mxu0 %v16857_v55  ;;  %v16903_v52 = vld [vmem:[#allocation3 + $0x568] ss:$48 sps:$4 sm:$0xff]   ;;  %v16914_v63 = vld [vmem:[#allocation3 + $0x4ac] ss:$48 sps:$4 sm:$0xff]  }
 0x268   :  { %v2948_v5 = vpop.f32.mrf.mxu1  ;;  %3258 = vmatprep.subr.bf16.mxu1 %v16923_v56  ;;  %v18909_v6 = vadd.f32 %v2946_v0, %v2904_v3  ;;  %v2906_v28 = vadd.f32 %v2905_v4, %v18905_v60  ;;  %3245 = vmatprep.mubr.bf16.mxu0 %v18842_v53  ;;  %v16873_v53 = vld [vmem:[#allocation3 + $0x148] ss:$48 sps:$4 sm:$0xff]   ;;  %v16911_v56 = vld [vmem:[#allocation3 + $0x50c] ss:$48 sps:$4 sm:$0xff]  }
 0x269   :  { %3288 = vmatprep.mubr.bf16.mxu1 %v18844_v54  ;;  %v2907_v11 = vpop.f32.mrf.mxu0  ;;  %v16939_v54 = vld [vmem:[#allocation3 + $0x748] ss:$48 sps:$4 sm:$0xff]   ;;  %v16962_v0 = vld [vmem:[#allocation3 + $0xaac] ss:$48 sps:$4 sm:$0xff]  }
 0x26a   :  { %v18914_v14 = vadd.f32 %v2948_v5, %v2906_v28  ;;  %v2908_v15 = vadd.f32 %v2907_v11, %v794_v57  ;;  %3216 = vmatpush1.bf16.msra.mxu0 %v16855_v61  ;;  %v2950_v16 = vpop.f32.mrf.mxu1  ;;  %v16954_v55 = vld [vmem:[#allocation3 + $0xb68] ss:$48 sps:$4 sm:$0xff]   ;;  %v16959_v57 = vld [vmem:[#allocation3 + $0xb0c] ss:$48 sps:$4 sm:$0xff]  }
 0x26b   :  { %3259 = vmatpush1.bf16.msra.mxu1 %v16921_v62  ;;  %3217 = vmatprep.subr.bf16.mxu0 %v16863_v1  ;;  %v16909_v61 = vld [vmem:[#allocation3 + $0x508] ss:$48 sps:$4 sm:$0xff]   ;;  %v16920_v3 = vld [vmem:[#allocation3 + $0x44c] ss:$48 sps:$4 sm:$0xff]  }
 0x26c   :  { %3260 = vmatprep.subr.bf16.mxu1 %v16929_v2  ;;  %v18916_v17 = vadd.f32 %v2950_v16, %v2908_v15  ;;  %v16957_v62 = vld [vmem:[#allocation3 + $0xb08] ss:$48 sps:$4 sm:$0xff]   ;;  %v16965_v4 = vld [vmem:[#allocation3 + $0xa4c] ss:$48 sps:$4 sm:$0xff]  }
 0x26d   :  { %v16912_v1 = vld [vmem:[#allocation3 + $0x4a8] ss:$48 sps:$4 sm:$0xff]   ;;  %v16971_v15 = vld [vmem:[#allocation3 + $0x98c] ss:$48 sps:$4 sm:$0xff]  }
 0x26e   :  { %3218 = vmatpush1.bf16.msra.mxu0 %v16861_v7  ;;  %v16960_v2 = vld [vmem:[#allocation3 + $0xaa8] ss:$48 sps:$4 sm:$0xff]   ;;  %v16926_v7 = vld [vmem:[#allocation3 + $0x3ec] ss:$48 sps:$4 sm:$0xff]  }
 0x26f   :  { %3261 = vmatpush1.bf16.msra.mxu1 %v16927_v10  ;;  %3219 = vmatprep.subr.bf16.mxu0 %v16869_v12  ;;  %v16918_v5 = vld [vmem:[#allocation3 + $0x448] ss:$48 sps:$4 sm:$0xff]   ;;  %v16968_v10 = vld [vmem:[#allocation3 + $0x9ec] ss:$48 sps:$4 sm:$0xff]  }
 0x270   :  { %3262 = vmatprep.subr.bf16.mxu1 %v16935_v13  ;;  %v16963_v28 = vld [vmem:[#allocation3 + $0xa48] ss:$48 sps:$4 sm:$0xff]   ;;  %v16932_v13 = vld [vmem:[#allocation3 + $0x38c] ss:$48 sps:$4 sm:$0xff]  }
 0x271   :  { %v16924_v11 = vld [vmem:[#allocation3 + $0x3e8] ss:$48 sps:$4 sm:$0xff]  }
 0x272   :  { %3220 = vmatpush1.bf16.msra.mxu0 %v16867_v18  ;;  %v16966_v12 = vld [vmem:[#allocation3 + $0x9e8] ss:$48 sps:$4 sm:$0xff]  }
 0x273   :  { %3263 = vmatpush1.bf16.msra.mxu1 %v16933_v19  ;;  %3221 = vmatprep.subr.bf16.mxu0 %v16875_v21  ;;  %v16930_v16 = vld [vmem:[#allocation3 + $0x388] ss:$48 sps:$4 sm:$0xff]   ;;  %v16938_v19 = vld [vmem:[#allocation3 + $0x32c] ss:$48 sps:$4 sm:$0xff]  }
 0x274   :  { %3264 = vmatprep.subr.bf16.mxu1 %v16941_v22  ;;  %v16969_v18 = vld [vmem:[#allocation3 + $0x988] ss:$48 sps:$4 sm:$0xff]   ;;  %v16974_v21 = vld [vmem:[#allocation3 + $0x92c] ss:$48 sps:$4 sm:$0xff]  }
 0x275   :  { %v16936_v22 = vld [vmem:[#allocation3 + $0x328] ss:$48 sps:$4 sm:$0xff]  }
 0x276   :  { %3222 = vmatpush1.bf16.msra.mxu0 %v16873_v53  ;;  %v16972_v53 = vld [vmem:[#allocation3 + $0x928] ss:$48 sps:$4 sm:$0xff]  }
 0x277   :  { %3265 = vmatpush1.bf16.msra.mxu1 %v16939_v54  ;;  %3223 = vmatprep.subr.bf16.mxu0 %v16881_v24  ;;  %v18919_v54 = vsub.s32 4, %v18865_v23  ;;  %v18055_v24 = vld [vmem:[#allocation7] sm:$0xff] }
 0x278   :  { %3266 = vmatprep.subr.bf16.mxu1 %v16944_v25 }
 0x279   :  { %v802_v25 = vrot.slane %v18055_v24, %v18919_v54 }
 0x27a   :  { %3224 = vmatpush1.bf16.msra.mxu0 %v16879_v26  ;;  %v18923_v26 = vsub.s32 5, %v18865_v23 }
 0x27b   :  { %3267 = vmatpush1.bf16.msra.mxu1 %v16942_v27  ;;  %3225 = vmatprep.subr.bf16.mxu0 %v16887_v32  ;;  %v18925_v27 = vpop.f32.mrf.mxu0  ;;  %v18597_v32 = vmov 0.0  }
 0x27c   :  { %3268 = vmatprep.subr.bf16.mxu1 %v16947_v33  ;;  %v18929_v33 = vpop.f32.mrf.mxu1 }
 0x27e   :  { %3226 = vmatpush1.bf16.msra.mxu0 %v16885_v34 }
 0x27f   :  { %3269 = vmatpush1.bf16.msra.mxu1 %v16945_v35  ;;  %3227 = vmatprep.subr.bf16.mxu0 %v16893_v39  ;;  %v806_v39 = vrot.slane %v18055_v24, %v18923_v26 }
 0x280   :  { %3270 = vmatprep.subr.bf16.mxu1 %v16950_v40 }
 0x282   :  { %3228 = vmatpush1.bf16.msra.mxu0 %v16891_v41 }
 0x283   :  { %3271 = vmatpush1.bf16.msra.mxu1 %v16948_v42  ;;  %3229 = vmatprep.subr.bf16.mxu0 %v16899_v43  ;;  %v2818_v43 = vadd.f32 %v18872_v30, %v18884_v38  ;;  %v18954_v38 = vsub.s32 6, %v18865_v23 }
 0x284   :  { %3272 = vmatprep.subr.bf16.mxu1 %v16953_v44 }
 0x286   :  { %3230 = vmatpush2.bf16.msra.mxu0 %v16897_v45  ;;  %v2861_v45 = vadd.f32 %v18874_v31, %v2818_v43 }
 0x287   :  { %3273 = vmatpush2.bf16.msra.mxu1 %v16951_v47  ;;  %3231 = vmatprep.subr.bf16.mxu0 %v16905_v48 }
 0x288   :  { %3274 = vmatprep.subr.bf16.mxu1 %v16956_v51 }
 0x28a   :  { %3232 = vmatpush2.bf16.msra.mxu0 %v16903_v52  ;;  %v3299_v52 = vpack.c.bf16 %v2861_v45, %v2861_v45 }
 0x28b   :  { %3275 = vmatpush2.bf16.msra.mxu1 %v16954_v55  ;;  %3233 = vmatprep.subr.bf16.mxu0 %v16911_v56 }
 0x28c   :  { %3276 = vmatprep.subr.bf16.mxu1 %v16959_v57 }
 0x28e   :  { %3234 = vmatpush2.bf16.msra.mxu0 %v16909_v61  ;;  %v810_v61 = vrot.slane %v18055_v24, %v18954_v38 }
 0x28f   :  { %3277 = vmatpush2.bf16.msra.mxu1 %v16957_v62  ;;  %3235 = vmatprep.subr.bf16.mxu0 %v16914_v63  ;;  %v18958_v62 = vsub.s32 7, %v18865_v23 }
 0x290   :  { %3278 = vmatprep.subr.bf16.mxu1 %v16962_v0 }
 0x292   :  { %3236 = vmatpush2.bf16.msra.mxu0 %v16912_v1 }
 0x293   :  { %3279 = vmatpush2.bf16.msra.mxu1 %v16960_v2  ;;  %3237 = vmatprep.subr.bf16.mxu0 %v16920_v3  ;;  %v814_v2 = vrot.slane %v18055_v24, %v18958_v62 }
 0x294   :  { %3280 = vmatprep.subr.bf16.mxu1 %v16965_v4 }
 0x296   :  { %3238 = vmatpush2.bf16.msra.mxu0 %v16918_v5 }
 0x297   :  { %3281 = vmatpush2.bf16.msra.mxu1 %v16963_v28  ;;  %3239 = vmatprep.subr.bf16.mxu0 %v16926_v7 }
 0x298   :  { %3282 = vmatprep.subr.bf16.mxu1 %v16968_v10 }
 0x29a   :  { %3240 = vmatpush2.bf16.msra.mxu0 %v16924_v11 }
 0x29b   :  { %3283 = vmatpush2.bf16.msra.mxu1 %v16966_v12  ;;  %3241 = vmatprep.subr.bf16.mxu0 %v16932_v13  ;;  %v3507_v12 = vpack.c.bf16 %v18909_v6, %v18909_v6 }
 0x29c   :  { %3284 = vmatprep.subr.bf16.mxu1 %v16971_v15 }
 0x29e   :  { %3242 = vmatpush2.bf16.msra.mxu0 %v16930_v16 }
 0x29f   :  { %3285 = vmatpush2.bf16.msra.mxu1 %v16969_v18  ;;  %3243 = vmatprep.subr.bf16.mxu0 %v16938_v19  ;;  %v3610_v18 = vpack.c.bf16 %v18914_v14, %v18914_v14 }
 0x2a0   :  { %3286 = vmatprep.subr.bf16.mxu1 %v16974_v21 }
 0x2a2   :  { %3244 = vmatpush2.bf16.msra.mxu0 %v16936_v22 }
 0x2a3   :  { %3287 = vmatpush2.bf16.msra.mxu1 %v16972_v53  ;;  %16166 = vmatprep.subr.bf16.mxu0 %v18597_v32  ;;  %v3713_v53 = vpack.c.bf16 %v18889_v46, %v18889_v46 }
 0x2a4   :  { %16172 = vmatprep.subr.bf16.mxu1 %v18597_v32 }
 0x2a5   :  { %v2989_v34 = vpop.f32.mrf.mxu0  ;;  %3246 = vmatmul.mubr.bf16.vlgmr.msra.gmra.mxu0 %v18848_v8  ;;  %v18941_v8 = vsub.s32 1, %v18865_v23 }
 0x2a6   :  { %3289 = vmatmul.mubr.bf16.vlgmr.msra.gmra.mxu1 %v18850_v9  ;;  %v2990_v35 = vadd.f32 %v2989_v34, %v802_v25  ;;  %16168 = vmatprep.mubr.msk.bf16.mxu0 %vm18598_vm0, %v18597_v32  ;;  %v3032_v40 = vpop.f32.mrf.mxu1 }
 0x2a7   :  { %16174 = vmatprep.mubr.msk.bf16.mxu1 %vm18598_vm0, %v18597_v32  ;;  %v2991_v41 = vpop.f32.mrf.mxu0  ;;  %v790_v47 = vrot.slane %v18055_v24, %v18941_v8 }
 0x2a8   :  { %v3033_v42 = vadd.f32 %v3032_v40, %v2990_v35  ;;  %v2992_v44 = vadd.f32 %v2991_v41, %v806_v39  ;;  %v3034_v48 = vpop.f32.mrf.mxu1 }
 0x2a9   :  { %v2820_v55 = vadd.f32 %v18878_v36, %v790_v47  ;;  %v2993_v57 = vpop.f32.mrf.mxu0  ;;  %v2824_v24 = vadd.f32 %v18899_v58, %v790_v47 }
 0x2aa   :  { %v3300_v9 = vpack.c.bf16 %v3033_v42, %v3033_v42  ;;  %v3035_v51 = vadd.f32 %v3034_v48, %v2992_v44  ;;  %v3036_v36 = vpop.f32.mrf.mxu1  ;;  %v2994_v13 = vadd.f32 %v2993_v57, %v802_v25  ;;  %v18989_v48 = vld [vmem:[#allocation7 + $0x8] sm:$0xf] }
 0x2ab   :  { %v2863_v30 = vadd.f32 %v18880_v37, %v2820_v55  ;;  %v2995_v63 = vpop.f32.mrf.mxu0  ;;  %v2867_v14 = vadd.f32 %v18901_v59, %v2824_v24  ;;  %v3919_v59 = vpack.c.bf16 %v18916_v17, %v18916_v17 }
 0x2ac   :  { %16167 = vmatpush3.bf16.xpose.msra.mxu0 %v3300_v9  ;;  %v3405_v56 = vpack.c.bf16 %v3035_v51, %v3035_v51  ;;  %v3038_v0 = vpop.f32.mrf.mxu1  ;;  %v3037_v16 = vadd.f32 %v3036_v36, %v2994_v13  ;;  %v2996_v21 = vadd.f32 %v2995_v63, %v806_v39  ;;  %v2910_v9 = vadd.f32 %v18925_v27, %v18905_v60 }
 0x2ad   :  { %16178 = vmatprep.subr.bf16.mxu0 %v18597_v32  ;;  %v3404_v31 = vpack.c.bf16 %v2863_v30, %v2863_v30  ;;  %v3816_v41 = vpack.c.bf16 %v2867_v14, %v2867_v14  ;;  %v818_v51 = vrot.slane %v18989_v48, %v18870_v29 }
 0x2ae   :  { %v3714_v19 = vpack.c.bf16 %v3037_v16, %v3037_v16  ;;  %v3039_v6 = vadd.f32 %v3038_v0, %v2996_v21  ;;  %v2953_v45 = vadd.f32 %v18929_v33, %v2910_v9 }
 0x2b0   :  { %v3817_v25 = vpack.c.bf16 %v3039_v6, %v3039_v6  ;;  %v4022_v47 = vpack.c.bf16 %v2953_v45, %v2953_v45 }
 0x2b3   :  { %16169 = vmatmul.mubr.bf16.vlgmr.msra.gmra.mxu0 %v3299_v52 }
 0x2b4   :  { %16179 = vmatpush3.bf16.xpose.msra.mxu0 %v3405_v56  ;;  %16180 = vmatprep.mubr.msk.bf16.mxu0 %vm18598_vm0, %v18597_v32 }
 0x2b5   :  { %16190 = vmatprep.subr.bf16.mxu0 %v18597_v32 }
 0x2bb   :  { %16181 = vmatmul.mubr.bf16.vlgmr.msra.gmra.mxu0 %v3404_v31 }
 0x2bc   :  { %16192 = vmatprep.mubr.msk.bf16.mxu0 %vm18598_vm0, %v18597_v32 }
 0x2e5   :  { %v3075_v37 = vpop.f32.mrf.mxu0 }
 0x2e6   :  { %v3076_v1 = vadd.f32 %v3075_v37, %v810_v61  ;;  %v3118_v3 = vpop.f32.mrf.mxu1  ;;  %v19007_v37 = vrot.slane %v18989_v48, %v18892_v49 }
 0x2e7   :  { %v3077_v4 = vpop.f32.mrf.mxu0 }
 0x2e8   :  { %v3119_v5 = vadd.f32 %v3118_v3, %v3076_v1  ;;  %v3078_v7 = vadd.f32 %v3077_v4, %v814_v2  ;;  %v3120_v10 = vpop.f32.mrf.mxu1  ;;  %v19015_v4 = vand.u32 127, %v389_v20 }
 0x2e9   :  { %v3079_v22 = vpop.f32.mrf.mxu0 }
 0x2ea   :  { %v3508_v28 = vpack.c.bf16 %v3119_v5, %v3119_v5  ;;  %v3121_v11 = vadd.f32 %v3120_v10, %v3078_v7  ;;  %v3080_v34 = vadd.f32 %v3079_v22, %v810_v61  ;;  %v3122_v35 = vpop.f32.mrf.mxu1  ;;  %vm393_vm2 = vcmp.le.s32.totalorder %v19015_v4, %v18865_v23 }
 0x2eb   :  { %v3081_v40 = vpop.f32.mrf.mxu0  ;;  %v18599_v7 = vmov -1e+30   ;;  %vm8220_vm4 = vcmp.lt.s32.totalorder %v19015_v4, 16 }
 0x2ec   :  { %16191 = vmatpush3.bf16.xpose.msra.mxu0 %v3508_v28  ;;  %v3611_v15 = vpack.c.bf16 %v3121_v11, %v3121_v11  ;;  %v3123_v39 = vadd.f32 %v3122_v35, %v3080_v34  ;;  %v3082_v43 = vadd.f32 %v3081_v40, %v814_v2  ;;  %v3124_v46 = vpop.f32.mrf.mxu1  ;;  %v394_v10 = vsel %vm393_vm2, 0.0, %v18599_v7 }
 0x2ed   :  { %16202 = vmatprep.subr.bf16.mxu0 %v18597_v32 }
 0x2ee   :  { %v3920_v42 = vpack.c.bf16 %v3123_v39, %v3123_v39  ;;  %v3125_v58 = vadd.f32 %v3124_v46, %v3082_v43 }
 0x2f0   :  { %v4023_v44 = vpack.c.bf16 %v3125_v58, %v3125_v58 }
 0x2f3   :  { %16193 = vmatmul.mubr.bf16.vlgmr.msra.gmra.mxu0 %v3507_v12 }
 0x2f4   :  { %16203 = vmatpush3.bf16.xpose.msra.mxu0 %v3611_v15  ;;  %16204 = vmatprep.mubr.msk.bf16.mxu0 %vm18598_vm0, %v18597_v32 }
 0x2f5   :  { %16214 = vmatprep.subr.bf16.mxu0 %v18597_v32 }
 0x2fb   :  { %16205 = vmatmul.mubr.bf16.vlgmr.msra.gmra.mxu0 %v3610_v18 }
 0x2fc   :  { %16215 = vmatpush3.bf16.xpose.msra.mxu0 %v3714_v19  ;;  %16216 = vmatprep.mubr.msk.bf16.mxu0 %vm18598_vm0, %v18597_v32 }
 0x2fd   :  { %16226 = vmatprep.subr.bf16.mxu0 %v18597_v32 }
 0x303   :  { %16217 = vmatmul.mubr.bf16.vlgmr.msra.gmra.mxu0 %v3713_v53 }
 0x304   :  { %16227 = vmatpush3.bf16.xpose.msra.mxu0 %v3817_v25  ;;  %16228 = vmatprep.mubr.msk.bf16.mxu0 %vm18598_vm0, %v18597_v32 }
 0x305   :  { %16238 = vmatprep.subr.bf16.mxu0 %v18597_v32 }
 0x30b   :  { %16229 = vmatmul.mubr.bf16.vlgmr.msra.gmra.mxu0 %v3816_v41 }
 0x30c   :  { %16239 = vmatpush3.bf16.xpose.msra.mxu0 %v3920_v42  ;;  %16240 = vmatprep.mubr.msk.bf16.mxu0 %vm18598_vm0, %v18597_v32 }
 0x30d   :  { %16250 = vmatprep.subr.bf16.mxu0 %v18597_v32 }
 0x313   :  { %16241 = vmatmul.mubr.bf16.vlgmr.msra.gmra.mxu0 %v3919_v59 }
 0x314   :  { %16251 = vmatpush3.bf16.xpose.msra.mxu0 %v4023_v44  ;;  %16252 = vmatprep.mubr.msk.bf16.mxu0 %vm18598_vm0, %v18597_v32 }
 0x31b   :  { %16253 = vmatmul.mubr.bf16.vlgmr.msra.gmra.mxu0 %v4022_v47 }
 0x325   :  { %v3161_v52 = vpop.f32.mrf.mxu0 }
 0x326   :  { %v3204_v17 = vpop.f32.mrf.mxu1  ;;  %v3162_v55 = vadd.f32 %v3161_v52, %v818_v51 }
 0x327   :  { %v18993_v56 = vpop.f32.mrf.mxu0 }
 0x328   :  { %v18995_v60 = vpop.f32.mrf.mxu1  ;;  %v3205_v27 = vadd.f32 %v3204_v17, %v3162_v55 }
 0x329   :  { %v3165_v30 = vpop.f32.mrf.mxu0 }
 0x32a   :  { %v3301_v31 = vpack.c.bf16 %v3205_v27, %v3205_v27  ;;  %v3166_v57 = vadd.f32 %v3165_v30, %v818_v51  ;;  %v3208_v33 = vpop.f32.mrf.mxu1 }
 0x32b   :  { %v19001_v63 = vpop.f32.mrf.mxu0 }
 0x32c   :  { %v3362_v36 = vsel %vm3360_vm1, %v3301_v31, 0  ;;  %v18998_v61 = vadd.f32 %v3208_v33, %v3166_v57 }
 0x32d   :  { %16173 = vmatpush3.bf16.msra.mxu1 %v3362_v36 }
 0x32e   :  { %16184 = vmatprep.subr.bf16.mxu1 %v18597_v32 }
 0x365   :  { %v19003_v0 = vpop.f32.mrf.mxu0 }
 0x367   :  { %v19009_v1 = vpop.f32.mrf.mxu0 }
 0x369   :  { %v3251_v2 = vpop.f32.mrf.mxu0 }
 0x36a   :  { %v19012_v3 = vadd.f32 %v3251_v2, %v19007_v37 }
 0x36b   :  { %v19017_v5 = vpop.f32.mrf.mxu0 }
 0x373   :  { %v3336_v28 = vpop.f32.mrf.mxu0 }
 0x374   :  { %v3342_v11 = vmul.f32 0.088388346, %v3336_v28 }
 0x375   :  { %v16170_v12 = vpop.f32.mrf.mxu0 }
 0x376   :  { %v19022_v13 = vadd.f32 %v3342_v11, %v394_v10 }
 0x377   :  { %v3339_v15 = vpop.f32.mrf.mxu0 }
 0x378   :  { %v3345_v16 = vsel %vm3344_vm3, %v19022_v13, -inf }
 0x379   :  { %3346 = vmax.xlane.f32.xlu0 %v3345_v16  ;;  %v16171_v20 = vpop.f32.mrf.mxu0 }
 0x37b   :  { %v3441_v18 = vpop.f32.mrf.mxu0 }
 0x37c   :  { %v3447_v19 = vmul.f32 0.088388346, %v3441_v18 }
 0x37d   :  { %v16182_v21 = vpop.f32.mrf.mxu0 }
 0x37e   :  { %v3448_v6 = vadd.f32 %v3447_v19, %v394_v10 }
 0x37f   :  { %v3444_v23 = vpop.f32.mrf.mxu0 }
 0x380   :  { %v3449_v22 = vsel %vm3344_vm3, %v3448_v6, -inf }
 0x381   :  { %3450 = vmax.xlane.f32.xlu0 %v3449_v22  ;;  %v16183_v53 = vpop.f32.mrf.mxu0 }
 0x3b3   :  { %v3544_v24 = vpop.f32.mrf.mxu0 }
 0x3b4   :  { %v3550_v25 = vmul.f32 0.088388346, %v3544_v24 }
 0x3b5   :  { %v16194_v34 = vpop.f32.mrf.mxu0 }
 0x3b6   :  { %v3551_v14 = vadd.f32 %v3550_v25, %v394_v10 }
 0x3b7   :  { %v3547_v35 = vpop.f32.mrf.mxu0 }
 0x3b8   :  { %v3552_v39 = vsel %vm3344_vm3, %v3551_v14, -inf }
 0x3b9   :  { %3553 = vmax.xlane.f32.xlu1 %v3552_v39  ;;  %v16195_v40 = vpop.f32.mrf.mxu0 }
 0x3bb   :  { %v3647_v41 = vpop.f32.mrf.mxu0 }
 0x3bc   :  { %v3653_v42 = vmul.f32 0.088388346, %v3647_v41 }
 0x3bd   :  { %v16206_v43 = vpop.f32.mrf.mxu0 }
 0x3be   :  { %v3654_v46 = vadd.f32 %v3653_v42, %v394_v10 }
 0x3bf   :  { %v3650_v58 = vpop.f32.mrf.mxu0 }
 0x3c0   :  { %v3655_v59 = vsel %vm3344_vm3, %v3654_v46, -inf }
 0x3c1   :  { %3656 = vmax.xlane.f32.xlu1 %v3655_v59  ;;  %v16207_v9 = vpop.f32.mrf.mxu0 }
 0x3c3   :  { %v3750_v44 = vpop.f32.mrf.mxu0 }
 0x3c4   :  { %v3756_v45 = vmul.f32 0.088388346, %v3750_v44 }
 0x3c5   :  { %v16218_v47 = vpop.f32.mrf.mxu0 }
 0x3c6   :  { %v3757_v51 = vadd.f32 %v3756_v45, %v394_v10 }
 0x3c7   :  { %v3753_v52 = vpop.f32.mrf.mxu0 }
 0x3c8   :  { %v3758_v17 = vsel %vm3344_vm3, %v3757_v51, -inf }
 0x3c9   :  { %3759 = vmax.xlane.f32.xlu0 %v3758_v17  ;;  %v16219_v55 = vpop.f32.mrf.mxu0 }
 0x3cb   :  { %v3853_v27 = vpop.f32.mrf.mxu0 }
 0x3cc   :  { %v3859_v30 = vmul.f32 0.088388346, %v3853_v27 }
 0x3cd   :  { %v16230_v31 = vpop.f32.mrf.mxu0 }
 0x3ce   :  { %v3860_v57 = vadd.f32 %v3859_v30, %v394_v10 }
 0x3cf   :  { %v3856_v33 = vpop.f32.mrf.mxu0 }
 0x3d0   :  { %v3861_v36 = vsel %vm3344_vm3, %v3860_v57, -inf }
 0x3d1   :  { %3862 = vmax.xlane.f32.xlu1 %v3861_v36  ;;  %v16231_v2 = vpop.f32.mrf.mxu0 }
 0x3d3   :  { %v3956_v28 = vpop.f32.mrf.mxu0 }
 0x3d4   :  { %v3962_v11 = vmul.f32 0.088388346, %v3956_v28 }
 0x3d5   :  { %v16242_v12 = vpop.f32.mrf.mxu0 }
 0x3d6   :  { %v3963_v15 = vadd.f32 %v3962_v11, %v394_v10 }
 0x3d7   :  { %v3959_v16 = vpop.f32.mrf.mxu0 }
 0x3d8   :  { %v3964_v20 = vsel %vm3344_vm3, %v3963_v15, -inf }
 0x3d9   :  { %3965 = vmax.xlane.f32.xlu0 %v3964_v20  ;;  %v16243_v18 = vpop.f32.mrf.mxu0 }
 0x3db   :  { %v4059_v19 = vpop.f32.mrf.mxu0 }
 0x3dc   :  { %v4065_v21 = vmul.f32 0.088388346, %v4059_v19 }
 0x3dd   :  { %v16254_v23 = vpop.f32.mrf.mxu0 }
 0x3de   :  { %v4066_v22 = vadd.f32 %v4065_v21, %v394_v10 }
 0x3df   :  { %v4062_v53 = vpop.f32.mrf.mxu0 }
 0x3e0   :  { %v4067_v24 = vsel %vm3344_vm3, %v4066_v22, -inf }
 0x3e1   :  { %4068 = vmax.xlane.f32.xlu1 %v4067_v24  ;;  %v16255_v25 = vpop.f32.mrf.mxu0  ;;  %v822_v24 = vrot.slane %v18989_v48, %v18941_v8 }
 0x3e3   :  { %v3164_v25 = vadd.f32 %v18993_v56, %v822_v24 }
 0x402   :  { %v3347_v34 = vpop.xlane.xlu0 %3346 }
 0x403   :  { %v3348_v35 = vsub.f32 %v19022_v13, %v3347_v34 }
 0x405   :  { %v3349_v39 = vmul.f32 1.442695, %v3348_v35  ;;  %v3207_v35 = vadd.f32 %v18995_v60, %v3164_v25 }
 0x407   :  { %17979 = vpow2.f32 %v3349_v39 }
 0x40a   :  { %v3451_v40 = vpop.xlane.xlu0 %3450 }
 0x40b   :  { %v3452_v41 = vsub.f32 %v3448_v6, %v3451_v40  ;;  %v3406_v40 = vpack.c.bf16 %v3207_v35, %v3207_v35  ;;  %v16983_v35 = vld [vmem:[#allocation9 + $0xa4] ss:$16 sps:$4 sm:$0xff]  }
 0x40d   :  { %v3453_v42 = vmul.f32 1.442695, %v3452_v41  ;;  %v3248_v41 = vadd.f32 %v19003_v0, %v19007_v37 }
 0x40f   :  { %17981 = vpow2.f32 %v3453_v42 }
 0x414   :  { %v17980_v43 = vpop.eup %17979 }
 0x415   :  { %v3351_v58 = vsel %vm3344_vm3, %v17980_v43, 0.0 }
 0x416   :  { %3352 = vadd.xlane.f32.xlu0 %v3351_v58  ;;  %v3210_v58 = vpop.f32.mrf.mxu1 }
 0x41c   :  { %v19035_v59 = vpop.eup %17981 }
 0x41d   :  { %v3455_v10 = vsel %vm3344_vm3, %v19035_v59, 0.0 }
 0x41e   :  { %3456 = vadd.xlane.f32.xlu1 %v3455_v10 }
 0x442   :  { %v3554_v9 = vpop.xlane.xlu1 %3553 }
 0x443   :  { %v3555_v44 = vsub.f32 %v3551_v14, %v3554_v9  ;;  %v3290_v9 = vpop.f32.mrf.mxu1 }
 0x445   :  { %v3556_v45 = vmul.f32 1.442695, %v3555_v44  ;;  %v3465_v44 = vsel %vm3360_vm1, %v3406_v40, 0 }
 0x447   :  { %17983 = vpow2.f32 %v3556_v45  ;;  %v3291_v45 = vadd.f32 %v3290_v9, %v3248_v41  ;;  %v16986_v9 = vld [vmem:[#allocation9 + $0x84] ss:$16 sps:$4 sm:$0xff]  }
 0x449   :  { %v3509_v60 = vpack.c.bf16 %v3291_v45, %v3291_v45 }
 0x44a   :  { %v3657_v13 = vpop.xlane.xlu1 %3656 }
 0x44b   :  { %v3658_v47 = vsub.f32 %v3654_v46, %v3657_v13  ;;  %v3568_v37 = vsel %vm3360_vm1, %v3509_v60, 0 }
 0x44d   :  { %v3659_v52 = vmul.f32 1.442695, %v3658_v47  ;;  %v830_v47 = vrot.slane %v18989_v48, %v18895_v50 }
 0x44f   :  { %17985 = vpow2.f32 %v3659_v52  ;;  %v3250_v52 = vadd.f32 %v19009_v1, %v830_v47  ;;  %v3168_v1 = vadd.f32 %v19001_v63, %v822_v24 }
 0x452   :  { %v3760_v6 = vpop.xlane.xlu0 %3759 }
 0x453   :  { %v3761_v17 = vsub.f32 %v3757_v51, %v3760_v6 }
 0x454   :  { %v19039_v55 = vpop.eup %17983 }
 0x455   :  { %v3762_v27 = vmul.f32 1.442695, %v3761_v17  ;;  %v3558_v30 = vsel %vm3344_vm3, %v19039_v55, 0.0 }
 0x456   :  { %3559 = vadd.xlane.f32.xlu0 %v3558_v30 }
 0x457   :  { %17987 = vpow2.f32 %v3762_v27 }
 0x45a   :  { %v3863_v31 = vpop.xlane.xlu1 %3862 }
 0x45b   :  { %v3864_v33 = vsub.f32 %v3860_v57, %v3863_v31 }
 0x45c   :  { %v19043_v36 = vpop.eup %17985 }
 0x45d   :  { %v3865_v14 = vmul.f32 1.442695, %v3864_v33  ;;  %v3661_v46 = vsel %vm3344_vm3, %v19043_v36, 0.0 }
 0x45e   :  { %3662 = vadd.xlane.f32.xlu1 %v3661_v46 }
 0x45f   :  { %17989 = vpow2.f32 %v3865_v14 }
 0x462   :  { %v3966_v2 = vpop.xlane.xlu0 %3965 }
 0x463   :  { %v3967_v51 = vsub.f32 %v3963_v15, %v3966_v2  ;;  %v3715_v2 = vpack.c.bf16 %v18998_v61, %v18998_v61 }
 0x464   :  { %v19047_v28 = vpop.eup %17987 }
 0x465   :  { %v3968_v11 = vmul.f32 1.442695, %v3967_v51  ;;  %v3764_v12 = vsel %vm3344_vm3, %v19047_v28, 0.0 }
 0x466   :  { %3765 = vadd.xlane.f32.xlu0 %v3764_v12  ;;  %v3774_v12 = vsel %vm3360_vm1, %v3715_v2, 0  ;;  %v17013_v2 = vld [vmem:[#allocation9 + $0x1e4] ss:$16 sps:$4 sm:$0xff]  }
 0x467   :  { %17991 = vpow2.f32 %v3968_v11 }
 0x46a   :  { %v4069_v16 = vpop.xlane.xlu1 %4068 }
 0x46b   :  { %v4070_v57 = vsub.f32 %v4066_v22, %v4069_v16  ;;  %v3211_v16 = vadd.f32 %v3210_v58, %v3168_v1  ;;  %v17005_v1 = vld [vmem:[#allocation9] ss:$16 sps:$4 sm:$0xff]  }
 0x46c   :  { %v19051_v20 = vpop.eup %17989 }
 0x46d   :  { %v4071_v18 = vmul.f32 1.442695, %v4070_v57  ;;  %v3867_v19 = vsel %vm3344_vm3, %v19051_v20, 0.0  ;;  %v3818_v57 = vpack.c.bf16 %v3211_v16, %v3211_v16  ;;  %v17016_v16 = vld [vmem:[#allocation9 + $0x264] ss:$16 sps:$4 sm:$0xff]  }
 0x46e   :  { %3868 = vadd.xlane.f32.xlu1 %v3867_v19  ;;  %v16975_v19 = vld [vmem:[#allocation9 + $0xe0] ss:$16 sps:$4 sm:$0xff]  }
 0x46f   :  { %17993 = vpow2.f32 %v4071_v18  ;;  %v3877_v25 = vsel %vm3360_vm1, %v3818_v57, 0  ;;  %v17014_v57 = vld [vmem:[#allocation9 + $0x260] ss:$16 sps:$4 sm:$0xff]  }
 0x474   :  { %v19055_v21 = vpop.eup %17991 }
 0x475   :  { %v3970_v15 = vsel %vm3344_vm3, %v19055_v21, 0.0 }
 0x476   :  { %3971 = vadd.xlane.f32.xlu0 %v3970_v15  ;;  %v16977_v15 = vld [vmem:[#allocation9 + $0xe4] ss:$16 sps:$4 sm:$0xff]  }
 0x477   :  { %4919 = vmatprep.subr.bf16.mxu0 %v16977_v15  ;;  %v17026_v15 = vld [vmem:[#allocation9 + $0x220] ss:$16 sps:$4 sm:$0xff]  }
 0x478   :  { %4920 = vmatpush1.bf16.msra.mxu0 %v16975_v19  ;;  %v17025_v19 = vld [vmem:[#allocation9 + $0x1a4] ss:$16 sps:$4 sm:$0xff]  }
 0x47c   :  { %v19059_v23 = vpop.eup %17993 }
 0x47d   :  { %v4073_v53 = vsel %vm3344_vm3, %v19059_v23, 0.0 }
 0x47e   :  { %4074 = vadd.xlane.f32.xlu1 %v4073_v53 }
 0x49f   :  { %v3353_v22 = vpop.xlane.xlu0 %3352 }
 0x4a0   :  { %17995 = vrcp.f32 %v3353_v22  ;;  %v16980_v22 = vld [vmem:[#allocation9 + $0xc4] ss:$16 sps:$4 sm:$0xff]  }
 0x4a1   :  { %4921 = vmatprep.subr.bf16.mxu0 %v16980_v22  ;;  %v17029_v22 = vld [vmem:[#allocation9 + $0x180] ss:$16 sps:$4 sm:$0xff]  }
 0x4a7   :  { %v3457_v34 = vpop.xlane.xlu1 %3456 }
 0x4a8   :  { %17997 = vrcp.f32 %v3457_v34 }
 0x4ad   :  { %v17996_v39 = vpop.eup %17995 }
 0x4ae   :  { %v3355_v42 = vmul.f32 %v17996_v39, %v17980_v43  ;;  %v3254_v39 = vadd.f32 %v19017_v5, %v830_v47  ;;  %v16984_v5 = vld [vmem:[#allocation9 + $0x80] ss:$16 sps:$4 sm:$0xff]   ;;  %v16995_v47 = vld [vmem:[#allocation9 + $0x44] ss:$16 sps:$4 sm:$0xff]  }
 0x4b0   :  { %v3356_v10 = vpack.c.bf16 %v3355_v42, %v3355_v42 }
 0x4b2   :  { %16175 = vmatmul.mubr.msk.bf16.vlgmr.msra.gmra.mxu1 %vm3344_vm3, %v3356_v10  ;;  %v16981_v10 = vld [vmem:[#allocation9 + $0xa0] ss:$16 sps:$4 sm:$0xff]  }
 0x4b3   :  { %16185 = vmatpush3.bf16.msra.mxu1 %v3465_v44  ;;  %16186 = vmatprep.mubr.msk.bf16.mxu1 %vm18598_vm0, %v18597_v32 }
 0x4b4   :  { %16196 = vmatprep.subr.bf16.mxu1 %v18597_v32 }
 0x4b5   :  { %v17998_v56 = vpop.eup %17997 }
 0x4b6   :  { %v3459_v13 = vmul.f32 %v17998_v56, %v19035_v59  ;;  %v3292_v59 = vpop.f32.mrf.mxu1  ;;  %v16989_v56 = vld [vmem:[#allocation9 + $0x64] ss:$16 sps:$4 sm:$0xff]  }
 0x4b7   :  { %v3293_v17 = vadd.f32 %v3292_v59, %v3250_v52 }
 0x4b8   :  { %v3460_v0 = vpack.c.bf16 %v3459_v13, %v3459_v13  ;;  %v3294_v53 = vpop.f32.mrf.mxu1 }
 0x4b9   :  { %v3612_v30 = vpack.c.bf16 %v3293_v17, %v3293_v17  ;;  %v3295_v24 = vadd.f32 %v3294_v53, %v19012_v3  ;;  %v17028_v53 = vld [vmem:[#allocation9 + $0x224] ss:$16 sps:$4 sm:$0xff]  }
 0x4ba   :  { %16187 = vmatmul.mubr.msk.bf16.vlgmr.msra.gmra.mxu1 %vm3344_vm3, %v3460_v0  ;;  %v3296_v41 = vpop.f32.mrf.mxu1 }
 0x4bb   :  { %16197 = vmatpush3.bf16.msra.mxu1 %v3568_v37  ;;  %16198 = vmatprep.mubr.msk.bf16.mxu1 %vm18598_vm0, %v18597_v32  ;;  %v3671_v46 = vsel %vm3360_vm1, %v3612_v30, 0  ;;  %v3921_v40 = vpack.c.bf16 %v3295_v24, %v3295_v24  ;;  %v3297_v45 = vadd.f32 %v3296_v41, %v3254_v39  ;;  %v16987_v37 = vld [vmem:[#allocation9 + $0x60] ss:$16 sps:$4 sm:$0xff]   ;;  %v17031_v24 = vld [vmem:[#allocation9 + $0x184] ss:$16 sps:$4 sm:$0xff]  }
 0x4bc   :  { %16208 = vmatprep.subr.bf16.mxu1 %v18597_v32  ;;  %v17038_v39 = vld [vmem:[#allocation9 + $0x3e0] ss:$16 sps:$4 sm:$0xff]   ;;  %v17043_v41 = vld [vmem:[#allocation9 + $0x144] ss:$16 sps:$4 sm:$0xff]  }
 0x4bd   :  { %v3980_v44 = vsel %vm3360_vm1, %v3921_v40, 0  ;;  %v4024_v60 = vpack.c.bf16 %v3297_v45, %v3297_v45  ;;  %v17040_v40 = vld [vmem:[#allocation9 + $0x3e4] ss:$16 sps:$4 sm:$0xff]  }
 0x4be   :  { %v17052_v45 = vld [vmem:[#allocation9 + $0x3a4] ss:$16 sps:$4 sm:$0xff]  }
 0x4bf   :  { %v4083_v52 = vsel %vm3360_vm1, %v4024_v60, 0  ;;  %v17058_v60 = vld [vmem:[#allocation9 + $0x384] ss:$16 sps:$4 sm:$0xff]  }
 0x4df   :  { %v3560_v43 = vpop.xlane.xlu0 %3559 }
 0x4e0   :  { %17999 = vrcp.f32 %v3560_v43  ;;  %v16992_v43 = vld [vmem:[#allocation9 + $0x2e4] ss:$16 sps:$4 sm:$0xff]  }
 0x4e7   :  { %v3663_v6 = vpop.xlane.xlu1 %3662 }
 0x4e8   :  { %18001 = vrcp.f32 %v3663_v6  ;;  %v16993_v6 = vld [vmem:[#allocation9 + $0x40] ss:$16 sps:$4 sm:$0xff]  }
 0x4ed   :  { %v18000_v27 = vpop.eup %17999 }
 0x4ee   :  { %v3562_v31 = vmul.f32 %v18000_v27, %v19039_v55  ;;  %v16990_v27 = vld [vmem:[#allocation9 + $0x2e0] ss:$16 sps:$4 sm:$0xff]  }
 0x4ef   :  { %v3766_v33 = vpop.xlane.xlu0 %3765 }
 0x4f0   :  { %18003 = vrcp.f32 %v3766_v33  ;;  %v3563_v14 = vpack.c.bf16 %v3562_v31, %v3562_v31  ;;  %v16998_v31 = vld [vmem:[#allocation9 + $0x2c4] ss:$16 sps:$4 sm:$0xff]   ;;  %v16999_v33 = vld [vmem:[#allocation9 + $0x20] ss:$16 sps:$4 sm:$0xff]  }
 0x4f2   :  { %16199 = vmatmul.mubr.msk.bf16.vlgmr.msra.gmra.mxu1 %vm3344_vm3, %v3563_v14  ;;  %v17007_v14 = vld [vmem:[#allocation9 + $0x4] ss:$16 sps:$4 sm:$0xff]  }
 0x4f3   :  { %16209 = vmatpush3.bf16.msra.mxu1 %v3671_v46  ;;  %16210 = vmatprep.mubr.msk.bf16.mxu1 %vm18598_vm0, %v18597_v32  ;;  %v16996_v46 = vld [vmem:[#allocation9 + $0x2c0] ss:$16 sps:$4 sm:$0xff]  }
 0x4f4   :  { %16220 = vmatprep.subr.bf16.mxu1 %v18597_v32 }
 0x4f5   :  { %v18002_v48 = vpop.eup %18001 }
 0x4f6   :  { %v3665_v55 = vmul.f32 %v18002_v48, %v19043_v36  ;;  %v17004_v48 = vld [vmem:[#allocation9 + $0x2a4] ss:$16 sps:$4 sm:$0xff]  }
 0x4f7   :  { %v3869_v51 = vpop.xlane.xlu1 %3868 }
 0x4f8   :  { %18005 = vrcp.f32 %v3869_v51  ;;  %v3666_v11 = vpack.c.bf16 %v3665_v55, %v3665_v55  ;;  %v17002_v55 = vld [vmem:[#allocation9 + $0x2a0] ss:$16 sps:$4 sm:$0xff]  }
 0x4f9   :  { %v17011_v51 = vld [vmem:[#allocation9 + $0x1e0] ss:$16 sps:$4 sm:$0xff]  }
 0x4fa   :  { %16211 = vmatmul.mubr.msk.bf16.vlgmr.msra.gmra.mxu1 %vm3344_vm3, %v3666_v11  ;;  %v17019_v11 = vld [vmem:[#allocation9 + $0x1c4] ss:$16 sps:$4 sm:$0xff]  }
 0x4fb   :  { %16221 = vmatpush3.bf16.msra.mxu1 %v3774_v12  ;;  %16222 = vmatprep.mubr.msk.bf16.mxu1 %vm18598_vm0, %v18597_v32  ;;  %v17008_v12 = vld [vmem:[#allocation9 + $0x280] ss:$16 sps:$4 sm:$0xff]  }
 0x4fc   :  { %16232 = vmatprep.subr.bf16.mxu1 %v18597_v32 }
 0x4fd   :  { %v18004_v63 = vpop.eup %18003 }
 0x4fe   :  { %v3768_v61 = vmul.f32 %v18004_v63, %v19047_v28  ;;  %v16978_v28 = vld [vmem:[#allocation9 + $0xc0] ss:$16 sps:$4 sm:$0xff]  }
 0x4ff   :  { %v3972_v18 = vpop.xlane.xlu0 %3971  ;;  %4922 = vmatpush1.bf16.msra.mxu0 %v16978_v28  ;;  %v17017_v63 = vld [vmem:[#allocation9 + $0x1c0] ss:$16 sps:$4 sm:$0xff]   ;;  %v17034_v28 = vld [vmem:[#allocation9 + $0x204] ss:$16 sps:$4 sm:$0xff]  }
 0x500   :  { %18007 = vrcp.f32 %v3972_v18  ;;  %v3769_v36 = vpack.c.bf16 %v3768_v61, %v3768_v61  ;;  %4923 = vmatprep.subr.bf16.mxu0 %v16983_v35  ;;  %v17022_v61 = vld [vmem:[#allocation9 + $0x244] ss:$16 sps:$4 sm:$0xff]   ;;  %v17020_v18 = vld [vmem:[#allocation9 + $0x240] ss:$16 sps:$4 sm:$0xff]  }
 0x501   :  { %v17037_v35 = vld [vmem:[#allocation9 + $0x164] ss:$16 sps:$4 sm:$0xff]  }
 0x502   :  { %16223 = vmatmul.mubr.msk.bf16.vlgmr.msra.gmra.mxu1 %vm3344_vm3, %v3769_v36  ;;  %v17023_v36 = vld [vmem:[#allocation9 + $0x1a0] ss:$16 sps:$4 sm:$0xff]  }
 0x503   :  { %16233 = vmatpush3.bf16.msra.mxu1 %v3877_v25  ;;  %16234 = vmatprep.mubr.msk.bf16.mxu1 %vm18598_vm0, %v18597_v32  ;;  %v17032_v25 = vld [vmem:[#allocation9 + $0x200] ss:$16 sps:$4 sm:$0xff]  }
 0x504   :  { %16244 = vmatprep.subr.bf16.mxu1 %v18597_v32  ;;  %4924 = vmatpush1.bf16.msra.mxu0 %v16981_v10  ;;  %v17047_v10 = vld [vmem:[#allocation9 + $0x120] ss:$16 sps:$4 sm:$0xff]  }
 0x505   :  { %v18006_v34 = vpop.eup %18005  ;;  %4925 = vmatprep.subr.bf16.mxu0 %v16986_v9  ;;  %v17049_v9 = vld [vmem:[#allocation9 + $0x124] ss:$16 sps:$4 sm:$0xff]  }
 0x506   :  { %v3871_v3 = vmul.f32 %v18006_v34, %v19051_v20  ;;  %v17035_v34 = vld [vmem:[#allocation9 + $0x160] ss:$16 sps:$4 sm:$0xff]  }
 0x507   :  { %v4075_v42 = vpop.xlane.xlu1 %4074 }
 0x508   :  { %18009 = vrcp.f32 %v4075_v42  ;;  %v3872_v58 = vpack.c.bf16 %v3871_v3, %v3871_v3  ;;  %4926 = vmatpush1.bf16.msra.mxu0 %v16984_v5  ;;  %v17041_v3 = vld [vmem:[#allocation9 + $0x140] ss:$16 sps:$4 sm:$0xff]  }
 0x509   :  { %4927 = vmatprep.subr.bf16.mxu0 %v16989_v56  ;;  %v17044_v42 = vld [vmem:[#allocation9 + $0x3c0] ss:$16 sps:$4 sm:$0xff]  }
 0x50a   :  { %16235 = vmatmul.mubr.msk.bf16.vlgmr.msra.gmra.mxu1 %vm3344_vm3, %v3872_v58  ;;  %v17046_v58 = vld [vmem:[#allocation9 + $0x3c4] ss:$16 sps:$4 sm:$0xff]   ;;  %v17053_v5 = vld [vmem:[#allocation9 + $0x100] ss:$16 sps:$4 sm:$0xff]  }
 0x50b   :  { %16245 = vmatpush3.bf16.msra.mxu1 %v3980_v44  ;;  %16246 = vmatprep.mubr.msk.bf16.mxu1 %vm18598_vm0, %v18597_v32  ;;  %v17050_v44 = vld [vmem:[#allocation9 + $0x3a0] ss:$16 sps:$4 sm:$0xff]  }
 0x50c   :  { %16256 = vmatprep.subr.bf16.mxu1 %v18597_v32  ;;  %4928 = vmatpush1.bf16.msra.mxu0 %v16987_v37  ;;  %v17056_v56 = vld [vmem:[#allocation9 + $0x380] ss:$16 sps:$4 sm:$0xff]  }
 0x50d   :  { %v18008_v20 = vpop.eup %18007  ;;  %4929 = vmatprep.subr.bf16.mxu0 %v16995_v47  ;;  %v17059_v37 = vld [vmem:[#allocation9 + $0x360] ss:$16 sps:$4 sm:$0xff]   ;;  %v17067_v47 = vld [vmem:[#allocation9 + $0x344] ss:$16 sps:$4 sm:$0xff]  }
 0x50e   :  { %v3974_v13 = vmul.f32 %v18008_v20, %v19055_v21  ;;  %v17001_v21 = vld [vmem:[#allocation9 + $0x24] ss:$16 sps:$4 sm:$0xff]  }
 0x50f   :  { %v17055_v20 = vld [vmem:[#allocation9 + $0x104] ss:$16 sps:$4 sm:$0xff]  }
 0x510   :  { %v3975_v0 = vpack.c.bf16 %v3974_v13, %v3974_v13  ;;  %4930 = vmatpush1.bf16.msra.mxu0 %v16993_v6  ;;  %v17061_v13 = vld [vmem:[#allocation9 + $0x364] ss:$16 sps:$4 sm:$0xff]  }
 0x511   :  { %4931 = vmatprep.subr.bf16.mxu0 %v17001_v21  ;;  %v17073_v6 = vld [vmem:[#allocation9 + $0x324] ss:$16 sps:$4 sm:$0xff]  }
 0x512   :  { %16247 = vmatmul.mubr.msk.bf16.vlgmr.msra.gmra.mxu1 %vm3344_vm3, %v3975_v0  ;;  %v17064_v0 = vld [vmem:[#allocation9 + $0xec] ss:$16 sps:$4 sm:$0xff]   ;;  %v17079_v21 = vld [vmem:[#allocation9 + $0x304] ss:$16 sps:$4 sm:$0xff]  }
 0x513   :  { %16257 = vmatpush3.bf16.msra.mxu1 %v4083_v52  ;;  %16258 = vmatprep.mubr.msk.bf16.mxu1 %vm18598_vm0, %v18597_v32  ;;  %v17071_v52 = vld [vmem:[#allocation9 + $0x320] ss:$16 sps:$4 sm:$0xff]  }
 0x514   :  { %4962 = vmatprep.subr.bf16.mxu1 %v16992_v43  ;;  %4932 = vmatpush1.bf16.msra.mxu0 %v16999_v33  ;;  %v17065_v43 = vld [vmem:[#allocation9 + $0x340] ss:$16 sps:$4 sm:$0xff]  }
 0x515   :  { %v18010_v59 = vpop.eup %18009  ;;  %4933 = vmatprep.subr.bf16.mxu0 %v17007_v14 }
 0x516   :  { %v4077_v17 = vmul.f32 %v18010_v59, %v19059_v23  ;;  %v17010_v23 = vld [vmem:[#allocation9 + $0x284] ss:$16 sps:$4 sm:$0xff]   ;;  %v17077_v59 = vld [vmem:[#allocation9 + $0x300] ss:$16 sps:$4 sm:$0xff]  }
 0x518   :  { %v4078_v30 = vpack.c.bf16 %v4077_v17, %v4077_v17  ;;  %4934 = vmatpush1.bf16.msra.mxu0 %v17005_v1  ;;  %v17088_v17 = vld [vmem:[#allocation9 + $0x2ec] ss:$16 sps:$4 sm:$0xff]  }
 0x519   :  { %4935 = vmatprep.subr.bf16.mxu0 %v17013_v2 }
 0x51a   :  { %16259 = vmatmul.mubr.msk.bf16.vlgmr.msra.gmra.mxu1 %vm3344_vm3, %v4078_v30 }
 0x51b   :  { %4963 = vmatpush1.bf16.msra.mxu1 %v16990_v27 }
 0x51c   :  { %4964 = vmatprep.subr.bf16.mxu1 %v16998_v31  ;;  %4936 = vmatpush2.bf16.msra.mxu0 %v17011_v51 }
 0x51d   :  { %4937 = vmatprep.subr.bf16.mxu0 %v17019_v11 }
 0x51f   :  { %4965 = vmatpush1.bf16.msra.mxu1 %v16996_v46 }
 0x520   :  { %4966 = vmatprep.subr.bf16.mxu1 %v17004_v48  ;;  %4938 = vmatpush2.bf16.msra.mxu0 %v17017_v63 }
 0x521   :  { %4939 = vmatprep.subr.bf16.mxu0 %v17025_v19 }
 0x523   :  { %4967 = vmatpush1.bf16.msra.mxu1 %v17002_v55 }
 0x524   :  { %4968 = vmatprep.subr.bf16.mxu1 %v17010_v23  ;;  %4940 = vmatpush2.bf16.msra.mxu0 %v17023_v36 }
 0x525   :  { %4941 = vmatprep.subr.bf16.mxu0 %v17031_v24 }
 0x527   :  { %4969 = vmatpush1.bf16.msra.mxu1 %v17008_v12 }
 0x528   :  { %4970 = vmatprep.subr.bf16.mxu1 %v17016_v16  ;;  %4942 = vmatpush2.bf16.msra.mxu0 %v17029_v22 }
 0x529   :  { %4943 = vmatprep.subr.bf16.mxu0 %v17037_v35 }
 0x52b   :  { %4971 = vmatpush1.bf16.msra.mxu1 %v17014_v57 }
 0x52c   :  { %4972 = vmatprep.subr.bf16.mxu1 %v17022_v61  ;;  %4944 = vmatpush2.bf16.msra.mxu0 %v17035_v34  ;;  %v17068_v34 = vld [vmem:[#allocation9 + $0xc8] ss:$16 sps:$4 sm:$0xff]  }
 0x52d   :  { %4945 = vmatprep.subr.bf16.mxu0 %v17043_v41 }
 0x52f   :  { %4973 = vmatpush1.bf16.msra.mxu1 %v17020_v18 }
 0x530   :  { %4974 = vmatprep.subr.bf16.mxu1 %v17028_v53  ;;  %4946 = vmatpush2.bf16.msra.mxu0 %v17041_v3  ;;  %v17062_v53 = vld [vmem:[#allocation9 + $0xe8] ss:$16 sps:$4 sm:$0xff]  }
 0x531   :  { %4947 = vmatprep.subr.bf16.mxu0 %v17049_v9  ;;  %v17074_v3 = vld [vmem:[#allocation9 + $0xa8] ss:$16 sps:$4 sm:$0xff]  }
 0x533   :  { %4975 = vmatpush1.bf16.msra.mxu1 %v17026_v15 }
 0x534   :  { %4976 = vmatprep.subr.bf16.mxu1 %v17034_v28  ;;  %4948 = vmatpush2.bf16.msra.mxu0 %v17047_v10  ;;  %v17080_v10 = vld [vmem:[#allocation9 + $0x88] ss:$16 sps:$4 sm:$0xff]  }
 0x535   :  { %4949 = vmatprep.subr.bf16.mxu0 %v17055_v20  ;;  %v17083_v20 = vld [vmem:[#allocation9 + $0x68] ss:$16 sps:$4 sm:$0xff]  }
 0x537   :  { %4977 = vmatpush1.bf16.msra.mxu1 %v17032_v25  ;;  %v17070_v25 = vld [vmem:[#allocation9 + $0xcc] ss:$16 sps:$4 sm:$0xff]  }
 0x538   :  { %4978 = vmatprep.subr.bf16.mxu1 %v17040_v40  ;;  %4950 = vmatpush2.bf16.msra.mxu0 %v17053_v5 }
 0x539   :  { %5005 = vmatprep.subr.bf16.mxu0 %v17064_v0  ;;  %v17091_v0 = vld [vmem:[#allocation9 + $0x4c] ss:$16 sps:$4 sm:$0xff]  }
 0x53b   :  { %4979 = vmatpush2.bf16.msra.mxu1 %v17038_v39  ;;  %v17076_v39 = vld [vmem:[#allocation9 + $0xac] ss:$16 sps:$4 sm:$0xff]  }
 0x53c   :  { %4980 = vmatprep.subr.bf16.mxu1 %v17046_v58 }
 0x53f   :  { %4981 = vmatpush2.bf16.msra.mxu1 %v17044_v42  ;;  %v17082_v42 = vld [vmem:[#allocation9 + $0x8c] ss:$16 sps:$4 sm:$0xff]  }
 0x540   :  { %4982 = vmatprep.subr.bf16.mxu1 %v17052_v45 }
 0x543   :  { %4983 = vmatpush2.bf16.msra.mxu1 %v17050_v44  ;;  %v17085_v44 = vld [vmem:[#allocation9 + $0x6c] ss:$16 sps:$4 sm:$0xff]  }
 0x544   :  { %4984 = vmatprep.subr.bf16.mxu1 %v17058_v60 }
 0x547   :  { %4985 = vmatpush2.bf16.msra.mxu1 %v17056_v56  ;;  %v17086_v56 = vld [vmem:[#allocation9 + $0x2e8] ss:$16 sps:$4 sm:$0xff]  }
 0x548   :  { %4986 = vmatprep.subr.bf16.mxu1 %v17061_v13 }
 0x54b   :  { %4987 = vmatpush2.bf16.msra.mxu1 %v17059_v37  ;;  %v17094_v37 = vld [vmem:[#allocation9 + $0x2cc] ss:$16 sps:$4 sm:$0xff]  }
 0x54c   :  { %4988 = vmatprep.subr.bf16.mxu1 %v17067_v47  ;;  %v17089_v47 = vld [vmem:[#allocation9 + $0x48] ss:$16 sps:$4 sm:$0xff]  }
 0x54f   :  { %4989 = vmatpush2.bf16.msra.mxu1 %v17065_v43 }
 0x550   :  { %4990 = vmatprep.subr.bf16.mxu1 %v17073_v6 }
 0x553   :  { %4991 = vmatpush2.bf16.msra.mxu1 %v17071_v52  ;;  %v17092_v52 = vld [vmem:[#allocation9 + $0x2c8] ss:$16 sps:$4 sm:$0xff]  }
 0x554   :  { %4992 = vmatprep.subr.bf16.mxu1 %v17079_v21  ;;  %v17100_v21 = vld [vmem:[#allocation9 + $0x2ac] ss:$16 sps:$4 sm:$0xff]  }
 0x557   :  { %4993 = vmatpush2.bf16.msra.mxu1 %v17077_v59  ;;  %v17097_v59 = vld [vmem:[#allocation9 + $0x2c] ss:$16 sps:$4 sm:$0xff]  }
 0x558   :  { %5048 = vmatprep.subr.bf16.mxu1 %v17088_v17  ;;  %v17095_v17 = vld [vmem:[#allocation9 + $0x28] ss:$16 sps:$4 sm:$0xff]  }
 0x572   :  { %v3398_v27 = vpop.f32.mrf.mxu1 }
 0x574   :  { %v16176_v30 = vpop.f32.mrf.mxu1 }
 0x575   :  { %v17103_v30 = vld [vmem:[#allocation9 + $0xc] ss:$16 sps:$4 sm:$0xff]  }
 0x576   :  { %v3401_v31 = vpop.f32.mrf.mxu1 }
 0x577   :  { %v17106_v31 = vld [vmem:[#allocation9 + $0x28c] ss:$16 sps:$4 sm:$0xff]  }
 0x578   :  { %v16177_v33 = vpop.f32.mrf.mxu1 }
 0x579   :  { %v17101_v33 = vld [vmem:[#allocation9 + $0x8] ss:$16 sps:$4 sm:$0xff]  }
 0x57a   :  { %v3501_v14 = vpop.f32.mrf.mxu1 }
 0x57c   :  { %v16188_v46 = vpop.f32.mrf.mxu1 }
 0x57d   :  { %v17109_v46 = vld [vmem:[#allocation9 + $0x1ec] ss:$16 sps:$4 sm:$0xff]  }
 0x57e   :  { %v3504_v48 = vpop.f32.mrf.mxu1 }
 0x57f   :  { %v17112_v48 = vld [vmem:[#allocation9 + $0x26c] ss:$16 sps:$4 sm:$0xff]  }
 0x580   :  { %v16189_v1 = vpop.f32.mrf.mxu1 }
 0x581   :  { %v17107_v1 = vld [vmem:[#allocation9 + $0x1e8] ss:$16 sps:$4 sm:$0xff]  }
 0x5b2   :  { %v3604_v2 = vpop.f32.mrf.mxu1 }
 0x5b4   :  { %v16200_v55 = vpop.f32.mrf.mxu1 }
 0x5b5   :  { %v17115_v55 = vld [vmem:[#allocation9 + $0x1cc] ss:$16 sps:$4 sm:$0xff]  }
 0x5b6   :  { %v3607_v23 = vpop.f32.mrf.mxu1 }
 0x5b7   :  { %v17118_v23 = vld [vmem:[#allocation9 + $0x24c] ss:$16 sps:$4 sm:$0xff]  }
 0x5b8   :  { %v16201_v51 = vpop.f32.mrf.mxu1 }
 0x5b9   :  { %v17113_v51 = vld [vmem:[#allocation9 + $0x1c8] ss:$16 sps:$4 sm:$0xff]  }
 0x5ba   :  { %v3707_v11 = vpop.f32.mrf.mxu1 }
 0x5bc   :  { %v16212_v12 = vpop.f32.mrf.mxu1 }
 0x5bd   :  { %v17121_v12 = vld [vmem:[#allocation9 + $0x1ac] ss:$16 sps:$4 sm:$0xff]  }
 0x5be   :  { %v3710_v16 = vpop.f32.mrf.mxu1 }
 0x5bf   :  { %v17124_v16 = vld [vmem:[#allocation9 + $0x22c] ss:$16 sps:$4 sm:$0xff]  }
 0x5c0   :  { %v16213_v63 = vpop.f32.mrf.mxu1 }
 0x5c1   :  { %v17119_v63 = vld [vmem:[#allocation9 + $0x1a8] ss:$16 sps:$4 sm:$0xff]  }
 0x5c2   :  { %v3810_v57 = vpop.f32.mrf.mxu1 }
 0x5c3   :  { %v19119_v22 = vpack.c.bf16 %v3810_v57, %v3398_v27  ;;  %v17098_v27 = vld [vmem:[#allocation9 + $0x2a8] ss:$16 sps:$4 sm:$0xff]  }
 0x5c4   :  { %v16224_v61 = vpop.f32.mrf.mxu1  ;;  %v17122_v57 = vld [vmem:[#allocation9 + $0x228] ss:$16 sps:$4 sm:$0xff]  }
 0x5c5   :  { %v17127_v61 = vld [vmem:[#allocation9 + $0x18c] ss:$16 sps:$4 sm:$0xff]  }
 0x5c6   :  { %v3813_v18 = vpop.f32.mrf.mxu1 }
 0x5c7   :  { %v17130_v18 = vld [vmem:[#allocation9 + $0x20c] ss:$16 sps:$4 sm:$0xff]  }
 0x5c8   :  { %v16225_v36 = vpop.f32.mrf.mxu1 }
 0x5c9   :  { %v17125_v36 = vld [vmem:[#allocation9 + $0x188] ss:$16 sps:$4 sm:$0xff]  }
 0x5ca   :  { %v3913_v19 = vpop.f32.mrf.mxu1 }
 0x5cb   :  { %v4126_v15 = vpack.c.bf16 %v3913_v19, %v3501_v14  ;;  %v17104_v14 = vld [vmem:[#allocation9 + $0x288] ss:$16 sps:$4 sm:$0xff]  }
 0x5cc   :  { %v16236_v24 = vpop.f32.mrf.mxu1  ;;  %v17128_v19 = vld [vmem:[#allocation9 + $0x208] ss:$16 sps:$4 sm:$0xff]  }
 0x5cd   :  { %4951 = vmatprep.mubr.bf16.mxu0 %v4126_v15  ;;  %v17131_v24 = vld [vmem:[#allocation9 + $0x168] ss:$16 sps:$4 sm:$0xff]  }
 0x5ce   :  { %v3916_v28 = vpop.f32.mrf.mxu1  ;;  %4952 = vmatmul.mubr.bf16.vlgmr.msra.gmra.mxu0 %v19119_v22 }
 0x5cf   :  { %5006 = vmatpush1.bf16.msra.mxu0 %v17062_v53  ;;  %5037 = vmatprep.mubr.bf16.mxu0 %v4126_v15  ;;  %v17133_v15 = vld [vmem:[#allocation9 + $0x16c] ss:$16 sps:$4 sm:$0xff]  }
 0x5d0   :  { %v16237_v35 = vpop.f32.mrf.mxu1  ;;  %5007 = vmatprep.subr.bf16.mxu0 %v17070_v25  ;;  %v17136_v53 = vld [vmem:[#allocation9 + $0x3ec] ss:$16 sps:$4 sm:$0xff]   ;;  %v17134_v25 = vld [vmem:[#allocation9 + $0x3e8] ss:$16 sps:$4 sm:$0xff]  }
 0x5d1   :  { %v17139_v28 = vld [vmem:[#allocation9 + $0x14c] ss:$16 sps:$4 sm:$0xff]   ;;  %v17137_v35 = vld [vmem:[#allocation9 + $0x148] ss:$16 sps:$4 sm:$0xff]  }
 0x5d2   :  { %v4016_v40 = vpop.f32.mrf.mxu1 }
 0x5d3   :  { %5008 = vmatpush1.bf16.msra.mxu0 %v17068_v34  ;;  %v19122_v60 = vpack.c.bf16 %v4016_v40, %v3604_v2  ;;  %v17110_v2 = vld [vmem:[#allocation9 + $0x268] ss:$16 sps:$4 sm:$0xff]   ;;  %v17142_v34 = vld [vmem:[#allocation9 + $0x3cc] ss:$16 sps:$4 sm:$0xff]  }
 0x5d4   :  { %v16248_v41 = vpop.f32.mrf.mxu1  ;;  %5009 = vmatprep.subr.bf16.mxu0 %v17076_v39  ;;  %v17140_v39 = vld [vmem:[#allocation9 + $0x3c8] ss:$16 sps:$4 sm:$0xff]   ;;  %v17145_v40 = vld [vmem:[#allocation9 + $0x12c] ss:$16 sps:$4 sm:$0xff]  }
 0x5d5   :  { %v17143_v41 = vld [vmem:[#allocation9 + $0x128] ss:$16 sps:$4 sm:$0xff]  }
 0x5d6   :  { %v4019_v58 = vpop.f32.mrf.mxu1 }
 0x5d7   :  { %5010 = vmatpush1.bf16.msra.mxu0 %v17074_v3  ;;  %v17148_v3 = vld [vmem:[#allocation9 + $0x3ac] ss:$16 sps:$4 sm:$0xff]  }
 0x5d8   :  { %v16249_v9 = vpop.f32.mrf.mxu1  ;;  %5011 = vmatprep.subr.bf16.mxu0 %v17082_v42  ;;  %v17146_v42 = vld [vmem:[#allocation9 + $0x3a8] ss:$16 sps:$4 sm:$0xff]   ;;  %v17151_v58 = vld [vmem:[#allocation9 + $0x10c] ss:$16 sps:$4 sm:$0xff]  }
 0x5d9   :  { %v17149_v9 = vld [vmem:[#allocation9 + $0x108] ss:$16 sps:$4 sm:$0xff]  }
 0x5da   :  { %v4119_v45 = vpop.f32.mrf.mxu1 }
 0x5db   :  { %v4128_v5 = vpack.c.bf16 %v4119_v45, %v3707_v11  ;;  %5012 = vmatpush1.bf16.msra.mxu0 %v17080_v10  ;;  %v17116_v11 = vld [vmem:[#allocation9 + $0x248] ss:$16 sps:$4 sm:$0xff]   ;;  %v17154_v10 = vld [vmem:[#allocation9 + $0x38c] ss:$16 sps:$4 sm:$0xff]  }
 0x5dc   :  { %v16260_v13 = vpop.f32.mrf.mxu1  ;;  %5013 = vmatprep.subr.bf16.mxu0 %v17085_v44  ;;  %v17152_v44 = vld [vmem:[#allocation9 + $0x388] ss:$16 sps:$4 sm:$0xff]   ;;  %v17157_v45 = vld [vmem:[#allocation9 + $0x36c] ss:$16 sps:$4 sm:$0xff]  }
 0x5dd   :  { %4994 = vmatprep.mubr.bf16.mxu1 %v4128_v5  ;;  %v17163_v13 = vld [vmem:[#allocation9 + $0x32c] ss:$16 sps:$4 sm:$0xff]  }
 0x5de   :  { %v4122_v43 = vpop.f32.mrf.mxu1  ;;  %4995 = vmatmul.mubr.bf16.vlgmr.msra.gmra.mxu1 %v19122_v60 }
 0x5df   :  { %5014 = vmatpush1.bf16.msra.mxu0 %v17083_v20  ;;  %5049 = vmatpush1.bf16.msra.mxu1 %v17086_v56  ;;  %v17160_v20 = vld [vmem:[#allocation9 + $0x34c] ss:$16 sps:$4 sm:$0xff]   ;;  %v17158_v56 = vld [vmem:[#allocation9 + $0x348] ss:$16 sps:$4 sm:$0xff]  }
 0x5e0   :  { %5080 = vmatprep.mubr.bf16.mxu1 %v4128_v5  ;;  %v16261_v6 = vpop.f32.mrf.mxu1  ;;  %5015 = vmatprep.subr.bf16.mxu0 %v17091_v0  ;;  %v17155_v5 = vld [vmem:[#allocation9 + $0x368] ss:$16 sps:$4 sm:$0xff]  }
 0x5e1   :  { %5050 = vmatprep.subr.bf16.mxu1 %v17094_v37  ;;  %v17161_v0 = vld [vmem:[#allocation9 + $0x328] ss:$16 sps:$4 sm:$0xff]   ;;  %v17166_v37 = vld [vmem:[#allocation9 + $0x30c] ss:$16 sps:$4 sm:$0xff]  }
 0x5e2   :  { %v17164_v43 = vld [vmem:[#allocation9 + $0x308] ss:$16 sps:$4 sm:$0xff]  }
 0x5e3   :  { %5016 = vmatpush1.bf16.msra.mxu0 %v17089_v47  ;;  %5051 = vmatpush1.bf16.msra.mxu1 %v17092_v52 }
 0x5e4   :  { %5017 = vmatprep.subr.bf16.mxu0 %v17097_v59  ;;  %5052 = vmatprep.subr.bf16.mxu1 %v17100_v21  ;;  %v4257_v21 = vld [vmem:[#allocation10] sm:$0xf] }
 0x5e7   :  { %5018 = vmatpush1.bf16.msra.mxu0 %v17095_v17  ;;  %5053 = vmatpush1.bf16.msra.mxu1 %v17098_v27 }
 0x5e8   :  { %5019 = vmatprep.subr.bf16.mxu0 %v17103_v30  ;;  %5054 = vmatprep.subr.bf16.mxu1 %v17106_v31  ;;  %v4262_v30 = vrot.slane %v4257_v21, %v18870_v29 }
 0x5eb   :  { %5020 = vmatpush1.bf16.msra.mxu0 %v17101_v33  ;;  %5055 = vmatpush1.bf16.msra.mxu1 %v17104_v14 }
 0x5ec   :  { %5021 = vmatprep.subr.bf16.mxu0 %v17109_v46  ;;  %5056 = vmatprep.subr.bf16.mxu1 %v17112_v48  ;;  %v18056_v48 = vld [vmem:[%s19954_s12] sm:$0xff] }
 0x5ef   :  { %5022 = vmatpush2.bf16.msra.mxu0 %v17107_v1  ;;  %5057 = vmatpush1.bf16.msra.mxu1 %v17110_v2 }
 0x5f0   :  { %5023 = vmatprep.subr.bf16.mxu0 %v17115_v55  ;;  %5058 = vmatprep.subr.bf16.mxu1 %v17118_v23  ;;  %v4270_v55 = vrot.slane %v4257_v21, %v18892_v49  ;;  %v381_v23 = vunpack.c.l.bf16 %v18056_v48 }
 0x5f3   :  { %5024 = vmatpush2.bf16.msra.mxu0 %v17113_v51  ;;  %5059 = vmatpush1.bf16.msra.mxu1 %v17116_v11 }
 0x5f4   :  { %5025 = vmatprep.subr.bf16.mxu0 %v17121_v12  ;;  %5060 = vmatprep.subr.bf16.mxu1 %v17124_v16  ;;  %v4274_v16 = vrot.slane %v4257_v21, %v18895_v50 }
 0x5f7   :  { %5026 = vmatpush2.bf16.msra.mxu0 %v17119_v63  ;;  %5061 = vmatpush1.bf16.msra.mxu1 %v17122_v57 }
 0x5f8   :  { %5027 = vmatprep.subr.bf16.mxu0 %v17127_v61  ;;  %5062 = vmatprep.subr.bf16.mxu1 %v17130_v18  ;;  %v18057_v18 = vld [vmem:[%s19954_s12 + $0x10] sm:$0xff] }
 0x5fb   :  { %5028 = vmatpush2.bf16.msra.mxu0 %v17125_v36  ;;  %5063 = vmatpush1.bf16.msra.mxu1 %v17128_v19  ;;  %v386_v36 = vunpack.c.h.bf16 %v18057_v18 }
 0x5fc   :  { %5029 = vmatprep.subr.bf16.mxu0 %v17133_v15  ;;  %5064 = vmatprep.subr.bf16.mxu1 %v17136_v53  ;;  %v18058_v53 = vld [vmem:[%s19954_s12 + $0x8] sm:$0xff] }
 0x5ff   :  { %5030 = vmatpush2.bf16.msra.mxu0 %v17131_v24  ;;  %5065 = vmatpush2.bf16.msra.mxu1 %v17134_v25  ;;  %v383_v24 = vunpack.c.l.bf16 %v18058_v53 }
 0x600   :  { %5031 = vmatprep.subr.bf16.mxu0 %v17139_v28  ;;  %5066 = vmatprep.subr.bf16.mxu1 %v17142_v34  ;;  %v385_v28 = vunpack.c.l.bf16 %v18057_v18  ;;  %v17188_v18 = vld [vmem:[#allocation15 + $0x280] ss:$16 sps:$4 sm:$0xff]  }
 0x603   :  { %5032 = vmatpush2.bf16.msra.mxu0 %v17137_v35  ;;  %5067 = vmatpush2.bf16.msra.mxu1 %v17140_v39 }
 0x604   :  { %5033 = vmatprep.subr.bf16.mxu0 %v17145_v40  ;;  %5068 = vmatprep.subr.bf16.mxu1 %v17148_v3  ;;  %v384_v3 = vunpack.c.h.bf16 %v18058_v53  ;;  %v17194_v53 = vld [vmem:[#allocation15 + $0x260] ss:$16 sps:$4 sm:$0xff]  }
 0x607   :  { %5034 = vmatpush2.bf16.msra.mxu0 %v17143_v41  ;;  %5069 = vmatpush2.bf16.msra.mxu1 %v17146_v42 }
 0x608   :  { %5035 = vmatprep.subr.bf16.mxu0 %v17151_v58  ;;  %5070 = vmatprep.subr.bf16.mxu1 %v17154_v10  ;;  %v18059_v10 = vld [vmem:[%s19954_s12 + $0x18] sm:$0xff] }
 0x60b   :  { %5036 = vmatpush2.bf16.msra.mxu0 %v17149_v9  ;;  %5071 = vmatpush2.bf16.msra.mxu1 %v17152_v44  ;;  %v387_v9 = vunpack.c.l.bf16 %v18059_v10 }
 0x60c   :  { %5072 = vmatprep.subr.bf16.mxu1 %v17157_v45 }
 0x60e   :  { %5038 = vmatmul.mubr.bf16.vlgmr.msra.gmra.mxu0 %v19119_v22  ;;  %v4266_v22 = vrot.slane %v4257_v21, %v18941_v8 }
 0x60f   :  { %5073 = vmatpush2.bf16.msra.mxu1 %v17155_v5 }
 0x610   :  { %5074 = vmatprep.subr.bf16.mxu1 %v17160_v20 }
 0x613   :  { %5075 = vmatpush2.bf16.msra.mxu1 %v17158_v56 }
 0x614   :  { %5076 = vmatprep.subr.bf16.mxu1 %v17163_v13 }
 0x617   :  { %5077 = vmatpush2.bf16.msra.mxu1 %v17161_v0  ;;  %v388_v0 = vunpack.c.h.bf16 %v18059_v10  ;;  %v17209_v10 = vld [vmem:[#allocation15] ss:$16 sps:$4 sm:$0xff]  }
 0x618   :  { %5078 = vmatprep.subr.bf16.mxu1 %v17166_v37 }
 0x61b   :  { %5079 = vmatpush2.bf16.msra.mxu1 %v17164_v43 }
 0x61e   :  { %5081 = vmatmul.mubr.bf16.vlgmr.msra.gmra.mxu1 %v19122_v60  ;;  %v382_v60 = vunpack.c.h.bf16 %v18056_v48  ;;  %v17172_v48 = vld [vmem:[#allocation15 + $0x2e4] ss:$16 sps:$4 sm:$0xff]  }
 0x61f   :  { %6049 = vmatprep.subr.bf16.mxu1 %v17172_v48 }
 0x68e   :  { %v4953_v47 = vpop.f32.mrf.mxu0 }
 0x68f   :  { %v4954_v46 = vadd.f32 %v4953_v47, %v4262_v30 }
 0x690   :  { %v4955_v52 = vpop.f32.mrf.mxu0 }
 0x691   :  { %v4956_v33 = vadd.f32 %v4955_v52, %v4266_v22 }
 0x692   :  { %v4957_v6 = vpop.f32.mrf.mxu0 }
 0x693   :  { %v4958_v63 = vadd.f32 %v4957_v6, %v4262_v30 }
 0x694   :  { %v4959_v17 = vpop.f32.mrf.mxu0 }
 0x695   :  { %v4960_v12 = vadd.f32 %v4959_v17, %v4266_v22 }
 0x69e   :  { %v4996_v59 = vpop.f32.mrf.mxu1 }
 0x69f   :  { %v4997_v51 = vadd.f32 %v4996_v59, %v4954_v46  ;;  %v17170_v46 = vld [vmem:[#allocation15 + $0x2e0] ss:$16 sps:$4 sm:$0xff]  }
 0x6a0   :  { %v4998_v27 = vpop.f32.mrf.mxu1  ;;  %6050 = vmatpush1.bf16.msra.mxu1 %v17170_v46 }
 0x6a1   :  { %v4999_v1 = vadd.f32 %v4998_v27, %v4956_v33  ;;  %v19142_v25 = vadd.f32 %v4997_v51, %v381_v23  ;;  %v17167_v33 = vld [vmem:[#allocation15 + $0xe0] ss:$16 sps:$4 sm:$0xff]   ;;  %v17181_v23 = vld [vmem:[#allocation15 + $0xa4] ss:$16 sps:$4 sm:$0xff]  }
 0x6a2   :  { %v5000_v14 = vpop.f32.mrf.mxu1  ;;  %v17184_v51 = vld [vmem:[#allocation15 + $0x2a4] ss:$16 sps:$4 sm:$0xff]  }
 0x6a3   :  { %v19134_v57 = vadd.f32 %v4999_v1, %v382_v60  ;;  %v5001_v34 = vadd.f32 %v5000_v14, %v4958_v63  ;;  %v17169_v14 = vld [vmem:[#allocation15 + $0xe4] ss:$16 sps:$4 sm:$0xff]  }
 0x6a4   :  { %v5002_v11 = vpop.f32.mrf.mxu1  ;;  %v17175_v60 = vld [vmem:[#allocation15 + $0xc4] ss:$16 sps:$4 sm:$0xff]   ;;  %6006 = vmatprep.subr.bf16.mxu0 %v17169_v14 }
 0x6a5   :  { %v5003_v19 = vadd.f32 %v5002_v11, %v4960_v12  ;;  %v5101_v41 = vadd.f32 %v19134_v57, %v19142_v25  ;;  %v19153_v56 = vadd.f32 %v5001_v34, %v385_v28  ;;  %v17178_v1 = vld [vmem:[#allocation15 + $0x2c4] ss:$16 sps:$4 sm:$0xff]   ;;  %6007 = vmatpush1.bf16.msra.mxu0 %v17167_v33  ;;  %v17179_v11 = vld [vmem:[#allocation15 + $0xa0] ss:$16 sps:$4 sm:$0xff]  }
 0x6a6   :  { %6008 = vmatprep.subr.bf16.mxu0 %v17175_v60  ;;  %6051 = vmatprep.subr.bf16.mxu1 %v17178_v1  ;;  %v17182_v12 = vld [vmem:[#allocation15 + $0x2a0] ss:$16 sps:$4 sm:$0xff]   ;;  %v17190_v63 = vld [vmem:[#allocation15 + $0x284] ss:$16 sps:$4 sm:$0xff]  }
 0x6a7   :  { %v19149_v44 = vadd.f32 %v5003_v19, %v386_v36  ;;  %v17193_v36 = vld [vmem:[#allocation15 + $0x64] ss:$16 sps:$4 sm:$0xff]   ;;  %v17197_v34 = vld [vmem:[#allocation15 + $0x40] ss:$16 sps:$4 sm:$0xff]  }
 0x6a8   :  { %v17196_v19 = vld [vmem:[#allocation15 + $0x264] ss:$16 sps:$4 sm:$0xff]  }
 0x6a9   :  { %v5106_v17 = vadd.f32 %v19149_v44, %v19153_v56  ;;  %v17202_v28 = vld [vmem:[#allocation15 + $0x244] ss:$16 sps:$4 sm:$0xff]  }
 0x6ce   :  { %v5039_v31 = vpop.f32.mrf.mxu0 }
 0x6cf   :  { %v5040_v15 = vadd.f32 %v5039_v31, %v4270_v55 }
 0x6d0   :  { %v5041_v2 = vpop.f32.mrf.mxu0 }
 0x6d1   :  { %v5042_v39 = vadd.f32 %v5041_v2, %v4274_v16  ;;  %v17173_v2 = vld [vmem:[#allocation15 + $0xc0] ss:$16 sps:$4 sm:$0xff]  }
 0x6d2   :  { %v5043_v61 = vpop.f32.mrf.mxu0  ;;  %6009 = vmatpush1.bf16.msra.mxu0 %v17173_v2 }
 0x6d3   :  { %v5044_v45 = vadd.f32 %v5043_v61, %v4270_v55  ;;  %v17176_v55 = vld [vmem:[#allocation15 + $0x2c0] ss:$16 sps:$4 sm:$0xff]   ;;  %6010 = vmatprep.subr.bf16.mxu0 %v17181_v23 }
 0x6d4   :  { %v5045_v42 = vpop.f32.mrf.mxu0  ;;  %6052 = vmatpush1.bf16.msra.mxu1 %v17176_v55  ;;  %v17185_v61 = vld [vmem:[#allocation15 + $0x80] ss:$16 sps:$4 sm:$0xff]  }
 0x6d5   :  { %v5046_v37 = vadd.f32 %v5045_v42, %v4274_v16  ;;  %v17187_v16 = vld [vmem:[#allocation15 + $0x84] ss:$16 sps:$4 sm:$0xff]   ;;  %6053 = vmatprep.subr.bf16.mxu1 %v17184_v51 }
 0x6d6   :  { %6011 = vmatpush1.bf16.msra.mxu0 %v17179_v11  ;;  %v17211_v42 = vld [vmem:[#allocation15 + $0x4] ss:$16 sps:$4 sm:$0xff]  }
 0x6d7   :  { %6012 = vmatprep.subr.bf16.mxu0 %v17187_v16  ;;  %v17226_v11 = vld [vmem:[#allocation15 + $0x3c4] ss:$16 sps:$4 sm:$0xff]   ;;  %v17224_v16 = vld [vmem:[#allocation15 + $0x3c0] ss:$16 sps:$4 sm:$0xff]  }
 0x6d8   :  { %6054 = vmatpush1.bf16.msra.mxu1 %v17182_v12  ;;  %v17221_v12 = vld [vmem:[#allocation15 + $0x1c0] ss:$16 sps:$4 sm:$0xff]  }
 0x6d9   :  { %6055 = vmatprep.subr.bf16.mxu1 %v17190_v63  ;;  %v17229_v63 = vld [vmem:[#allocation15 + $0x1a4] ss:$16 sps:$4 sm:$0xff]  }
 0x6da   :  { %6013 = vmatpush1.bf16.msra.mxu0 %v17185_v61  ;;  %v17232_v61 = vld [vmem:[#allocation15 + $0x3a4] ss:$16 sps:$4 sm:$0xff]  }
 0x6db   :  { %6014 = vmatprep.subr.bf16.mxu0 %v17193_v36  ;;  %v17230_v36 = vld [vmem:[#allocation15 + $0x3a0] ss:$16 sps:$4 sm:$0xff]  }
 0x6dc   :  { %6056 = vmatpush1.bf16.msra.mxu1 %v17188_v18  ;;  %v17227_v18 = vld [vmem:[#allocation15 + $0x1a0] ss:$16 sps:$4 sm:$0xff]  }
 0x6dd   :  { %6057 = vmatprep.subr.bf16.mxu1 %v17196_v19  ;;  %v17233_v19 = vld [vmem:[#allocation15 + $0x180] ss:$16 sps:$4 sm:$0xff]  }
 0x6de   :  { %v5082_v35 = vpop.f32.mrf.mxu1 }
 0x6df   :  { %v5083_v40 = vadd.f32 %v5082_v35, %v5040_v15  ;;  %v17191_v15 = vld [vmem:[#allocation15 + $0x60] ss:$16 sps:$4 sm:$0xff]  }
 0x6e0   :  { %v5084_v58 = vpop.f32.mrf.mxu1  ;;  %6015 = vmatpush1.bf16.msra.mxu0 %v17191_v15  ;;  %6058 = vmatpush1.bf16.msra.mxu1 %v17194_v53  ;;  %v17200_v35 = vld [vmem:[#allocation15 + $0x240] ss:$16 sps:$4 sm:$0xff]   ;;  %v17235_v15 = vld [vmem:[#allocation15 + $0x184] ss:$16 sps:$4 sm:$0xff]  }
 0x6e1   :  { %v19151_v5 = vadd.f32 %v5083_v40, %v383_v24  ;;  %v5085_v20 = vadd.f32 %v5084_v58, %v5042_v39  ;;  %v17199_v24 = vld [vmem:[#allocation15 + $0x44] ss:$16 sps:$4 sm:$0xff]   ;;  %6059 = vmatprep.subr.bf16.mxu1 %v17202_v28  ;;  %v17236_v53 = vld [vmem:[#allocation15 + $0x380] ss:$16 sps:$4 sm:$0xff]  }
 0x6e2   :  { %v5086_v13 = vpop.f32.mrf.mxu1  ;;  %6016 = vmatprep.subr.bf16.mxu0 %v17199_v24  ;;  %v17205_v39 = vld [vmem:[#allocation15 + $0x24] ss:$16 sps:$4 sm:$0xff]  }
 0x6e3   :  { %v19155_v43 = vadd.f32 %v5085_v20, %v384_v3  ;;  %v5087_v47 = vadd.f32 %v5086_v13, %v5044_v45  ;;  %v5102_v52 = vadd.f32 %v5101_v41, %v19151_v5  ;;  %v17208_v40 = vld [vmem:[#allocation15 + $0x224] ss:$16 sps:$4 sm:$0xff]   ;;  %v17203_v3 = vld [vmem:[#allocation15 + $0x20] ss:$16 sps:$4 sm:$0xff]  }
 0x6e4   :  { %v5088_v6 = vpop.f32.mrf.mxu1  ;;  %6017 = vmatpush1.bf16.msra.mxu0 %v17197_v34  ;;  %6060 = vmatpush1.bf16.msra.mxu1 %v17200_v35  ;;  %v17206_v41 = vld [vmem:[#allocation15 + $0x220] ss:$16 sps:$4 sm:$0xff]   ;;  %v17214_v58 = vld [vmem:[#allocation15 + $0x204] ss:$16 sps:$4 sm:$0xff]  }
 0x6e5   :  { %v19158_v59 = vadd.f32 %v5087_v47, %v387_v9  ;;  %v5089_v21 = vadd.f32 %v5088_v6, %v5046_v37  ;;  %v5103_v22 = vadd.f32 %v5102_v52, %v19155_v43  ;;  %6018 = vmatprep.subr.bf16.mxu0 %v17205_v39  ;;  %6061 = vmatprep.subr.bf16.mxu1 %v17208_v40  ;;  %v17212_v9 = vld [vmem:[#allocation15 + $0x200] ss:$16 sps:$4 sm:$0xff]   ;;  %v17217_v45 = vld [vmem:[#allocation15 + $0x1e4] ss:$16 sps:$4 sm:$0xff]  }
 0x6e6   :  { %v17220_v20 = vld [vmem:[#allocation15 + $0x3e4] ss:$16 sps:$4 sm:$0xff]   ;;  %v17215_v13 = vld [vmem:[#allocation15 + $0x1e0] ss:$16 sps:$4 sm:$0xff]  }
 0x6e7   :  { %5104 = vadd.xlane.f32.xlu0 %v5103_v22  ;;  %v19163_v27 = vadd.f32 %v5089_v21, %v388_v0  ;;  %v5107_v30 = vadd.f32 %v5106_v17, %v19158_v59  ;;  %v17218_v0 = vld [vmem:[#allocation15 + $0x3e0] ss:$16 sps:$4 sm:$0xff]   ;;  %v17238_v24 = vld [vmem:[#allocation15 + $0x384] ss:$16 sps:$4 sm:$0xff]  }
 0x6e8   :  { %6019 = vmatpush1.bf16.msra.mxu0 %v17203_v3  ;;  %6062 = vmatpush1.bf16.msra.mxu1 %v17206_v41  ;;  %v17241_v28 = vld [vmem:[#allocation15 + $0x164] ss:$16 sps:$4 sm:$0xff]   ;;  %v17239_v35 = vld [vmem:[#allocation15 + $0x160] ss:$16 sps:$4 sm:$0xff]  }
 0x6e9   :  { %v5108_v31 = vadd.f32 %v5107_v30, %v19163_v27  ;;  %6020 = vmatprep.subr.bf16.mxu0 %v17211_v42  ;;  %6063 = vmatprep.subr.bf16.mxu1 %v17214_v58  ;;  %v17244_v34 = vld [vmem:[#allocation15 + $0x364] ss:$16 sps:$4 sm:$0xff]   ;;  %v17242_v39 = vld [vmem:[#allocation15 + $0x360] ss:$16 sps:$4 sm:$0xff]  }
 0x6ea   :  { %v17247_v40 = vld [vmem:[#allocation15 + $0x144] ss:$16 sps:$4 sm:$0xff]   ;;  %v17245_v41 = vld [vmem:[#allocation15 + $0x140] ss:$16 sps:$4 sm:$0xff]  }
 0x6eb   :  { %5109 = vadd.xlane.f32.xlu1 %v5108_v31  ;;  %v17250_v3 = vld [vmem:[#allocation15 + $0x344] ss:$16 sps:$4 sm:$0xff]   ;;  %v17248_v42 = vld [vmem:[#allocation15 + $0x340] ss:$16 sps:$4 sm:$0xff]  }
 0x6ec   :  { %6021 = vmatpush1.bf16.msra.mxu0 %v17209_v10  ;;  %6064 = vmatpush1.bf16.msra.mxu1 %v17212_v9  ;;  %v17253_v58 = vld [vmem:[#allocation15 + $0x124] ss:$16 sps:$4 sm:$0xff]   ;;  %v17251_v9 = vld [vmem:[#allocation15 + $0x120] ss:$16 sps:$4 sm:$0xff]  }
 0x6ed   :  { %6022 = vmatprep.subr.bf16.mxu0 %v17217_v45  ;;  %6065 = vmatprep.subr.bf16.mxu1 %v17220_v20  ;;  %v17256_v10 = vld [vmem:[#allocation15 + $0x324] ss:$16 sps:$4 sm:$0xff]   ;;  %v17254_v45 = vld [vmem:[#allocation15 + $0x320] ss:$16 sps:$4 sm:$0xff]  }
 0x6ee   :  { %v17259_v20 = vld [vmem:[#allocation15 + $0x104] ss:$16 sps:$4 sm:$0xff]  }
 0x6f0   :  { %6023 = vmatpush2.bf16.msra.mxu0 %v17215_v13  ;;  %6066 = vmatpush2.bf16.msra.mxu1 %v17218_v0  ;;  %v17262_v13 = vld [vmem:[#allocation15 + $0x304] ss:$16 sps:$4 sm:$0xff]   ;;  %v17257_v0 = vld [vmem:[#allocation15 + $0x100] ss:$16 sps:$4 sm:$0xff]  }
 0x6f1   :  { %6067 = vmatprep.subr.bf16.mxu1 %v17226_v11 }
 0x6f4   :  { %6068 = vmatpush2.bf16.msra.mxu1 %v17224_v16 }
 0x6f5   :  { %6069 = vmatprep.subr.bf16.mxu1 %v17232_v61 }
 0x6f8   :  { %6070 = vmatpush2.bf16.msra.mxu1 %v17230_v36 }
 0x6f9   :  { %6071 = vmatprep.subr.bf16.mxu1 %v17238_v24 }
 0x6fc   :  { %6072 = vmatpush2.bf16.msra.mxu1 %v17236_v53 }
 0x6fd   :  { %6073 = vmatprep.subr.bf16.mxu1 %v17244_v34 }
 0x700   :  { %6074 = vmatpush2.bf16.msra.mxu1 %v17242_v39 }
 0x701   :  { %6075 = vmatprep.subr.bf16.mxu1 %v17250_v3 }
 0x704   :  { %6076 = vmatpush2.bf16.msra.mxu1 %v17248_v42 }
 0x705   :  { %6077 = vmatprep.subr.bf16.mxu1 %v17256_v10  ;;  %v17263_v10 = vld [vmem:[#allocation15 + $0xe8] ss:$16 sps:$4 sm:$0xff]  }
 0x708   :  { %6078 = vmatpush2.bf16.msra.mxu1 %v17254_v45 }
 0x709   :  { %6079 = vmatprep.subr.bf16.mxu1 %v17262_v13  ;;  %v17271_v13 = vld [vmem:[#allocation15 + $0xcc] ss:$16 sps:$4 sm:$0xff]  }
 0x770   :  { %v5105_v37 = vpop.xlane.xlu0 %5104 }
 0x771   :  { %v5112_v47 = vmul.f32 0.001953125, %v5105_v37  ;;  %v17260_v37 = vld [vmem:[#allocation15 + $0x300] ss:$16 sps:$4 sm:$0xff]  }
 0x772   :  { %6080 = vmatpush2.bf16.msra.mxu1 %v17260_v37  ;;  %v17269_v37 = vld [vmem:[#allocation15 + $0xc8] ss:$16 sps:$4 sm:$0xff]  }
 0x773   :  { %v19168_v52 = vsub.f32 %v19142_v25, %v5112_v47  ;;  %v19171_v6 = vsub.f32 %v19134_v57, %v5112_v47  ;;  %v19174_v21 = vsub.f32 %v19151_v5, %v5112_v47  ;;  %v19177_v17 = vsub.f32 %v19155_v43, %v5112_v47  ;;  %v17265_v47 = vld [vmem:[#allocation15 + $0xec] ss:$16 sps:$4 sm:$0xff]  }
 0x774   :  { %v5110_v22 = vpop.xlane.xlu1 %5109 }
 0x775   :  { %v5113_v30 = vmul.f32 0.001953125, %v5110_v22  ;;  %v5122_v31 = vmul.f32 %v19168_v52, %v19168_v52  ;;  %v5123_v33 = vmul.f32 %v19171_v6, %v19171_v6  ;;  %v5124_v25 = vmul.f32 %v19174_v21, %v19174_v21  ;;  %v17268_v22 = vld [vmem:[#allocation15 + $0x2ec] ss:$16 sps:$4 sm:$0xff]  }
 0x776   :  { %v5125_v46 = vmul.f32 %v19177_v17, %v19177_v17  ;;  %6135 = vmatprep.subr.bf16.mxu1 %v17268_v22  ;;  %v17277_v22 = vld [vmem:[#allocation15 + $0xac] ss:$16 sps:$4 sm:$0xff]  }
 0x777   :  { %v19186_v57 = vsub.f32 %v19153_v56, %v5113_v30  ;;  %v19189_v5 = vsub.f32 %v19149_v44, %v5113_v30  ;;  %v5130_v14 = vadd.f32 %v5123_v33, %v5122_v31  ;;  %v19192_v43 = vsub.f32 %v19158_v59, %v5113_v30 }
 0x778   :  { %v19197_v60 = vsub.f32 %v19163_v27, %v5113_v30  ;;  %v17223_v27 = vld [vmem:[#allocation15 + $0x1c4] ss:$16 sps:$4 sm:$0xff]  }
 0x779   :  { %v5131_v48 = vadd.f32 %v5130_v14, %v5124_v25  ;;  %v5126_v1 = vmul.f32 %v19186_v57, %v19186_v57  ;;  %v5127_v56 = vmul.f32 %v19189_v5, %v19189_v5  ;;  %v5128_v44 = vmul.f32 %v19192_v43, %v19192_v43  ;;  %6024 = vmatprep.subr.bf16.mxu0 %v17223_v27 }
 0x77a   :  { %v5129_v59 = vmul.f32 %v19197_v60, %v19197_v60  ;;  %6025 = vmatpush2.bf16.msra.mxu0 %v17221_v12 }
 0x77b   :  { %v5132_v2 = vadd.f32 %v5131_v48, %v5125_v46  ;;  %v5135_v55 = vadd.f32 %v5127_v56, %v5126_v1  ;;  %6026 = vmatprep.subr.bf16.mxu0 %v17229_v63  ;;  %v5099_v48 = vld [vmem:[#allocation12] sm:$0xf]  ;;  %v5100_v56 = vld [vmem:[#allocation13] sm:$0xf] }
 0x77c   :  { %v5166_v11 = vrot.slane %v5099_v48, %v18892_v49  ;;  %v5191_v16 = vrot.slane %v5100_v56, %v18941_v8  ;;  %v5199_v63 = vrot.slane %v5100_v56, %v18895_v50  ;;  %v5195_v61 = vrot.slane %v5100_v56, %v18892_v49 }
 0x77d   :  { %5133 = vadd.xlane.f32.xlu0 %v5132_v2  ;;  %v5136_v23 = vadd.f32 %v5135_v55, %v5128_v44  ;;  %v5162_v44 = vrot.slane %v5099_v48, %v18941_v8 }
 0x77e   :  { %6027 = vmatpush2.bf16.msra.mxu0 %v17227_v18 }
 0x77f   :  { %v5137_v51 = vadd.f32 %v5136_v23, %v5129_v59  ;;  %6028 = vmatprep.subr.bf16.mxu0 %v17235_v15  ;;  %v5170_v59 = vrot.slane %v5099_v48, %v18895_v50 }
 0x781   :  { %5138 = vadd.xlane.f32.xlu1 %v5137_v51  ;;  %v5158_v51 = vrot.slane %v5099_v48, %v18870_v29  ;;  %v17284_v48 = vld [vmem:[#allocation15 + $0x288] ss:$16 sps:$4 sm:$0xff]  }
 0x782   :  { %6029 = vmatpush2.bf16.msra.mxu0 %v17233_v19 }
 0x783   :  { %6030 = vmatprep.subr.bf16.mxu0 %v17241_v28 }
 0x786   :  { %6031 = vmatpush2.bf16.msra.mxu0 %v17239_v35 }
 0x787   :  { %6032 = vmatprep.subr.bf16.mxu0 %v17247_v40 }
 0x78a   :  { %6033 = vmatpush2.bf16.msra.mxu0 %v17245_v41 }
 0x78b   :  { %6034 = vmatprep.subr.bf16.mxu0 %v17253_v58 }
 0x78e   :  { %6035 = vmatpush2.bf16.msra.mxu0 %v17251_v9  ;;  %v17266_v9 = vld [vmem:[#allocation15 + $0x2e8] ss:$16 sps:$4 sm:$0xff]  }
 0x78f   :  { %6036 = vmatprep.subr.bf16.mxu0 %v17259_v20 }
 0x792   :  { %6037 = vmatpush2.bf16.msra.mxu0 %v17257_v0  ;;  %v17274_v0 = vld [vmem:[#allocation15 + $0x2cc] ss:$16 sps:$4 sm:$0xff]  }
 0x793   :  { %6092 = vmatprep.subr.bf16.mxu0 %v17265_v47  ;;  %v17272_v47 = vld [vmem:[#allocation15 + $0x2c8] ss:$16 sps:$4 sm:$0xff]  }
 0x806   :  { %v5134_v30 = vpop.xlane.xlu0 %5133 }
 0x807   :  { %v5140_v31 = vmul.f32 0.001953125, %v5134_v30  ;;  %v17280_v30 = vld [vmem:[#allocation15 + $0x2ac] ss:$16 sps:$4 sm:$0xff]  }
 0x809   :  { %v5142_v33 = vadd.f32 1e-06, %v5140_v31  ;;  %v17275_v31 = vld [vmem:[#allocation15 + $0xa8] ss:$16 sps:$4 sm:$0xff]  }
 0x80a   :  { %v5139_v25 = vpop.xlane.xlu1 %5138 }
 0x80b   :  { %18011 = vrsqrt.f32 %v5142_v33  ;;  %v5141_v14 = vmul.f32 0.001953125, %v5139_v25  ;;  %v17278_v33 = vld [vmem:[#allocation15 + $0x2a8] ss:$16 sps:$4 sm:$0xff]   ;;  %v17283_v25 = vld [vmem:[#allocation15 + $0x8c] ss:$16 sps:$4 sm:$0xff]  }
 0x80d   :  { %v5143_v46 = vadd.f32 1e-06, %v5141_v14  ;;  %v17286_v14 = vld [vmem:[#allocation15 + $0x28c] ss:$16 sps:$4 sm:$0xff]  }
 0x80f   :  { %18013 = vrsqrt.f32 %v5143_v46  ;;  %v17281_v46 = vld [vmem:[#allocation15 + $0x88] ss:$16 sps:$4 sm:$0xff]  }
 0x818   :  { %v18012_v1 = vpop.eup %18011 }
 0x819   :  { %v5147_v2 = vmul.f32 %v18012_v1, %v19171_v6  ;;  %v5149_v55 = vmul.f32 %v18012_v1, %v19177_v17  ;;  %v5146_v23 = vmul.f32 %v18012_v1, %v19168_v52  ;;  %v5148_v27 = vmul.f32 %v18012_v1, %v19174_v21  ;;  %v17289_v1 = vld [vmem:[#allocation15 + $0x6c] ss:$16 sps:$4 sm:$0xff]  }
 0x81a   :  { %v5187_v6 = vrot.slane %v5100_v56, %v18870_v29  ;;  %v17292_v56 = vld [vmem:[#allocation15 + $0x26c] ss:$16 sps:$4 sm:$0xff]  }
 0x81b   :  { %v5176_v18 = vmul.f32 %v5162_v44, %v5147_v2  ;;  %v5178_v36 = vmul.f32 %v5170_v59, %v5149_v55  ;;  %v5175_v21 = vmul.f32 %v5158_v51, %v5146_v23  ;;  %v5177_v53 = vmul.f32 %v5166_v11, %v5148_v27  ;;  %v17287_v2 = vld [vmem:[#allocation15 + $0x68] ss:$16 sps:$4 sm:$0xff]   ;;  %v17295_v55 = vld [vmem:[#allocation15 + $0x4c] ss:$16 sps:$4 sm:$0xff]  }
 0x81c   :  { %v18014_v12 = vpop.eup %18013  ;;  %v17293_v23 = vld [vmem:[#allocation15 + $0x48] ss:$16 sps:$4 sm:$0xff]   ;;  %v17301_v27 = vld [vmem:[#allocation15 + $0x2c] ss:$16 sps:$4 sm:$0xff]  }
 0x81d   :  { %v5151_v17 = vmul.f32 %v18014_v12, %v19189_v5  ;;  %v5153_v52 = vmul.f32 %v18014_v12, %v19197_v60  ;;  %v5150_v19 = vmul.f32 %v18014_v12, %v19186_v57  ;;  %v5152_v15 = vmul.f32 %v18014_v12, %v19192_v43  ;;  %v17299_v12 = vld [vmem:[#allocation15 + $0x28] ss:$16 sps:$4 sm:$0xff]  }
 0x81e   :  { %v19223_v39 = vadd.f32 %v5191_v16, %v5176_v18  ;;  %v19227_v3 = vadd.f32 %v5199_v63, %v5178_v36  ;;  %v19231_v60 = vadd.f32 %v5187_v6, %v5175_v21  ;;  %v19235_v57 = vadd.f32 %v5195_v61, %v5177_v53  ;;  %v17313_v18 = vld [vmem:[#allocation15 + $0x1ec] ss:$16 sps:$4 sm:$0xff]   ;;  %v17311_v36 = vld [vmem:[#allocation15 + $0x1e8] ss:$16 sps:$4 sm:$0xff]  }
 0x81f   :  { %v5180_v24 = vmul.f32 %v5162_v44, %v5151_v17  ;;  %v5182_v28 = vmul.f32 %v5170_v59, %v5153_v52  ;;  %v5179_v34 = vmul.f32 %v5158_v51, %v5150_v19  ;;  %v5181_v35 = vmul.f32 %v5166_v11, %v5152_v15  ;;  %v17290_v44 = vld [vmem:[#allocation15 + $0x268] ss:$16 sps:$4 sm:$0xff]   ;;  %v17298_v59 = vld [vmem:[#allocation15 + $0x24c] ss:$16 sps:$4 sm:$0xff]  }
 0x820   :  { %v17296_v51 = vld [vmem:[#allocation15 + $0x248] ss:$16 sps:$4 sm:$0xff]   ;;  %v17304_v11 = vld [vmem:[#allocation15 + $0x22c] ss:$16 sps:$4 sm:$0xff]  }
 0x821   :  { %v19225_v40 = vadd.f32 %v5191_v16, %v5180_v24  ;;  %v19229_v5 = vadd.f32 %v5199_v63, %v5182_v28  ;;  %v19233_v41 = vadd.f32 %v5187_v6, %v5179_v34  ;;  %v19237_v43 = vadd.f32 %v5195_v61, %v5181_v35  ;;  %v17302_v16 = vld [vmem:[#allocation15 + $0x228] ss:$16 sps:$4 sm:$0xff]   ;;  %v17307_v63 = vld [vmem:[#allocation15 + $0xc] ss:$16 sps:$4 sm:$0xff]  }
 0x822   :  { %v17310_v6 = vld [vmem:[#allocation15 + $0x20c] ss:$16 sps:$4 sm:$0xff]   ;;  %v17305_v61 = vld [vmem:[#allocation15 + $0x8] ss:$16 sps:$4 sm:$0xff]  }
 0x823   :  { %v5213_v42 = vpack.c.bf16 %v19225_v40, %v19223_v39  ;;  %v5215_v58 = vpack.c.bf16 %v19229_v5, %v19227_v3  ;;  %v19245_v45 = vpack.c.bf16 %v19233_v41, %v19231_v60  ;;  %v19249_v20 = vpack.c.bf16 %v19237_v43, %v19235_v57  ;;  %v17308_v17 = vld [vmem:[#allocation15 + $0x208] ss:$16 sps:$4 sm:$0xff]   ;;  %v17316_v52 = vld [vmem:[#allocation15 + $0x3ec] ss:$16 sps:$4 sm:$0xff]  }
 0x824   :  { %v17314_v19 = vld [vmem:[#allocation15 + $0x3e8] ss:$16 sps:$4 sm:$0xff]   ;;  %v17319_v21 = vld [vmem:[#allocation15 + $0x1cc] ss:$16 sps:$4 sm:$0xff]  }
 0x825   :  { %6038 = vmatprep.mubr.bf16.mxu0 %v5213_v42  ;;  %6081 = vmatprep.mubr.bf16.mxu1 %v5215_v58  ;;  %v17322_v15 = vld [vmem:[#allocation15 + $0x3cc] ss:$16 sps:$4 sm:$0xff]   ;;  %v17317_v53 = vld [vmem:[#allocation15 + $0x1c8] ss:$16 sps:$4 sm:$0xff]  }
 0x826   :  { %6039 = vmatmul.mubr.bf16.vlgmr.msra.gmra.mxu0 %v19245_v45  ;;  %6082 = vmatmul.mubr.bf16.vlgmr.msra.gmra.mxu1 %v19249_v20  ;;  %v17320_v24 = vld [vmem:[#allocation15 + $0x3c8] ss:$16 sps:$4 sm:$0xff]   ;;  %v17325_v28 = vld [vmem:[#allocation15 + $0x1ac] ss:$16 sps:$4 sm:$0xff]  }
 0x827   :  { %6093 = vmatpush1.bf16.msra.mxu0 %v17263_v10  ;;  %6136 = vmatpush1.bf16.msra.mxu1 %v17266_v9  ;;  %v17328_v34 = vld [vmem:[#allocation15 + $0x3ac] ss:$16 sps:$4 sm:$0xff]   ;;  %v17323_v35 = vld [vmem:[#allocation15 + $0x1a8] ss:$16 sps:$4 sm:$0xff]  }
 0x828   :  { %6124 = vmatprep.mubr.bf16.mxu0 %v5213_v42  ;;  %6167 = vmatprep.mubr.bf16.mxu1 %v5215_v58  ;;  %v17326_v42 = vld [vmem:[#allocation15 + $0x3a8] ss:$16 sps:$4 sm:$0xff]   ;;  %v17331_v58 = vld [vmem:[#allocation15 + $0x18c] ss:$16 sps:$4 sm:$0xff]  }
 0x829   :  { %6094 = vmatprep.subr.bf16.mxu0 %v17271_v13  ;;  %6137 = vmatprep.subr.bf16.mxu1 %v17274_v0  ;;  %v17334_v10 = vld [vmem:[#allocation15 + $0x38c] ss:$16 sps:$4 sm:$0xff]   ;;  %v17329_v9 = vld [vmem:[#allocation15 + $0x188] ss:$16 sps:$4 sm:$0xff]  }
 0x82a   :  { %v17332_v13 = vld [vmem:[#allocation15 + $0x388] ss:$16 sps:$4 sm:$0xff]   ;;  %v17337_v0 = vld [vmem:[#allocation15 + $0x16c] ss:$16 sps:$4 sm:$0xff]  }
 0x82b   :  { %6095 = vmatpush1.bf16.msra.mxu0 %v17269_v37  ;;  %6138 = vmatpush1.bf16.msra.mxu1 %v17272_v47  ;;  %v17340_v37 = vld [vmem:[#allocation15 + $0x36c] ss:$16 sps:$4 sm:$0xff]   ;;  %v17335_v47 = vld [vmem:[#allocation15 + $0x168] ss:$16 sps:$4 sm:$0xff]  }
 0x82c   :  { %6096 = vmatprep.subr.bf16.mxu0 %v17277_v22  ;;  %6139 = vmatprep.subr.bf16.mxu1 %v17280_v30  ;;  %v17338_v22 = vld [vmem:[#allocation15 + $0x368] ss:$16 sps:$4 sm:$0xff]   ;;  %v17343_v30 = vld [vmem:[#allocation15 + $0x14c] ss:$16 sps:$4 sm:$0xff]  }
 0x82f   :  { %6097 = vmatpush1.bf16.msra.mxu0 %v17275_v31  ;;  %6140 = vmatpush1.bf16.msra.mxu1 %v17278_v33  ;;  %v17346_v31 = vld [vmem:[#allocation15 + $0x34c] ss:$16 sps:$4 sm:$0xff]   ;;  %v17341_v33 = vld [vmem:[#allocation15 + $0x148] ss:$16 sps:$4 sm:$0xff]  }
 0x830   :  { %6098 = vmatprep.subr.bf16.mxu0 %v17283_v25  ;;  %6141 = vmatprep.subr.bf16.mxu1 %v17286_v14  ;;  %v17344_v25 = vld [vmem:[#allocation15 + $0x348] ss:$16 sps:$4 sm:$0xff]   ;;  %v17349_v14 = vld [vmem:[#allocation15 + $0x12c] ss:$16 sps:$4 sm:$0xff]  }
 0x833   :  { %6099 = vmatpush1.bf16.msra.mxu0 %v17281_v46  ;;  %6142 = vmatpush1.bf16.msra.mxu1 %v17284_v48  ;;  %v17352_v46 = vld [vmem:[#allocation15 + $0x32c] ss:$16 sps:$4 sm:$0xff]   ;;  %v17347_v48 = vld [vmem:[#allocation15 + $0x128] ss:$16 sps:$4 sm:$0xff]  }
 0x834   :  { %6100 = vmatprep.subr.bf16.mxu0 %v17289_v1  ;;  %6143 = vmatprep.subr.bf16.mxu1 %v17292_v56  ;;  %v17350_v1 = vld [vmem:[#allocation15 + $0x328] ss:$16 sps:$4 sm:$0xff]   ;;  %v17355_v56 = vld [vmem:[#allocation15 + $0x10c] ss:$16 sps:$4 sm:$0xff]  }
 0x837   :  { %6101 = vmatpush1.bf16.msra.mxu0 %v17287_v2  ;;  %6144 = vmatpush1.bf16.msra.mxu1 %v17290_v44  ;;  %v17358_v2 = vld [vmem:[#allocation15 + $0x30c] ss:$16 sps:$4 sm:$0xff]   ;;  %v6234_v44 = vld [vmem:[#allocation18 + $0x1c0] sm:$0xff] }
 0x838   :  { %6102 = vmatprep.subr.bf16.mxu0 %v17295_v55  ;;  %6145 = vmatprep.subr.bf16.mxu1 %v17298_v59  ;;  %v6238_v55 = vld [vmem:[#allocation18 + $0x1e0] sm:$0xff] }
 0x839   :  { %v6362_v59 = vld [vmem:[#allocation18 + $0x5c0] sm:$0xff] }
 0x83b   :  { %6103 = vmatpush1.bf16.msra.mxu0 %v17293_v23  ;;  %6146 = vmatpush1.bf16.msra.mxu1 %v17296_v51  ;;  %v6366_v23 = vld [vmem:[#allocation18 + $0x5e0] sm:$0xff] }
 0x83c   :  { %6104 = vmatprep.subr.bf16.mxu0 %v17301_v27  ;;  %6147 = vmatprep.subr.bf16.mxu1 %v17304_v11  ;;  %v17353_v51 = vld [vmem:[#allocation15 + $0x108] ss:$16 sps:$4 sm:$0xff]   ;;  %v15180_v11 = vcombine.high %v6234_v44, %v6238_v55 }
 0x83d   :  { %v17356_v27 = vld [vmem:[#allocation15 + $0x308] ss:$16 sps:$4 sm:$0xff]  }
 0x83f   :  { %6105 = vmatpush1.bf16.msra.mxu0 %v17299_v12  ;;  %6148 = vmatpush1.bf16.msra.mxu1 %v17302_v16  ;;  %v15308_v12 = vcombine.high %v6362_v59, %v6366_v23  ;;  %v6226_v16 = vld [vmem:[#allocation18 + $0x180] sm:$0xff] }
 0x840   :  { %6106 = vmatprep.subr.bf16.mxu0 %v17307_v63  ;;  %6149 = vmatprep.subr.bf16.mxu1 %v17310_v6  ;;  %v6230_v63 = vld [vmem:[#allocation18 + $0x1a0] sm:$0xff] }
 0x841   :  { %v6354_v6 = vld [vmem:[#allocation18 + $0x580] sm:$0xff] }
 0x843   :  { %6107 = vmatpush1.bf16.msra.mxu0 %v17305_v61  ;;  %6150 = vmatpush1.bf16.msra.mxu1 %v17308_v17  ;;  %v6358_v61 = vld [vmem:[#allocation18 + $0x5a0] sm:$0xff]  ;;  %v15179_v17 = vcombine.low %v6234_v44, %v6238_v55 }
 0x844   :  { %6108 = vmatprep.subr.bf16.mxu0 %v17313_v18  ;;  %6151 = vmatprep.subr.bf16.mxu1 %v17316_v52  ;;  %v15307_v18 = vcombine.low %v6362_v59, %v6366_v23  ;;  %v15172_v52 = vcombine.high %v6226_v16, %v6230_v63  ;;  %v6326_v44 = vld [vmem:[#allocation18 + $0x4a0] sm:$0xff] }
 0x847   :  { %6109 = vmatpush2.bf16.msra.mxu0 %v17311_v36  ;;  %6152 = vmatpush2.bf16.msra.mxu1 %v17314_v19  ;;  %v15300_v36 = vcombine.high %v6354_v6, %v6358_v61  ;;  %v6218_v19 = vld [vmem:[#allocation18 + $0x140] sm:$0xff] }
 0x848   :  { %6110 = vmatprep.subr.bf16.mxu0 %v17319_v21  ;;  %6153 = vmatprep.subr.bf16.mxu1 %v17322_v15  ;;  %v6222_v21 = vld [vmem:[#allocation18 + $0x160] sm:$0xff] }
 0x849   :  { %v6346_v15 = vld [vmem:[#allocation18 + $0x540] sm:$0xff] }
 0x84b   :  { %6111 = vmatpush2.bf16.msra.mxu0 %v17317_v53  ;;  %6154 = vmatpush2.bf16.msra.mxu1 %v17320_v24  ;;  %v6350_v53 = vld [vmem:[#allocation18 + $0x560] sm:$0xff]  ;;  %v19256_v24 = vld [vmem:[%s19955_s8 + $0x4] ss:$16 sps:$4 sm:$0xff]  }
 0x84c   :  { %6112 = vmatprep.subr.bf16.mxu0 %v17325_v28  ;;  %6155 = vmatprep.subr.bf16.mxu1 %v17328_v34  ;;  %v19261_v28 = vld [vmem:[%s19955_s8 + $0xc] ss:$16 sps:$4 sm:$0xff]   ;;  %v15171_v34 = vcombine.low %v6226_v16, %v6230_v63 }
 0x84d   :  { %v6318_v16 = vld [vmem:[#allocation18 + $0x460] sm:$0xff] }
 0x84f   :  { %6113 = vmatpush2.bf16.msra.mxu0 %v17323_v35  ;;  %6156 = vmatpush2.bf16.msra.mxu1 %v17326_v42  ;;  %v15299_v35 = vcombine.low %v6354_v6, %v6358_v61  ;;  %v15164_v42 = vcombine.high %v6218_v19, %v6222_v21 }
 0x850   :  { %6114 = vmatprep.subr.bf16.mxu0 %v17331_v58  ;;  %6157 = vmatprep.subr.bf16.mxu1 %v17334_v10  ;;  %v15292_v58 = vcombine.high %v6346_v15, %v6350_v53  ;;  %v6210_v10 = vld [vmem:[#allocation18 + $0x100] sm:$0xff] }
 0x853   :  { %6115 = vmatpush2.bf16.msra.mxu0 %v17329_v9  ;;  %6158 = vmatpush2.bf16.msra.mxu1 %v17332_v13  ;;  %v6214_v9 = vld [vmem:[#allocation18 + $0x120] sm:$0xff] }
 0x854   :  { %6116 = vmatprep.subr.bf16.mxu0 %v17337_v0  ;;  %6159 = vmatprep.subr.bf16.mxu1 %v17340_v37  ;;  %v6338_v13 = vld [vmem:[#allocation18 + $0x500] sm:$0xff]  ;;  %v15156_v37 = vcombine.high %v6210_v10, %v6214_v9 }
 0x855   :  { %v6342_v0 = vld [vmem:[#allocation18 + $0x520] sm:$0xff] }
 0x857   :  { %6117 = vmatpush2.bf16.msra.mxu0 %v17335_v47  ;;  %6160 = vmatpush2.bf16.msra.mxu1 %v17338_v22  ;;  %v15284_v47 = vcombine.high %v6338_v13, %v6342_v0  ;;  %v6202_v22 = vld [vmem:[#allocation18 + $0xc0] sm:$0xff] }
 0x858   :  { %6118 = vmatprep.subr.bf16.mxu0 %v17343_v30  ;;  %6161 = vmatprep.subr.bf16.mxu1 %v17346_v31  ;;  %v6206_v30 = vld [vmem:[#allocation18 + $0xe0] sm:$0xff] }
 0x859   :  { %v6330_v31 = vld [vmem:[#allocation18 + $0x4c0] sm:$0xff]  ;;  %v15147_v55 = vcombine.low %v6202_v22, %v6206_v30 }
 0x85b   :  { %6119 = vmatpush2.bf16.msra.mxu0 %v17341_v33  ;;  %6162 = vmatpush2.bf16.msra.mxu1 %v17344_v25  ;;  %v6334_v33 = vld [vmem:[#allocation18 + $0x4e0] sm:$0xff]  ;;  %v15155_v25 = vcombine.low %v6210_v10, %v6214_v9 }
 0x85c   :  { %6120 = vmatprep.subr.bf16.mxu0 %v17349_v14  ;;  %6163 = vmatprep.subr.bf16.mxu1 %v17352_v46  ;;  %v15283_v14 = vcombine.low %v6338_v13, %v6342_v0  ;;  %v15148_v46 = vcombine.high %v6202_v22, %v6206_v30  ;;  %v15275_v59 = vcombine.low %v6330_v31, %v6334_v33  ;;  %v6430_v10 = vld [vmem:[#allocation18 + $0x7e0] sm:$0xff] }
 0x85d   :  { %v6422_v22 = vld [vmem:[#allocation18 + $0x7a0] sm:$0xff] }
 0x85f   :  { %6121 = vmatpush2.bf16.msra.mxu0 %v17347_v48  ;;  %6164 = vmatpush2.bf16.msra.mxu1 %v17350_v1  ;;  %v15276_v48 = vcombine.high %v6330_v31, %v6334_v33  ;;  %v6194_v1 = vld [vmem:[#allocation18 + $0x80] sm:$0xff] }
 0x860   :  { %6122 = vmatprep.subr.bf16.mxu0 %v17355_v56  ;;  %6165 = vmatprep.subr.bf16.mxu1 %v17358_v2  ;;  %v6198_v56 = vld [vmem:[#allocation18 + $0xa0] sm:$0xff] }
 0x861   :  { %v6322_v2 = vld [vmem:[#allocation18 + $0x480] sm:$0xff]  ;;  %v15140_v23 = vcombine.high %v6194_v1, %v6198_v56  ;;  %v15139_v63 = vcombine.low %v6194_v1, %v6198_v56 }
 0x862   :  { %v15267_v6 = vcombine.low %v6322_v2, %v6326_v44  ;;  %v6414_v1 = vld [vmem:[#allocation18 + $0x760] sm:$0xff] }
 0x863   :  { %6123 = vmatpush2.bf16.msra.mxu0 %v17353_v51  ;;  %6166 = vmatpush2.bf16.msra.mxu1 %v17356_v27  ;;  %v15268_v51 = vcombine.high %v6322_v2, %v6326_v44  ;;  %v6186_v27 = vld [vmem:[#allocation18 + $0x40] sm:$0xff] }
 0x864   :  { %7796 = vmatprep.subr.bf16.mxu0 %v15180_v11  ;;  %7849 = vmatprep.subr.bf16.mxu1 %v15308_v12  ;;  %v6190_v11 = vld [vmem:[#allocation18 + $0x60] sm:$0xff] }
 0x865   :  { %v6314_v12 = vld [vmem:[#allocation18 + $0x440] sm:$0xff]  ;;  %v15132_v61 = vcombine.high %v6186_v27, %v6190_v11 }
 0x866   :  { %6125 = vmatmul.mubr.bf16.vlgmr.msra.gmra.mxu0 %v19245_v45  ;;  %6168 = vmatmul.mubr.bf16.vlgmr.msra.gmra.mxu1 %v19249_v20  ;;  %v15163_v45 = vcombine.low %v6218_v19, %v6222_v21  ;;  %v15291_v20 = vcombine.low %v6346_v15, %v6350_v53  ;;  %v6310_v19 = vld [vmem:[#allocation18 + $0x420] sm:$0xff]  ;;  %v15131_v21 = vcombine.low %v6186_v27, %v6190_v11 }
 0x867   :  { %7797 = vmatpush1.bf16.msra.mxu0 %v15179_v17  ;;  %7850 = vmatpush1.bf16.msra.mxu1 %v15307_v18  ;;  %v15260_v17 = vcombine.high %v6314_v12, %v6318_v16  ;;  %v6178_v18 = vld [vmem:[#allocation18] sm:$0xff]  ;;  %v15259_v15 = vcombine.low %v6314_v12, %v6318_v16 }
 0x868   :  { %7798 = vmatprep.subr.bf16.mxu0 %v15172_v52  ;;  %7851 = vmatprep.subr.bf16.mxu1 %v15300_v36  ;;  %v6182_v52 = vld [vmem:[#allocation18 + $0x20] sm:$0xff] }
 0x869   :  { %7828 = vmatprep.mubr.bf16.mxu0 %v19256_v24  ;;  %7881 = vmatprep.mubr.bf16.mxu1 %v19261_v28  ;;  %v6306_v36 = vld [vmem:[#allocation18 + $0x400] sm:$0xff]  ;;  %v15124_v53 = vcombine.high %v6178_v18, %v6182_v52  ;;  %v15123_v9 = vcombine.low %v6178_v18, %v6182_v52 }
 0x86a   :  { %v15251_v13 = vcombine.low %v6306_v36, %v6310_v19  ;;  %v6406_v27 = vld [vmem:[#allocation18 + $0x720] sm:$0xff] }
 0x86b   :  { %7799 = vmatpush1.bf16.msra.mxu0 %v15171_v34  ;;  %7852 = vmatpush1.bf16.msra.mxu1 %v15299_v35  ;;  %v15252_v34 = vcombine.high %v6306_v36, %v6310_v19  ;;  %v6298_v35 = vld [vmem:[#allocation18 + $0x3c0] sm:$0xff] }
 0x86c   :  { %7800 = vmatprep.subr.bf16.mxu0 %v15164_v42  ;;  %7853 = vmatprep.subr.bf16.mxu1 %v15292_v58  ;;  %v6302_v42 = vld [vmem:[#allocation18 + $0x3e0] sm:$0xff] }
 0x86d   :  { %v6426_v58 = vld [vmem:[#allocation18 + $0x7c0] sm:$0xff]  ;;  %v15244_v0 = vcombine.high %v6298_v35, %v6302_v42  ;;  %v15243_v30 = vcombine.low %v6298_v35, %v6302_v42 }
 0x86e   :  { %v15371_v31 = vcombine.low %v6426_v58, %v6430_v10  ;;  %v6398_v18 = vld [vmem:[#allocation18 + $0x6e0] sm:$0xff] }
 0x86f   :  { %7801 = vmatpush1.bf16.msra.mxu0 %v15163_v45  ;;  %7854 = vmatpush1.bf16.msra.mxu1 %v15291_v20  ;;  %v15372_v45 = vcombine.high %v6426_v58, %v6430_v10  ;;  %v6290_v20 = vld [vmem:[#allocation18 + $0x380] sm:$0xff] }
 0x870   :  { %7802 = vmatprep.subr.bf16.mxu0 %v15156_v37  ;;  %7855 = vmatprep.subr.bf16.mxu1 %v15284_v47  ;;  %v6294_v37 = vld [vmem:[#allocation18 + $0x3a0] sm:$0xff] }
 0x871   :  { %v6418_v47 = vld [vmem:[#allocation18 + $0x780] sm:$0xff]  ;;  %v15236_v33 = vcombine.high %v6290_v20, %v6294_v37  ;;  %v15235_v56 = vcombine.low %v6290_v20, %v6294_v37 }
 0x872   :  { %v15363_v2 = vcombine.low %v6418_v47, %v6422_v22  ;;  %v6390_v35 = vld [vmem:[#allocation18 + $0x6a0] sm:$0xff] }
 0x873   :  { %7803 = vmatpush1.bf16.msra.mxu0 %v15155_v25  ;;  %7856 = vmatpush1.bf16.msra.mxu1 %v15283_v14  ;;  %v15364_v25 = vcombine.high %v6418_v47, %v6422_v22  ;;  %v6282_v14 = vld [vmem:[#allocation18 + $0x340] sm:$0xff] }
 0x874   :  { %7804 = vmatprep.subr.bf16.mxu0 %v15148_v46  ;;  %7857 = vmatprep.subr.bf16.mxu1 %v15276_v48  ;;  %v6286_v46 = vld [vmem:[#allocation18 + $0x360] sm:$0xff] }
 0x875   :  { %v6410_v48 = vld [vmem:[#allocation18 + $0x740] sm:$0xff]  ;;  %v15228_v44 = vcombine.high %v6282_v14, %v6286_v46  ;;  %v15227_v11 = vcombine.low %v6282_v14, %v6286_v46 }
 0x876   :  { %v15355_v12 = vcombine.low %v6410_v48, %v6414_v1  ;;  %v6382_v20 = vld [vmem:[#allocation18 + $0x660] sm:$0xff] }
 0x877   :  { %7805 = vmatpush1.bf16.msra.mxu0 %v15147_v55  ;;  %7858 = vmatpush1.bf16.msra.mxu1 %v15275_v59  ;;  %v15356_v55 = vcombine.high %v6410_v48, %v6414_v1  ;;  %v6274_v59 = vld [vmem:[#allocation18 + $0x300] sm:$0xff] }
 0x878   :  { %7806 = vmatprep.subr.bf16.mxu0 %v15140_v23  ;;  %7859 = vmatprep.subr.bf16.mxu1 %v15268_v51  ;;  %v6278_v23 = vld [vmem:[#allocation18 + $0x320] sm:$0xff] }
 0x879   :  { %v6402_v51 = vld [vmem:[#allocation18 + $0x700] sm:$0xff]  ;;  %v15220_v16 = vcombine.high %v6274_v59, %v6278_v23  ;;  %v15219_v52 = vcombine.low %v6274_v59, %v6278_v23  ;;  %v6367_v59 = vld [vmem:[#allocation18 + $0x5e8] sm:$0xff] }
 0x87a   :  { %v15347_v36 = vcombine.low %v6402_v51, %v6406_v27  ;;  %v6374_v14 = vld [vmem:[#allocation18 + $0x620] sm:$0xff] }
 0x87b   :  { %7807 = vmatpush1.bf16.msra.mxu0 %v15139_v63  ;;  %7860 = vmatpush1.bf16.msra.mxu1 %v15267_v6  ;;  %v15348_v63 = vcombine.high %v6402_v51, %v6406_v27  ;;  %v6266_v6 = vld [vmem:[#allocation18 + $0x2c0] sm:$0xff] }
 0x87c   :  { %7808 = vmatprep.subr.bf16.mxu0 %v15132_v61  ;;  %7861 = vmatprep.subr.bf16.mxu1 %v15260_v17  ;;  %v6270_v61 = vld [vmem:[#allocation18 + $0x2e0] sm:$0xff] }
 0x87d   :  { %v6394_v17 = vld [vmem:[#allocation18 + $0x6c0] sm:$0xff]  ;;  %v15212_v19 = vcombine.high %v6266_v6, %v6270_v61  ;;  %v15211_v42 = vcombine.low %v6266_v6, %v6270_v61  ;;  %v6359_v6 = vld [vmem:[#allocation18 + $0x5a8] sm:$0xff] }
 0x87e   :  { %v15339_v58 = vcombine.low %v6394_v17, %v6398_v18  ;;  %v19270_v61 = vld [vmem:[%s19955_s8] ss:$16 sps:$4 sm:$0xff]  }
 0x87f   :  { %7809 = vmatpush1.bf16.msra.mxu0 %v15131_v21  ;;  %7862 = vmatpush1.bf16.msra.mxu1 %v15259_v15  ;;  %v15340_v21 = vcombine.high %v6394_v17, %v6398_v18  ;;  %v6258_v15 = vld [vmem:[#allocation18 + $0x280] sm:$0xff]  ;;  %v19275_v17 = vld [vmem:[%s19955_s8 + $0x8] ss:$16 sps:$4 sm:$0xff]  }
 0x880   :  { %7810 = vmatprep.subr.bf16.mxu0 %v15124_v53  ;;  %7863 = vmatprep.subr.bf16.mxu1 %v15252_v34  ;;  %v6262_v53 = vld [vmem:[#allocation18 + $0x2a0] sm:$0xff] }
 0x881   :  { %v6386_v34 = vld [vmem:[#allocation18 + $0x680] sm:$0xff]  ;;  %v15204_v10 = vcombine.high %v6258_v15, %v6262_v53  ;;  %v15203_v37 = vcombine.low %v6258_v15, %v6262_v53  ;;  %v6223_v15 = vld [vmem:[#allocation18 + $0x168] sm:$0xff] }
 0x882   :  { %v15331_v47 = vcombine.low %v6386_v34, %v6390_v35  ;;  %v6347_v53 = vld [vmem:[#allocation18 + $0x548] sm:$0xff] }
 0x883   :  { %7811 = vmatpush1.bf16.msra.mxu0 %v15123_v9  ;;  %7864 = vmatpush1.bf16.msra.mxu1 %v15251_v13  ;;  %v15332_v9 = vcombine.high %v6386_v34, %v6390_v35  ;;  %v6250_v13 = vld [vmem:[#allocation18 + $0x240] sm:$0xff]  ;;  %v6351_v34 = vld [vmem:[#allocation18 + $0x568] sm:$0xff] }
 0x884   :  { %7812 = vmatprep.subr.bf16.mxu0 %v15244_v0  ;;  %7865 = vmatprep.subr.bf16.mxu1 %v15372_v45  ;;  %v6254_v0 = vld [vmem:[#allocation18 + $0x260] sm:$0xff]  ;;  %v19280_v35 = vld [vmem:[%s19955_s8 + $0x24] ss:$16 sps:$4 sm:$0xff]  }
 0x885   :  { %v6378_v45 = vld [vmem:[#allocation18 + $0x640] sm:$0xff]  ;;  %v15196_v22 = vcombine.high %v6250_v13, %v6254_v0  ;;  %v15195_v46 = vcombine.low %v6250_v13, %v6254_v0  ;;  %v15294_v13 = vcombine.high %v6347_v53, %v6351_v34  ;;  %v6211_v0 = vld [vmem:[#allocation18 + $0x108] sm:$0xff] }
 0x886   :  { %v15323_v48 = vcombine.low %v6378_v45, %v6382_v20 }
 0x887   :  { %7813 = vmatpush2.bf16.msra.mxu0 %v15243_v30  ;;  %7866 = vmatpush2.bf16.msra.mxu1 %v15371_v31  ;;  %v15324_v30 = vcombine.high %v6378_v45, %v6382_v20  ;;  %v6242_v31 = vld [vmem:[#allocation18 + $0x200] sm:$0xff]  ;;  %v6215_v45 = vld [vmem:[#allocation18 + $0x128] sm:$0xff] }
 0x888   :  { %7814 = vmatprep.subr.bf16.mxu0 %v15236_v33  ;;  %7867 = vmatprep.subr.bf16.mxu1 %v15364_v25  ;;  %v6246_v33 = vld [vmem:[#allocation18 + $0x220] sm:$0xff]  ;;  %v6339_v20 = vld [vmem:[#allocation18 + $0x508] sm:$0xff] }
 0x889   :  { %v6370_v25 = vld [vmem:[#allocation18 + $0x600] sm:$0xff]  ;;  %v15188_v1 = vcombine.high %v6242_v31, %v6246_v33  ;;  %v15187_v23 = vcombine.low %v6242_v31, %v6246_v33  ;;  %v15293_v31 = vcombine.low %v6347_v53, %v6351_v34  ;;  %v15158_v33 = vcombine.high %v6211_v0, %v6215_v45  ;;  %v6179_v34 = vld [vmem:[#allocation18 + $0x8] sm:$0xff] }
 0x88a   :  { %v15315_v51 = vcombine.low %v6370_v25, %v6374_v14 }
 0x88b   :  { %7815 = vmatpush2.bf16.msra.mxu0 %v15235_v56  ;;  %7868 = vmatpush2.bf16.msra.mxu1 %v15363_v2  ;;  %v15316_v56 = vcombine.high %v6370_v25, %v6374_v14  ;;  %v6235_v2 = vld [vmem:[#allocation18 + $0x1c8] sm:$0xff] }
 0x88c   :  { %7816 = vmatprep.subr.bf16.mxu0 %v15228_v44  ;;  %7869 = vmatprep.subr.bf16.mxu1 %v15356_v55  ;;  %v6239_v44 = vld [vmem:[#allocation18 + $0x1e8] sm:$0xff] }
 0x88d   :  { %v6363_v55 = vld [vmem:[#allocation18 + $0x5c8] sm:$0xff]  ;;  %v15182_v27 = vcombine.high %v6235_v2, %v6239_v44  ;;  %v15181_v18 = vcombine.low %v6235_v2, %v6239_v44 }
 0x88e   :  { %v6203_v14 = vld [vmem:[#allocation18 + $0xc8] sm:$0xff] }
 0x88f   :  { %7817 = vmatpush2.bf16.msra.mxu0 %v15227_v11  ;;  %7870 = vmatpush2.bf16.msra.mxu1 %v15355_v12  ;;  %v15310_v11 = vcombine.high %v6363_v55, %v6367_v59  ;;  %v6227_v12 = vld [vmem:[#allocation18 + $0x188] sm:$0xff] }
 0x890   :  { %7818 = vmatprep.subr.bf16.mxu0 %v15220_v16  ;;  %7871 = vmatprep.subr.bf16.mxu1 %v15348_v63  ;;  %v6231_v16 = vld [vmem:[#allocation18 + $0x1a8] sm:$0xff] }
 0x891   :  { %v6355_v63 = vld [vmem:[#allocation18 + $0x588] sm:$0xff] }
 0x893   :  { %7819 = vmatpush2.bf16.msra.mxu0 %v15219_v52  ;;  %7872 = vmatpush2.bf16.msra.mxu1 %v15347_v36  ;;  %v15309_v52 = vcombine.low %v6363_v55, %v6367_v59  ;;  %v15174_v36 = vcombine.high %v6227_v12, %v6231_v16  ;;  %v6195_v59 = vld [vmem:[#allocation18 + $0x88] sm:$0xff] }
 0x894   :  { %7820 = vmatprep.subr.bf16.mxu0 %v15212_v19  ;;  %7873 = vmatprep.subr.bf16.mxu1 %v15340_v21  ;;  %v15302_v19 = vcombine.high %v6355_v63, %v6359_v6  ;;  %v6219_v21 = vld [vmem:[#allocation18 + $0x148] sm:$0xff] }
 0x897   :  { %7821 = vmatpush2.bf16.msra.mxu0 %v15211_v42  ;;  %7874 = vmatpush2.bf16.msra.mxu1 %v15339_v58  ;;  %v19285_v42 = vld [vmem:[%s19955_s8 + $0x2c] ss:$16 sps:$4 sm:$0xff]   ;;  %v15173_v58 = vcombine.low %v6227_v12, %v6231_v16 }
 0x898   :  { %7822 = vmatprep.subr.bf16.mxu0 %v15204_v10  ;;  %7875 = vmatprep.subr.bf16.mxu1 %v15332_v9  ;;  %v15301_v10 = vcombine.low %v6355_v63, %v6359_v6  ;;  %v15166_v9 = vcombine.high %v6219_v21, %v6223_v15  ;;  %v6187_v6 = vld [vmem:[#allocation18 + $0x48] sm:$0xff] }
 0x89b   :  { %7823 = vmatpush2.bf16.msra.mxu0 %v15203_v37  ;;  %7876 = vmatpush2.bf16.msra.mxu1 %v15331_v47  ;;  %v6343_v37 = vld [vmem:[#allocation18 + $0x528] sm:$0xff]  ;;  %v19294_v47 = vld [vmem:[%s19955_s8 + $0x20] ss:$16 sps:$4 sm:$0xff]  }
 0x89c   :  { %7824 = vmatprep.subr.bf16.mxu0 %v15196_v22  ;;  %7877 = vmatprep.subr.bf16.mxu1 %v15324_v30  ;;  %v19299_v22 = vld [vmem:[%s19955_s8 + $0x28] ss:$16 sps:$4 sm:$0xff]   ;;  %v15165_v30 = vcombine.low %v6219_v21, %v6223_v15  ;;  %v15286_v25 = vcombine.high %v6339_v20, %v6343_v37  ;;  %v15285_v2 = vcombine.low %v6339_v20, %v6343_v37 }
 0x89d   :  { %v6299_v37 = vld [vmem:[#allocation18 + $0x3c8] sm:$0xff] }
 0x89f   :  { %7825 = vmatpush2.bf16.msra.mxu0 %v15195_v46  ;;  %7878 = vmatpush2.bf16.msra.mxu1 %v15323_v48  ;;  %v6207_v46 = vld [vmem:[#allocation18 + $0xe8] sm:$0xff] }
 0x8a0   :  { %7826 = vmatprep.subr.bf16.mxu0 %v15188_v1  ;;  %7879 = vmatprep.subr.bf16.mxu1 %v15316_v56  ;;  %v6331_v48 = vld [vmem:[#allocation18 + $0x4c8] sm:$0xff]  ;;  %v15157_v56 = vcombine.low %v6211_v0, %v6215_v45  ;;  %v15150_v44 = vcombine.high %v6203_v14, %v6207_v46 }
 0x8a1   :  { %v6335_v1 = vld [vmem:[#allocation18 + $0x4e8] sm:$0xff] }
 0x8a2   :  { %v15278_v55 = vcombine.high %v6331_v48, %v6335_v1  ;;  %v15277_v12 = vcombine.low %v6331_v48, %v6335_v1  ;;  %v6291_v1 = vld [vmem:[#allocation18 + $0x388] sm:$0xff] }
 0x8a3   :  { %7827 = vmatpush2.bf16.msra.mxu0 %v15187_v23  ;;  %7880 = vmatpush2.bf16.msra.mxu1 %v15315_v51  ;;  %v6199_v23 = vld [vmem:[#allocation18 + $0xa8] sm:$0xff] }
 0x8a4   :  { %7902 = vmatprep.subr.bf16.mxu0 %v15182_v27  ;;  %7955 = vmatprep.subr.bf16.mxu1 %v15310_v11  ;;  %v6323_v51 = vld [vmem:[#allocation18 + $0x488] sm:$0xff]  ;;  %v15149_v11 = vcombine.low %v6203_v14, %v6207_v46  ;;  %v15142_v16 = vcombine.high %v6195_v59, %v6199_v23 }
 0x8a5   :  { %v6327_v27 = vld [vmem:[#allocation18 + $0x4a8] sm:$0xff] }
 0x8a6   :  { %7829 = vmatmul.mubr.bf16.vlgmr.msra.gmra.mxu0 %v19270_v61  ;;  %7882 = vmatmul.mubr.bf16.vlgmr.msra.gmra.mxu1 %v19275_v17  ;;  %v15270_v63 = vcombine.high %v6323_v51, %v6327_v27  ;;  %v15269_v21 = vcombine.low %v6323_v51, %v6327_v27  ;;  %v6283_v27 = vld [vmem:[#allocation18 + $0x348] sm:$0xff] }
 0x8a7   :  { %7903 = vmatpush1.bf16.msra.mxu0 %v15181_v18  ;;  %7956 = vmatpush1.bf16.msra.mxu1 %v15309_v52  ;;  %v6191_v18 = vld [vmem:[#allocation18 + $0x68] sm:$0xff] }
 0x8a8   :  { %7904 = vmatprep.subr.bf16.mxu0 %v15174_v36  ;;  %7957 = vmatprep.subr.bf16.mxu1 %v15302_v19  ;;  %v6315_v52 = vld [vmem:[#allocation18 + $0x448] sm:$0xff]  ;;  %v15141_v19 = vcombine.low %v6195_v59, %v6199_v23  ;;  %v15134_v15 = vcombine.high %v6187_v6, %v6191_v18 }
 0x8a9   :  { %7838 = vmatprep.mubr.bf16.mxu0 %v19280_v35  ;;  %7891 = vmatprep.mubr.bf16.mxu1 %v19285_v42  ;;  %v6319_v36 = vld [vmem:[#allocation18 + $0x468] sm:$0xff] }
 0x8aa   :  { %v15262_v53 = vcombine.high %v6315_v52, %v6319_v36  ;;  %v15261_v0 = vcombine.low %v6315_v52, %v6319_v36  ;;  %v6275_v36 = vld [vmem:[#allocation18 + $0x308] sm:$0xff] }
 0x8ab   :  { %7905 = vmatpush1.bf16.msra.mxu0 %v15173_v58  ;;  %7958 = vmatpush1.bf16.msra.mxu1 %v15301_v10  ;;  %v6183_v58 = vld [vmem:[#allocation18 + $0x28] sm:$0xff] }
 0x8ac   :  { %7906 = vmatprep.subr.bf16.mxu0 %v15166_v9  ;;  %7959 = vmatprep.subr.bf16.mxu1 %v15294_v13  ;;  %v6307_v10 = vld [vmem:[#allocation18 + $0x408] sm:$0xff]  ;;  %v15133_v13 = vcombine.low %v6187_v6, %v6191_v18  ;;  %v15126_v45 = vcombine.high %v6179_v34, %v6183_v58 }
 0x8ad   :  { %v6311_v9 = vld [vmem:[#allocation18 + $0x428] sm:$0xff] }
 0x8ae   :  { %7839 = vmatmul.mubr.bf16.gmra.mxu0 %v19294_v47  ;;  %7892 = vmatmul.mubr.bf16.gmra.mxu1 %v19299_v22  ;;  %v15254_v20 = vcombine.high %v6307_v10, %v6311_v9  ;;  %v15253_v14 = vcombine.low %v6307_v10, %v6311_v9  ;;  %v6267_v9 = vld [vmem:[#allocation18 + $0x2c8] sm:$0xff] }
 0x8af   :  { %7907 = vmatpush1.bf16.msra.mxu0 %v15165_v30  ;;  %7960 = vmatpush1.bf16.msra.mxu1 %v15293_v31  ;;  %v6303_v30 = vld [vmem:[#allocation18 + $0x3e8] sm:$0xff] }
 0x8b0   :  { %7908 = vmatprep.subr.bf16.mxu0 %v15158_v33  ;;  %7961 = vmatprep.subr.bf16.mxu1 %v15286_v25  ;;  %v6427_v31 = vld [vmem:[#allocation18 + $0x7c8] sm:$0xff]  ;;  %v15125_v25 = vcombine.low %v6179_v34, %v6183_v58  ;;  %v15246_v46 = vcombine.high %v6299_v37, %v6303_v30 }
 0x8b1   :  { %7934 = vmatprep.mubr.bf16.mxu0 %v19256_v24  ;;  %7987 = vmatprep.mubr.bf16.mxu1 %v19261_v28  ;;  %v6431_v33 = vld [vmem:[#allocation18 + $0x7e8] sm:$0xff] }
 0x8b2   :  { %v15374_v48 = vcombine.high %v6427_v31, %v6431_v33  ;;  %v15373_v59 = vcombine.low %v6427_v31, %v6431_v33  ;;  %v6259_v33 = vld [vmem:[#allocation18 + $0x288] sm:$0xff] }
 0x8b3   :  { %7909 = vmatpush1.bf16.msra.mxu0 %v15157_v56  ;;  %7962 = vmatpush1.bf16.msra.mxu1 %v15285_v2  ;;  %v6295_v56 = vld [vmem:[#allocation18 + $0x3a8] sm:$0xff] }
 0x8b4   :  { %7910 = vmatprep.subr.bf16.mxu0 %v15150_v44  ;;  %7963 = vmatprep.subr.bf16.mxu1 %v15278_v55  ;;  %v6419_v2 = vld [vmem:[#allocation18 + $0x788] sm:$0xff]  ;;  %v15245_v55 = vcombine.low %v6299_v37, %v6303_v30  ;;  %v15238_v23 = vcombine.high %v6291_v1, %v6295_v56 }
 0x8b5   :  { %v6423_v44 = vld [vmem:[#allocation18 + $0x7a8] sm:$0xff] }
 0x8b6   :  { %v15366_v51 = vcombine.high %v6419_v2, %v6423_v44  ;;  %v15365_v6 = vcombine.low %v6419_v2, %v6423_v44  ;;  %v6251_v44 = vld [vmem:[#allocation18 + $0x248] sm:$0xff] }
 0x8b7   :  { %7911 = vmatpush1.bf16.msra.mxu0 %v15149_v11  ;;  %7964 = vmatpush1.bf16.msra.mxu1 %v15277_v12  ;;  %v6287_v11 = vld [vmem:[#allocation18 + $0x368] sm:$0xff] }
 0x8b8   :  { %7912 = vmatprep.subr.bf16.mxu0 %v15142_v16  ;;  %7965 = vmatprep.subr.bf16.mxu1 %v15270_v63  ;;  %v6411_v12 = vld [vmem:[#allocation18 + $0x748] sm:$0xff]  ;;  %v15237_v63 = vcombine.low %v6291_v1, %v6295_v56  ;;  %v15230_v18 = vcombine.high %v6283_v27, %v6287_v11 }
 0x8b9   :  { %v6415_v16 = vld [vmem:[#allocation18 + $0x768] sm:$0xff] }
 0x8ba   :  { %v15358_v52 = vcombine.high %v6411_v12, %v6415_v16  ;;  %v15357_v34 = vcombine.low %v6411_v12, %v6415_v16  ;;  %v6243_v16 = vld [vmem:[#allocation18 + $0x208] sm:$0xff] }
 0x8bb   :  { %7913 = vmatpush1.bf16.msra.mxu0 %v15141_v19  ;;  %7966 = vmatpush1.bf16.msra.mxu1 %v15269_v21  ;;  %v6279_v19 = vld [vmem:[#allocation18 + $0x328] sm:$0xff] }
 0x8bc   :  { %7914 = vmatprep.subr.bf16.mxu0 %v15134_v15  ;;  %7967 = vmatprep.subr.bf16.mxu1 %v15262_v53  ;;  %v6403_v21 = vld [vmem:[#allocation18 + $0x708] sm:$0xff]  ;;  %v15229_v53 = vcombine.low %v6283_v27, %v6287_v11  ;;  %v15222_v58 = vcombine.high %v6275_v36, %v6279_v19 }
 0x8bd   :  { %v6407_v15 = vld [vmem:[#allocation18 + $0x728] sm:$0xff] }
 0x8be   :  { %v15350_v10 = vcombine.high %v6403_v21, %v6407_v15  ;;  %v15349_v37 = vcombine.low %v6403_v21, %v6407_v15  ;;  %v6236_v15 = vld [vmem:[#allocation18 + $0x1d0] sm:$0xff] }
 0x8bf   :  { %7915 = vmatpush1.bf16.msra.mxu0 %v15133_v13  ;;  %7968 = vmatpush1.bf16.msra.mxu1 %v15261_v0  ;;  %v6271_v13 = vld [vmem:[#allocation18 + $0x2e8] sm:$0xff] }
 0x8c0   :  { %7916 = vmatprep.subr.bf16.mxu0 %v15126_v45  ;;  %7969 = vmatprep.subr.bf16.mxu1 %v15254_v20  ;;  %v6395_v0 = vld [vmem:[#allocation18 + $0x6c8] sm:$0xff]  ;;  %v15221_v20 = vcombine.low %v6275_v36, %v6279_v19  ;;  %v15214_v30 = vcombine.high %v6267_v9, %v6271_v13 }
 0x8c1   :  { %v6399_v45 = vld [vmem:[#allocation18 + $0x6e8] sm:$0xff] }
 0x8c2   :  { %v15342_v31 = vcombine.high %v6395_v0, %v6399_v45  ;;  %v15341_v1 = vcombine.low %v6395_v0, %v6399_v45  ;;  %v6228_v45 = vld [vmem:[#allocation18 + $0x190] sm:$0xff] }
 0x8c3   :  { %7917 = vmatpush1.bf16.msra.mxu0 %v15125_v25  ;;  %7970 = vmatpush1.bf16.msra.mxu1 %v15253_v14  ;;  %v6263_v25 = vld [vmem:[#allocation18 + $0x2a8] sm:$0xff] }
 0x8c4   :  { %7918 = vmatprep.subr.bf16.mxu0 %v15246_v46  ;;  %7971 = vmatprep.subr.bf16.mxu1 %v15374_v48  ;;  %v6387_v14 = vld [vmem:[#allocation18 + $0x688] sm:$0xff]  ;;  %v15213_v48 = vcombine.low %v6267_v9, %v6271_v13  ;;  %v15206_v56 = vcombine.high %v6259_v33, %v6263_v25 }
 0x8c5   :  { %v6391_v46 = vld [vmem:[#allocation18 + $0x6a8] sm:$0xff] }
 0x8c6   :  { %v15334_v2 = vcombine.high %v6387_v14, %v6391_v46  ;;  %v15333_v27 = vcombine.low %v6387_v14, %v6391_v46  ;;  %v6224_v14 = vld [vmem:[#allocation18 + $0x170] sm:$0xff] }
 0x8c7   :  { %7919 = vmatpush2.bf16.msra.mxu0 %v15245_v55  ;;  %7972 = vmatpush2.bf16.msra.mxu1 %v15373_v59  ;;  %v6255_v55 = vld [vmem:[#allocation18 + $0x268] sm:$0xff] }
 0x8c8   :  { %7920 = vmatprep.subr.bf16.mxu0 %v15238_v23  ;;  %7973 = vmatprep.subr.bf16.mxu1 %v15366_v51  ;;  %v6379_v59 = vld [vmem:[#allocation18 + $0x648] sm:$0xff]  ;;  %v15205_v51 = vcombine.low %v6259_v33, %v6263_v25  ;;  %v15198_v11 = vcombine.high %v6251_v44, %v6255_v55  ;;  %v6220_v25 = vld [vmem:[#allocation18 + $0x150] sm:$0xff] }
 0x8c9   :  { %v6383_v23 = vld [vmem:[#allocation18 + $0x668] sm:$0xff] }
 0x8ca   :  { %v15326_v12 = vcombine.high %v6379_v59, %v6383_v23  ;;  %v15325_v36 = vcombine.low %v6379_v59, %v6383_v23  ;;  %v15168_v23 = vcombine.high %v6220_v25, %v6224_v14 }
 0x8cb   :  { %7921 = vmatpush2.bf16.msra.mxu0 %v15237_v63  ;;  %7974 = vmatpush2.bf16.msra.mxu1 %v15365_v6  ;;  %v6247_v63 = vld [vmem:[#allocation18 + $0x228] sm:$0xff] }
 0x8cc   :  { %7922 = vmatprep.subr.bf16.mxu0 %v15230_v18  ;;  %7975 = vmatprep.subr.bf16.mxu1 %v15358_v52  ;;  %v6371_v6 = vld [vmem:[#allocation18 + $0x608] sm:$0xff]  ;;  %v15197_v52 = vcombine.low %v6251_v44, %v6255_v55  ;;  %v15190_v19 = vcombine.high %v6243_v16, %v6247_v63 }
 0x8cd   :  { %v6375_v18 = vld [vmem:[#allocation18 + $0x628] sm:$0xff] }
 0x8ce   :  { %v15318_v21 = vcombine.high %v6371_v6, %v6375_v18  ;;  %v15317_v9 = vcombine.low %v6371_v6, %v6375_v18 }
 0x8cf   :  { %7923 = vmatpush2.bf16.msra.mxu0 %v15229_v53  ;;  %7976 = vmatpush2.bf16.msra.mxu1 %v15357_v34  ;;  %v6240_v53 = vld [vmem:[#allocation18 + $0x1f0] sm:$0xff] }
 0x8d0   :  { %7924 = vmatprep.subr.bf16.mxu0 %v15222_v58  ;;  %7977 = vmatprep.subr.bf16.mxu1 %v15350_v10  ;;  %v6364_v34 = vld [vmem:[#allocation18 + $0x5d0] sm:$0xff]  ;;  %v15189_v10 = vcombine.low %v6243_v16, %v6247_v63  ;;  %v15184_v13 = vcombine.high %v6236_v15, %v6240_v53 }
 0x8d1   :  { %v6368_v58 = vld [vmem:[#allocation18 + $0x5f0] sm:$0xff] }
 0x8d2   :  { %v15312_v0 = vcombine.high %v6364_v34, %v6368_v58  ;;  %v15311_v46 = vcombine.low %v6364_v34, %v6368_v58  ;;  %v6216_v16 = vld [vmem:[#allocation18 + $0x130] sm:$0xff] }
 0x8d3   :  { %7925 = vmatpush2.bf16.msra.mxu0 %v15221_v20  ;;  %7978 = vmatpush2.bf16.msra.mxu1 %v15349_v37  ;;  %v6232_v20 = vld [vmem:[#allocation18 + $0x1b0] sm:$0xff]  ;;  %v15183_v37 = vcombine.low %v6236_v15, %v6240_v53 }
 0x8d4   :  { %7926 = vmatprep.subr.bf16.mxu0 %v15214_v30  ;;  %7979 = vmatprep.subr.bf16.mxu1 %v15342_v31  ;;  %v6356_v30 = vld [vmem:[#allocation18 + $0x590] sm:$0xff]  ;;  %v15176_v33 = vcombine.high %v6228_v45, %v6232_v20  ;;  %v15175_v44 = vcombine.low %v6228_v45, %v6232_v20 }
 0x8d5   :  { %v6360_v31 = vld [vmem:[#allocation18 + $0x5b0] sm:$0xff] }
 0x8d6   :  { %v15303_v63 = vcombine.low %v6356_v30, %v6360_v31  ;;  %v6204_v58 = vld [vmem:[#allocation18 + $0xd0] sm:$0xff] }
 0x8d7   :  { %7927 = vmatpush2.bf16.msra.mxu0 %v15213_v48  ;;  %7980 = vmatpush2.bf16.msra.mxu1 %v15341_v1  ;;  %v19307_v48 = vld [vmem:[#allocation16] sm:$0xf]  ;;  %v6332_v45 = vld [vmem:[#allocation18 + $0x4d0] sm:$0xff] }
 0x8d8   :  { %7928 = vmatprep.subr.bf16.mxu0 %v15206_v56  ;;  %7981 = vmatprep.subr.bf16.mxu1 %v15334_v2  ;;  %v15304_v2 = vcombine.high %v6356_v30, %v6360_v31  ;;  %v6336_v20 = vld [vmem:[#allocation18 + $0x4f0] sm:$0xff] }
 0x8d9   :  { %v6196_v30 = vld [vmem:[#allocation18 + $0x90] sm:$0xff] }
 0x8da   :  { %v6200_v31 = vld [vmem:[#allocation18 + $0xb0] sm:$0xff] }
 0x8db   :  { %7929 = vmatpush2.bf16.msra.mxu0 %v15205_v51  ;;  %7982 = vmatpush2.bf16.msra.mxu1 %v15333_v27  ;;  %v6348_v51 = vld [vmem:[#allocation18 + $0x550] sm:$0xff] }
 0x8dc   :  { %7930 = vmatprep.subr.bf16.mxu0 %v15198_v11  ;;  %7983 = vmatprep.subr.bf16.mxu1 %v15326_v12  ;;  %v6352_v27 = vld [vmem:[#allocation18 + $0x570] sm:$0xff]  ;;  %v19321_v11 = vrot.slane %v19307_v48, %v18870_v29 }
 0x8dd   :  { %v6212_v12 = vld [vmem:[#allocation18 + $0x110] sm:$0xff] }
 0x8de   :  { %v15160_v53 = vcombine.high %v6212_v12, %v6216_v16 }
 0x8df   :  { %7931 = vmatpush2.bf16.msra.mxu0 %v15197_v52  ;;  %7984 = vmatpush2.bf16.msra.mxu1 %v15325_v36  ;;  %v15167_v52 = vcombine.low %v6220_v25, %v6224_v14  ;;  %v15296_v36 = vcombine.high %v6348_v51, %v6352_v27  ;;  %v15280_v25 = vcombine.high %v6332_v45, %v6336_v20 }
 0x8e0   :  { %7932 = vmatprep.subr.bf16.mxu0 %v15190_v19  ;;  %7985 = vmatprep.subr.bf16.mxu1 %v15318_v21  ;;  %v6340_v19 = vld [vmem:[#allocation18 + $0x510] sm:$0xff] }
 0x8e1   :  { %v6344_v21 = vld [vmem:[#allocation18 + $0x530] sm:$0xff] }
 0x8e3   :  { %7933 = vmatpush2.bf16.msra.mxu0 %v15189_v10  ;;  %7986 = vmatpush2.bf16.msra.mxu1 %v15317_v9  ;;  %v6208_v10 = vld [vmem:[#allocation18 + $0xf0] sm:$0xff]  ;;  %v15295_v9 = vcombine.low %v6348_v51, %v6352_v27  ;;  %v15279_v27 = vcombine.low %v6332_v45, %v6336_v20 }
 0x8e4   :  { %8008 = vmatprep.subr.bf16.mxu0 %v15184_v13  ;;  %8061 = vmatprep.subr.bf16.mxu1 %v15312_v0  ;;  %v15288_v13 = vcombine.high %v6340_v19, %v6344_v21  ;;  %v15159_v0 = vcombine.low %v6212_v12, %v6216_v16  ;;  %v15151_v14 = vcombine.low %v6204_v58, %v6208_v10  ;;  %v6192_v51 = vld [vmem:[#allocation18 + $0x70] sm:$0xff] }
 0x8e5   :  { %v15143_v12 = vcombine.low %v6196_v30, %v6200_v31  ;;  %v6316_v16 = vld [vmem:[#allocation18 + $0x450] sm:$0xff] }
 0x8e6   :  { %7935 = vmatmul.mubr.bf16.vlgmr.msra.gmra.mxu0 %v19270_v61  ;;  %7988 = vmatmul.mubr.bf16.vlgmr.msra.gmra.mxu1 %v19275_v17  ;;  %v19309_v1 = vpop.f32.mrf.mxu0  ;;  %v19311_v56 = vpop.f32.mrf.mxu1  ;;  %v6428_v45 = vld [vmem:[#allocation18 + $0x7d0] sm:$0xff] }
 0x8e7   :  { %8009 = vmatpush1.bf16.msra.mxu0 %v15183_v37  ;;  %7944 = vmatprep.mubr.bf16.mxu0 %v19280_v35  ;;  %v15152_v37 = vcombine.high %v6204_v58, %v6208_v10  ;;  %v6300_v58 = vld [vmem:[#allocation18 + $0x3d0] sm:$0xff] }
 0x8e8   :  { %v19314_v55 = vpop.f32.mrf.mxu0  ;;  %v19316_v59 = vpop.f32.mrf.mxu1  ;;  %8010 = vmatprep.subr.bf16.mxu0 %v15176_v33  ;;  %7997 = vmatprep.mubr.bf16.mxu1 %v19285_v42  ;;  %v15287_v33 = vcombine.low %v6340_v19, %v6344_v21  ;;  %v6308_v21 = vld [vmem:[#allocation18 + $0x410] sm:$0xff] }
 0x8e9   :  { %8062 = vmatpush1.bf16.msra.mxu1 %v15311_v46  ;;  %v6324_v46 = vld [vmem:[#allocation18 + $0x490] sm:$0xff] }
 0x8ea   :  { %v6044_v6 = vpop.f32.mrf.mxu0  ;;  %8063 = vmatprep.subr.bf16.mxu1 %v15304_v2  ;;  %v6087_v15 = vpop.f32.mrf.mxu1  ;;  %v6328_v2 = vld [vmem:[#allocation18 + $0x4b0] sm:$0xff] }
 0x8eb   :  { %v6045_v18 = vadd.f32 %v6044_v6, %v19321_v11  ;;  %8011 = vmatpush1.bf16.msra.mxu0 %v15175_v44  ;;  %v15144_v44 = vcombine.high %v6196_v30, %v6200_v31  ;;  %v6180_v6 = vld [vmem:[#allocation18 + $0x10] sm:$0xff] }
 0x8ec   :  { %8012 = vmatprep.subr.bf16.mxu0 %v15168_v23  ;;  %v6188_v23 = vld [vmem:[#allocation18 + $0x50] sm:$0xff] }
 0x8ed   :  { %v19324_v34 = vadd.f32 %v6087_v15, %v6045_v18  ;;  %8064 = vmatpush1.bf16.msra.mxu1 %v15303_v63  ;;  %v6320_v63 = vld [vmem:[#allocation18 + $0x470] sm:$0xff]  ;;  %v15135_v19 = vcombine.low %v6188_v23, %v6192_v51 }
 0x8ee   :  { %7945 = vmatmul.mubr.bf16.gmra.mxu0 %v19294_v47  ;;  %7998 = vmatmul.mubr.bf16.gmra.mxu1 %v19299_v22  ;;  %v6184_v18 = vld [vmem:[#allocation18 + $0x30] sm:$0xff] }
 0x8ef   :  { %8013 = vmatpush1.bf16.msra.mxu0 %v15167_v52  ;;  %8065 = vmatprep.subr.bf16.mxu1 %v15296_v36  ;;  %v15271_v52 = vcombine.low %v6324_v46, %v6328_v2  ;;  %v15264_v36 = vcombine.high %v6316_v16, %v6320_v63  ;;  %v6312_v15 = vld [vmem:[#allocation18 + $0x430] sm:$0xff] }
 0x8f0   :  { %8014 = vmatprep.subr.bf16.mxu0 %v15160_v53  ;;  %8040 = vmatprep.mubr.bf16.mxu0 %v19256_v24  ;;  %v15272_v24 = vcombine.high %v6324_v46, %v6328_v2  ;;  %v15128_v53 = vcombine.high %v6180_v6, %v6184_v18  ;;  %v6304_v10 = vld [vmem:[#allocation18 + $0x3f0] sm:$0xff] }
 0x8f1   :  { %8066 = vmatpush1.bf16.msra.mxu1 %v15295_v9  ;;  %8093 = vmatprep.mubr.bf16.mxu1 %v19261_v28  ;;  %v15136_v28 = vcombine.high %v6188_v23, %v6192_v51  ;;  %v15263_v9 = vcombine.low %v6316_v16, %v6320_v63  ;;  %v6432_v20 = vld [vmem:[#allocation18 + $0x7f0] sm:$0xff] }
 0x8f2   :  { %8067 = vmatprep.subr.bf16.mxu1 %v15288_v13  ;;  %v15256_v13 = vcombine.high %v6308_v21, %v6312_v15  ;;  %v6292_v30 = vld [vmem:[#allocation18 + $0x390] sm:$0xff] }
 0x8f3   :  { %8015 = vmatpush1.bf16.msra.mxu0 %v15159_v0  ;;  %v15127_v0 = vcombine.low %v6180_v6, %v6184_v18  ;;  %v6296_v31 = vld [vmem:[#allocation18 + $0x3b0] sm:$0xff] }
 0x8f4   :  { %8016 = vmatprep.subr.bf16.mxu0 %v15152_v37  ;;  %v15248_v37 = vcombine.high %v6300_v58, %v6304_v10  ;;  %v6420_v46 = vld [vmem:[#allocation18 + $0x790] sm:$0xff] }
 0x8f5   :  { %8068 = vmatpush1.bf16.msra.mxu1 %v15287_v33  ;;  %v15255_v33 = vcombine.low %v6308_v21, %v6312_v15  ;;  %v6424_v2 = vld [vmem:[#allocation18 + $0x7b0] sm:$0xff] }
 0x8f6   :  { %8069 = vmatprep.subr.bf16.mxu1 %v15280_v25  ;;  %v15376_v25 = vcombine.high %v6428_v45, %v6432_v20  ;;  %v6284_v23 = vld [vmem:[#allocation18 + $0x350] sm:$0xff] }
 0x8f7   :  { %8017 = vmatpush1.bf16.msra.mxu0 %v15151_v14  ;;  %v15247_v14 = vcombine.low %v6300_v58, %v6304_v10  ;;  %v6288_v51 = vld [vmem:[#allocation18 + $0x370] sm:$0xff] }
 0x8f8   :  { %8018 = vmatprep.subr.bf16.mxu0 %v15144_v44  ;;  %v15240_v44 = vcombine.high %v6292_v30, %v6296_v31  ;;  %v6412_v16 = vld [vmem:[#allocation18 + $0x750] sm:$0xff] }
 0x8f9   :  { %8070 = vmatpush1.bf16.msra.mxu1 %v15279_v27  ;;  %v15375_v27 = vcombine.low %v6428_v45, %v6432_v20  ;;  %v6416_v63 = vld [vmem:[#allocation18 + $0x770] sm:$0xff] }
 0x8fa   :  { %8071 = vmatprep.subr.bf16.mxu1 %v15272_v24  ;;  %v15368_v24 = vcombine.high %v6420_v46, %v6424_v2  ;;  %v6276_v6 = vld [vmem:[#allocation18 + $0x310] sm:$0xff] }
 0x8fb   :  { %8019 = vmatpush1.bf16.msra.mxu0 %v15143_v12  ;;  %v15239_v12 = vcombine.low %v6292_v30, %v6296_v31  ;;  %v6280_v18 = vld [vmem:[#allocation18 + $0x330] sm:$0xff] }
 0x8fc   :  { %8020 = vmatprep.subr.bf16.mxu0 %v15136_v28  ;;  %v15232_v28 = vcombine.high %v6284_v23, %v6288_v51  ;;  %v6404_v21 = vld [vmem:[#allocation18 + $0x710] sm:$0xff] }
 0x8fd   :  { %8072 = vmatpush1.bf16.msra.mxu1 %v15271_v52  ;;  %v15367_v52 = vcombine.low %v6420_v46, %v6424_v2  ;;  %v6408_v15 = vld [vmem:[#allocation18 + $0x730] sm:$0xff] }
 0x8fe   :  { %8073 = vmatprep.subr.bf16.mxu1 %v15264_v36  ;;  %v15360_v36 = vcombine.high %v6412_v16, %v6416_v63  ;;  %v6268_v58 = vld [vmem:[#allocation18 + $0x2d0] sm:$0xff] }
 0x8ff   :  { %8021 = vmatpush1.bf16.msra.mxu0 %v15135_v19  ;;  %v15231_v19 = vcombine.low %v6284_v23, %v6288_v51  ;;  %v6272_v10 = vld [vmem:[#allocation18 + $0x2f0] sm:$0xff] }
 0x900   :  { %8022 = vmatprep.subr.bf16.mxu0 %v15128_v53  ;;  %v15224_v53 = vcombine.high %v6276_v6, %v6280_v18  ;;  %v6396_v45 = vld [vmem:[#allocation18 + $0x6d0] sm:$0xff] }
 0x901   :  { %8074 = vmatpush1.bf16.msra.mxu1 %v15263_v9  ;;  %v15359_v9 = vcombine.low %v6412_v16, %v6416_v63  ;;  %v6400_v20 = vld [vmem:[#allocation18 + $0x6f0] sm:$0xff] }
 0x902   :  { %8075 = vmatprep.subr.bf16.mxu1 %v15256_v13  ;;  %v15352_v13 = vcombine.high %v6404_v21, %v6408_v15  ;;  %v6260_v30 = vld [vmem:[#allocation18 + $0x290] sm:$0xff] }
 0x903   :  { %8023 = vmatpush1.bf16.msra.mxu0 %v15127_v0  ;;  %v15223_v0 = vcombine.low %v6276_v6, %v6280_v18  ;;  %v6264_v31 = vld [vmem:[#allocation18 + $0x2b0] sm:$0xff] }
 0x904   :  { %8024 = vmatprep.subr.bf16.mxu0 %v15248_v37  ;;  %v15216_v37 = vcombine.high %v6268_v58, %v6272_v10  ;;  %v6388_v46 = vld [vmem:[#allocation18 + $0x690] sm:$0xff] }
 0x905   :  { %8076 = vmatpush1.bf16.msra.mxu1 %v15255_v33  ;;  %v15351_v33 = vcombine.low %v6404_v21, %v6408_v15  ;;  %v6392_v2 = vld [vmem:[#allocation18 + $0x6b0] sm:$0xff] }
 0x906   :  { %8077 = vmatprep.subr.bf16.mxu1 %v15376_v25  ;;  %v15344_v25 = vcombine.high %v6396_v45, %v6400_v20  ;;  %v6252_v23 = vld [vmem:[#allocation18 + $0x250] sm:$0xff] }
 0x907   :  { %8025 = vmatpush2.bf16.msra.mxu0 %v15247_v14  ;;  %v15215_v14 = vcombine.low %v6268_v58, %v6272_v10  ;;  %v6256_v51 = vld [vmem:[#allocation18 + $0x270] sm:$0xff]  ;;  %v6237_v58 = vld [vmem:[#allocation18 + $0x1d8] sm:$0xff] }
 0x908   :  { %8026 = vmatprep.subr.bf16.mxu0 %v15240_v44  ;;  %v15208_v44 = vcombine.high %v6260_v30, %v6264_v31  ;;  %v6380_v16 = vld [vmem:[#allocation18 + $0x650] sm:$0xff]  ;;  %v6241_v10 = vld [vmem:[#allocation18 + $0x1f8] sm:$0xff] }
 0x909   :  { %8078 = vmatpush2.bf16.msra.mxu1 %v15375_v27  ;;  %v15343_v27 = vcombine.low %v6396_v45, %v6400_v20  ;;  %v6384_v63 = vld [vmem:[#allocation18 + $0x670] sm:$0xff]  ;;  %v6365_v45 = vld [vmem:[#allocation18 + $0x5d8] sm:$0xff] }
 0x90a   :  { %8079 = vmatprep.subr.bf16.mxu1 %v15368_v24  ;;  %v15336_v24 = vcombine.high %v6388_v46, %v6392_v2  ;;  %v6244_v6 = vld [vmem:[#allocation18 + $0x210] sm:$0xff]  ;;  %v6369_v20 = vld [vmem:[#allocation18 + $0x5f8] sm:$0xff] }
 0x90b   :  { %8027 = vmatpush2.bf16.msra.mxu0 %v15239_v12  ;;  %v15207_v12 = vcombine.low %v6260_v30, %v6264_v31  ;;  %v6248_v18 = vld [vmem:[#allocation18 + $0x230] sm:$0xff]  ;;  %v6229_v30 = vld [vmem:[#allocation18 + $0x198] sm:$0xff] }
 0x90c   :  { %8028 = vmatprep.subr.bf16.mxu0 %v15232_v28  ;;  %v15200_v28 = vcombine.high %v6252_v23, %v6256_v51  ;;  %v6372_v21 = vld [vmem:[#allocation18 + $0x610] sm:$0xff]  ;;  %v6233_v31 = vld [vmem:[#allocation18 + $0x1b8] sm:$0xff] }
 0x90d   :  { %8080 = vmatpush2.bf16.msra.mxu1 %v15367_v52  ;;  %v15335_v52 = vcombine.low %v6388_v46, %v6392_v2  ;;  %v6376_v15 = vld [vmem:[#allocation18 + $0x630] sm:$0xff]  ;;  %v15185_v46 = vcombine.low %v6237_v58, %v6241_v10  ;;  %v6357_v2 = vld [vmem:[#allocation18 + $0x598] sm:$0xff] }
 0x90e   :  { %8081 = vmatprep.subr.bf16.mxu1 %v15360_v36  ;;  %v15328_v36 = vcombine.high %v6380_v16, %v6384_v63 }
 0x90f   :  { %8029 = vmatpush2.bf16.msra.mxu0 %v15231_v19  ;;  %v15199_v19 = vcombine.low %v6252_v23, %v6256_v51  ;;  %v19332_v23 = vpop.f32.mrf.mxu0  ;;  %v19334_v51 = vpop.f32.mrf.mxu1 }
 0x910   :  { %8030 = vmatprep.subr.bf16.mxu0 %v15224_v53  ;;  %v15192_v53 = vcombine.high %v6244_v6, %v6248_v18 }
 0x911   :  { %8082 = vmatpush2.bf16.msra.mxu1 %v15359_v9  ;;  %v15327_v9 = vcombine.low %v6380_v16, %v6384_v63  ;;  %v6225_v16 = vld [vmem:[#allocation18 + $0x178] sm:$0xff]  ;;  %v15313_v63 = vcombine.low %v6365_v45, %v6369_v20 }
 0x912   :  { %8083 = vmatprep.subr.bf16.mxu1 %v15352_v13  ;;  %v15320_v13 = vcombine.high %v6372_v21, %v6376_v15 }
 0x913   :  { %8031 = vmatpush2.bf16.msra.mxu0 %v15223_v0  ;;  %v15191_v0 = vcombine.low %v6244_v6, %v6248_v18 }
 0x914   :  { %8032 = vmatprep.subr.bf16.mxu0 %v15216_v37  ;;  %v15186_v37 = vcombine.high %v6237_v58, %v6241_v10 }
 0x915   :  { %8084 = vmatpush2.bf16.msra.mxu1 %v15351_v33  ;;  %v15319_v33 = vcombine.low %v6372_v21, %v6376_v15  ;;  %v6353_v21 = vld [vmem:[#allocation18 + $0x578] sm:$0xff] }
 0x916   :  { %8085 = vmatprep.subr.bf16.mxu1 %v15344_v25  ;;  %v15314_v25 = vcombine.high %v6365_v45, %v6369_v20 }
 0x917   :  { %8033 = vmatpush2.bf16.msra.mxu0 %v15215_v14  ;;  %v5357_v14 = vrot.slane %v19307_v48, %v18892_v49 }
 0x918   :  { %8034 = vmatprep.subr.bf16.mxu0 %v15208_v44  ;;  %v6361_v44 = vld [vmem:[#allocation18 + $0x5b8] sm:$0xff] }
 0x919   :  { %8086 = vmatpush2.bf16.msra.mxu1 %v15343_v27  ;;  %v15178_v27 = vcombine.high %v6229_v30, %v6233_v31  ;;  %v15306_v18 = vcombine.high %v6357_v2, %v6361_v44 }
 0x91a   :  { %8087 = vmatprep.subr.bf16.mxu1 %v15336_v24  ;;  %v5361_v24 = vrot.slane %v19307_v48, %v18895_v50 }
 0x91b   :  { %8035 = vmatpush2.bf16.msra.mxu0 %v15207_v12  ;;  %v6221_v12 = vld [vmem:[#allocation18 + $0x158] sm:$0xff] }
 0x91c   :  { %8036 = vmatprep.subr.bf16.mxu0 %v15200_v28  ;;  %v15170_v58 = vcombine.high %v6221_v12, %v6225_v16 }
 0x91d   :  { %8088 = vmatpush2.bf16.msra.mxu1 %v15335_v52 }
 0x91e   :  { %8089 = vmatprep.subr.bf16.mxu1 %v15328_v36  ;;  %v15177_v36 = vcombine.low %v6229_v30, %v6233_v31  ;;  %v15169_v31 = vcombine.low %v6221_v12, %v6225_v16  ;;  %v6333_v16 = vld [vmem:[#allocation18 + $0x4d8] sm:$0xff] }
 0x91f   :  { %8037 = vmatpush2.bf16.msra.mxu0 %v15199_v19  ;;  %v6349_v19 = vld [vmem:[#allocation18 + $0x558] sm:$0xff] }
 0x920   :  { %8038 = vmatprep.subr.bf16.mxu0 %v15192_v53 }
 0x921   :  { %8090 = vmatpush2.bf16.msra.mxu1 %v15327_v9 }
 0x922   :  { %8091 = vmatprep.subr.bf16.mxu1 %v15320_v13  ;;  %v6213_v13 = vld [vmem:[#allocation18 + $0x118] sm:$0xff] }
 0x923   :  { %8039 = vmatpush2.bf16.msra.mxu0 %v15191_v0  ;;  %v15305_v0 = vcombine.low %v6357_v2, %v6361_v44  ;;  %v6205_v2 = vld [vmem:[#allocation18 + $0xd8] sm:$0xff] }
 0x924   :  { %8114 = vmatprep.subr.bf16.mxu0 %v15186_v37  ;;  %v15298_v37 = vcombine.high %v6349_v19, %v6353_v21  ;;  %v6209_v44 = vld [vmem:[#allocation18 + $0xf8] sm:$0xff] }
 0x925   :  { %8092 = vmatpush2.bf16.msra.mxu1 %v15319_v33  ;;  %v6341_v33 = vld [vmem:[#allocation18 + $0x518] sm:$0xff] }
 0x926   :  { %v6126_v28 = vpop.f32.mrf.mxu0  ;;  %v6169_v6 = vpop.f32.mrf.mxu1  ;;  %8041 = vmatmul.mubr.bf16.vlgmr.msra.gmra.mxu0 %v19270_v61  ;;  %8167 = vmatprep.subr.bf16.mxu1 %v15314_v25  ;;  %v6217_v61 = vld [vmem:[#allocation18 + $0x138] sm:$0xff] }
 0x927   :  { %v6127_v52 = vadd.f32 %v6126_v28, %v5357_v14  ;;  %8115 = vmatpush1.bf16.msra.mxu0 %v15185_v46  ;;  %8050 = vmatprep.mubr.bf16.mxu0 %v19280_v35  ;;  %v15162_v46 = vcombine.high %v6213_v13, %v6217_v61  ;;  %v15161_v12 = vcombine.low %v6213_v13, %v6217_v61  ;;  %v6189_v61 = vld [vmem:[#allocation18 + $0x58] sm:$0xff] }
 0x928   :  { %v6128_v15 = vpop.f32.mrf.mxu0  ;;  %v6171_v53 = vpop.f32.mrf.mxu1  ;;  %8116 = vmatprep.subr.bf16.mxu0 %v15178_v27  ;;  %8094 = vmatmul.mubr.bf16.vlgmr.msra.gmra.mxu1 %v19275_v17  ;;  %v6345_v17 = vld [vmem:[#allocation18 + $0x538] sm:$0xff] }
 0x929   :  { %v19341_v10 = vadd.f32 %v6169_v6, %v6127_v52  ;;  %v6129_v9 = vadd.f32 %v6128_v15, %v5361_v24  ;;  %8168 = vmatpush1.bf16.msra.mxu1 %v15313_v63  ;;  %8103 = vmatprep.mubr.bf16.mxu1 %v19285_v42  ;;  %v15297_v42 = vcombine.low %v6349_v19, %v6353_v21  ;;  %v18060_v52 = vld [vmem:[%s19955_s8 + $0x4] ss:$16 sps:$4 sm:$0xff]   ;;  %v18061_v21 = vld [vmem:[%s19955_s8 + $0xc] ss:$16 sps:$4 sm:$0xff]  }
 0x92a   :  { %v6130_v45 = vpop.f32.mrf.mxu0  ;;  %v6173_v20 = vpop.f32.mrf.mxu1  ;;  %8169 = vmatprep.subr.bf16.mxu1 %v15306_v18  ;;  %v15290_v6 = vcombine.high %v6341_v33, %v6345_v17  ;;  %v6337_v18 = vld [vmem:[#allocation18 + $0x4f8] sm:$0xff] }
 0x92b   :  { %v19344_v35 = vadd.f32 %v6171_v53, %v6129_v9  ;;  %v6131_v30 = vadd.f32 %v6130_v45, %v5357_v14  ;;  %8117 = vmatpush1.bf16.msra.mxu0 %v15177_v36  ;;  %v6197_v36 = vld [vmem:[#allocation18 + $0x98] sm:$0xff]  ;;  %v15282_v15 = vcombine.high %v6333_v16, %v6337_v18  ;;  %v15153_v53 = vcombine.low %v6205_v2, %v6209_v44 }
 0x92c   :  { %v6132_v25 = vpop.f32.mrf.mxu0  ;;  %8118 = vmatprep.subr.bf16.mxu0 %v15170_v58  ;;  %v6175_v28 = vpop.f32.mrf.mxu1  ;;  %v6201_v19 = vld [vmem:[#allocation18 + $0xb8] sm:$0xff] }
 0x92d   :  { %v19346_v27 = vadd.f32 %v6173_v20, %v6131_v30  ;;  %v6133_v63 = vadd.f32 %v6132_v25, %v5361_v24  ;;  %8170 = vmatpush1.bf16.msra.mxu1 %v15305_v0  ;;  %v15154_v24 = vcombine.high %v6205_v2, %v6209_v44  ;;  %v6325_v58 = vld [vmem:[#allocation18 + $0x498] sm:$0xff]  ;;  %v15146_v13 = vcombine.high %v6197_v36, %v6201_v19 }
 0x92e   :  { %8171 = vmatprep.subr.bf16.mxu1 %v15298_v37  ;;  %8051 = vmatmul.mubr.bf16.gmra.mxu0 %v19294_v47  ;;  %v15289_v47 = vcombine.low %v6341_v33, %v6345_v17  ;;  %v6329_v9 = vld [vmem:[#allocation18 + $0x4b8] sm:$0xff]  ;;  %v15145_v20 = vcombine.low %v6197_v36, %v6201_v19 }
 0x92f   :  { %v19349_v14 = vadd.f32 %v6175_v28, %v6133_v63  ;;  %8119 = vmatpush1.bf16.msra.mxu0 %v15169_v31  ;;  %8146 = vmatprep.mubr.bf16.mxu0 %v18060_v52  ;;  %v6193_v0 = vld [vmem:[#allocation18 + $0x78] sm:$0xff]  ;;  %v15274_v45 = vcombine.high %v6325_v58, %v6329_v9  ;;  %v15273_v25 = vcombine.low %v6325_v58, %v6329_v9 }
 0x930   :  { %8120 = vmatprep.subr.bf16.mxu0 %v15162_v46  ;;  %8104 = vmatmul.mubr.bf16.gmra.mxu1 %v19299_v22  ;;  %v15281_v22 = vcombine.low %v6333_v16, %v6337_v18  ;;  %v6317_v37 = vld [vmem:[#allocation18 + $0x458] sm:$0xff]  ;;  %v15138_v31 = vcombine.high %v6189_v61, %v6193_v0  ;;  %v15137_v63 = vcombine.low %v6189_v61, %v6193_v0 }
 0x931   :  { %8172 = vmatpush1.bf16.msra.mxu1 %v15297_v42  ;;  %8199 = vmatprep.mubr.bf16.mxu1 %v18061_v21  ;;  %v6321_v30 = vld [vmem:[#allocation18 + $0x478] sm:$0xff] }
 0x932   :  { %8173 = vmatprep.subr.bf16.mxu1 %v15290_v6  ;;  %v6181_v33 = vld [vmem:[#allocation18 + $0x18] sm:$0xff]  ;;  %v15266_v46 = vcombine.high %v6317_v37, %v6321_v30 }
 0x933   :  { %8121 = vmatpush1.bf16.msra.mxu0 %v15161_v12  ;;  %v6185_v17 = vld [vmem:[#allocation18 + $0x38] sm:$0xff]  ;;  %v15265_v12 = vcombine.low %v6317_v37, %v6321_v30 }
 0x934   :  { %8122 = vmatprep.subr.bf16.mxu0 %v15154_v24  ;;  %v6309_v2 = vld [vmem:[#allocation18 + $0x418] sm:$0xff]  ;;  %v15130_v42 = vcombine.high %v6181_v33, %v6185_v17  ;;  %v15129_v18 = vcombine.low %v6181_v33, %v6185_v17 }
 0x935   :  { %8174 = vmatpush1.bf16.msra.mxu1 %v15289_v47  ;;  %v6313_v44 = vld [vmem:[#allocation18 + $0x438] sm:$0xff] }
 0x936   :  { %8175 = vmatprep.subr.bf16.mxu1 %v15282_v15  ;;  %v6301_v28 = vld [vmem:[#allocation18 + $0x3d8] sm:$0xff]  ;;  %v15258_v16 = vcombine.high %v6309_v2, %v6313_v44  ;;  %v15257_v21 = vcombine.low %v6309_v2, %v6313_v44 }
 0x937   :  { %8123 = vmatpush1.bf16.msra.mxu0 %v15153_v53  ;;  %v6305_v6 = vld [vmem:[#allocation18 + $0x3f8] sm:$0xff] }
 0x938   :  { %8124 = vmatprep.subr.bf16.mxu0 %v15146_v13  ;;  %v6429_v52 = vld [vmem:[#allocation18 + $0x7d8] sm:$0xff]  ;;  %v15250_v36 = vcombine.high %v6301_v28, %v6305_v6  ;;  %v15249_v53 = vcombine.low %v6301_v28, %v6305_v6 }
 0x939   :  { %8176 = vmatpush1.bf16.msra.mxu1 %v15281_v22  ;;  %v6433_v24 = vld [vmem:[#allocation18 + $0x7f8] sm:$0xff] }
 0x93a   :  { %8177 = vmatprep.subr.bf16.mxu1 %v15274_v45  ;;  %v6293_v19 = vld [vmem:[#allocation18 + $0x398] sm:$0xff]  ;;  %v15378_v15 = vcombine.high %v6429_v52, %v6433_v24  ;;  %v15377_v22 = vcombine.low %v6429_v52, %v6433_v24 }
 0x93b   :  { %8125 = vmatpush1.bf16.msra.mxu0 %v15145_v20  ;;  %v6297_v47 = vld [vmem:[#allocation18 + $0x3b8] sm:$0xff] }
 0x93c   :  { %8126 = vmatprep.subr.bf16.mxu0 %v15138_v31  ;;  %v6421_v58 = vld [vmem:[#allocation18 + $0x798] sm:$0xff]  ;;  %v15242_v13 = vcombine.high %v6293_v19, %v6297_v47  ;;  %v15241_v20 = vcombine.low %v6293_v19, %v6297_v47 }
 0x93d   :  { %8178 = vmatpush1.bf16.msra.mxu1 %v15273_v25  ;;  %v6425_v9 = vld [vmem:[#allocation18 + $0x7b8] sm:$0xff] }
 0x93e   :  { %8179 = vmatprep.subr.bf16.mxu1 %v15266_v46  ;;  %v6285_v61 = vld [vmem:[#allocation18 + $0x358] sm:$0xff]  ;;  %v15370_v45 = vcombine.high %v6421_v58, %v6425_v9  ;;  %v15369_v25 = vcombine.low %v6421_v58, %v6425_v9 }
 0x93f   :  { %8127 = vmatpush1.bf16.msra.mxu0 %v15137_v63  ;;  %v6289_v0 = vld [vmem:[#allocation18 + $0x378] sm:$0xff] }
 0x940   :  { %8128 = vmatprep.subr.bf16.mxu0 %v15130_v42  ;;  %v6413_v37 = vld [vmem:[#allocation18 + $0x758] sm:$0xff]  ;;  %v15234_v31 = vcombine.high %v6285_v61, %v6289_v0  ;;  %v15233_v63 = vcombine.low %v6285_v61, %v6289_v0 }
 0x941   :  { %8180 = vmatpush1.bf16.msra.mxu1 %v15265_v12  ;;  %v6417_v30 = vld [vmem:[#allocation18 + $0x778] sm:$0xff] }
 0x942   :  { %8181 = vmatprep.subr.bf16.mxu1 %v15258_v16  ;;  %v6277_v33 = vld [vmem:[#allocation18 + $0x318] sm:$0xff]  ;;  %v15362_v46 = vcombine.high %v6413_v37, %v6417_v30  ;;  %v15361_v12 = vcombine.low %v6413_v37, %v6417_v30 }
 0x943   :  { %8129 = vmatpush1.bf16.msra.mxu0 %v15129_v18  ;;  %v6281_v17 = vld [vmem:[#allocation18 + $0x338] sm:$0xff] }
 0x944   :  { %8130 = vmatprep.subr.bf16.mxu0 %v15250_v36  ;;  %v6405_v2 = vld [vmem:[#allocation18 + $0x718] sm:$0xff]  ;;  %v15226_v42 = vcombine.high %v6277_v33, %v6281_v17  ;;  %v15225_v18 = vcombine.low %v6277_v33, %v6281_v17 }
 0x945   :  { %8182 = vmatpush1.bf16.msra.mxu1 %v15257_v21  ;;  %v6409_v44 = vld [vmem:[#allocation18 + $0x738] sm:$0xff] }
 0x946   :  { %8183 = vmatprep.subr.bf16.mxu1 %v15378_v15  ;;  %v6269_v28 = vld [vmem:[#allocation18 + $0x2d8] sm:$0xff]  ;;  %v15354_v16 = vcombine.high %v6405_v2, %v6409_v44  ;;  %v15353_v21 = vcombine.low %v6405_v2, %v6409_v44 }
 0x947   :  { %8131 = vmatpush2.bf16.msra.mxu0 %v15249_v53  ;;  %v6273_v6 = vld [vmem:[#allocation18 + $0x2f8] sm:$0xff] }
 0x948   :  { %8132 = vmatprep.subr.bf16.mxu0 %v15242_v13  ;;  %v6397_v52 = vld [vmem:[#allocation18 + $0x6d8] sm:$0xff]  ;;  %v15218_v36 = vcombine.high %v6269_v28, %v6273_v6  ;;  %v15217_v53 = vcombine.low %v6269_v28, %v6273_v6 }
 0x949   :  { %8184 = vmatpush2.bf16.msra.mxu1 %v15377_v22  ;;  %v6401_v24 = vld [vmem:[#allocation18 + $0x6f8] sm:$0xff] }
 0x94a   :  { %8185 = vmatprep.subr.bf16.mxu1 %v15370_v45  ;;  %v6261_v19 = vld [vmem:[#allocation18 + $0x298] sm:$0xff]  ;;  %v15346_v15 = vcombine.high %v6397_v52, %v6401_v24  ;;  %v15345_v22 = vcombine.low %v6397_v52, %v6401_v24 }
 0x94b   :  { %8133 = vmatpush2.bf16.msra.mxu0 %v15241_v20  ;;  %v6265_v47 = vld [vmem:[#allocation18 + $0x2b8] sm:$0xff] }
 0x94c   :  { %8134 = vmatprep.subr.bf16.mxu0 %v15234_v31  ;;  %v6389_v58 = vld [vmem:[#allocation18 + $0x698] sm:$0xff]  ;;  %v15210_v13 = vcombine.high %v6261_v19, %v6265_v47  ;;  %v15209_v20 = vcombine.low %v6261_v19, %v6265_v47  ;;  %v18062_v19 = vld [vmem:[%s19955_s8] ss:$16 sps:$4 sm:$0xff]  }
 0x94d   :  { %8186 = vmatpush2.bf16.msra.mxu1 %v15369_v25  ;;  %v6393_v9 = vld [vmem:[#allocation18 + $0x6b8] sm:$0xff] }
 0x94e   :  { %8187 = vmatprep.subr.bf16.mxu1 %v15362_v46  ;;  %v6253_v61 = vld [vmem:[#allocation18 + $0x258] sm:$0xff]  ;;  %v15338_v45 = vcombine.high %v6389_v58, %v6393_v9  ;;  %v15337_v25 = vcombine.low %v6389_v58, %v6393_v9  ;;  %v18065_v9 = vld [vmem:[%s19955_s8 + $0x2c] ss:$16 sps:$4 sm:$0xff]  }
 0x94f   :  { %8135 = vmatpush2.bf16.msra.mxu0 %v15233_v63  ;;  %v6257_v0 = vld [vmem:[#allocation18 + $0x278] sm:$0xff] }
 0x950   :  { %8136 = vmatprep.subr.bf16.mxu0 %v15226_v42  ;;  %v6381_v37 = vld [vmem:[#allocation18 + $0x658] sm:$0xff]  ;;  %v15202_v31 = vcombine.high %v6253_v61, %v6257_v0  ;;  %v15201_v63 = vcombine.low %v6253_v61, %v6257_v0 }
 0x951   :  { %8188 = vmatpush2.bf16.msra.mxu1 %v15361_v12  ;;  %v6385_v30 = vld [vmem:[#allocation18 + $0x678] sm:$0xff] }
 0x952   :  { %8189 = vmatprep.subr.bf16.mxu1 %v15354_v16  ;;  %v6245_v33 = vld [vmem:[#allocation18 + $0x218] sm:$0xff]  ;;  %v15330_v46 = vcombine.high %v6381_v37, %v6385_v30  ;;  %v15329_v28 = vcombine.low %v6381_v37, %v6385_v30  ;;  %v6041_v30 = vadd.f32 %v19309_v1, %v19321_v11  ;;  %v19401_v11 = vrot.slane %v19307_v48, %v18941_v8 }
 0x953   :  { %8137 = vmatpush2.bf16.msra.mxu0 %v15225_v18  ;;  %v6249_v17 = vld [vmem:[#allocation18 + $0x238] sm:$0xff]  ;;  %v19358_v18 = vld [vmem:[#allocation19] sm:$0xff] }
 0x954   :  { %8138 = vmatprep.subr.bf16.mxu0 %v15218_v36  ;;  %v6373_v2 = vld [vmem:[#allocation18 + $0x618] sm:$0xff]  ;;  %v15194_v42 = vcombine.high %v6245_v33, %v6249_v17  ;;  %v15193_v12 = vcombine.low %v6245_v33, %v6249_v17  ;;  %v19363_v52 = vrot.slane %v19358_v18, %v18870_v29  ;;  %v6084_v1 = vadd.f32 %v19311_v56, %v6041_v30 }
 0x955   :  { %8190 = vmatpush2.bf16.msra.mxu1 %v15353_v21  ;;  %v6377_v44 = vld [vmem:[#allocation18 + $0x638] sm:$0xff]  ;;  %v6451_v30 = vrot.slane %v19358_v18, %v18895_v50 }
 0x956   :  { %8191 = vmatprep.subr.bf16.mxu1 %v15346_v15  ;;  %v15322_v6 = vcombine.high %v6373_v2, %v6377_v44  ;;  %v15321_v16 = vcombine.low %v6373_v2, %v6377_v44  ;;  %v18063_v47 = vld [vmem:[%s19955_s8 + $0x24] ss:$16 sps:$4 sm:$0xff]  }
 0x957   :  { %8139 = vmatpush2.bf16.msra.mxu0 %v15217_v53  ;;  %v18064_v53 = vld [vmem:[%s19955_s8 + $0x8] ss:$16 sps:$4 sm:$0xff]  }
 0x958   :  { %8140 = vmatprep.subr.bf16.mxu0 %v15210_v13 }
 0x959   :  { %8192 = vmatpush2.bf16.msra.mxu1 %v15345_v22 }
 0x95a   :  { %8193 = vmatprep.subr.bf16.mxu1 %v15338_v45 }
 0x95b   :  { %8141 = vmatpush2.bf16.msra.mxu0 %v15209_v20  ;;  %v19382_v20 = vrot.slane %v19358_v18, %v18941_v8 }
 0x95c   :  { %8142 = vmatprep.subr.bf16.mxu0 %v15202_v31  ;;  %v18066_v31 = vld [vmem:[%s19955_s8 + $0x20] ss:$16 sps:$4 sm:$0xff]  }
 0x95d   :  { %8194 = vmatpush2.bf16.msra.mxu1 %v15337_v25  ;;  %v18067_v25 = vld [vmem:[%s19955_s8 + $0x28] ss:$16 sps:$4 sm:$0xff]   ;;  %s19528_s8 = sld [smem:[#allocation24 + $0x1]] }
 0x95e   :  { %8195 = vmatprep.subr.bf16.mxu1 %v15330_v46 }
 0x95f   :  { %8143 = vmatpush2.bf16.msra.mxu0 %v15201_v63 }
 0x960   :  { %8144 = vmatprep.subr.bf16.mxu0 %v15194_v42  ;;  %v8222_v42 = vpack.c.bf16 %v6084_v1, %v6084_v1 }
 0x961   :  { %8196 = vmatpush2.bf16.msra.mxu1 %v15329_v28  ;;  %v6043_v28 = vadd.f32 %v19314_v55, %v19401_v11 }
 0x962   :  { %8197 = vmatprep.subr.bf16.mxu1 %v15322_v6 }
 0x963   :  { %8145 = vmatpush2.bf16.msra.mxu0 %v15193_v12  ;;  %v6086_v56 = vadd.f32 %v19316_v59, %v6043_v28 }
 0x964   :  { %16262 = vmatprep.subr.bf16.mxu0 %v18597_v32 }
 0x965   :  { %8198 = vmatpush2.bf16.msra.mxu1 %v15321_v16  ;;  %v8321_v48 = vpack.c.bf16 %v6086_v56, %v6086_v56 }
 0x966   :  { %v7830_v24 = vpop.f32.mrf.mxu0  ;;  %v7883_v36 = vpop.f32.mrf.mxu1  ;;  %8147 = vmatmul.mubr.bf16.vlgmr.msra.gmra.mxu0 %v18062_v19  ;;  %16268 = vmatprep.subr.bf16.mxu1 %v18597_v32 }
 0x967   :  { %8156 = vmatprep.mubr.bf16.mxu0 %v18063_v47  ;;  %v7831_v58 = vadd.f32 %v7830_v24, %v19363_v52 }
 0x968   :  { %v7832_v21 = vpop.f32.mrf.mxu0  ;;  %v7885_v15 = vpop.f32.mrf.mxu1  ;;  %8200 = vmatmul.mubr.bf16.vlgmr.msra.gmra.mxu1 %v18064_v53 }
 0x969   :  { %8209 = vmatprep.mubr.bf16.mxu1 %v18065_v9  ;;  %v7884_v45 = vadd.f32 %v7883_v36, %v7831_v58  ;;  %v7833_v46 = vadd.f32 %v7832_v21, %v19382_v20 }
 0x96a   :  { %v7834_v13 = vpop.f32.mrf.mxu0  ;;  %v7887_v0 = vpop.f32.mrf.mxu1 }
 0x96b   :  { %v7835_v61 = vadd.f32 %v7834_v13, %v19363_v52  ;;  %v7886_v44 = vadd.f32 %v7885_v15, %v7833_v46  ;;  %v6447_v15 = vrot.slane %v19358_v18, %v18892_v49 }
 0x96c   :  { %v7836_v22 = vpop.f32.mrf.mxu0  ;;  %v7889_v63 = vpop.f32.mrf.mxu1 }
 0x96d   :  { %v7888_v37 = vadd.f32 %v7887_v0, %v7835_v61  ;;  %v7837_v17 = vadd.f32 %v7836_v22, %v19382_v20 }
 0x96e   :  { %8157 = vmatmul.mubr.bf16.gmra.mxu0 %v18066_v31  ;;  %v7840_v12 = vpop.f32.mrf.mxu0  ;;  %v7893_v16 = vpop.f32.mrf.mxu1 }
 0x96f   :  { %v8223_v33 = vpack.c.bf16 %v7888_v37, %v7884_v45  ;;  %16264 = vmatprep.mubr.msk.bf16.mxu0 %vm18598_vm0, %v18597_v32  ;;  %v7890_v2 = vadd.f32 %v7889_v63, %v7837_v17 }
 0x970   :  { %8210 = vmatmul.mubr.bf16.gmra.mxu1 %v18067_v25  ;;  %v7842_v24 = vpop.f32.mrf.mxu0  ;;  %v7895_v36 = vpop.f32.mrf.mxu1 }
 0x971   :  { %16263 = vmatpush3.bf16.xpose.msra.mxu0 %v8223_v33  ;;  %16270 = vmatprep.mubr.msk.bf16.mxu1 %vm18598_vm0, %v18597_v32  ;;  %v8322_v6 = vpack.c.bf16 %v7890_v2, %v7886_v44  ;;  %v8420_v2 = vpack.c.bf16 %v19341_v10, %v19341_v10  ;;  %v7841_v44 = vadd.f32 %v7840_v12, %v19363_v52 }
 0x972   :  { %16274 = vmatprep.subr.bf16.mxu0 %v18597_v32  ;;  %v7844_v55 = vpop.f32.mrf.mxu0  ;;  %v7897_v19 = vpop.f32.mrf.mxu1  ;;  %v7843_v10 = vadd.f32 %v7842_v24, %v19382_v20  ;;  %v6047_v24 = vadd.f32 %v19332_v23, %v19401_v11 }
 0x974   :  { %v7846_v47 = vpop.f32.mrf.mxu0  ;;  %v7899_v21 = vpop.f32.mrf.mxu1 }
 0x975   :  { %v7847_v12 = vadd.f32 %v7846_v47, %v19382_v20 }
 0x978   :  { %16265 = vmatmul.mubr.bf16.vlgmr.msra.gmra.mxu0 %v8222_v42  ;;  %v7845_v42 = vadd.f32 %v7844_v55, %v19363_v52 }
 0x979   :  { %16275 = vmatpush3.bf16.xpose.msra.mxu0 %v8322_v6  ;;  %16276 = vmatprep.mubr.msk.bf16.mxu0 %vm18598_vm0, %v18597_v32  ;;  %v7894_v6 = vadd.f32 %v7893_v16, %v7841_v44  ;;  %v7896_v16 = vadd.f32 %v7895_v36, %v7843_v10 }
 0x97a   :  { %16286 = vmatprep.subr.bf16.mxu0 %v18597_v32  ;;  %v7898_v56 = vadd.f32 %v7897_v19, %v7845_v42  ;;  %v7900_v19 = vadd.f32 %v7899_v21, %v7847_v12 }
 0x97c   :  { %v8721_v47 = vpack.c.bf16 %v7900_v19, %v7896_v16 }
 0x980   :  { %16277 = vmatmul.mubr.bf16.vlgmr.msra.gmra.mxu0 %v8321_v48  ;;  %v8519_v48 = vpack.c.bf16 %v19344_v35, %v19344_v35  ;;  %v8622_v35 = vpack.c.bf16 %v19324_v34, %v19324_v34 }
 0x981   :  { %16288 = vmatprep.mubr.msk.bf16.mxu0 %vm18598_vm0, %v18597_v32 }
 0x9a6   :  { %v7936_v53 = vpop.f32.mrf.mxu0  ;;  %v7989_v59 = vpop.f32.mrf.mxu1 }
 0x9a7   :  { %v7937_v13 = vadd.f32 %v7936_v53, %v6447_v15 }
 0x9a8   :  { %v7938_v58 = vpop.f32.mrf.mxu0  ;;  %v7991_v9 = vpop.f32.mrf.mxu1 }
 0x9a9   :  { %v7990_v37 = vadd.f32 %v7989_v59, %v7937_v13  ;;  %v7939_v25 = vadd.f32 %v7938_v58, %v6451_v30  ;;  %v8623_v59 = vpack.c.bf16 %v7898_v56, %v7894_v6 }
 0x9aa   :  { %v7940_v61 = vpop.f32.mrf.mxu0  ;;  %v7993_v22 = vpop.f32.mrf.mxu1 }
 0x9ab   :  { %v7941_v0 = vadd.f32 %v7940_v61, %v6447_v15  ;;  %v7992_v63 = vadd.f32 %v7991_v9, %v7939_v25  ;;  %v6090_v61 = vadd.f32 %v19334_v51, %v6047_v24  ;;  %v6459_v25 = vrot.slane %v19358_v18, %v18923_v26 }
 0x9ac   :  { %v7942_v45 = vpop.f32.mrf.mxu0  ;;  %v7995_v46 = vpop.f32.mrf.mxu1 }
 0x9ad   :  { %v7994_v31 = vadd.f32 %v7993_v22, %v7941_v0  ;;  %v7943_v17 = vadd.f32 %v7942_v45, %v6451_v30  ;;  %v8720_v22 = vpack.c.bf16 %v6090_v61, %v6090_v61 }
 0x9ae   :  { %v7946_v53 = vpop.f32.mrf.mxu0  ;;  %v7999_v55 = vpop.f32.mrf.mxu1 }
 0x9af   :  { %v8421_v33 = vpack.c.bf16 %v7994_v31, %v7990_v37  ;;  %v7996_v1 = vadd.f32 %v7995_v46, %v7943_v17  ;;  %v7947_v9 = vadd.f32 %v7946_v53, %v6447_v15  ;;  %v8819_v31 = vpack.c.bf16 %v19346_v27, %v19346_v27 }
 0x9b0   :  { %v7948_v52 = vpop.f32.mrf.mxu0  ;;  %v8001_v20 = vpop.f32.mrf.mxu1  ;;  %v6455_v17 = vrot.slane %v19358_v18, %v18919_v54 }
 0x9b1   :  { %16287 = vmatpush3.bf16.xpose.msra.mxu0 %v8421_v33  ;;  %v8520_v28 = vpack.c.bf16 %v7996_v1, %v7992_v63  ;;  %v8000_v21 = vadd.f32 %v7999_v55, %v7947_v9  ;;  %v7949_v23 = vadd.f32 %v7948_v52, %v6451_v30 }
 0x9b2   :  { %16298 = vmatprep.subr.bf16.mxu0 %v18597_v32  ;;  %v7950_v58 = vpop.f32.mrf.mxu0  ;;  %v8003_v36 = vpop.f32.mrf.mxu1 }
 0x9b3   :  { %v7951_v13 = vadd.f32 %v7950_v58, %v6447_v15  ;;  %v8002_v15 = vadd.f32 %v8001_v20, %v7949_v23 }
 0x9b4   :  { %v7952_v0 = vpop.f32.mrf.mxu0  ;;  %v8005_v37 = vpop.f32.mrf.mxu1 }
 0x9b5   :  { %v8004_v34 = vadd.f32 %v8003_v36, %v7951_v13  ;;  %v7953_v11 = vadd.f32 %v7952_v0, %v6451_v30  ;;  %v8918_v30 = vpack.c.bf16 %v19349_v14, %v19349_v14 }
 0x9b7   :  { %v8820_v45 = vpack.c.bf16 %v8004_v34, %v8000_v21  ;;  %v8006_v51 = vadd.f32 %v8005_v37, %v7953_v11  ;;  %v6463_v37 = vrot.slane %v19358_v18, %v18954_v38 }
 0x9b8   :  { %16289 = vmatmul.mubr.bf16.vlgmr.msra.gmra.mxu0 %v8420_v2 }
 0x9b9   :  { %16299 = vmatpush3.bf16.xpose.msra.mxu0 %v8520_v28  ;;  %16300 = vmatprep.mubr.msk.bf16.mxu0 %vm18598_vm0, %v18597_v32  ;;  %v8919_v33 = vpack.c.bf16 %v8006_v51, %v8002_v15  ;;  %v6467_v15 = vrot.slane %v19358_v18, %v18958_v62 }
 0x9ba   :  { %16310 = vmatprep.subr.bf16.mxu0 %v18597_v32 }
 0x9c0   :  { %16301 = vmatmul.mubr.bf16.vlgmr.msra.gmra.mxu0 %v8519_v48 }
 0x9c1   :  { %16311 = vmatpush3.bf16.xpose.msra.mxu0 %v8623_v59  ;;  %16312 = vmatprep.mubr.msk.bf16.mxu0 %vm18598_vm0, %v18597_v32 }
 0x9c2   :  { %16322 = vmatprep.subr.bf16.mxu0 %v18597_v32 }
 0x9c8   :  { %16313 = vmatmul.mubr.bf16.vlgmr.msra.gmra.mxu0 %v8622_v35 }
 0x9c9   :  { %16323 = vmatpush3.bf16.xpose.msra.mxu0 %v8721_v47  ;;  %16324 = vmatprep.mubr.msk.bf16.mxu0 %vm18598_vm0, %v18597_v32 }
 0x9ca   :  { %16334 = vmatprep.subr.bf16.mxu0 %v18597_v32 }
 0x9d0   :  { %16325 = vmatmul.mubr.bf16.vlgmr.msra.gmra.mxu0 %v8720_v22 }
 0x9d1   :  { %16335 = vmatpush3.bf16.xpose.msra.mxu0 %v8820_v45  ;;  %16336 = vmatprep.mubr.msk.bf16.mxu0 %vm18598_vm0, %v18597_v32 }
 0x9d2   :  { %16346 = vmatprep.subr.bf16.mxu0 %v18597_v32 }
 0x9d8   :  { %16337 = vmatmul.mubr.bf16.vlgmr.msra.gmra.mxu0 %v8819_v31 }
 0x9d9   :  { %16347 = vmatpush3.bf16.xpose.msra.mxu0 %v8919_v33  ;;  %16348 = vmatprep.mubr.msk.bf16.mxu0 %vm18598_vm0, %v18597_v32 }
 0x9e0   :  { %16349 = vmatmul.mubr.bf16.vlgmr.msra.gmra.mxu0 %v8918_v30 }
 0x9e6   :  { %v8042_v46 = vpop.f32.mrf.mxu0 }
 0x9e7   :  { %v8043_v1 = vadd.f32 %v8042_v46, %v6455_v17 }
 0x9e8   :  { %v8044_v63 = vpop.f32.mrf.mxu0  ;;  %v8095_v27 = vpop.f32.mrf.mxu1 }
 0x9e9   :  { %v8045_v2 = vadd.f32 %v8044_v63, %v6459_v25  ;;  %v8096_v28 = vadd.f32 %v8095_v27, %v8043_v1 }
 0x9ea   :  { %v8046_v44 = vpop.f32.mrf.mxu0  ;;  %v8097_v42 = vpop.f32.mrf.mxu1 }
 0x9eb   :  { %v8047_v6 = vadd.f32 %v8046_v44, %v6455_v17  ;;  %v19452_v56 = vadd.f32 %v8097_v42, %v8045_v2 }
 0x9ec   :  { %v8048_v48 = vpop.f32.mrf.mxu0  ;;  %v8099_v14 = vpop.f32.mrf.mxu1 }
 0x9ed   :  { %v8049_v53 = vadd.f32 %v8048_v48, %v6459_v25  ;;  %v8100_v10 = vadd.f32 %v8099_v14, %v8047_v6 }
 0x9ee   :  { %v8101_v12 = vpop.f32.mrf.mxu1  ;;  %v8052_v59 = vpop.f32.mrf.mxu0 }
 0x9ef   :  { %v8225_v52 = vpack.c.bf16 %v8100_v10, %v8096_v28  ;;  %v19454_v55 = vadd.f32 %v8101_v12, %v8049_v53  ;;  %v8053_v16 = vadd.f32 %v8052_v59, %v6455_v17 }
 0x9f0   :  { %v8054_v19 = vpop.f32.mrf.mxu0  ;;  %v8105_v35 = vpop.f32.mrf.mxu1 }
 0x9f1   :  { %v8323_v24 = vpack.c.bf16 %v19454_v55, %v19452_v56  ;;  %16269 = vmatpush3.bf16.msra.mxu1 %v8225_v52  ;;  %v8055_v58 = vadd.f32 %v8054_v19, %v6459_v25  ;;  %v19458_v20 = vadd.f32 %v8105_v35, %v8053_v16 }
 0x9f2   :  { %v8056_v47 = vpop.f32.mrf.mxu0  ;;  %v8107_v9 = vpop.f32.mrf.mxu1  ;;  %16280 = vmatprep.subr.bf16.mxu1 %v18597_v32 }
 0x9f3   :  { %v8057_v13 = vadd.f32 %v8056_v47, %v6455_v17  ;;  %v19461_v61 = vadd.f32 %v8107_v9, %v8055_v58 }
 0x9f4   :  { %v8058_v36 = vpop.f32.mrf.mxu0  ;;  %v8109_v21 = vpop.f32.mrf.mxu1 }
 0x9f5   :  { %v8059_v34 = vadd.f32 %v8058_v36, %v6459_v25  ;;  %v19463_v0 = vadd.f32 %v8109_v21, %v8057_v13 }
 0x9f6   :  { %v8111_v22 = vpop.f32.mrf.mxu1 }
 0x9f7   :  { %v8624_v23 = vpack.c.bf16 %v19463_v0, %v19458_v20  ;;  %v19467_v11 = vadd.f32 %v8111_v22, %v8059_v34  ;;  %v17371_v0 = vld [vmem:[#allocation21 + $0xe0] ss:$16 sps:$4 sm:$0xff]  }
 0x9f9   :  { %v8722_v45 = vpack.c.bf16 %v19467_v11, %v19461_v61  ;;  %v17382_v61 = vld [vmem:[#allocation21 + $0x84] ss:$16 sps:$4 sm:$0xff]   ;;  %v17380_v11 = vld [vmem:[#allocation21 + $0x80] ss:$16 sps:$4 sm:$0xff]  }
 0xa26   :  { %v8148_v51 = vpop.f32.mrf.mxu0 }
 0xa27   :  { %v8149_v31 = vadd.f32 %v8148_v51, %v6463_v37 }
 0xa28   :  { %v8150_v33 = vpop.f32.mrf.mxu0  ;;  %v8201_v30 = vpop.f32.mrf.mxu1 }
 0xa29   :  { %v8151_v17 = vadd.f32 %v8150_v33, %v6467_v15  ;;  %v19475_v63 = vadd.f32 %v8201_v30, %v8149_v31 }
 0xa2a   :  { %v8152_v25 = vpop.f32.mrf.mxu0  ;;  %v8203_v46 = vpop.f32.mrf.mxu1 }
 0xa2b   :  { %v8153_v1 = vadd.f32 %v8152_v25, %v6463_v37  ;;  %v19477_v42 = vadd.f32 %v8203_v46, %v8151_v17 }
 0xa2c   :  { %v8154_v27 = vpop.f32.mrf.mxu0  ;;  %v8205_v2 = vpop.f32.mrf.mxu1 }
 0xa2d   :  { %v8155_v44 = vadd.f32 %v8154_v27, %v6467_v15  ;;  %v19479_v28 = vadd.f32 %v8205_v2, %v8153_v1 }
 0xa2e   :  { %v8158_v6 = vpop.f32.mrf.mxu0  ;;  %v8207_v48 = vpop.f32.mrf.mxu1 }
 0xa2f   :  { %v8159_v18 = vadd.f32 %v8158_v6, %v6463_v37  ;;  %v8422_v14 = vpack.c.bf16 %v19479_v28, %v19475_v63  ;;  %v19483_v53 = vadd.f32 %v8207_v48, %v8155_v44  ;;  %v8417_v28 = vstv %s19528_s8 }
 0xa30   :  { %v8160_v10 = vpop.f32.mrf.mxu0  ;;  %v8211_v12 = vpop.f32.mrf.mxu1 }
 0xa31   :  { %v8161_v59 = vadd.f32 %v8160_v10, %v6467_v15  ;;  %v8521_v52 = vpack.c.bf16 %v19483_v53, %v19477_v42  ;;  %v19487_v58 = vadd.f32 %v8211_v12, %v8159_v18  ;;  %v8619_v53 = vstv %s19917_s15  ;;  %s18600_s15 = smov [#allocation40]  }
 0xa32   :  { %v8162_v16 = vpop.f32.mrf.mxu0  ;;  %v8213_v19 = vpop.f32.mrf.mxu1 }
 0xa33   :  { %v8163_v35 = vadd.f32 %v8162_v16, %v6463_v37  ;;  %v19490_v36 = vadd.f32 %v8213_v19, %v8161_v59  ;;  %v8221_v37 = vsel %vm8220_vm4, 0.0, %v18599_v7 }
 0xa34   :  { %v8164_v47 = vpop.f32.mrf.mxu0  ;;  %v8215_v9 = vpop.f32.mrf.mxu1 }
 0xa35   :  { %v8165_v13 = vadd.f32 %v8164_v47, %v6467_v15  ;;  %v19492_v21 = vadd.f32 %v8215_v9, %v8163_v35 }
 0xa36   :  { %v8217_v34 = vpop.f32.mrf.mxu1 }
 0xa37   :  { %v8821_v22 = vpack.c.bf16 %v19492_v21, %v19487_v58  ;;  %v19496_v51 = vadd.f32 %v8217_v34, %v8165_v13  ;;  %v17388_v58 = vld [vmem:[#allocation21 + $0x2e4] ss:$16 sps:$4 sm:$0xff]  }
 0xa38   :  { %v8260_v31 = vpop.f32.mrf.mxu0  ;;  %v17391_v21 = vld [vmem:[#allocation21 + $0x44] ss:$16 sps:$4 sm:$0xff]  }
 0xa39   :  { %v8266_v33 = vmul.f32 0.088388346, %v8260_v31  ;;  %v8920_v30 = vpack.c.bf16 %v19496_v51, %v19490_v36 }
 0xa3a   :  { %v16266_v15 = vpop.f32.mrf.mxu0 }
 0xa3b   :  { %v8267_v17 = vadd.f32 %v8266_v33, %v8221_v37 }
 0xa3c   :  { %v8263_v4 = vpop.f32.mrf.mxu0 }
 0xa3d   :  { %8268 = vmax.xlane.f32.xlu0 %v8267_v17 }
 0xa3e   :  { %v16267_v25 = vpop.f32.mrf.mxu0 }
 0xa40   :  { %v8358_v46 = vpop.f32.mrf.mxu0 }
 0xa41   :  { %v8364_v1 = vmul.f32 0.088388346, %v8358_v46 }
 0xa42   :  { %v16278_v27 = vpop.f32.mrf.mxu0 }
 0xa43   :  { %v8365_v2 = vadd.f32 %v8364_v1, %v8221_v37 }
 0xa44   :  { %v8361_v44 = vpop.f32.mrf.mxu0 }
 0xa45   :  { %8366 = vmax.xlane.f32.xlu1 %v8365_v2 }
 0xa46   :  { %v16279_v6 = vpop.f32.mrf.mxu0 }
 0xa78   :  { %v8457_v48 = vpop.f32.mrf.mxu0 }
 0xa79   :  { %v8463_v18 = vmul.f32 0.088388346, %v8457_v48 }
 0xa7a   :  { %v16290_v10 = vpop.f32.mrf.mxu0 }
 0xa7b   :  { %v8464_v7 = vadd.f32 %v8463_v18, %v8221_v37 }
 0xa7c   :  { %v8460_v12 = vpop.f32.mrf.mxu0 }
 0xa7d   :  { %8465 = vmax.xlane.f32.xlu0 %v8464_v7 }
 0xa7e   :  { %v16291_v59 = vpop.f32.mrf.mxu0 }
 0xa80   :  { %v8556_v16 = vpop.f32.mrf.mxu0 }
 0xa81   :  { %v8562_v19 = vmul.f32 0.088388346, %v8556_v16 }
 0xa82   :  { %v16302_v35 = vpop.f32.mrf.mxu0 }
 0xa83   :  { %v8563_v47 = vadd.f32 %v8562_v19, %v8221_v37 }
 0xa84   :  { %v8559_v9 = vpop.f32.mrf.mxu0 }
 0xa85   :  { %8564 = vmax.xlane.f32.xlu1 %v8563_v47 }
 0xa86   :  { %v16303_v13 = vpop.f32.mrf.mxu0 }
 0xa88   :  { %v8659_v34 = vpop.f32.mrf.mxu0 }
 0xa89   :  { %v8665_v31 = vmul.f32 0.088388346, %v8659_v34 }
 0xa8a   :  { %v16314_v33 = vpop.f32.mrf.mxu0 }
 0xa8b   :  { %v8666_v15 = vadd.f32 %v8665_v31, %v8221_v37 }
 0xa8c   :  { %v8662_v4 = vpop.f32.mrf.mxu0 }
 0xa8d   :  { %8667 = vmax.xlane.f32.xlu0 %v8666_v15 }
 0xa8e   :  { %v16315_v25 = vpop.f32.mrf.mxu0 }
 0xa90   :  { %v8757_v46 = vpop.f32.mrf.mxu0 }
 0xa91   :  { %v8763_v1 = vmul.f32 0.088388346, %v8757_v46 }
 0xa92   :  { %v16326_v27 = vpop.f32.mrf.mxu0 }
 0xa93   :  { %v8764_v44 = vadd.f32 %v8763_v1, %v8221_v37 }
 0xa94   :  { %v8760_v6 = vpop.f32.mrf.mxu0 }
 0xa95   :  { %8765 = vmax.xlane.f32.xlu1 %v8764_v44 }
 0xa96   :  { %v16327_v48 = vpop.f32.mrf.mxu0 }
 0xa98   :  { %v8856_v18 = vpop.f32.mrf.mxu0 }
 0xa99   :  { %v8862_v10 = vmul.f32 0.088388346, %v8856_v18 }
 0xa9a   :  { %v16338_v12 = vpop.f32.mrf.mxu0 }
 0xa9b   :  { %v8863_v59 = vadd.f32 %v8862_v10, %v8221_v37 }
 0xa9c   :  { %v8859_v16 = vpop.f32.mrf.mxu0 }
 0xa9d   :  { %8864 = vmax.xlane.f32.xlu0 %v8863_v59 }
 0xa9e   :  { %v16339_v19 = vpop.f32.mrf.mxu0 }
 0xaa0   :  { %v8955_v35 = vpop.f32.mrf.mxu0 }
 0xaa1   :  { %v8961_v9 = vmul.f32 0.088388346, %v8955_v35 }
 0xaa2   :  { %v16350_v13 = vpop.f32.mrf.mxu0 }
 0xaa3   :  { %v8962_v34 = vadd.f32 %v8961_v9, %v8221_v37 }
 0xaa4   :  { %v8958_v31 = vpop.f32.mrf.mxu0 }
 0xaa5   :  { %8963 = vmax.xlane.f32.xlu1 %v8962_v34 }
 0xaa6   :  { %v16351_v33 = vpop.f32.mrf.mxu0 }
 0xac6   :  { %v8269_v4 = vpop.xlane.xlu0 %8268 }
 0xac7   :  { %v8270_v25 = vsub.f32 %v8267_v17, %v8269_v4 }
 0xac9   :  { %v8271_v46 = vmul.f32 1.442695, %v8270_v25 }
 0xacb   :  { %18015 = vpow2.f32 %v8271_v46 }
 0xace   :  { %v8367_v1 = vpop.xlane.xlu1 %8366 }
 0xacf   :  { %v8368_v27 = vsub.f32 %v8365_v2, %v8367_v1 }
 0xad1   :  { %v8369_v6 = vmul.f32 1.442695, %v8368_v27 }
 0xad3   :  { %18017 = vpow2.f32 %v8369_v6 }
 0xad8   :  { %v18016_v48 = vpop.eup %18015 }
 0xad9   :  { %8273 = vadd.xlane.f32.xlu0 %v18016_v48 }
 0xae0   :  { %v18018_v18 = vpop.eup %18017 }
 0xae1   :  { %8371 = vadd.xlane.f32.xlu1 %v18018_v18 }
 0xb06   :  { %v8466_v10 = vpop.xlane.xlu0 %8465 }
 0xb07   :  { %v8467_v12 = vsub.f32 %v8464_v7, %v8466_v10 }
 0xb09   :  { %v8468_v16 = vmul.f32 1.442695, %v8467_v12 }
 0xb0b   :  { %18019 = vpow2.f32 %v8468_v16 }
 0xb0e   :  { %v8565_v37 = vpop.xlane.xlu1 %8564 }
 0xb0f   :  { %v8566_v19 = vsub.f32 %v8563_v47, %v8565_v37 }
 0xb11   :  { %v8567_v35 = vmul.f32 1.442695, %v8566_v19 }
 0xb13   :  { %18021 = vpow2.f32 %v8567_v35 }
 0xb16   :  { %v8668_v9 = vpop.xlane.xlu0 %8667 }
 0xb17   :  { %v8669_v17 = vsub.f32 %v8666_v15, %v8668_v9 }
 0xb18   :  { %v18020_v13 = vpop.eup %18019 }
 0xb19   :  { %v8670_v31 = vmul.f32 1.442695, %v8669_v17  ;;  %8470 = vadd.xlane.f32.xlu0 %v18020_v13 }
 0xb1b   :  { %18023 = vpow2.f32 %v8670_v31  ;;  %v8516_v31 = vstv %s19532_s22 }
 0xb1e   :  { %v8766_v2 = vpop.xlane.xlu1 %8765 }
 0xb1f   :  { %v8767_v33 = vsub.f32 %v8764_v44, %v8766_v2 }
 0xb20   :  { %v19501_v4 = vpop.eup %18021 }
 0xb21   :  { %v8768_v25 = vmul.f32 1.442695, %v8767_v33  ;;  %8569 = vadd.xlane.f32.xlu1 %v19501_v4 }
 0xb23   :  { %18025 = vpow2.f32 %v8768_v25 }
 0xb26   :  { %v8865_v7 = vpop.xlane.xlu0 %8864 }
 0xb27   :  { %v8866_v46 = vsub.f32 %v8863_v59, %v8865_v7  ;;  %v8615_v7 = vstv %s19534_s23 }
 0xb28   :  { %v19504_v1 = vpop.eup %18023 }
 0xb29   :  { %v8867_v47 = vmul.f32 1.442695, %v8866_v46  ;;  %8672 = vadd.xlane.f32.xlu0 %v19504_v1 }
 0xb2b   :  { %18027 = vpow2.f32 %v8867_v47 }
 0xb2e   :  { %v8964_v15 = vpop.xlane.xlu1 %8963 }
 0xb2f   :  { %v8965_v27 = vsub.f32 %v8962_v34, %v8964_v15 }
 0xb30   :  { %v19507_v6 = vpop.eup %18025 }
 0xb31   :  { %v8966_v10 = vmul.f32 1.442695, %v8965_v27  ;;  %8770 = vadd.xlane.f32.xlu1 %v19507_v6 }
 0xb33   :  { %18029 = vpow2.f32 %v8966_v10 }
 0xb38   :  { %v19510_v44 = vpop.eup %18027 }
 0xb39   :  { %8869 = vadd.xlane.f32.xlu0 %v19510_v44 }
 0xb40   :  { %v19513_v12 = vpop.eup %18029 }
 0xb41   :  { %8968 = vadd.xlane.f32.xlu1 %v19513_v12 }
 0xb62   :  { %v8274_v59 = vpop.xlane.xlu0 %8273 }
 0xb63   :  { %18031 = vrcp.f32 %v8274_v59 }
 0xb6a   :  { %v8372_v16 = vpop.xlane.xlu1 %8371 }
 0xb6b   :  { %18033 = vrcp.f32 %v8372_v16 }
 0xb70   :  { %v18032_v37 = vpop.eup %18031 }
 0xb71   :  { %v8276_v34 = vmul.f32 %v18032_v37, %v18016_v48 }
 0xb73   :  { %v8277_v19 = vpack.c.bf16 %v8276_v34, %v8276_v34 }
 0xb75   :  { %16271 = vmatmul.mubr.bf16.vlgmr.msra.gmra.mxu1 %v8277_v19  ;;  %v17374_v19 = vld [vmem:[#allocation21 + $0xc0] ss:$16 sps:$4 sm:$0xff]  }
 0xb76   :  { %16281 = vmatpush3.bf16.msra.mxu1 %v8323_v24  ;;  %16282 = vmatprep.mubr.msk.bf16.mxu1 %vm18598_vm0, %v18597_v32 }
 0xb77   :  { %16292 = vmatprep.subr.bf16.mxu1 %v18597_v32 }
 0xb78   :  { %v18034_v35 = vpop.eup %18033 }
 0xb79   :  { %v8374_v9 = vmul.f32 %v18034_v35, %v18018_v18  ;;  %v8319_v18 = vstv %s19530_s2  ;;  %v17379_v35 = vld [vmem:[#allocation21 + $0xa4] ss:$16 sps:$4 sm:$0xff]  }
 0xb7a   :  { %v8320_v33 = vmul.f32 %v8319_v18, %v8276_v34  ;;  %v17376_v34 = vld [vmem:[#allocation21 + $0xc4] ss:$16 sps:$4 sm:$0xff]  }
 0xb7b   :  { %v8375_v17 = vpack.c.bf16 %v8374_v9, %v8374_v9  ;;  %v8418_v2 = vmul.f32 %v8417_v28, %v8374_v9 }
 0xb7d   :  { %16283 = vmatmul.mubr.bf16.vlgmr.msra.gmra.mxu1 %v8375_v17  ;;  %v8419_v46 = vadd.f32 %v8418_v2, %v8320_v33  ;;  %v17389_v2 = vld [vmem:[#allocation21 + $0x40] ss:$16 sps:$4 sm:$0xff]  }
 0xb7e   :  { %16293 = vmatpush3.bf16.msra.mxu1 %v8422_v14  ;;  %16294 = vmatprep.mubr.msk.bf16.mxu1 %vm18598_vm0, %v18597_v32 }
 0xb7f   :  { %16304 = vmatprep.subr.bf16.mxu1 %v18597_v32 }
 0xba2   :  { %v8471_v56 = vpop.xlane.xlu0 %8470 }
 0xba3   :  { %18035 = vrcp.f32 %v8471_v56 }
 0xbaa   :  { %v8570_v55 = vpop.xlane.xlu1 %8569 }
 0xbab   :  { %18037 = vrcp.f32 %v8570_v55  ;;  %v17377_v55 = vld [vmem:[#allocation21 + $0xa0] ss:$16 sps:$4 sm:$0xff]  }
 0xbb0   :  { %v18036_v24 = vpop.eup %18035 }
 0xbb1   :  { %v8473_v63 = vmul.f32 %v18036_v24, %v18020_v13 }
 0xbb2   :  { %v8673_v14 = vpop.xlane.xlu0 %8672 }
 0xbb3   :  { %18039 = vrcp.f32 %v8673_v14  ;;  %v8474_v48 = vpack.c.bf16 %v8473_v63, %v8473_v63  ;;  %v8517_v13 = vmul.f32 %v8516_v31, %v8473_v63  ;;  %v17383_v14 = vld [vmem:[#allocation21 + $0x60] ss:$16 sps:$4 sm:$0xff]  }
 0xbb5   :  { %16295 = vmatmul.mubr.bf16.vlgmr.msra.gmra.mxu1 %v8474_v48  ;;  %v8518_v27 = vadd.f32 %v8517_v13, %v8419_v46  ;;  %v17397_v13 = vld [vmem:[#allocation21 + $0x24] ss:$16 sps:$4 sm:$0xff]   ;;  %v17386_v46 = vld [vmem:[#allocation21 + $0x2e0] ss:$16 sps:$4 sm:$0xff]  }
 0xbb6   :  { %16305 = vmatpush3.bf16.msra.mxu1 %v8521_v52  ;;  %16306 = vmatprep.mubr.msk.bf16.mxu1 %vm18598_vm0, %v18597_v32 }
 0xbb7   :  { %16316 = vmatprep.subr.bf16.mxu1 %v18597_v32 }
 0xbb8   :  { %v18038_v25 = vpop.eup %18037 }
 0xbb9   :  { %v8572_v47 = vmul.f32 %v18038_v25, %v19501_v4 }
 0xbba   :  { %v8771_v15 = vpop.xlane.xlu1 %8770 }
 0xbbb   :  { %18041 = vrcp.f32 %v8771_v15  ;;  %v8573_v10 = vpack.c.bf16 %v8572_v47, %v8572_v47  ;;  %v8616_v42 = vmul.f32 %v8615_v7, %v8572_v47  ;;  %v17394_v47 = vld [vmem:[#allocation21 + $0x2c4] ss:$16 sps:$4 sm:$0xff]   ;;  %v17392_v15 = vld [vmem:[#allocation21 + $0x2c0] ss:$16 sps:$4 sm:$0xff]  }
 0xbbd   :  { %16307 = vmatmul.mubr.bf16.vlgmr.msra.gmra.mxu1 %v8573_v10  ;;  %v8617_v52 = vadd.f32 %v8616_v42, %v8518_v27  ;;  %v17401_v10 = vld [vmem:[#allocation21] ss:$16 sps:$4 sm:$0xff]  }
 0xbbe   :  { %16317 = vmatpush3.bf16.msra.mxu1 %v8624_v23  ;;  %16318 = vmatprep.mubr.msk.bf16.mxu1 %vm18598_vm0, %v18597_v32  ;;  %v17373_v23 = vld [vmem:[#allocation21 + $0xe4] ss:$16 sps:$4 sm:$0xff]   ;;  %v17398_v42 = vld [vmem:[#allocation21 + $0x2a0] ss:$16 sps:$4 sm:$0xff]  }
 0xbbf   :  { %v8620_v4 = vadd.f32 %v8619_v53, %v8617_v52  ;;  %16328 = vmatprep.subr.bf16.mxu1 %v18597_v32  ;;  %9815 = vmatprep.subr.bf16.mxu0 %v17373_v23  ;;  %v17406_v52 = vld [vmem:[#allocation21 + $0x284] ss:$16 sps:$4 sm:$0xff]   ;;  %v17416_v23 = vld [vmem:[#allocation21 + $0x240] ss:$16 sps:$4 sm:$0xff]  }
 0xbc0   :  { %v18040_v59 = vpop.eup %18039  ;;  %9816 = vmatpush1.bf16.msra.mxu0 %v17371_v0  ;;  %v17418_v0 = vld [vmem:[#allocation21 + $0x244] ss:$16 sps:$4 sm:$0xff]  }
 0xbc1   :  { %8621 = vst [vmem:[%s19929_s27] sm:$0xff] %v8620_v4  ;;  %v8675_v16 = vmul.f32 %v18040_v59, %v19504_v1  ;;  %9817 = vmatprep.subr.bf16.mxu0 %v17376_v34  ;;  %v17407_v4 = vld [vmem:[#allocation21 + $0x1e0] ss:$16 sps:$4 sm:$0xff]   ;;  %v17415_v59 = vld [vmem:[#allocation21 + $0x1c4] ss:$16 sps:$4 sm:$0xff]  }
 0xbc2   :  { %v8870_v37 = vpop.xlane.xlu0 %8869  ;;  %v17419_v34 = vld [vmem:[#allocation21 + $0x1a0] ss:$16 sps:$4 sm:$0xff]  }
 0xbc3   :  { %18043 = vrcp.f32 %v8870_v37  ;;  %v8676_v20 = vpack.c.bf16 %v8675_v16, %v8675_v16  ;;  %v8719_v48 = vmul.f32 %v8675_v16, %v8319_v18  ;;  %v17403_v18 = vld [vmem:[#allocation21 + $0x4] ss:$16 sps:$4 sm:$0xff]   ;;  %v17413_v37 = vld [vmem:[#allocation21 + $0x1c0] ss:$16 sps:$4 sm:$0xff]  }
 0xbc4   :  { %9818 = vmatpush1.bf16.msra.mxu0 %v17374_v19  ;;  %v17412_v16 = vld [vmem:[#allocation21 + $0x264] ss:$16 sps:$4 sm:$0xff]  }
 0xbc5   :  { %16319 = vmatmul.mubr.bf16.vlgmr.msra.gmra.mxu1 %v8676_v20  ;;  %9819 = vmatprep.subr.bf16.mxu0 %v17379_v35  ;;  %v17410_v20 = vld [vmem:[#allocation21 + $0x260] ss:$16 sps:$4 sm:$0xff]   ;;  %v17421_v19 = vld [vmem:[#allocation21 + $0x1a4] ss:$16 sps:$4 sm:$0xff]  }
 0xbc6   :  { %16329 = vmatpush3.bf16.msra.mxu1 %v8722_v45  ;;  %16330 = vmatprep.mubr.msk.bf16.mxu1 %vm18598_vm0, %v18597_v32  ;;  %v17424_v35 = vld [vmem:[#allocation21 + $0x224] ss:$16 sps:$4 sm:$0xff]  }
 0xbc7   :  { %16340 = vmatprep.subr.bf16.mxu1 %v18597_v32 }
 0xbc8   :  { %v18042_v1 = vpop.eup %18041  ;;  %9820 = vmatpush1.bf16.msra.mxu0 %v17377_v55  ;;  %v17430_v55 = vld [vmem:[#allocation21 + $0x204] ss:$16 sps:$4 sm:$0xff]  }
 0xbc9   :  { %v8773_v9 = vmul.f32 %v18042_v1, %v19507_v6  ;;  %9821 = vmatprep.subr.bf16.mxu0 %v17382_v61  ;;  %v17385_v6 = vld [vmem:[#allocation21 + $0x64] ss:$16 sps:$4 sm:$0xff]   ;;  %v17422_v1 = vld [vmem:[#allocation21 + $0x220] ss:$16 sps:$4 sm:$0xff]  }
 0xbca   :  { %v8969_v17 = vpop.xlane.xlu1 %8968  ;;  %v17431_v61 = vld [vmem:[#allocation21 + $0x160] ss:$16 sps:$4 sm:$0xff]  }
 0xbcb   :  { %18045 = vrcp.f32 %v8969_v17  ;;  %v8774_v56 = vpack.c.bf16 %v8773_v9, %v8773_v9  ;;  %v17427_v17 = vld [vmem:[#allocation21 + $0x184] ss:$16 sps:$4 sm:$0xff]  }
 0xbcc   :  { %9822 = vmatpush1.bf16.msra.mxu0 %v17380_v11  ;;  %v17433_v11 = vld [vmem:[#allocation21 + $0x164] ss:$16 sps:$4 sm:$0xff]  }
 0xbcd   :  { %16331 = vmatmul.mubr.bf16.vlgmr.msra.gmra.mxu1 %v8774_v56  ;;  %9823 = vmatprep.subr.bf16.mxu0 %v17385_v6  ;;  %v17428_v56 = vld [vmem:[#allocation21 + $0x200] ss:$16 sps:$4 sm:$0xff]   ;;  %v17436_v6 = vld [vmem:[#allocation21 + $0x3e4] ss:$16 sps:$4 sm:$0xff]  }
 0xbce   :  { %16341 = vmatpush3.bf16.msra.mxu1 %v8821_v22  ;;  %16342 = vmatprep.mubr.msk.bf16.mxu1 %vm18598_vm0, %v18597_v32  ;;  %v8817_v22 = vmul.f32 %v8773_v9, %v8417_v28  ;;  %v17425_v9 = vld [vmem:[#allocation21 + $0x180] ss:$16 sps:$4 sm:$0xff]  }
 0xbcf   :  { %16352 = vmatprep.subr.bf16.mxu1 %v18597_v32 }
 0xbd0   :  { %v18044_v45 = vpop.eup %18043  ;;  %9824 = vmatpush1.bf16.msra.mxu0 %v17383_v14  ;;  %v8818_v28 = vadd.f32 %v8817_v22, %v8719_v48  ;;  %v17440_v14 = vld [vmem:[#allocation21 + $0x3c0] ss:$16 sps:$4 sm:$0xff]   ;;  %v17445_v22 = vld [vmem:[#allocation21 + $0x124] ss:$16 sps:$4 sm:$0xff]  }
 0xbd1   :  { %v8872_v24 = vmul.f32 %v18044_v45, %v19510_v44  ;;  %9825 = vmatprep.subr.bf16.mxu0 %v17391_v21  ;;  %v17434_v45 = vld [vmem:[#allocation21 + $0x3e0] ss:$16 sps:$4 sm:$0xff]  }
 0xbd2   :  { %v17443_v21 = vld [vmem:[#allocation21 + $0x120] ss:$16 sps:$4 sm:$0xff]  }
 0xbd3   :  { %v8873_v63 = vpack.c.bf16 %v8872_v24, %v8872_v24  ;;  %v8916_v44 = vmul.f32 %v8872_v24, %v8516_v31  ;;  %v17437_v24 = vld [vmem:[#allocation21 + $0x140] ss:$16 sps:$4 sm:$0xff]  }
 0xbd4   :  { %9826 = vmatpush1.bf16.msra.mxu0 %v17389_v2  ;;  %v17446_v48 = vld [vmem:[#allocation21 + $0x3a0] ss:$16 sps:$4 sm:$0xff]  }
 0xbd5   :  { %16343 = vmatmul.mubr.bf16.vlgmr.msra.gmra.mxu1 %v8873_v63  ;;  %v8917_v36 = vadd.f32 %v8916_v44, %v8818_v28  ;;  %9827 = vmatprep.subr.bf16.mxu0 %v17397_v13  ;;  %v17439_v63 = vld [vmem:[#allocation21 + $0x144] ss:$16 sps:$4 sm:$0xff]   ;;  %v17449_v2 = vld [vmem:[#allocation21 + $0x100] ss:$16 sps:$4 sm:$0xff]  }
 0xbd6   :  { %16353 = vmatpush3.bf16.msra.mxu1 %v8920_v30  ;;  %16354 = vmatprep.mubr.msk.bf16.mxu1 %vm18598_vm0, %v18597_v32  ;;  %v17395_v32 = vld [vmem:[#allocation21 + $0x20] ss:$16 sps:$4 sm:$0xff]   ;;  %v17448_v44 = vld [vmem:[#allocation21 + $0x3a4] ss:$16 sps:$4 sm:$0xff]  }
 0xbd7   :  { %9858 = vmatprep.subr.bf16.mxu1 %v17388_v58  ;;  %v17442_v58 = vld [vmem:[#allocation21 + $0x3c4] ss:$16 sps:$4 sm:$0xff]   ;;  %v17452_v13 = vld [vmem:[#allocation21 + $0x380] ss:$16 sps:$4 sm:$0xff]  }
 0xbd8   :  { %v18046_v33 = vpop.eup %18045  ;;  %9828 = vmatpush1.bf16.msra.mxu0 %v17395_v32  ;;  %v17454_v28 = vld [vmem:[#allocation21 + $0x384] ss:$16 sps:$4 sm:$0xff]  }
 0xbd9   :  { %v8971_v25 = vmul.f32 %v18046_v33, %v19513_v12  ;;  %v17400_v12 = vld [vmem:[#allocation21 + $0x2a4] ss:$16 sps:$4 sm:$0xff]   ;;  %9829 = vmatprep.subr.bf16.mxu0 %v17403_v18  ;;  %v17473_v18 = vld [vmem:[#allocation21 + $0x300] ss:$16 sps:$4 sm:$0xff]  }
 0xbda   :  { %v17451_v33 = vld [vmem:[#allocation21 + $0x104] ss:$16 sps:$4 sm:$0xff]  }
 0xbdb   :  { %v8972_v51 = vpack.c.bf16 %v8971_v25, %v8971_v25  ;;  %v9015_v30 = vmul.f32 %v8971_v25, %v8615_v7  ;;  %v17409_v7 = vld [vmem:[#allocation21 + $0x1e4] ss:$16 sps:$4 sm:$0xff]  }
 0xbdc   :  { %9830 = vmatpush1.bf16.msra.mxu0 %v17401_v10  ;;  %v17457_v25 = vld [vmem:[#allocation21 + $0x364] ss:$16 sps:$4 sm:$0xff]  }
 0xbdd   :  { %16355 = vmatmul.mubr.bf16.vlgmr.msra.gmra.mxu1 %v8972_v51  ;;  %v9016_v31 = vadd.f32 %v9015_v30, %v8917_v36  ;;  %9831 = vmatprep.subr.bf16.mxu0 %v17409_v7  ;;  %v17455_v36 = vld [vmem:[#allocation21 + $0x360] ss:$16 sps:$4 sm:$0xff]   ;;  %v17463_v30 = vld [vmem:[#allocation21 + $0x344] ss:$16 sps:$4 sm:$0xff]  }
 0xbde   :  { %9859 = vmatpush1.bf16.msra.mxu1 %v17386_v46  ;;  %v17460_v46 = vld [vmem:[#allocation21 + $0xec] ss:$16 sps:$4 sm:$0xff]   ;;  %v17461_v51 = vld [vmem:[#allocation21 + $0x340] ss:$16 sps:$4 sm:$0xff]   ;;  %v17469_v32 = vld [vmem:[#allocation21 + $0x324] ss:$16 sps:$4 sm:$0xff]  }
 0xbdf   :  { %v9019_v27 = vadd.f32 %v9016_v31, %v8619_v53  ;;  %9860 = vmatprep.subr.bf16.mxu1 %v17394_v47  ;;  %v17404_v53 = vld [vmem:[#allocation21 + $0x280] ss:$16 sps:$4 sm:$0xff]   ;;  %v17475_v31 = vld [vmem:[#allocation21 + $0x304] ss:$16 sps:$4 sm:$0xff]  }
 0xbe0   :  { %9832 = vmatpush2.bf16.msra.mxu0 %v17407_v4  ;;  %v17467_v47 = vld [vmem:[#allocation21 + $0x320] ss:$16 sps:$4 sm:$0xff]  }
 0xbe1   :  { %9020 = vst [vmem:[%s19929_s27 + $0x8] sm:$0xff] %v9019_v27  ;;  %9833 = vmatprep.subr.bf16.mxu0 %v17415_v59  ;;  %s14435_s27 = sshll.u32 %s18600_s15, 4  ;;  %s14436_s27 = int_to_ptr.vmem [resolvable:$true] %s14435_s27 }
 0xbe2   :  { %9861 = vmatpush1.bf16.msra.mxu1 %v17392_v15  ;;  %v17484_v15 = vld [vmem:[#allocation21 + $0x2ec] ss:$16 sps:$4 sm:$0xff]   ;;  %s18516_s16 = scalar_lea.vmem %s14436_s27, 256  ;;  %p18521_p13 = scmp.lt.s32.totalorder %s14436_s27, %s14436_s27 }
 0xbe3   :  { %9862 = vmatprep.subr.bf16.mxu1 %v17400_v12  ;;  %p18517_p12 = scmp.ne.s32.totalorder %s14436_s27, %s18516_s16  ;;  %p18522_p0 = scmp.lt.s32.totalorder %s18516_s16, %s18516_s16 }
 0xbe4   :  { %9834 = vmatpush2.bf16.msra.mxu0 %v17413_v37 }
 0xbe5   :  { %9835 = vmatprep.subr.bf16.mxu0 %v17421_v19  ;;  %p18523_p1 = por %p18522_p0, %p18521_p13 }
 0xbe6   :  { %9863 = vmatpush1.bf16.msra.mxu1 %v17398_v42 }
 0xbe7   :  { %9864 = vmatprep.subr.bf16.mxu1 %v17406_v52  ;;  %p18524_p2 = pnand %p18523_p1, %p18517_p12 }
 0xbe8   :  { %9836 = vmatpush2.bf16.msra.mxu0 %v17419_v34 }
 0xbe9   :  { %9837 = vmatprep.subr.bf16.mxu0 %v17427_v17 }
 0xbea   :  { %9865 = vmatpush1.bf16.msra.mxu1 %v17404_v53 }
 0xbeb   :  { %9866 = vmatprep.subr.bf16.mxu1 %v17412_v16 }
 0xbec   :  { %9838 = vmatpush2.bf16.msra.mxu0 %v17425_v9 }
 0xbed   :  { %9839 = vmatprep.subr.bf16.mxu0 %v17433_v11 }
 0xbee   :  { %9867 = vmatpush1.bf16.msra.mxu1 %v17410_v20 }
 0xbef   :  { %9868 = vmatprep.subr.bf16.mxu1 %v17418_v0 }
 0xbf0   :  { %9840 = vmatpush2.bf16.msra.mxu0 %v17431_v61  ;;  %v17458_v61 = vld [vmem:[#allocation21 + $0xe8] ss:$16 sps:$4 sm:$0xff]  }
 0xbf1   :  { %9841 = vmatprep.subr.bf16.mxu0 %v17439_v63  ;;  %v17464_v63 = vld [vmem:[#allocation21 + $0xc8] ss:$16 sps:$4 sm:$0xff]  }
 0xbf2   :  { %9869 = vmatpush1.bf16.msra.mxu1 %v17416_v23 }
 0xbf3   :  { %9870 = vmatprep.subr.bf16.mxu1 %v17424_v35 }
 0xbf4   :  { %9842 = vmatpush2.bf16.msra.mxu0 %v17437_v24 }
 0xbf5   :  { %9843 = vmatprep.subr.bf16.mxu0 %v17445_v22  ;;  %v17470_v22 = vld [vmem:[#allocation21 + $0xa8] ss:$16 sps:$4 sm:$0xff]  }
 0xbf6   :  { %9871 = vmatpush1.bf16.msra.mxu1 %v17422_v1 }
 0xbf7   :  { %9872 = vmatprep.subr.bf16.mxu1 %v17430_v55 }
 0xbf8   :  { %9844 = vmatpush2.bf16.msra.mxu0 %v17443_v21 }
 0xbf9   :  { %9845 = vmatprep.subr.bf16.mxu0 %v17451_v33  ;;  %v17476_v33 = vld [vmem:[#allocation21 + $0x88] ss:$16 sps:$4 sm:$0xff]  }
 0xbfa   :  { %9873 = vmatpush1.bf16.msra.mxu1 %v17428_v56 }
 0xbfb   :  { %9874 = vmatprep.subr.bf16.mxu1 %v17436_v6  ;;  %v17466_v6 = vld [vmem:[#allocation21 + $0xcc] ss:$16 sps:$4 sm:$0xff]  }
 0xbfc   :  { %9846 = vmatpush2.bf16.msra.mxu0 %v17449_v2 }
 0xbfd   :  { %9901 = vmatprep.subr.bf16.mxu0 %v17460_v46 }
 0xbfe   :  { %9875 = vmatpush2.bf16.msra.mxu1 %v17434_v45 }
 0xbff   :  { %9876 = vmatprep.subr.bf16.mxu1 %v17442_v58  ;;  %v17472_v58 = vld [vmem:[#allocation21 + $0xac] ss:$16 sps:$4 sm:$0xff]  }
 0xc02   :  { %9877 = vmatpush2.bf16.msra.mxu1 %v17440_v14 }
 0xc03   :  { %9878 = vmatprep.subr.bf16.mxu1 %v17448_v44  ;;  %v17478_v44 = vld [vmem:[#allocation21 + $0x8c] ss:$16 sps:$4 sm:$0xff]  }
 0xc06   :  { %9879 = vmatpush2.bf16.msra.mxu1 %v17446_v48 }
 0xc07   :  { %9880 = vmatprep.subr.bf16.mxu1 %v17454_v28  ;;  %v17481_v28 = vld [vmem:[#allocation21 + $0x6c] ss:$16 sps:$4 sm:$0xff]  }
 0xc0a   :  { %9881 = vmatpush2.bf16.msra.mxu1 %v17452_v13 }
 0xc0b   :  { %9882 = vmatprep.subr.bf16.mxu1 %v17457_v25 }
 0xc0e   :  { %9883 = vmatpush2.bf16.msra.mxu1 %v17455_v36  ;;  %v17479_v36 = vld [vmem:[#allocation21 + $0x68] ss:$16 sps:$4 sm:$0xff]  }
 0xc0f   :  { %9884 = vmatprep.subr.bf16.mxu1 %v17463_v30 }
 0xc12   :  { %9885 = vmatpush2.bf16.msra.mxu1 %v17461_v51  ;;  %v17482_v51 = vld [vmem:[#allocation21 + $0x2e8] ss:$16 sps:$4 sm:$0xff]  }
 0xc13   :  { %9886 = vmatprep.subr.bf16.mxu1 %v17469_v32  ;;  %v17487_v32 = vld [vmem:[#allocation21 + $0x4c] ss:$16 sps:$4 sm:$0xff]  }
 0xc16   :  { %9887 = vmatpush2.bf16.msra.mxu1 %v17467_v47 }
 0xc17   :  { %9888 = vmatprep.subr.bf16.mxu1 %v17475_v31 }
 0xc1a   :  { %9889 = vmatpush2.bf16.msra.mxu1 %v17473_v18  ;;  %v17490_v18 = vld [vmem:[#allocation21 + $0x2cc] ss:$16 sps:$4 sm:$0xff]  }
 0xc1b   :  { %9944 = vmatprep.subr.bf16.mxu1 %v17484_v15  ;;  %v17485_v15 = vld [vmem:[#allocation21 + $0x48] ss:$16 sps:$4 sm:$0xff]  }
 0xc35   :  { %v8312_v27 = vpop.f32.mrf.mxu1 }
 0xc37   :  { %v16272_v12 = vpop.f32.mrf.mxu1 }
 0xc39   :  { %v8315_v10 = vpop.f32.mrf.mxu1 }
 0xc3a   :  { %v17493_v10 = vld [vmem:[#allocation21 + $0x2c] ss:$16 sps:$4 sm:$0xff]  }
 0xc3b   :  { %v16273_v7 = vpop.f32.mrf.mxu1 }
 0xc3c   :  { %v17496_v7 = vld [vmem:[#allocation21 + $0x2ac] ss:$16 sps:$4 sm:$0xff]  }
 0xc3d   :  { %v8410_v42 = vpop.f32.mrf.mxu1 }
 0xc3f   :  { %v16284_v52 = vpop.f32.mrf.mxu1 }
 0xc40   :  { %v17494_v52 = vld [vmem:[#allocation21 + $0x2a8] ss:$16 sps:$4 sm:$0xff]  }
 0xc41   :  { %v8413_v4 = vpop.f32.mrf.mxu1 }
 0xc42   :  { %v17499_v4 = vld [vmem:[#allocation21 + $0xc] ss:$16 sps:$4 sm:$0xff]  }
 0xc43   :  { %v16285_v59 = vpop.f32.mrf.mxu1 }
 0xc44   :  { %v17502_v59 = vld [vmem:[#allocation21 + $0x28c] ss:$16 sps:$4 sm:$0xff]  }
 0xc75   :  { %v8509_v53 = vpop.f32.mrf.mxu1 }
 0xc77   :  { %v16296_v16 = vpop.f32.mrf.mxu1 }
 0xc78   :  { %v17500_v16 = vld [vmem:[#allocation21 + $0x288] ss:$16 sps:$4 sm:$0xff]  }
 0xc79   :  { %v8512_v37 = vpop.f32.mrf.mxu1 }
 0xc7a   :  { %v17505_v37 = vld [vmem:[#allocation21 + $0x1ec] ss:$16 sps:$4 sm:$0xff]  }
 0xc7b   :  { %v16297_v20 = vpop.f32.mrf.mxu1 }
 0xc7c   :  { %v17508_v20 = vld [vmem:[#allocation21 + $0x26c] ss:$16 sps:$4 sm:$0xff]  }
 0xc7d   :  { %v8608_v0 = vpop.f32.mrf.mxu1 }
 0xc7f   :  { %v16308_v23 = vpop.f32.mrf.mxu1 }
 0xc80   :  { %v17506_v23 = vld [vmem:[#allocation21 + $0x268] ss:$16 sps:$4 sm:$0xff]  }
 0xc81   :  { %v8611_v34 = vpop.f32.mrf.mxu1 }
 0xc82   :  { %v17511_v34 = vld [vmem:[#allocation21 + $0x1cc] ss:$16 sps:$4 sm:$0xff]  }
 0xc83   :  { %v16309_v19 = vpop.f32.mrf.mxu1 }
 0xc84   :  { %v17514_v19 = vld [vmem:[#allocation21 + $0x24c] ss:$16 sps:$4 sm:$0xff]  }
 0xc85   :  { %v8711_v1 = vpop.f32.mrf.mxu1 }
 0xc86   :  { %v19607_v11 = vpack.c.bf16 %v8711_v1, %v8312_v27  ;;  %v17488_v27 = vld [vmem:[#allocation21 + $0x2c8] ss:$16 sps:$4 sm:$0xff]  }
 0xc87   :  { %v16320_v35 = vpop.f32.mrf.mxu1  ;;  %v17509_v1 = vld [vmem:[#allocation21 + $0x1c8] ss:$16 sps:$4 sm:$0xff]  }
 0xc88   :  { %v17512_v35 = vld [vmem:[#allocation21 + $0x248] ss:$16 sps:$4 sm:$0xff]  }
 0xc89   :  { %v8714_v9 = vpop.f32.mrf.mxu1 }
 0xc8a   :  { %v17517_v9 = vld [vmem:[#allocation21 + $0x1ac] ss:$16 sps:$4 sm:$0xff]  }
 0xc8b   :  { %v16321_v17 = vpop.f32.mrf.mxu1 }
 0xc8c   :  { %v17520_v17 = vld [vmem:[#allocation21 + $0x22c] ss:$16 sps:$4 sm:$0xff]  }
 0xc8d   :  { %v8809_v56 = vpop.f32.mrf.mxu1 }
 0xc8e   :  { %v9022_v55 = vpack.c.bf16 %v8809_v56, %v8410_v42  ;;  %v17491_v42 = vld [vmem:[#allocation21 + $0x28] ss:$16 sps:$4 sm:$0xff]  }
 0xc8f   :  { %v16332_v45 = vpop.f32.mrf.mxu1  ;;  %v17515_v56 = vld [vmem:[#allocation21 + $0x1a8] ss:$16 sps:$4 sm:$0xff]  }
 0xc90   :  { %9847 = vmatprep.mubr.bf16.mxu0 %v9022_v55  ;;  %v17526_v45 = vld [vmem:[#allocation21 + $0x20c] ss:$16 sps:$4 sm:$0xff]  }
 0xc91   :  { %v8812_v24 = vpop.f32.mrf.mxu1  ;;  %9848 = vmatmul.mubr.bf16.vlgmr.msra.gmra.mxu0 %v19607_v11 }
 0xc92   :  { %9902 = vmatpush1.bf16.msra.mxu0 %v17458_v61  ;;  %9933 = vmatprep.mubr.bf16.mxu0 %v9022_v55  ;;  %v17518_v55 = vld [vmem:[#allocation21 + $0x228] ss:$16 sps:$4 sm:$0xff]   ;;  %v17523_v61 = vld [vmem:[#allocation21 + $0x18c] ss:$16 sps:$4 sm:$0xff]  }
 0xc93   :  { %v16333_v14 = vpop.f32.mrf.mxu1  ;;  %9903 = vmatprep.subr.bf16.mxu0 %v17466_v6  ;;  %v17521_v6 = vld [vmem:[#allocation21 + $0x188] ss:$16 sps:$4 sm:$0xff]  }
 0xc94   :  { %v17524_v24 = vld [vmem:[#allocation21 + $0x208] ss:$16 sps:$4 sm:$0xff]   ;;  %v17532_v14 = vld [vmem:[#allocation21 + $0x3ec] ss:$16 sps:$4 sm:$0xff]  }
 0xc95   :  { %v8908_v21 = vpop.f32.mrf.mxu1 }
 0xc96   :  { %9904 = vmatpush1.bf16.msra.mxu0 %v17464_v63  ;;  %v19610_v30 = vpack.c.bf16 %v8908_v21, %v8509_v53  ;;  %v17497_v53 = vld [vmem:[#allocation21 + $0x8] ss:$16 sps:$4 sm:$0xff]   ;;  %v17529_v63 = vld [vmem:[#allocation21 + $0x16c] ss:$16 sps:$4 sm:$0xff]  }
 0xc97   :  { %v16344_v48 = vpop.f32.mrf.mxu1  ;;  %9905 = vmatprep.subr.bf16.mxu0 %v17472_v58  ;;  %v17527_v58 = vld [vmem:[#allocation21 + $0x168] ss:$16 sps:$4 sm:$0xff]  }
 0xc98   :  { %v17530_v21 = vld [vmem:[#allocation21 + $0x3e8] ss:$16 sps:$4 sm:$0xff]   ;;  %v17538_v48 = vld [vmem:[#allocation21 + $0x3cc] ss:$16 sps:$4 sm:$0xff]  }
 0xc99   :  { %v8911_v2 = vpop.f32.mrf.mxu1 }
 0xc9a   :  { %9906 = vmatpush1.bf16.msra.mxu0 %v17470_v22  ;;  %v17535_v22 = vld [vmem:[#allocation21 + $0x14c] ss:$16 sps:$4 sm:$0xff]   ;;  %v17536_v2 = vld [vmem:[#allocation21 + $0x3c8] ss:$16 sps:$4 sm:$0xff]  }
 0xc9b   :  { %v16345_v13 = vpop.f32.mrf.mxu1  ;;  %9907 = vmatprep.subr.bf16.mxu0 %v17478_v44  ;;  %v17533_v44 = vld [vmem:[#allocation21 + $0x148] ss:$16 sps:$4 sm:$0xff]  }
 0xc9c   :  { %v17544_v13 = vld [vmem:[#allocation21 + $0x3ac] ss:$16 sps:$4 sm:$0xff]  }
 0xc9d   :  { %v9007_v25 = vpop.f32.mrf.mxu1 }
 0xc9e   :  { %v9024_v46 = vpack.c.bf16 %v9007_v25, %v8608_v0  ;;  %9908 = vmatpush1.bf16.msra.mxu0 %v17476_v33  ;;  %v17503_v0 = vld [vmem:[#allocation21 + $0x1e8] ss:$16 sps:$4 sm:$0xff]   ;;  %v17541_v33 = vld [vmem:[#allocation21 + $0x12c] ss:$16 sps:$4 sm:$0xff]  }
 0xc9f   :  { %v16356_v47 = vpop.f32.mrf.mxu1  ;;  %9909 = vmatprep.subr.bf16.mxu0 %v17481_v28  ;;  %v17539_v28 = vld [vmem:[#allocation21 + $0x128] ss:$16 sps:$4 sm:$0xff]  }
 0xca0   :  { %9890 = vmatprep.mubr.bf16.mxu1 %v9024_v46  ;;  %v17542_v25 = vld [vmem:[#allocation21 + $0x3a8] ss:$16 sps:$4 sm:$0xff]  }
 0xca1   :  { %v9010_v31 = vpop.f32.mrf.mxu1  ;;  %9891 = vmatmul.mubr.bf16.vlgmr.msra.gmra.mxu1 %v19610_v30  ;;  %v17548_v47 = vld [vmem:[#allocation21 + $0x388] ss:$16 sps:$4 sm:$0xff]  }
 0xca2   :  { %9910 = vmatpush1.bf16.msra.mxu0 %v17479_v36  ;;  %9945 = vmatpush1.bf16.msra.mxu1 %v17482_v51  ;;  %v17550_v36 = vld [vmem:[#allocation21 + $0x38c] ss:$16 sps:$4 sm:$0xff]   ;;  %v17545_v51 = vld [vmem:[#allocation21 + $0x108] ss:$16 sps:$4 sm:$0xff]  }
 0xca3   :  { %9976 = vmatprep.mubr.bf16.mxu1 %v9024_v46  ;;  %v16357_v12 = vpop.f32.mrf.mxu1  ;;  %9911 = vmatprep.subr.bf16.mxu0 %v17487_v32  ;;  %v17547_v46 = vld [vmem:[#allocation21 + $0x10c] ss:$16 sps:$4 sm:$0xff]  }
 0xca4   :  { %9946 = vmatprep.subr.bf16.mxu1 %v17490_v18  ;;  %v17553_v32 = vld [vmem:[#allocation21 + $0x36c] ss:$16 sps:$4 sm:$0xff]   ;;  %v17551_v18 = vld [vmem:[#allocation21 + $0x368] ss:$16 sps:$4 sm:$0xff]  }
 0xca5   :  { %v17556_v31 = vld [vmem:[#allocation21 + $0x34c] ss:$16 sps:$4 sm:$0xff]   ;;  %v17557_v12 = vld [vmem:[#allocation21 + $0x328] ss:$16 sps:$4 sm:$0xff]  }
 0xca6   :  { %9912 = vmatpush1.bf16.msra.mxu0 %v17485_v15  ;;  %9947 = vmatpush1.bf16.msra.mxu1 %v17488_v27  ;;  %v17554_v15 = vld [vmem:[#allocation21 + $0x348] ss:$16 sps:$4 sm:$0xff]   ;;  %v17559_v27 = vld [vmem:[#allocation21 + $0x32c] ss:$16 sps:$4 sm:$0xff]  }
 0xca7   :  { %9913 = vmatprep.subr.bf16.mxu0 %v17493_v10  ;;  %9948 = vmatprep.subr.bf16.mxu1 %v17496_v7  ;;  %v17562_v10 = vld [vmem:[#allocation21 + $0x30c] ss:$16 sps:$4 sm:$0xff]   ;;  %v17560_v7 = vld [vmem:[#allocation21 + $0x308] ss:$16 sps:$4 sm:$0xff]  }
 0xcaa   :  { %9914 = vmatpush1.bf16.msra.mxu0 %v17491_v42  ;;  %9949 = vmatpush1.bf16.msra.mxu1 %v17494_v52 }
 0xcab   :  { %9915 = vmatprep.subr.bf16.mxu0 %v17499_v4  ;;  %9950 = vmatprep.subr.bf16.mxu1 %v17502_v59 }
 0xcae   :  { %9916 = vmatpush1.bf16.msra.mxu0 %v17497_v53  ;;  %9951 = vmatpush1.bf16.msra.mxu1 %v17500_v16  ;;  %v9153_v53 = vld [vmem:[#allocation22] sm:$0xf] }
 0xcaf   :  { %9917 = vmatprep.subr.bf16.mxu0 %v17505_v37  ;;  %9952 = vmatprep.subr.bf16.mxu1 %v17508_v20  ;;  %v9158_v20 = vrot.slane %v9153_v53, %v18870_v29 }
 0xcb2   :  { %9918 = vmatpush2.bf16.msra.mxu0 %v17503_v0  ;;  %9953 = vmatpush1.bf16.msra.mxu1 %v17506_v23 }
 0xcb3   :  { %9919 = vmatprep.subr.bf16.mxu0 %v17511_v34  ;;  %9954 = vmatprep.subr.bf16.mxu1 %v17514_v19 }
 0xcb6   :  { %9920 = vmatpush2.bf16.msra.mxu0 %v17509_v1  ;;  %9955 = vmatpush1.bf16.msra.mxu1 %v17512_v35 }
 0xcb7   :  { %9921 = vmatprep.subr.bf16.mxu0 %v17517_v9  ;;  %9956 = vmatprep.subr.bf16.mxu1 %v17520_v17  ;;  %v9166_v9 = vrot.slane %v9153_v53, %v18892_v49 }
 0xcba   :  { %9922 = vmatpush2.bf16.msra.mxu0 %v17515_v56  ;;  %9957 = vmatpush1.bf16.msra.mxu1 %v17518_v55  ;;  %v9170_v55 = vrot.slane %v9153_v53, %v18895_v50 }
 0xcbb   :  { %9923 = vmatprep.subr.bf16.mxu0 %v17523_v61  ;;  %9958 = vmatprep.subr.bf16.mxu1 %v17526_v45 }
 0xcbe   :  { %9924 = vmatpush2.bf16.msra.mxu0 %v17521_v6  ;;  %9959 = vmatpush1.bf16.msra.mxu1 %v17524_v24 }
 0xcbf   :  { %9925 = vmatprep.subr.bf16.mxu0 %v17529_v63  ;;  %9960 = vmatprep.subr.bf16.mxu1 %v17532_v14 }
 0xcc2   :  { %9926 = vmatpush2.bf16.msra.mxu0 %v17527_v58  ;;  %9961 = vmatpush2.bf16.msra.mxu1 %v17530_v21 }
 0xcc3   :  { %9927 = vmatprep.subr.bf16.mxu0 %v17535_v22  ;;  %9962 = vmatprep.subr.bf16.mxu1 %v17538_v48 }
 0xcc6   :  { %9928 = vmatpush2.bf16.msra.mxu0 %v17533_v44  ;;  %9963 = vmatpush2.bf16.msra.mxu1 %v17536_v2 }
 0xcc7   :  { %9929 = vmatprep.subr.bf16.mxu0 %v17541_v33  ;;  %9964 = vmatprep.subr.bf16.mxu1 %v17544_v13 }
 0xcca   :  { %9930 = vmatpush2.bf16.msra.mxu0 %v17539_v28  ;;  %9965 = vmatpush2.bf16.msra.mxu1 %v17542_v25 }
 0xccb   :  { %9931 = vmatprep.subr.bf16.mxu0 %v17547_v46  ;;  %9966 = vmatprep.subr.bf16.mxu1 %v17550_v36 }
 0xcce   :  { %9932 = vmatpush2.bf16.msra.mxu0 %v17545_v51  ;;  %9967 = vmatpush2.bf16.msra.mxu1 %v17548_v47 }
 0xccf   :  { %9968 = vmatprep.subr.bf16.mxu1 %v17553_v32 }
 0xcd1   :  { %9934 = vmatmul.mubr.bf16.vlgmr.msra.gmra.mxu0 %v19607_v11  ;;  %v9162_v11 = vrot.slane %v9153_v53, %v18941_v8 }
 0xcd2   :  { %9969 = vmatpush2.bf16.msra.mxu1 %v17551_v18 }
 0xcd3   :  { %9970 = vmatprep.subr.bf16.mxu1 %v17556_v31 }
 0xcd6   :  { %9971 = vmatpush2.bf16.msra.mxu1 %v17554_v15 }
 0xcd7   :  { %9972 = vmatprep.subr.bf16.mxu1 %v17559_v27 }
 0xcda   :  { %9973 = vmatpush2.bf16.msra.mxu1 %v17557_v12  ;;  %v10167_v12 = vld [vmem:[#allocation28 + $0x1c0] sm:$0xff] }
 0xcdb   :  { %9974 = vmatprep.subr.bf16.mxu1 %v17562_v10  ;;  %v10171_v10 = vld [vmem:[#allocation28 + $0x1e0] sm:$0xff] }
 0xcde   :  { %9975 = vmatpush2.bf16.msra.mxu1 %v17560_v7  ;;  %v10295_v7 = vld [vmem:[#allocation28 + $0x5c0] sm:$0xff] }
 0xce1   :  { %9977 = vmatmul.mubr.bf16.vlgmr.msra.gmra.mxu1 %v19610_v30 }
 0xd51   :  { %v9849_v42 = vpop.f32.mrf.mxu0 }
 0xd52   :  { %v9850_v19 = vadd.f32 %v9849_v42, %v9158_v20  ;;  %v15569_v42 = vcombine.low %v10167_v12, %v10171_v10 }
 0xd53   :  { %v9851_v52 = vpop.f32.mrf.mxu0 }
 0xd54   :  { %v9852_v23 = vadd.f32 %v9851_v52, %v9162_v11  ;;  %v15570_v52 = vcombine.high %v10167_v12, %v10171_v10  ;;  %v10247_v12 = vld [vmem:[#allocation28 + $0x440] sm:$0xff] }
 0xd55   :  { %v9853_v4 = vpop.f32.mrf.mxu0  ;;  %v10251_v10 = vld [vmem:[#allocation28 + $0x460] sm:$0xff] }
 0xd56   :  { %v9854_v61 = vadd.f32 %v9853_v4, %v9158_v20  ;;  %v10299_v4 = vld [vmem:[#allocation28 + $0x5e0] sm:$0xff]  ;;  %11689 = vmatprep.subr.bf16.mxu0 %v15570_v52 }
 0xd57   :  { %v9855_v16 = vpop.f32.mrf.mxu0  ;;  %v15697_v53 = vcombine.low %v10295_v7, %v10299_v4  ;;  %v10151_v20 = vld [vmem:[#allocation28 + $0x140] sm:$0xff]  ;;  %11690 = vmatpush1.bf16.msra.mxu0 %v15569_v42 }
 0xd58   :  { %v9856_v56 = vadd.f32 %v9855_v16, %v9162_v11  ;;  %v15698_v11 = vcombine.high %v10295_v7, %v10299_v4  ;;  %v15650_v4 = vcombine.high %v10247_v12, %v10251_v10 }
 0xd5a   :  { %11732 = vmatprep.subr.bf16.mxu1 %v15698_v11  ;;  %v10243_v11 = vld [vmem:[#allocation28 + $0x420] sm:$0xff] }
 0xd5b   :  { %11733 = vmatpush1.bf16.msra.mxu1 %v15697_v53  ;;  %v10239_v53 = vld [vmem:[#allocation28 + $0x400] sm:$0xff] }
 0xd61   :  { %v9892_v59 = vpop.f32.mrf.mxu1 }
 0xd62   :  { %v9893_v30 = vadd.f32 %v9892_v59, %v9850_v19  ;;  %v10163_v59 = vld [vmem:[#allocation28 + $0x1a0] sm:$0xff] }
 0xd63   :  { %v9894_v37 = vpop.f32.mrf.mxu1  ;;  %v10283_v19 = vld [vmem:[#allocation28 + $0x560] sm:$0xff] }
 0xd64   :  { %v9895_v1 = vadd.f32 %v9894_v37, %v9852_v23  ;;  %v19623_v14 = vadd.f32 %v9893_v30, %v19231_v60  ;;  %v10287_v37 = vld [vmem:[#allocation28 + $0x580] sm:$0xff] }
 0xd65   :  { %v9896_v34 = vpop.f32.mrf.mxu1  ;;  %v10155_v23 = vld [vmem:[#allocation28 + $0x160] sm:$0xff] }
 0xd66   :  { %v19620_v45 = vadd.f32 %v9895_v1, %v19223_v39  ;;  %v9897_v58 = vadd.f32 %v9896_v34, %v9854_v61  ;;  %v10279_v34 = vld [vmem:[#allocation28 + $0x540] sm:$0xff] }
 0xd67   :  { %v9898_v17 = vpop.f32.mrf.mxu1  ;;  %v15682_v30 = vcombine.high %v10279_v34, %v10283_v19  ;;  %v10275_v61 = vld [vmem:[#allocation28 + $0x520] sm:$0xff] }
 0xd68   :  { %v9899_v24 = vadd.f32 %v9898_v17, %v9856_v56  ;;  %v9997_v44 = vadd.f32 %v19620_v45, %v19623_v14  ;;  %v19634_v60 = vadd.f32 %v9897_v58, %v19233_v41  ;;  %v10143_v17 = vld [vmem:[#allocation28 + $0x100] sm:$0xff] }
 0xd69   :  { %v10147_v56 = vld [vmem:[#allocation28 + $0x120] sm:$0xff] }
 0xd6a   :  { %v19628_v13 = vadd.f32 %v9899_v24, %v19225_v40  ;;  %v15681_v24 = vcombine.low %v10279_v34, %v10283_v19  ;;  %v10359_v34 = vld [vmem:[#allocation28 + $0x7c0] sm:$0xff] }
 0xd6b   :  { %v10363_v19 = vld [vmem:[#allocation28 + $0x7e0] sm:$0xff] }
 0xd6c   :  { %v10002_v40 = vadd.f32 %v19628_v13, %v19634_v60 }
 0xd91   :  { %v9935_v0 = vpop.f32.mrf.mxu0 }
 0xd92   :  { %v9936_v63 = vadd.f32 %v9935_v0, %v9166_v9 }
 0xd93   :  { %v9937_v35 = vpop.f32.mrf.mxu0 }
 0xd94   :  { %v9938_v22 = vadd.f32 %v9937_v35, %v9170_v55 }
 0xd95   :  { %v9939_v6 = vpop.f32.mrf.mxu0 }
 0xd96   :  { %v9940_v39 = vadd.f32 %v9939_v6, %v9166_v9  ;;  %v15554_v9 = vcombine.high %v10151_v20, %v10155_v23  ;;  %v15553_v6 = vcombine.low %v10151_v20, %v10155_v23  ;;  %v15642_v20 = vcombine.high %v10239_v53, %v10243_v11  ;;  %v10235_v23 = vld [vmem:[#allocation28 + $0x3e0] sm:$0xff] }
 0xd97   :  { %v9941_v2 = vpop.f32.mrf.mxu0 }
 0xd98   :  { %v9942_v36 = vadd.f32 %v9941_v2, %v9170_v55  ;;  %v10271_v55 = vld [vmem:[#allocation28 + $0x500] sm:$0xff]  ;;  %v15545_v2 = vcombine.low %v10143_v17, %v10147_v56 }
 0xd99   :  { %v15674_v58 = vcombine.high %v10271_v55, %v10275_v61 }
 0xda1   :  { %v9978_v21 = vpop.f32.mrf.mxu1 }
 0xda2   :  { %v9979_v48 = vadd.f32 %v9978_v21, %v9936_v63  ;;  %v15546_v63 = vcombine.high %v10143_v17, %v10147_v56  ;;  %v10135_v21 = vld [vmem:[#allocation28 + $0xc0] sm:$0xff]  ;;  %v15761_v56 = vcombine.low %v10359_v34, %v10363_v19 }
 0xda3   :  { %v9980_v33 = vpop.f32.mrf.mxu1 }
 0xda4   :  { %v19631_v28 = vadd.f32 %v9979_v48, %v19235_v57  ;;  %v9981_v25 = vadd.f32 %v9980_v33, %v9938_v22  ;;  %v10139_v22 = vld [vmem:[#allocation28 + $0xe0] sm:$0xff]  ;;  %v15673_v33 = vcombine.low %v10271_v55, %v10275_v61 }
 0xda5   :  { %v9982_v46 = vpop.f32.mrf.mxu1  ;;  %v10263_v48 = vld [vmem:[#allocation28 + $0x4c0] sm:$0xff] }
 0xda6   :  { %v19637_v51 = vadd.f32 %v9981_v25, %v19227_v3  ;;  %v9983_v47 = vadd.f32 %v9982_v46, %v9940_v39  ;;  %v9998_v32 = vadd.f32 %v9997_v44, %v19631_v28  ;;  %v10267_v44 = vld [vmem:[#allocation28 + $0x4e0] sm:$0xff]  ;;  %v15538_v39 = vcombine.high %v10135_v21, %v10139_v22 }
 0xda7   :  { %v9984_v18 = vpop.f32.mrf.mxu1  ;;  %v15666_v25 = vcombine.high %v10263_v48, %v10267_v44  ;;  %v10127_v46 = vld [vmem:[#allocation28 + $0x80] sm:$0xff] }
 0xda8   :  { %v19643_v31 = vadd.f32 %v9983_v47, %v19237_v43  ;;  %v9985_v57 = vadd.f32 %v9984_v18, %v9942_v36  ;;  %v9999_v15 = vadd.f32 %v9998_v32, %v19637_v51  ;;  %v10159_v43 = vld [vmem:[#allocation28 + $0x180] sm:$0xff]  ;;  %v15537_v18 = vcombine.low %v10135_v21, %v10139_v22 }
 0xda9   :  { %v15562_v16 = vcombine.high %v10159_v43, %v10163_v59  ;;  %v15561_v1 = vcombine.low %v10159_v43, %v10163_v59  ;;  %v10131_v36 = vld [vmem:[#allocation28 + $0xa0] sm:$0xff] }
 0xdaa   :  { %v19647_v41 = vadd.f32 %v9985_v57, %v19229_v5  ;;  %10000 = vadd.xlane.f32.xlu0 %v9999_v15  ;;  %v10003_v3 = vadd.f32 %v10002_v40, %v19643_v31  ;;  %v10291_v5 = vld [vmem:[#allocation28 + $0x5a0] sm:$0xff]  ;;  %v15665_v40 = vcombine.low %v10263_v48, %v10267_v44  ;;  %v15530_v57 = vcombine.high %v10127_v46, %v10131_v36 }
 0xdab   :  { %v15690_v0 = vcombine.high %v10287_v37, %v10291_v5  ;;  %11691 = vmatprep.subr.bf16.mxu0 %v15562_v16  ;;  %v15689_v35 = vcombine.low %v10287_v37, %v10291_v5  ;;  %v10255_v47 = vld [vmem:[#allocation28 + $0x480] sm:$0xff]  ;;  %v15529_v7 = vcombine.low %v10127_v46, %v10131_v36  ;;  %v15649_v37 = vcombine.low %v10247_v12, %v10251_v10 }
 0xdac   :  { %v10004_v27 = vadd.f32 %v10003_v3, %v19647_v41  ;;  %11692 = vmatpush1.bf16.msra.mxu0 %v15561_v1  ;;  %v10259_v32 = vld [vmem:[#allocation28 + $0x4a0] sm:$0xff] }
 0xdad   :  { %11734 = vmatprep.subr.bf16.mxu1 %v15690_v0  ;;  %11693 = vmatprep.subr.bf16.mxu0 %v15554_v9  ;;  %v15658_v15 = vcombine.high %v10255_v47, %v10259_v32  ;;  %v10119_v3 = vld [vmem:[#allocation28 + $0x40] sm:$0xff]  ;;  %v15657_v42 = vcombine.low %v10255_v47, %v10259_v32 }
 0xdae   :  { %10005 = vadd.xlane.f32.xlu1 %v10004_v27  ;;  %11735 = vmatpush1.bf16.msra.mxu1 %v15689_v35  ;;  %v10123_v27 = vld [vmem:[#allocation28 + $0x60] sm:$0xff]  ;;  %v15641_v35 = vcombine.low %v10239_v53, %v10243_v11 }
 0xdaf   :  { %11736 = vmatprep.subr.bf16.mxu1 %v15682_v30  ;;  %v15522_v52 = vcombine.high %v10119_v3, %v10123_v27  ;;  %v10111_v43 = vld [vmem:[#allocation28] sm:$0xff]  ;;  %v15521_v16 = vcombine.low %v10119_v3, %v10123_v27  ;;  %v15762_v30 = vcombine.high %v10359_v34, %v10363_v19 }
 0xdb0   :  { %11694 = vmatpush1.bf16.msra.mxu0 %v15553_v6  ;;  %v10115_v59 = vld [vmem:[#allocation28 + $0x20] sm:$0xff] }
 0xdb1   :  { %11695 = vmatprep.subr.bf16.mxu0 %v15546_v63  ;;  %v15514_v5 = vcombine.high %v10111_v43, %v10115_v59  ;;  %v10231_v0 = vld [vmem:[#allocation28 + $0x3c0] sm:$0xff]  ;;  %v15513_v1 = vcombine.low %v10111_v43, %v10115_v59 }
 0xdb2   :  { %11737 = vmatpush1.bf16.msra.mxu1 %v15681_v24  ;;  %v15634_v9 = vcombine.high %v10231_v0, %v10235_v23  ;;  %v15633_v17 = vcombine.low %v10231_v0, %v10235_v23  ;;  %v10355_v3 = vld [vmem:[#allocation28 + $0x7a0] sm:$0xff] }
 0xdb3   :  { %11738 = vmatprep.subr.bf16.mxu1 %v15674_v58  ;;  %v10347_v43 = vld [vmem:[#allocation28 + $0x760] sm:$0xff] }
 0xdb4   :  { %11696 = vmatpush1.bf16.msra.mxu0 %v15545_v2  ;;  %v10339_v23 = vld [vmem:[#allocation28 + $0x720] sm:$0xff] }
 0xdb5   :  { %11697 = vmatprep.subr.bf16.mxu0 %v15538_v39  ;;  %v10199_v34 = vld [vmem:[#allocation28 + $0x2c0] sm:$0xff] }
 0xdb6   :  { %11739 = vmatpush1.bf16.msra.mxu1 %v15673_v33  ;;  %v10203_v19 = vld [vmem:[#allocation28 + $0x2e0] sm:$0xff] }
 0xdb7   :  { %11740 = vmatprep.subr.bf16.mxu1 %v15666_v25 }
 0xdb8   :  { %11698 = vmatpush1.bf16.msra.mxu0 %v15537_v18 }
 0xdb9   :  { %11699 = vmatprep.subr.bf16.mxu0 %v15530_v57  ;;  %v10351_v57 = vld [vmem:[#allocation28 + $0x780] sm:$0xff] }
 0xdba   :  { %11741 = vmatpush1.bf16.msra.mxu1 %v15665_v40  ;;  %v10227_v40 = vld [vmem:[#allocation28 + $0x3a0] sm:$0xff]  ;;  %v15753_v12 = vcombine.low %v10351_v57, %v10355_v3  ;;  %v15754_v10 = vcombine.high %v10351_v57, %v10355_v3 }
 0xdbb   :  { %11742 = vmatprep.subr.bf16.mxu1 %v15658_v15 }
 0xdbc   :  { %11700 = vmatpush1.bf16.msra.mxu0 %v15529_v7  ;;  %v10215_v7 = vld [vmem:[#allocation28 + $0x340] sm:$0xff] }
 0xdbd   :  { %11701 = vmatprep.subr.bf16.mxu0 %v15522_v52  ;;  %v10343_v52 = vld [vmem:[#allocation28 + $0x740] sm:$0xff] }
 0xdbe   :  { %11743 = vmatpush1.bf16.msra.mxu1 %v15657_v42  ;;  %v10219_v42 = vld [vmem:[#allocation28 + $0x360] sm:$0xff]  ;;  %v15745_v53 = vcombine.low %v10343_v52, %v10347_v43  ;;  %v15746_v11 = vcombine.high %v10343_v52, %v10347_v43  ;;  %v19695_v52 = vld [vmem:[#allocation28 + $0x5c8] sm:$0xff] }
 0xdbf   :  { %11744 = vmatprep.subr.bf16.mxu1 %v15650_v4  ;;  %v15618_v4 = vcombine.high %v10215_v7, %v10219_v42  ;;  %v15617_v59 = vcombine.low %v10215_v7, %v10219_v42  ;;  %v19691_v7 = vld [vmem:[#allocation28 + $0x1c8] sm:$0xff] }
 0xdc0   :  { %11702 = vmatpush1.bf16.msra.mxu0 %v15521_v16  ;;  %v10207_v16 = vld [vmem:[#allocation28 + $0x300] sm:$0xff]  ;;  %v19693_v42 = vld [vmem:[#allocation28 + $0x1e8] sm:$0xff] }
 0xdc1   :  { %11703 = vmatprep.subr.bf16.mxu0 %v15514_v5  ;;  %v10335_v5 = vld [vmem:[#allocation28 + $0x700] sm:$0xff]  ;;  %v19699_v43 = vld [vmem:[#allocation28 + $0x5e8] sm:$0xff] }
 0xdc2   :  { %11745 = vmatpush1.bf16.msra.mxu1 %v15649_v37  ;;  %v10211_v37 = vld [vmem:[#allocation28 + $0x320] sm:$0xff] }
 0xdc3   :  { %11746 = vmatprep.subr.bf16.mxu1 %v15642_v20  ;;  %v15609_v20 = vcombine.low %v10207_v16, %v10211_v37  ;;  %v15610_v0 = vcombine.high %v10207_v16, %v10211_v37 }
 0xdc4   :  { %11704 = vmatpush1.bf16.msra.mxu0 %v15513_v1  ;;  %v15737_v1 = vcombine.low %v10335_v5, %v10339_v23 }
 0xdc5   :  { %11705 = vmatprep.subr.bf16.mxu0 %v15634_v9  ;;  %v15602_v9 = vcombine.high %v10199_v34, %v10203_v19 }
 0xdc6   :  { %11747 = vmatpush1.bf16.msra.mxu1 %v15641_v35  ;;  %v15738_v35 = vcombine.high %v10335_v5, %v10339_v23 }
 0xdc7   :  { %11748 = vmatprep.subr.bf16.mxu1 %v15762_v30  ;;  %v10327_v30 = vld [vmem:[#allocation28 + $0x6c0] sm:$0xff] }
 0xdc8   :  { %11706 = vmatpush2.bf16.msra.mxu0 %v15633_v17  ;;  %v10331_v17 = vld [vmem:[#allocation28 + $0x6e0] sm:$0xff] }
 0xdca   :  { %11749 = vmatpush2.bf16.msra.mxu1 %v15761_v56  ;;  %v10191_v56 = vld [vmem:[#allocation28 + $0x280] sm:$0xff] }
 0xdcb   :  { %11750 = vmatprep.subr.bf16.mxu1 %v15754_v10 }
 0xdce   :  { %11751 = vmatpush2.bf16.msra.mxu1 %v15753_v12 }
 0xdcf   :  { %11752 = vmatprep.subr.bf16.mxu1 %v15746_v11  ;;  %v15700_v11 = vcombine.high %v19695_v52, %v19699_v43 }
 0xdd2   :  { %11753 = vmatpush2.bf16.msra.mxu1 %v15745_v53  ;;  %v15699_v53 = vcombine.low %v19695_v52, %v19699_v43 }
 0xdd3   :  { %11754 = vmatprep.subr.bf16.mxu1 %v15738_v35 }
 0xdd6   :  { %11755 = vmatpush2.bf16.msra.mxu1 %v15737_v1  ;;  %v9996_v1 = vld [vmem:[#allocation26] sm:$0xf] }
 0xe33   :  { %v10001_v55 = vpop.xlane.xlu0 %10000 }
 0xe34   :  { %v10007_v61 = vmul.f32 0.001953125, %v10001_v55  ;;  %v15730_v55 = vcombine.high %v10327_v30, %v10331_v17 }
 0xe36   :  { %v19652_v6 = vsub.f32 %v19623_v14, %v10007_v61  ;;  %v19655_v24 = vsub.f32 %v19620_v45, %v10007_v61  ;;  %v19658_v63 = vsub.f32 %v19631_v28, %v10007_v61  ;;  %v19661_v21 = vsub.f32 %v19637_v51, %v10007_v61  ;;  %v10195_v61 = vld [vmem:[#allocation28 + $0x2a0] sm:$0xff]  ;;  %11756 = vmatprep.subr.bf16.mxu1 %v15730_v55 }
 0xe37   :  { %v10006_v58 = vpop.xlane.xlu1 %10005 }
 0xe38   :  { %v10008_v22 = vmul.f32 0.001953125, %v10006_v58  ;;  %v10017_v48 = vmul.f32 %v19652_v6, %v19652_v6  ;;  %v10018_v44 = vmul.f32 %v19655_v24, %v19655_v24  ;;  %v10019_v14 = vmul.f32 %v19658_v63, %v19658_v63  ;;  %v10319_v58 = vld [vmem:[#allocation28 + $0x680] sm:$0xff] }
 0xe39   :  { %v10020_v33 = vmul.f32 %v19661_v21, %v19661_v21 }
 0xe3a   :  { %v19670_v45 = vsub.f32 %v19634_v60, %v10008_v22  ;;  %v19673_v28 = vsub.f32 %v19628_v13, %v10008_v22  ;;  %v10025_v2 = vadd.f32 %v10018_v44, %v10017_v48  ;;  %v19676_v51 = vsub.f32 %v19643_v31, %v10008_v22 }
 0xe3b   :  { %v19681_v25 = vsub.f32 %v19647_v41, %v10008_v22  ;;  %v10223_v41 = vld [vmem:[#allocation28 + $0x380] sm:$0xff]  ;;  %v15601_v48 = vcombine.low %v10199_v34, %v10203_v19  ;;  %v15729_v44 = vcombine.low %v10327_v30, %v10331_v17  ;;  %v9995_v34 = vld [vmem:[#allocation25] sm:$0xf] }
 0xe3c   :  { %v10026_v39 = vadd.f32 %v10025_v2, %v10019_v14  ;;  %v10021_v46 = vmul.f32 %v19670_v45, %v19670_v45  ;;  %v10022_v60 = vmul.f32 %v19673_v28, %v19673_v28  ;;  %v10023_v13 = vmul.f32 %v19676_v51, %v19676_v51  ;;  %v10323_v22 = vld [vmem:[#allocation28 + $0x6a0] sm:$0xff] }
 0xe3d   :  { %v10024_v31 = vmul.f32 %v19681_v25, %v19681_v25  ;;  %v15626_v15 = vcombine.high %v10223_v41, %v10227_v40  ;;  %v15625_v27 = vcombine.low %v10223_v41, %v10227_v40  ;;  %v15594_v14 = vcombine.high %v10191_v56, %v10195_v61  ;;  %11757 = vmatpush2.bf16.msra.mxu1 %v15729_v44  ;;  %v10303_v41 = vld [vmem:[#allocation28 + $0x600] sm:$0xff] }
 0xe3e   :  { %v10027_v36 = vadd.f32 %v10026_v39, %v10020_v33  ;;  %v10030_v47 = vadd.f32 %v10022_v60, %v10021_v46  ;;  %v15722_v2 = vcombine.high %v10319_v58, %v10323_v22  ;;  %v10183_v33 = vld [vmem:[#allocation28 + $0x240] sm:$0xff]  ;;  %v10065_v17 = vrot.slane %v9995_v34, %v18895_v50 }
 0xe3f   :  { %11707 = vmatprep.subr.bf16.mxu0 %v15626_v15  ;;  %v10187_v39 = vld [vmem:[#allocation28 + $0x260] sm:$0xff]  ;;  %v10053_v55 = vrot.slane %v9995_v34, %v18870_v29  ;;  %v10094_v44 = vrot.slane %v9996_v1, %v18895_v50 }
 0xe40   :  { %10028 = vadd.xlane.f32.xlu0 %v10027_v36  ;;  %v10031_v32 = vadd.f32 %v10030_v47, %v10023_v13  ;;  %11708 = vmatpush2.bf16.msra.mxu0 %v15625_v27  ;;  %v10311_v46 = vld [vmem:[#allocation28 + $0x640] sm:$0xff]  ;;  %v15593_v36 = vcombine.low %v10191_v56, %v10195_v61  ;;  %v15721_v13 = vcombine.low %v10319_v58, %v10323_v22 }
 0xe41   :  { %11709 = vmatprep.subr.bf16.mxu0 %v15618_v4  ;;  %v10315_v60 = vld [vmem:[#allocation28 + $0x660] sm:$0xff]  ;;  %v15586_v47 = vcombine.high %v10183_v33, %v10187_v39  ;;  %11758 = vmatprep.subr.bf16.mxu1 %v15722_v2  ;;  %v15585_v57 = vcombine.low %v10183_v33, %v10187_v39  ;;  %v15572_v4 = vcombine.high %v19691_v7, %v19693_v42 }
 0xe42   :  { %v10032_v18 = vadd.f32 %v10031_v32, %v10024_v31  ;;  %v15714_v31 = vcombine.high %v10311_v46, %v10315_v60  ;;  %v10175_v32 = vld [vmem:[#allocation28 + $0x200] sm:$0xff]  ;;  %11759 = vmatpush2.bf16.msra.mxu1 %v15721_v13  ;;  %v15713_v15 = vcombine.low %v10311_v46, %v10315_v60  ;;  %v10061_v58 = vrot.slane %v9995_v34, %v18892_v49 }
 0xe43   :  { %v10307_v40 = vld [vmem:[#allocation28 + $0x620] sm:$0xff] }
 0xe44   :  { %10033 = vadd.xlane.f32.xlu1 %v10032_v18  ;;  %11710 = vmatpush2.bf16.msra.mxu0 %v15617_v59  ;;  %v10179_v18 = vld [vmem:[#allocation28 + $0x220] sm:$0xff]  ;;  %v15706_v27 = vcombine.high %v10303_v41, %v10307_v40  ;;  %v15705_v10 = vcombine.low %v10303_v41, %v10307_v40  ;;  %v15571_v59 = vcombine.low %v19691_v7, %v19693_v42 }
 0xe45   :  { %11711 = vmatprep.subr.bf16.mxu0 %v15610_v0  ;;  %v15578_v3 = vcombine.high %v10175_v32, %v10179_v18  ;;  %11760 = vmatprep.subr.bf16.mxu1 %v15714_v31  ;;  %v15577_v12 = vcombine.low %v10175_v32, %v10179_v18 }
 0xe46   :  { %11761 = vmatpush2.bf16.msra.mxu1 %v15713_v15  ;;  %v10164_v15 = vld [vmem:[#allocation28 + $0x1a8] sm:$0xff] }
 0xe47   :  { %11762 = vmatprep.subr.bf16.mxu1 %v15706_v27  ;;  %v10292_v27 = vld [vmem:[#allocation28 + $0x5a8] sm:$0xff] }
 0xe48   :  { %11712 = vmatpush2.bf16.msra.mxu0 %v15609_v20 }
 0xe49   :  { %11713 = vmatprep.subr.bf16.mxu0 %v15602_v9  ;;  %v10057_v9 = vrot.slane %v9995_v34, %v18941_v8 }
 0xe4a   :  { %11763 = vmatpush2.bf16.msra.mxu1 %v15705_v10 }
 0xe4b   :  { %11818 = vmatprep.subr.bf16.mxu1 %v15700_v11 }
 0xe4c   :  { %11714 = vmatpush2.bf16.msra.mxu0 %v15601_v48  ;;  %v10086_v48 = vrot.slane %v9996_v1, %v18941_v8 }
 0xe4d   :  { %11715 = vmatprep.subr.bf16.mxu0 %v15594_v14  ;;  %v10090_v14 = vrot.slane %v9996_v1, %v18892_v49 }
 0xe50   :  { %11716 = vmatpush2.bf16.msra.mxu0 %v15593_v36 }
 0xe51   :  { %11717 = vmatprep.subr.bf16.mxu0 %v15586_v47 }
 0xe54   :  { %11718 = vmatpush2.bf16.msra.mxu0 %v15585_v57 }
 0xe55   :  { %11719 = vmatprep.subr.bf16.mxu0 %v15578_v3  ;;  %v10288_v3 = vld [vmem:[#allocation28 + $0x588] sm:$0xff] }
 0xe58   :  { %11720 = vmatpush2.bf16.msra.mxu0 %v15577_v12 }
 0xe59   :  { %11775 = vmatprep.subr.bf16.mxu0 %v15572_v4 }
 0xec9   :  { %v10029_v16 = vpop.xlane.xlu0 %10028 }
 0xeca   :  { %v10035_v37 = vmul.f32 0.001953125, %v10029_v16  ;;  %v10152_v16 = vld [vmem:[#allocation28 + $0x148] sm:$0xff] }
 0xecc   :  { %v10037_v5 = vadd.f32 1e-06, %v10035_v37 }
 0xecd   :  { %v10034_v20 = vpop.xlane.xlu1 %10033 }
 0xece   :  { %18047 = vrsqrt.f32 %v10037_v5  ;;  %v10036_v0 = vmul.f32 0.001953125, %v10034_v20  ;;  %v15692_v5 = vcombine.high %v10288_v3, %v10292_v27  ;;  %v10156_v20 = vld [vmem:[#allocation28 + $0x168] sm:$0xff] }
 0xecf   :  { %v15555_v7 = vcombine.low %v10152_v16, %v10156_v20 }
 0xed0   :  { %v10038_v23 = vadd.f32 1e-06, %v10036_v0  ;;  %v10280_v0 = vld [vmem:[#allocation28 + $0x548] sm:$0xff] }
 0xed2   :  { %18049 = vrsqrt.f32 %v10038_v23  ;;  %v10284_v23 = vld [vmem:[#allocation28 + $0x568] sm:$0xff] }
 0xed3   :  { %v15683_v42 = vcombine.low %v10280_v0, %v10284_v23 }
 0xedb   :  { %v18048_v19 = vpop.eup %18047 }
 0xedc   :  { %v10042_v35 = vmul.f32 %v18048_v19, %v19655_v24  ;;  %v10044_v30 = vmul.f32 %v18048_v19, %v19661_v21  ;;  %v10041_v56 = vmul.f32 %v18048_v19, %v19652_v6  ;;  %v10043_v61 = vmul.f32 %v18048_v19, %v19658_v63 }
 0xedd   :  { %v10082_v24 = vrot.slane %v9996_v1, %v18870_v29  ;;  %v15691_v19 = vcombine.low %v10288_v3, %v10292_v27  ;;  %v15556_v1 = vcombine.high %v10152_v16, %v10156_v20  ;;  %v10112_v3 = vld [vmem:[#allocation28 + $0x8] sm:$0xff] }
 0xede   :  { %v10071_v2 = vmul.f32 %v10057_v9, %v10042_v35  ;;  %v10073_v33 = vmul.f32 %v10065_v17, %v10044_v30  ;;  %v10070_v63 = vmul.f32 %v10053_v55, %v10041_v56  ;;  %v10072_v60 = vmul.f32 %v10061_v58, %v10043_v61  ;;  %v10148_v30 = vld [vmem:[#allocation28 + $0x128] sm:$0xff] }
 0xedf   :  { %v18050_v22 = vpop.eup %18049  ;;  %v15684_v35 = vcombine.high %v10280_v0, %v10284_v23  ;;  %v10276_v56 = vld [vmem:[#allocation28 + $0x528] sm:$0xff] }
 0xee0   :  { %v10046_v21 = vmul.f32 %v18050_v22, %v19673_v28  ;;  %v10048_v6 = vmul.f32 %v18050_v22, %v19681_v25  ;;  %v10045_v39 = vmul.f32 %v18050_v22, %v19670_v45  ;;  %v10047_v46 = vmul.f32 %v18050_v22, %v19676_v51  ;;  %v10160_v25 = vld [vmem:[#allocation28 + $0x188] sm:$0xff] }
 0xee1   :  { %v19723_v32 = vadd.f32 %v10086_v48, %v10071_v2  ;;  %v19727_v41 = vadd.f32 %v10094_v44, %v10073_v33  ;;  %v19731_v40 = vadd.f32 %v10082_v24, %v10070_v63  ;;  %v19735_v57 = vadd.f32 %v10090_v14, %v10072_v60  ;;  %v10268_v61 = vld [vmem:[#allocation28 + $0x4e8] sm:$0xff] }
 0xee2   :  { %v10075_v36 = vmul.f32 %v10057_v9, %v10046_v21  ;;  %v10077_v13 = vmul.f32 %v10065_v17, %v10048_v6  ;;  %v10074_v47 = vmul.f32 %v10053_v55, %v10045_v39  ;;  %v10076_v31 = vmul.f32 %v10061_v58, %v10047_v46  ;;  %v10144_v9 = vld [vmem:[#allocation28 + $0x108] sm:$0xff] }
 0xee3   :  { %v15564_v37 = vcombine.high %v10160_v25, %v10164_v15  ;;  %v15563_v34 = vcombine.low %v10160_v25, %v10164_v15  ;;  %v10272_v17 = vld [vmem:[#allocation28 + $0x508] sm:$0xff]  ;;  %v15548_v52 = vcombine.high %v10144_v9, %v10148_v30  ;;  %v15547_v58 = vcombine.low %v10144_v9, %v10148_v30 }
 0xee4   :  { %v19725_v18 = vadd.f32 %v10086_v48, %v10075_v36  ;;  %v19729_v28 = vadd.f32 %v10094_v44, %v10077_v13  ;;  %v19733_v45 = vadd.f32 %v10082_v24, %v10074_v47  ;;  %v19737_v51 = vadd.f32 %v10090_v14, %v10076_v31  ;;  %v10264_v55 = vld [vmem:[#allocation28 + $0x4c8] sm:$0xff] }
 0xee5   :  { %v15676_v43 = vcombine.high %v10272_v17, %v10276_v56  ;;  %v15675_v22 = vcombine.low %v10272_v17, %v10276_v56  ;;  %v15668_v44 = vcombine.high %v10264_v55, %v10268_v61  ;;  %v10128_v24 = vld [vmem:[#allocation28 + $0x88] sm:$0xff]  ;;  %v15667_v33 = vcombine.low %v10264_v55, %v10268_v61 }
 0xee6   :  { %v19741_v12 = vpack.c.bf16 %v19725_v18, %v19723_v32  ;;  %v19745_v10 = vpack.c.bf16 %v19729_v28, %v19727_v41  ;;  %v19749_v4 = vpack.c.bf16 %v19733_v45, %v19731_v40  ;;  %v19753_v11 = vpack.c.bf16 %v19737_v51, %v19735_v57  ;;  %v10132_v14 = vld [vmem:[#allocation28 + $0xa8] sm:$0xff] }
 0xee7   :  { %v10256_v21 = vld [vmem:[#allocation28 + $0x488] sm:$0xff]  ;;  %v15532_v39 = vcombine.high %v10128_v24, %v10132_v14  ;;  %v15531_v47 = vcombine.low %v10128_v24, %v10132_v14 }
 0xee8   :  { %11721 = vmatprep.mubr.bf16.mxu0 %v19741_v12  ;;  %11764 = vmatprep.mubr.bf16.mxu1 %v19745_v10  ;;  %v10260_v2 = vld [vmem:[#allocation28 + $0x4a8] sm:$0xff] }
 0xee9   :  { %11722 = vmatmul.mubr.bf16.vlgmr.msra.gmra.mxu0 %v19749_v4  ;;  %11765 = vmatmul.mubr.bf16.vlgmr.msra.gmra.mxu1 %v19753_v11  ;;  %v15660_v63 = vcombine.high %v10256_v21, %v10260_v2  ;;  %v10120_v46 = vld [vmem:[#allocation28 + $0x48] sm:$0xff]  ;;  %v15659_v31 = vcombine.low %v10256_v21, %v10260_v2 }
 0xeea   :  { %11776 = vmatpush1.bf16.msra.mxu0 %v15571_v59  ;;  %11819 = vmatpush1.bf16.msra.mxu1 %v15699_v53  ;;  %v10136_v59 = vld [vmem:[#allocation28 + $0xc8] sm:$0xff] }
 0xeeb   :  { %11807 = vmatprep.mubr.bf16.mxu0 %v19741_v12  ;;  %11850 = vmatprep.mubr.bf16.mxu1 %v19745_v10  ;;  %v10140_v53 = vld [vmem:[#allocation28 + $0xe8] sm:$0xff] }
 0xeec   :  { %11777 = vmatprep.subr.bf16.mxu0 %v15564_v37  ;;  %11820 = vmatprep.subr.bf16.mxu1 %v15692_v5  ;;  %v15540_v48 = vcombine.high %v10136_v59, %v10140_v53  ;;  %v15539_v6 = vcombine.low %v10136_v59, %v10140_v53  ;;  %v10124_v60 = vld [vmem:[#allocation28 + $0x68] sm:$0xff] }
 0xeed   :  { %v10248_v36 = vld [vmem:[#allocation28 + $0x448] sm:$0xff]  ;;  %v15524_v25 = vcombine.high %v10120_v46, %v10124_v60  ;;  %v15523_v5 = vcombine.low %v10120_v46, %v10124_v60 }
 0xeee   :  { %11778 = vmatpush1.bf16.msra.mxu0 %v15563_v34  ;;  %11821 = vmatpush1.bf16.msra.mxu1 %v15691_v19  ;;  %v10252_v13 = vld [vmem:[#allocation28 + $0x468] sm:$0xff] }
 0xeef   :  { %11779 = vmatprep.subr.bf16.mxu0 %v15556_v1  ;;  %11822 = vmatprep.subr.bf16.mxu1 %v15684_v35  ;;  %v15652_v15 = vcombine.high %v10248_v36, %v10252_v13  ;;  %v10116_v27 = vld [vmem:[#allocation28 + $0x28] sm:$0xff]  ;;  %v15651_v20 = vcombine.low %v10248_v36, %v10252_v13 }
 0xef0   :  { %v10240_v16 = vld [vmem:[#allocation28 + $0x408] sm:$0xff]  ;;  %v15516_v0 = vcombine.high %v10112_v3, %v10116_v27  ;;  %v15515_v9 = vcombine.low %v10112_v3, %v10116_v27 }
 0xef1   :  { %v10244_v37 = vld [vmem:[#allocation28 + $0x428] sm:$0xff] }
 0xef2   :  { %11780 = vmatpush1.bf16.msra.mxu0 %v15555_v7  ;;  %11823 = vmatpush1.bf16.msra.mxu1 %v15683_v42  ;;  %v15644_v23 = vcombine.high %v10240_v16, %v10244_v37  ;;  %v10232_v34 = vld [vmem:[#allocation28 + $0x3c8] sm:$0xff]  ;;  %v15643_v30 = vcombine.low %v10240_v16, %v10244_v37 }
 0xef3   :  { %11781 = vmatprep.subr.bf16.mxu0 %v15548_v52  ;;  %11824 = vmatprep.subr.bf16.mxu1 %v15676_v43  ;;  %v10236_v19 = vld [vmem:[#allocation28 + $0x3e8] sm:$0xff] }
 0xef4   :  { %v10360_v1 = vld [vmem:[#allocation28 + $0x7c8] sm:$0xff]  ;;  %v15636_v17 = vcombine.high %v10232_v34, %v10236_v19  ;;  %v15635_v59 = vcombine.low %v10232_v34, %v10236_v19 }
 0xef5   :  { %v10364_v35 = vld [vmem:[#allocation28 + $0x7e8] sm:$0xff] }
 0xef6   :  { %11782 = vmatpush1.bf16.msra.mxu0 %v15547_v58  ;;  %11825 = vmatpush1.bf16.msra.mxu1 %v15675_v22  ;;  %v15764_v56 = vcombine.high %v10360_v1, %v10364_v35  ;;  %v10224_v7 = vld [vmem:[#allocation28 + $0x388] sm:$0xff]  ;;  %v15763_v53 = vcombine.low %v10360_v1, %v10364_v35 }
 0xef7   :  { %11783 = vmatprep.subr.bf16.mxu0 %v15540_v48  ;;  %11826 = vmatprep.subr.bf16.mxu1 %v15668_v44  ;;  %v10228_v42 = vld [vmem:[#allocation28 + $0x3a8] sm:$0xff] }
 0xef8   :  { %v10352_v52 = vld [vmem:[#allocation28 + $0x788] sm:$0xff]  ;;  %v15628_v55 = vcombine.high %v10224_v7, %v10228_v42  ;;  %v15627_v24 = vcombine.low %v10224_v7, %v10228_v42 }
 0xef9   :  { %v10356_v43 = vld [vmem:[#allocation28 + $0x7a8] sm:$0xff] }
 0xefa   :  { %11784 = vmatpush1.bf16.msra.mxu0 %v15539_v6  ;;  %11827 = vmatpush1.bf16.msra.mxu1 %v15667_v33  ;;  %v15756_v61 = vcombine.high %v10352_v52, %v10356_v43  ;;  %v10216_v58 = vld [vmem:[#allocation28 + $0x348] sm:$0xff]  ;;  %v15755_v14 = vcombine.low %v10352_v52, %v10356_v43 }
 0xefb   :  { %11785 = vmatprep.subr.bf16.mxu0 %v15532_v39  ;;  %11828 = vmatprep.subr.bf16.mxu1 %v15660_v63  ;;  %v10220_v22 = vld [vmem:[#allocation28 + $0x368] sm:$0xff] }
 0xefc   :  { %v10344_v48 = vld [vmem:[#allocation28 + $0x748] sm:$0xff]  ;;  %v15620_v21 = vcombine.high %v10216_v58, %v10220_v22  ;;  %v15619_v46 = vcombine.low %v10216_v58, %v10220_v22 }
 0xefd   :  { %v10348_v44 = vld [vmem:[#allocation28 + $0x768] sm:$0xff] }
 0xefe   :  { %11786 = vmatpush1.bf16.msra.mxu0 %v15531_v47  ;;  %11829 = vmatpush1.bf16.msra.mxu1 %v15659_v31  ;;  %v15748_v2 = vcombine.high %v10344_v48, %v10348_v44  ;;  %v10208_v6 = vld [vmem:[#allocation28 + $0x308] sm:$0xff]  ;;  %v15747_v60 = vcombine.low %v10344_v48, %v10348_v44 }
 0xeff   :  { %11787 = vmatprep.subr.bf16.mxu0 %v15524_v25  ;;  %11830 = vmatprep.subr.bf16.mxu1 %v15652_v15  ;;  %v10212_v33 = vld [vmem:[#allocation28 + $0x328] sm:$0xff] }
 0xf00   :  { %v10336_v39 = vld [vmem:[#allocation28 + $0x708] sm:$0xff]  ;;  %v15612_v36 = vcombine.high %v10208_v6, %v10212_v33  ;;  %v15611_v3 = vcombine.low %v10208_v6, %v10212_v33 }
 0xf01   :  { %v10340_v63 = vld [vmem:[#allocation28 + $0x728] sm:$0xff] }
 0xf02   :  { %11788 = vmatpush1.bf16.msra.mxu0 %v15523_v5  ;;  %11831 = vmatpush1.bf16.msra.mxu1 %v15651_v20  ;;  %v15740_v13 = vcombine.high %v10336_v39, %v10340_v63  ;;  %v10200_v47 = vld [vmem:[#allocation28 + $0x2c8] sm:$0xff]  ;;  %v15739_v27 = vcombine.low %v10336_v39, %v10340_v63 }
 0xf03   :  { %11789 = vmatprep.subr.bf16.mxu0 %v15516_v0  ;;  %11832 = vmatprep.subr.bf16.mxu1 %v15644_v23  ;;  %v10204_v31 = vld [vmem:[#allocation28 + $0x2e8] sm:$0xff] }
 0xf04   :  { %v10328_v25 = vld [vmem:[#allocation28 + $0x6c8] sm:$0xff]  ;;  %v15604_v16 = vcombine.high %v10200_v47, %v10204_v31  ;;  %v15603_v34 = vcombine.low %v10200_v47, %v10204_v31 }
 0xf05   :  { %v10332_v15 = vld [vmem:[#allocation28 + $0x6e8] sm:$0xff] }
 0xf06   :  { %11790 = vmatpush1.bf16.msra.mxu0 %v15515_v9  ;;  %11833 = vmatpush1.bf16.msra.mxu1 %v15643_v30  ;;  %v15732_v37 = vcombine.high %v10328_v25, %v10332_v15  ;;  %v10192_v5 = vld [vmem:[#allocation28 + $0x288] sm:$0xff]  ;;  %v15731_v19 = vcombine.low %v10328_v25, %v10332_v15 }
 0xf07   :  { %11791 = vmatprep.subr.bf16.mxu0 %v15636_v17  ;;  %11834 = vmatprep.subr.bf16.mxu1 %v15764_v56  ;;  %v10196_v20 = vld [vmem:[#allocation28 + $0x2a8] sm:$0xff] }
 0xf08   :  { %v10320_v0 = vld [vmem:[#allocation28 + $0x688] sm:$0xff]  ;;  %v15596_v1 = vcombine.high %v10192_v5, %v10196_v20  ;;  %v15595_v7 = vcombine.low %v10192_v5, %v10196_v20 }
 0xf09   :  { %v10324_v23 = vld [vmem:[#allocation28 + $0x6a8] sm:$0xff] }
 0xf0a   :  { %11792 = vmatpush2.bf16.msra.mxu0 %v15635_v59  ;;  %11835 = vmatpush2.bf16.msra.mxu1 %v15763_v53  ;;  %v15724_v35 = vcombine.high %v10320_v0, %v10324_v23  ;;  %v10184_v9 = vld [vmem:[#allocation28 + $0x248] sm:$0xff]  ;;  %v15723_v42 = vcombine.low %v10320_v0, %v10324_v23 }
 0xf0b   :  { %11793 = vmatprep.subr.bf16.mxu0 %v15628_v55  ;;  %11836 = vmatprep.subr.bf16.mxu1 %v15756_v61  ;;  %v10188_v30 = vld [vmem:[#allocation28 + $0x268] sm:$0xff] }
 0xf0c   :  { %v10312_v17 = vld [vmem:[#allocation28 + $0x648] sm:$0xff]  ;;  %v15588_v52 = vcombine.high %v10184_v9, %v10188_v30  ;;  %v15587_v58 = vcombine.low %v10184_v9, %v10188_v30 }
 0xf0d   :  { %v10316_v56 = vld [vmem:[#allocation28 + $0x668] sm:$0xff] }
 0xf0e   :  { %11794 = vmatpush2.bf16.msra.mxu0 %v15627_v24  ;;  %11837 = vmatpush2.bf16.msra.mxu1 %v15755_v14  ;;  %v15716_v43 = vcombine.high %v10312_v17, %v10316_v56  ;;  %v10176_v59 = vld [vmem:[#allocation28 + $0x208] sm:$0xff]  ;;  %v15715_v22 = vcombine.low %v10312_v17, %v10316_v56  ;;  %v10169_v24 = vld [vmem:[#allocation28 + $0x1d0] sm:$0xff] }
 0xf0f   :  { %11795 = vmatprep.subr.bf16.mxu0 %v15620_v21  ;;  %11838 = vmatprep.subr.bf16.mxu1 %v15748_v2  ;;  %v10180_v53 = vld [vmem:[#allocation28 + $0x228] sm:$0xff]  ;;  %v10173_v14 = vld [vmem:[#allocation28 + $0x1f0] sm:$0xff] }
 0xf10   :  { %v10304_v55 = vld [vmem:[#allocation28 + $0x608] sm:$0xff]  ;;  %v15580_v48 = vcombine.high %v10176_v59, %v10180_v53  ;;  %v10297_v21 = vld [vmem:[#allocation28 + $0x5d0] sm:$0xff]  ;;  %v15579_v6 = vcombine.low %v10176_v59, %v10180_v53  ;;  %v15574_v39 = vcombine.high %v10169_v24, %v10173_v14  ;;  %v15573_v47 = vcombine.low %v10169_v24, %v10173_v14 }
 0xf11   :  { %v10308_v61 = vld [vmem:[#allocation28 + $0x628] sm:$0xff]  ;;  %v10301_v2 = vld [vmem:[#allocation28 + $0x5f0] sm:$0xff] }
 0xf12   :  { %11796 = vmatpush2.bf16.msra.mxu0 %v15619_v46  ;;  %11839 = vmatpush2.bf16.msra.mxu1 %v15747_v60  ;;  %v15708_v44 = vcombine.high %v10304_v55, %v10308_v61  ;;  %v15707_v33 = vcombine.low %v10304_v55, %v10308_v61  ;;  %v15702_v63 = vcombine.high %v10297_v21, %v10301_v2  ;;  %v10161_v46 = vld [vmem:[#allocation28 + $0x190] sm:$0xff] }
 0xf13   :  { %11797 = vmatprep.subr.bf16.mxu0 %v15612_v36  ;;  %11840 = vmatprep.subr.bf16.mxu1 %v15740_v13  ;;  %v10165_v60 = vld [vmem:[#allocation28 + $0x1b0] sm:$0xff]  ;;  %v15701_v31 = vcombine.low %v10297_v21, %v10301_v2 }
 0xf14   :  { %v10289_v36 = vld [vmem:[#allocation28 + $0x590] sm:$0xff]  ;;  %v15566_v25 = vcombine.high %v10161_v46, %v10165_v60  ;;  %v15565_v5 = vcombine.low %v10161_v46, %v10165_v60 }
 0xf15   :  { %v10293_v13 = vld [vmem:[#allocation28 + $0x5b0] sm:$0xff] }
 0xf16   :  { %11798 = vmatpush2.bf16.msra.mxu0 %v15611_v3  ;;  %11841 = vmatpush2.bf16.msra.mxu1 %v15739_v27  ;;  %v15694_v15 = vcombine.high %v10289_v36, %v10293_v13  ;;  %v10153_v3 = vld [vmem:[#allocation28 + $0x150] sm:$0xff]  ;;  %v15693_v20 = vcombine.low %v10289_v36, %v10293_v13 }
 0xf17   :  { %11799 = vmatprep.subr.bf16.mxu0 %v15604_v16  ;;  %11842 = vmatprep.subr.bf16.mxu1 %v15732_v37  ;;  %v10157_v27 = vld [vmem:[#allocation28 + $0x170] sm:$0xff] }
 0xf18   :  { %v10281_v16 = vld [vmem:[#allocation28 + $0x550] sm:$0xff]  ;;  %v15558_v0 = vcombine.high %v10153_v3, %v10157_v27  ;;  %v15557_v9 = vcombine.low %v10153_v3, %v10157_v27 }
 0xf19   :  { %v10285_v37 = vld [vmem:[#allocation28 + $0x570] sm:$0xff] }
 0xf1a   :  { %11800 = vmatpush2.bf16.msra.mxu0 %v15603_v34  ;;  %11843 = vmatpush2.bf16.msra.mxu1 %v15731_v19  ;;  %v15686_v23 = vcombine.high %v10281_v16, %v10285_v37  ;;  %v10145_v34 = vld [vmem:[#allocation28 + $0x110] sm:$0xff]  ;;  %v15685_v30 = vcombine.low %v10281_v16, %v10285_v37 }
 0xf1b   :  { %11801 = vmatprep.subr.bf16.mxu0 %v15596_v1  ;;  %11844 = vmatprep.subr.bf16.mxu1 %v15724_v35  ;;  %v10149_v19 = vld [vmem:[#allocation28 + $0x130] sm:$0xff] }
 0xf1c   :  { %v10273_v1 = vld [vmem:[#allocation28 + $0x510] sm:$0xff]  ;;  %v15550_v17 = vcombine.high %v10145_v34, %v10149_v19  ;;  %v15549_v59 = vcombine.low %v10145_v34, %v10149_v19 }
 0xf1d   :  { %v10277_v35 = vld [vmem:[#allocation28 + $0x530] sm:$0xff] }
 0xf1e   :  { %11802 = vmatpush2.bf16.msra.mxu0 %v15595_v7  ;;  %11845 = vmatpush2.bf16.msra.mxu1 %v15723_v42  ;;  %v15678_v56 = vcombine.high %v10273_v1, %v10277_v35  ;;  %v10137_v7 = vld [vmem:[#allocation28 + $0xd0] sm:$0xff]  ;;  %v15677_v53 = vcombine.low %v10273_v1, %v10277_v35 }
 0xf1f   :  { %11803 = vmatprep.subr.bf16.mxu0 %v15588_v52  ;;  %11846 = vmatprep.subr.bf16.mxu1 %v15716_v43  ;;  %v10141_v42 = vld [vmem:[#allocation28 + $0xf0] sm:$0xff] }
 0xf20   :  { %v10265_v52 = vld [vmem:[#allocation28 + $0x4d0] sm:$0xff]  ;;  %v15542_v55 = vcombine.high %v10137_v7, %v10141_v42  ;;  %v15541_v24 = vcombine.low %v10137_v7, %v10141_v42 }
 0xf21   :  { %v10269_v43 = vld [vmem:[#allocation28 + $0x4f0] sm:$0xff] }
 0xf22   :  { %11804 = vmatpush2.bf16.msra.mxu0 %v15587_v58  ;;  %11847 = vmatpush2.bf16.msra.mxu1 %v15715_v22  ;;  %v15670_v61 = vcombine.high %v10265_v52, %v10269_v43  ;;  %v10129_v58 = vld [vmem:[#allocation28 + $0x90] sm:$0xff]  ;;  %v15669_v14 = vcombine.low %v10265_v52, %v10269_v43 }
 0xf23   :  { %11805 = vmatprep.subr.bf16.mxu0 %v15580_v48  ;;  %11848 = vmatprep.subr.bf16.mxu1 %v15708_v44  ;;  %v10133_v22 = vld [vmem:[#allocation28 + $0xb0] sm:$0xff] }
 0xf24   :  { %v10257_v48 = vld [vmem:[#allocation28 + $0x490] sm:$0xff]  ;;  %v15534_v21 = vcombine.high %v10129_v58, %v10133_v22  ;;  %v15533_v46 = vcombine.low %v10129_v58, %v10133_v22 }
 0xf25   :  { %v10261_v44 = vld [vmem:[#allocation28 + $0x4b0] sm:$0xff] }
 0xf26   :  { %11806 = vmatpush2.bf16.msra.mxu0 %v15579_v6  ;;  %11849 = vmatpush2.bf16.msra.mxu1 %v15707_v33  ;;  %v15662_v2 = vcombine.high %v10257_v48, %v10261_v44  ;;  %v10121_v6 = vld [vmem:[#allocation28 + $0x50] sm:$0xff]  ;;  %v15661_v60 = vcombine.low %v10257_v48, %v10261_v44 }
 0xf27   :  { %11861 = vmatprep.subr.bf16.mxu0 %v15574_v39  ;;  %11904 = vmatprep.subr.bf16.mxu1 %v15702_v63  ;;  %v10125_v33 = vld [vmem:[#allocation28 + $0x70] sm:$0xff] }
 0xf28   :  { %v10249_v39 = vld [vmem:[#allocation28 + $0x450] sm:$0xff]  ;;  %v15526_v36 = vcombine.high %v10121_v6, %v10125_v33  ;;  %v15525_v3 = vcombine.low %v10121_v6, %v10125_v33 }
 0xf29   :  { %11808 = vmatmul.mubr.bf16.vlgmr.msra.gmra.mxu0 %v19749_v4  ;;  %11851 = vmatmul.mubr.bf16.vlgmr.msra.gmra.mxu1 %v19753_v11  ;;  %v10253_v63 = vld [vmem:[#allocation28 + $0x470] sm:$0xff] }
 0xf2a   :  { %11862 = vmatpush1.bf16.msra.mxu0 %v15573_v47  ;;  %11893 = vmatprep.mubr.bf16.mxu0 %v19741_v12  ;;  %v15654_v13 = vcombine.high %v10249_v39, %v10253_v63  ;;  %v10113_v47 = vld [vmem:[#allocation28 + $0x10] sm:$0xff]  ;;  %v15653_v27 = vcombine.low %v10249_v39, %v10253_v63 }
 0xf2b   :  { %11905 = vmatpush1.bf16.msra.mxu1 %v15701_v31  ;;  %11936 = vmatprep.mubr.bf16.mxu1 %v19745_v10  ;;  %v10117_v31 = vld [vmem:[#allocation28 + $0x30] sm:$0xff] }
 0xf2c   :  { %11863 = vmatprep.subr.bf16.mxu0 %v15566_v25  ;;  %11906 = vmatprep.subr.bf16.mxu1 %v15694_v15  ;;  %v10241_v25 = vld [vmem:[#allocation28 + $0x410] sm:$0xff]  ;;  %v15518_v16 = vcombine.high %v10113_v47, %v10117_v31  ;;  %v15517_v34 = vcombine.low %v10113_v47, %v10117_v31 }
 0xf2d   :  { %v10245_v15 = vld [vmem:[#allocation28 + $0x430] sm:$0xff] }
 0xf2e   :  { %11864 = vmatpush1.bf16.msra.mxu0 %v15565_v5  ;;  %v15646_v37 = vcombine.high %v10241_v25, %v10245_v15  ;;  %v10233_v5 = vld [vmem:[#allocation28 + $0x3d0] sm:$0xff]  ;;  %v15645_v19 = vcombine.low %v10241_v25, %v10245_v15 }
 0xf2f   :  { %11907 = vmatpush1.bf16.msra.mxu1 %v15693_v20  ;;  %11865 = vmatprep.subr.bf16.mxu0 %v15558_v0  ;;  %v10237_v20 = vld [vmem:[#allocation28 + $0x3f0] sm:$0xff] }
 0xf30   :  { %11908 = vmatprep.subr.bf16.mxu1 %v15686_v23  ;;  %v10361_v0 = vld [vmem:[#allocation28 + $0x7d0] sm:$0xff]  ;;  %v15638_v1 = vcombine.high %v10233_v5, %v10237_v20  ;;  %v15637_v7 = vcombine.low %v10233_v5, %v10237_v20 }
 0xf31   :  { %v10365_v23 = vld [vmem:[#allocation28 + $0x7f0] sm:$0xff] }
 0xf32   :  { %11866 = vmatpush1.bf16.msra.mxu0 %v15557_v9  ;;  %v15766_v35 = vcombine.high %v10361_v0, %v10365_v23  ;;  %v10225_v9 = vld [vmem:[#allocation28 + $0x390] sm:$0xff]  ;;  %v15765_v42 = vcombine.low %v10361_v0, %v10365_v23 }
 0xf33   :  { %11909 = vmatpush1.bf16.msra.mxu1 %v15685_v30  ;;  %11867 = vmatprep.subr.bf16.mxu0 %v15550_v17  ;;  %v10229_v30 = vld [vmem:[#allocation28 + $0x3b0] sm:$0xff] }
 0xf34   :  { %11910 = vmatprep.subr.bf16.mxu1 %v15678_v56  ;;  %v10353_v17 = vld [vmem:[#allocation28 + $0x790] sm:$0xff]  ;;  %v15630_v52 = vcombine.high %v10225_v9, %v10229_v30  ;;  %v15629_v58 = vcombine.low %v10225_v9, %v10229_v30 }
 0xf35   :  { %v10357_v56 = vld [vmem:[#allocation28 + $0x7b0] sm:$0xff] }
 0xf36   :  { %11868 = vmatpush1.bf16.msra.mxu0 %v15549_v59  ;;  %v15758_v43 = vcombine.high %v10353_v17, %v10357_v56  ;;  %v10217_v59 = vld [vmem:[#allocation28 + $0x350] sm:$0xff]  ;;  %v15757_v22 = vcombine.low %v10353_v17, %v10357_v56 }
 0xf37   :  { %11911 = vmatpush1.bf16.msra.mxu1 %v15677_v53  ;;  %11869 = vmatprep.subr.bf16.mxu0 %v15542_v55  ;;  %v10221_v53 = vld [vmem:[#allocation28 + $0x370] sm:$0xff] }
 0xf38   :  { %11912 = vmatprep.subr.bf16.mxu1 %v15670_v61  ;;  %v10345_v55 = vld [vmem:[#allocation28 + $0x750] sm:$0xff]  ;;  %v15622_v48 = vcombine.high %v10217_v59, %v10221_v53  ;;  %v15621_v6 = vcombine.low %v10217_v59, %v10221_v53 }
 0xf39   :  { %v10349_v61 = vld [vmem:[#allocation28 + $0x770] sm:$0xff] }
 0xf3a   :  { %11870 = vmatpush1.bf16.msra.mxu0 %v15541_v24  ;;  %v15750_v44 = vcombine.high %v10345_v55, %v10349_v61  ;;  %v10209_v24 = vld [vmem:[#allocation28 + $0x310] sm:$0xff]  ;;  %v15749_v33 = vcombine.low %v10345_v55, %v10349_v61 }
 0xf3b   :  { %11913 = vmatpush1.bf16.msra.mxu1 %v15669_v14  ;;  %11871 = vmatprep.subr.bf16.mxu0 %v15534_v21  ;;  %v10213_v14 = vld [vmem:[#allocation28 + $0x330] sm:$0xff] }
 0xf3c   :  { %11914 = vmatprep.subr.bf16.mxu1 %v15662_v2  ;;  %v10337_v21 = vld [vmem:[#allocation28 + $0x710] sm:$0xff]  ;;  %v15614_v39 = vcombine.high %v10209_v24, %v10213_v14  ;;  %v15613_v47 = vcombine.low %v10209_v24, %v10213_v14 }
 0xf3d   :  { %v10341_v2 = vld [vmem:[#allocation28 + $0x730] sm:$0xff] }
 0xf3e   :  { %11872 = vmatpush1.bf16.msra.mxu0 %v15533_v46  ;;  %v15742_v63 = vcombine.high %v10337_v21, %v10341_v2  ;;  %v10201_v46 = vld [vmem:[#allocation28 + $0x2d0] sm:$0xff]  ;;  %v15741_v31 = vcombine.low %v10337_v21, %v10341_v2 }
 0xf3f   :  { %11915 = vmatpush1.bf16.msra.mxu1 %v15661_v60  ;;  %11873 = vmatprep.subr.bf16.mxu0 %v15526_v36  ;;  %v10205_v60 = vld [vmem:[#allocation28 + $0x2f0] sm:$0xff] }
 0xf40   :  { %11916 = vmatprep.subr.bf16.mxu1 %v15654_v13  ;;  %v10329_v36 = vld [vmem:[#allocation28 + $0x6d0] sm:$0xff]  ;;  %v15606_v25 = vcombine.high %v10201_v46, %v10205_v60  ;;  %v15605_v5 = vcombine.low %v10201_v46, %v10205_v60  ;;  %v10294_v46 = vld [vmem:[#allocation28 + $0x5b8] sm:$0xff] }
 0xf41   :  { %v10333_v13 = vld [vmem:[#allocation28 + $0x6f0] sm:$0xff] }
 0xf42   :  { %11874 = vmatpush1.bf16.msra.mxu0 %v15525_v3  ;;  %v15734_v15 = vcombine.high %v10329_v36, %v10333_v13  ;;  %v10193_v3 = vld [vmem:[#allocation28 + $0x290] sm:$0xff]  ;;  %v15733_v20 = vcombine.low %v10329_v36, %v10333_v13  ;;  %v10154_v13 = vld [vmem:[#allocation28 + $0x158] sm:$0xff] }
 0xf43   :  { %11917 = vmatpush1.bf16.msra.mxu1 %v15653_v27  ;;  %11875 = vmatprep.subr.bf16.mxu0 %v15518_v16  ;;  %v10197_v27 = vld [vmem:[#allocation28 + $0x2b0] sm:$0xff] }
 0xf44   :  { %11918 = vmatprep.subr.bf16.mxu1 %v15646_v37  ;;  %v10321_v16 = vld [vmem:[#allocation28 + $0x690] sm:$0xff]  ;;  %v15598_v0 = vcombine.high %v10193_v3, %v10197_v27  ;;  %v15597_v9 = vcombine.low %v10193_v3, %v10197_v27 }
 0xf45   :  { %v10325_v37 = vld [vmem:[#allocation28 + $0x6b0] sm:$0xff] }
 0xf46   :  { %11876 = vmatpush1.bf16.msra.mxu0 %v15517_v34  ;;  %v15726_v23 = vcombine.high %v10321_v16, %v10325_v37  ;;  %v10185_v34 = vld [vmem:[#allocation28 + $0x250] sm:$0xff]  ;;  %v15725_v30 = vcombine.low %v10321_v16, %v10325_v37 }
 0xf47   :  { %11919 = vmatpush1.bf16.msra.mxu1 %v15645_v19  ;;  %11877 = vmatprep.subr.bf16.mxu0 %v15638_v1  ;;  %v10189_v19 = vld [vmem:[#allocation28 + $0x270] sm:$0xff] }
 0xf48   :  { %11920 = vmatprep.subr.bf16.mxu1 %v15766_v35  ;;  %v10313_v1 = vld [vmem:[#allocation28 + $0x650] sm:$0xff]  ;;  %v15590_v17 = vcombine.high %v10185_v34, %v10189_v19  ;;  %v15589_v59 = vcombine.low %v10185_v34, %v10189_v19 }
 0xf49   :  { %v10317_v35 = vld [vmem:[#allocation28 + $0x670] sm:$0xff] }
 0xf4a   :  { %11878 = vmatpush2.bf16.msra.mxu0 %v15637_v7  ;;  %v15718_v56 = vcombine.high %v10313_v1, %v10317_v35  ;;  %v10177_v7 = vld [vmem:[#allocation28 + $0x210] sm:$0xff]  ;;  %v15717_v53 = vcombine.low %v10313_v1, %v10317_v35  ;;  %v10138_v35 = vld [vmem:[#allocation28 + $0xd8] sm:$0xff] }
 0xf4b   :  { %11921 = vmatpush2.bf16.msra.mxu1 %v15765_v42  ;;  %11879 = vmatprep.subr.bf16.mxu0 %v15630_v52  ;;  %v10181_v42 = vld [vmem:[#allocation28 + $0x230] sm:$0xff] }
 0xf4c   :  { %11922 = vmatprep.subr.bf16.mxu1 %v15758_v43  ;;  %v10305_v52 = vld [vmem:[#allocation28 + $0x610] sm:$0xff]  ;;  %v15582_v55 = vcombine.high %v10177_v7, %v10181_v42  ;;  %v15581_v24 = vcombine.low %v10177_v7, %v10181_v42 }
 0xf4d   :  { %v10309_v43 = vld [vmem:[#allocation28 + $0x630] sm:$0xff] }
 0xf4e   :  { %11880 = vmatpush2.bf16.msra.mxu0 %v15629_v58  ;;  %v15710_v61 = vcombine.high %v10305_v52, %v10309_v43  ;;  %v10170_v58 = vld [vmem:[#allocation28 + $0x1d8] sm:$0xff]  ;;  %v15709_v14 = vcombine.low %v10305_v52, %v10309_v43 }
 0xf4f   :  { %11923 = vmatpush2.bf16.msra.mxu1 %v15757_v22  ;;  %11881 = vmatprep.subr.bf16.mxu0 %v15622_v48  ;;  %v10174_v22 = vld [vmem:[#allocation28 + $0x1f8] sm:$0xff] }
 0xf50   :  { %11924 = vmatprep.subr.bf16.mxu1 %v15750_v44  ;;  %v10298_v48 = vld [vmem:[#allocation28 + $0x5d8] sm:$0xff]  ;;  %v15576_v21 = vcombine.high %v10170_v58, %v10174_v22 }
 0xf51   :  { %v10302_v44 = vld [vmem:[#allocation28 + $0x5f8] sm:$0xff] }
 0xf52   :  { %11882 = vmatpush2.bf16.msra.mxu0 %v15621_v6  ;;  %v15704_v2 = vcombine.high %v10298_v48, %v10302_v44  ;;  %v10162_v6 = vld [vmem:[#allocation28 + $0x198] sm:$0xff]  ;;  %v15703_v60 = vcombine.low %v10298_v48, %v10302_v44 }
 0xf53   :  { %11925 = vmatpush2.bf16.msra.mxu1 %v15749_v33  ;;  %11883 = vmatprep.subr.bf16.mxu0 %v15614_v39  ;;  %v10166_v33 = vld [vmem:[#allocation28 + $0x1b8] sm:$0xff]  ;;  %v15575_v39 = vcombine.low %v10170_v58, %v10174_v22 }
 0xf54   :  { %11926 = vmatprep.subr.bf16.mxu1 %v15742_v63  ;;  %v10290_v63 = vld [vmem:[#allocation28 + $0x598] sm:$0xff]  ;;  %v15568_v36 = vcombine.high %v10162_v6, %v10166_v33  ;;  %v15567_v3 = vcombine.low %v10162_v6, %v10166_v33 }
 0xf55   :  { %v15695_v27 = vcombine.low %v10290_v63, %v10294_v46  ;;  %v10130_v52 = vld [vmem:[#allocation28 + $0x98] sm:$0xff] }
 0xf56   :  { %11884 = vmatpush2.bf16.msra.mxu0 %v15613_v47  ;;  %v10158_v47 = vld [vmem:[#allocation28 + $0x178] sm:$0xff] }
 0xf57   :  { %11927 = vmatpush2.bf16.msra.mxu1 %v15741_v31  ;;  %11885 = vmatprep.subr.bf16.mxu0 %v15606_v25  ;;  %v15696_v31 = vcombine.high %v10290_v63, %v10294_v46  ;;  %v10282_v25 = vld [vmem:[#allocation28 + $0x558] sm:$0xff]  ;;  %v15560_v16 = vcombine.high %v10154_v13, %v10158_v47  ;;  %v15559_v34 = vcombine.low %v10154_v13, %v10158_v47 }
 0xf58   :  { %11928 = vmatprep.subr.bf16.mxu1 %v15734_v15  ;;  %v10286_v15 = vld [vmem:[#allocation28 + $0x578] sm:$0xff] }
 0xf59   :  { %v15688_v37 = vcombine.high %v10282_v25, %v10286_v15  ;;  %v15687_v19 = vcombine.low %v10282_v25, %v10286_v15  ;;  %v10134_v43 = vld [vmem:[#allocation28 + $0xb8] sm:$0xff] }
 0xf5a   :  { %11886 = vmatpush2.bf16.msra.mxu0 %v15605_v5  ;;  %v10146_v5 = vld [vmem:[#allocation28 + $0x118] sm:$0xff]  ;;  %v15536_v58 = vcombine.high %v10130_v52, %v10134_v43 }
 0xf5b   :  { %11929 = vmatpush2.bf16.msra.mxu1 %v15733_v20  ;;  %11887 = vmatprep.subr.bf16.mxu0 %v15598_v0  ;;  %v10150_v20 = vld [vmem:[#allocation28 + $0x138] sm:$0xff] }
 0xf5c   :  { %11930 = vmatprep.subr.bf16.mxu1 %v15726_v23  ;;  %v10274_v0 = vld [vmem:[#allocation28 + $0x518] sm:$0xff]  ;;  %v15552_v1 = vcombine.high %v10146_v5, %v10150_v20 }
 0xf5d   :  { %v10278_v23 = vld [vmem:[#allocation28 + $0x538] sm:$0xff] }
 0xf5e   :  { %11888 = vmatpush2.bf16.msra.mxu0 %v15597_v9  ;;  %v10142_v9 = vld [vmem:[#allocation28 + $0xf8] sm:$0xff] }
 0xf5f   :  { %11931 = vmatpush2.bf16.msra.mxu1 %v15725_v30  ;;  %11889 = vmatprep.subr.bf16.mxu0 %v15590_v17  ;;  %v10266_v30 = vld [vmem:[#allocation28 + $0x4d8] sm:$0xff]  ;;  %v15544_v7 = vcombine.high %v10138_v35, %v10142_v9 }
 0xf60   :  { %11932 = vmatprep.subr.bf16.mxu1 %v15718_v56  ;;  %v10270_v17 = vld [vmem:[#allocation28 + $0x4f8] sm:$0xff]  ;;  %v15679_v56 = vcombine.low %v10274_v0, %v10278_v23 }
 0xf61   :  { %v15672_v42 = vcombine.high %v10266_v30, %v10270_v17  ;;  %v10122_v48 = vld [vmem:[#allocation28 + $0x58] sm:$0xff] }
 0xf62   :  { %11890 = vmatpush2.bf16.msra.mxu0 %v15589_v59  ;;  %v10258_v59 = vld [vmem:[#allocation28 + $0x498] sm:$0xff] }
 0xf63   :  { %11933 = vmatpush2.bf16.msra.mxu1 %v15717_v53  ;;  %11891 = vmatprep.subr.bf16.mxu0 %v15582_v55  ;;  %v10262_v53 = vld [vmem:[#allocation28 + $0x4b8] sm:$0xff]  ;;  %v15543_v55 = vcombine.low %v10138_v35, %v10142_v9 }
 0xf64   :  { %11934 = vmatprep.subr.bf16.mxu1 %v15710_v61  ;;  %v15671_v61 = vcombine.low %v10266_v30, %v10270_v17  ;;  %v15664_v22 = vcombine.high %v10258_v59, %v10262_v53  ;;  %v10126_v44 = vld [vmem:[#allocation28 + $0x78] sm:$0xff] }
 0xf65   :  { %v15528_v6 = vcombine.high %v10122_v48, %v10126_v44  ;;  %v10118_v63 = vld [vmem:[#allocation28 + $0x38] sm:$0xff] }
 0xf66   :  { %11892 = vmatpush2.bf16.msra.mxu0 %v15581_v24  ;;  %v10250_v24 = vld [vmem:[#allocation28 + $0x458] sm:$0xff] }
 0xf67   :  { %11935 = vmatpush2.bf16.msra.mxu1 %v15709_v14  ;;  %11947 = vmatprep.subr.bf16.mxu0 %v15576_v21  ;;  %v10254_v14 = vld [vmem:[#allocation28 + $0x478] sm:$0xff]  ;;  %v15535_v21 = vcombine.low %v10130_v52, %v10134_v43 }
 0xf68   :  { %11990 = vmatprep.subr.bf16.mxu1 %v15704_v2  ;;  %v15663_v2 = vcombine.low %v10258_v59, %v10262_v53  ;;  %v15656_v33 = vcombine.high %v10250_v24, %v10254_v14  ;;  %v10242_v46 = vld [vmem:[#allocation28 + $0x418] sm:$0xff]  ;;  %v15655_v13 = vcombine.low %v10250_v24, %v10254_v14 }
 0xf69   :  { %11894 = vmatmul.mubr.bf16.vlgmr.msra.gmra.mxu0 %v19749_v4  ;;  %v10234_v25 = vld [vmem:[#allocation28 + $0x3d8] sm:$0xff] }
 0xf6a   :  { %11937 = vmatmul.mubr.bf16.vlgmr.msra.gmra.mxu1 %v19753_v11  ;;  %11948 = vmatpush1.bf16.msra.mxu0 %v15575_v39  ;;  %v10114_v39 = vld [vmem:[#allocation28 + $0x18] sm:$0xff] }
 0xf6b   :  { %11979 = vmatprep.mubr.bf16.mxu0 %v19741_v12  ;;  %11991 = vmatpush1.bf16.msra.mxu1 %v15703_v60  ;;  %v15680_v12 = vcombine.high %v10274_v0, %v10278_v23  ;;  %v10246_v60 = vld [vmem:[#allocation28 + $0x438] sm:$0xff]  ;;  %v15520_v47 = vcombine.high %v10114_v39, %v10118_v63 }
 0xf6c   :  { %12022 = vmatprep.mubr.bf16.mxu1 %v19745_v10  ;;  %11949 = vmatprep.subr.bf16.mxu0 %v15568_v36  ;;  %v15551_v10 = vcombine.low %v10146_v5, %v10150_v20  ;;  %v15527_v36 = vcombine.low %v10122_v48, %v10126_v44  ;;  %v10238_v15 = vld [vmem:[#allocation28 + $0x3f8] sm:$0xff] }
 0xf6d   :  { %11992 = vmatprep.subr.bf16.mxu1 %v15696_v31  ;;  %v15648_v31 = vcombine.high %v10242_v46, %v10246_v60  ;;  %v15640_v5 = vcombine.high %v10234_v25, %v10238_v15  ;;  %v10226_v0 = vld [vmem:[#allocation28 + $0x398] sm:$0xff] }
 0xf6e   :  { %11950 = vmatpush1.bf16.msra.mxu0 %v15567_v3  ;;  %v10362_v3 = vld [vmem:[#allocation28 + $0x7d8] sm:$0xff] }
 0xf6f   :  { %11993 = vmatpush1.bf16.msra.mxu1 %v15695_v27  ;;  %11951 = vmatprep.subr.bf16.mxu0 %v15560_v16  ;;  %v10366_v27 = vld [vmem:[#allocation28 + $0x7f8] sm:$0xff]  ;;  %v15519_v16 = vcombine.low %v10114_v39, %v10118_v63 }
 0xf70   :  { %11994 = vmatprep.subr.bf16.mxu1 %v15688_v37  ;;  %v15647_v37 = vcombine.low %v10242_v46, %v10246_v60  ;;  %v15768_v20 = vcombine.high %v10362_v3, %v10366_v27  ;;  %v10230_v23 = vld [vmem:[#allocation28 + $0x3b8] sm:$0xff] }
 0xf71   :  { %v15632_v35 = vcombine.high %v10226_v0, %v10230_v23  ;;  %v10218_v30 = vld [vmem:[#allocation28 + $0x358] sm:$0xff] }
 0xf72   :  { %11952 = vmatpush1.bf16.msra.mxu0 %v15559_v34  ;;  %v10354_v34 = vld [vmem:[#allocation28 + $0x798] sm:$0xff] }
 0xf73   :  { %11995 = vmatpush1.bf16.msra.mxu1 %v15687_v19  ;;  %11953 = vmatprep.subr.bf16.mxu0 %v15552_v1  ;;  %v10358_v19 = vld [vmem:[#allocation28 + $0x7b8] sm:$0xff]  ;;  %v15639_v1 = vcombine.low %v10234_v25, %v10238_v15 }
 0xf74   :  { %11996 = vmatprep.subr.bf16.mxu1 %v15680_v12  ;;  %v15767_v12 = vcombine.low %v10362_v3, %v10366_v27  ;;  %v15760_v9 = vcombine.high %v10354_v34, %v10358_v19  ;;  %v10222_v17 = vld [vmem:[#allocation28 + $0x378] sm:$0xff] }
 0xf75   :  { %v15624_v52 = vcombine.high %v10218_v30, %v10222_v17  ;;  %v10210_v59 = vld [vmem:[#allocation28 + $0x318] sm:$0xff] }
 0xf76   :  { %11954 = vmatpush1.bf16.msra.mxu0 %v15551_v10  ;;  %v10346_v10 = vld [vmem:[#allocation28 + $0x758] sm:$0xff] }
 0xf77   :  { %11997 = vmatpush1.bf16.msra.mxu1 %v15679_v56  ;;  %11955 = vmatprep.subr.bf16.mxu0 %v15544_v7  ;;  %v10350_v56 = vld [vmem:[#allocation28 + $0x778] sm:$0xff]  ;;  %v15631_v7 = vcombine.low %v10226_v0, %v10230_v23 }
 0xf78   :  { %11998 = vmatprep.subr.bf16.mxu1 %v15672_v42  ;;  %v15759_v42 = vcombine.low %v10354_v34, %v10358_v19  ;;  %v15752_v43 = vcombine.high %v10346_v10, %v10350_v56  ;;  %v10214_v53 = vld [vmem:[#allocation28 + $0x338] sm:$0xff] }
 0xf79   :  { %v15616_v48 = vcombine.high %v10210_v59, %v10214_v53  ;;  %v10202_v24 = vld [vmem:[#allocation28 + $0x2d8] sm:$0xff] }
 0xf7a   :  { %11956 = vmatpush1.bf16.msra.mxu0 %v15543_v55  ;;  %v10338_v55 = vld [vmem:[#allocation28 + $0x718] sm:$0xff] }
 0xf7b   :  { %11999 = vmatpush1.bf16.msra.mxu1 %v15671_v61  ;;  %11957 = vmatprep.subr.bf16.mxu0 %v15536_v58  ;;  %v10342_v61 = vld [vmem:[#allocation28 + $0x738] sm:$0xff]  ;;  %v15623_v58 = vcombine.low %v10218_v30, %v10222_v17 }
 0xf7c   :  { %12000 = vmatprep.subr.bf16.mxu1 %v15664_v22  ;;  %v15751_v22 = vcombine.low %v10346_v10, %v10350_v56  ;;  %v15744_v44 = vcombine.high %v10338_v55, %v10342_v61  ;;  %v10206_v14 = vld [vmem:[#allocation28 + $0x2f8] sm:$0xff] }
 0xf7d   :  { %v15608_v39 = vcombine.high %v10202_v24, %v10206_v14  ;;  %v10194_v46 = vld [vmem:[#allocation28 + $0x298] sm:$0xff] }
 0xf7e   :  { %11958 = vmatpush1.bf16.msra.mxu0 %v15535_v21  ;;  %v10330_v21 = vld [vmem:[#allocation28 + $0x6d8] sm:$0xff] }
 0xf7f   :  { %12001 = vmatpush1.bf16.msra.mxu1 %v15663_v2  ;;  %11959 = vmatprep.subr.bf16.mxu0 %v15528_v6  ;;  %v10334_v2 = vld [vmem:[#allocation28 + $0x6f8] sm:$0xff]  ;;  %v15615_v6 = vcombine.low %v10210_v59, %v10214_v53 }
 0xf80   :  { %12002 = vmatprep.subr.bf16.mxu1 %v15656_v33  ;;  %v15743_v33 = vcombine.low %v10338_v55, %v10342_v61  ;;  %v15736_v63 = vcombine.high %v10330_v21, %v10334_v2  ;;  %v10198_v60 = vld [vmem:[#allocation28 + $0x2b8] sm:$0xff] }
 0xf81   :  { %v15600_v25 = vcombine.high %v10194_v46, %v10198_v60  ;;  %v10186_v3 = vld [vmem:[#allocation28 + $0x258] sm:$0xff] }
 0xf82   :  { %11960 = vmatpush1.bf16.msra.mxu0 %v15527_v36  ;;  %v10322_v36 = vld [vmem:[#allocation28 + $0x698] sm:$0xff] }
 0xf83   :  { %12003 = vmatpush1.bf16.msra.mxu1 %v15655_v13  ;;  %11961 = vmatprep.subr.bf16.mxu0 %v15520_v47  ;;  %v10326_v13 = vld [vmem:[#allocation28 + $0x6b8] sm:$0xff]  ;;  %v15607_v47 = vcombine.low %v10202_v24, %v10206_v14 }
 0xf84   :  { %12004 = vmatprep.subr.bf16.mxu1 %v15648_v31  ;;  %v15735_v31 = vcombine.low %v10330_v21, %v10334_v2  ;;  %v15728_v15 = vcombine.high %v10322_v36, %v10326_v13  ;;  %v10190_v27 = vld [vmem:[#allocation28 + $0x278] sm:$0xff] }
 0xf85   :  { %v15592_v0 = vcombine.high %v10186_v3, %v10190_v27  ;;  %v10178_v34 = vld [vmem:[#allocation28 + $0x218] sm:$0xff] }
 0xf86   :  { %11962 = vmatpush1.bf16.msra.mxu0 %v15519_v16  ;;  %v10314_v16 = vld [vmem:[#allocation28 + $0x658] sm:$0xff] }
 0xf87   :  { %12005 = vmatpush1.bf16.msra.mxu1 %v15647_v37  ;;  %11963 = vmatprep.subr.bf16.mxu0 %v15640_v5  ;;  %v10318_v37 = vld [vmem:[#allocation28 + $0x678] sm:$0xff]  ;;  %v15599_v5 = vcombine.low %v10194_v46, %v10198_v60 }
 0xf88   :  { %12006 = vmatprep.subr.bf16.mxu1 %v15768_v20  ;;  %v15727_v20 = vcombine.low %v10322_v36, %v10326_v13  ;;  %v15720_v23 = vcombine.high %v10314_v16, %v10318_v37  ;;  %v10182_v19 = vld [vmem:[#allocation28 + $0x238] sm:$0xff] }
 0xf89   :  { %v15584_v30 = vcombine.high %v10178_v34, %v10182_v19  ;;  %v15583_v10 = vcombine.low %v10178_v34, %v10182_v19  ;;  %v17568_v59 = vld [vmem:[#allocation31 + $0xc4] ss:$16 sps:$4 sm:$0xff]   ;;  %v17578_v53 = vld [vmem:[#allocation31 + $0x2e0] ss:$16 sps:$4 sm:$0xff]  }
 0xf8a   :  { %11964 = vmatpush2.bf16.msra.mxu0 %v15639_v1  ;;  %v10306_v1 = vld [vmem:[#allocation28 + $0x618] sm:$0xff] }
 0xf8b   :  { %12007 = vmatpush2.bf16.msra.mxu1 %v15767_v12  ;;  %11965 = vmatprep.subr.bf16.mxu0 %v15632_v35  ;;  %v10310_v12 = vld [vmem:[#allocation28 + $0x638] sm:$0xff]  ;;  %v15591_v35 = vcombine.low %v10186_v3, %v10190_v27 }
 0xf8c   :  { %12008 = vmatprep.subr.bf16.mxu1 %v15760_v9  ;;  %v15719_v9 = vcombine.low %v10314_v16, %v10318_v37  ;;  %v15712_v17 = vcombine.high %v10306_v1, %v10310_v12  ;;  %v15711_v56 = vcombine.low %v10306_v1, %v10310_v12  ;;  %v17586_v61 = vld [vmem:[#allocation31 + $0x2c4] ss:$16 sps:$4 sm:$0xff]   ;;  %v17584_v21 = vld [vmem:[#allocation31 + $0x2c0] ss:$16 sps:$4 sm:$0xff]  }
 0xf8d   :  { %v17571_v14 = vld [vmem:[#allocation31 + $0xa4] ss:$16 sps:$4 sm:$0xff]   ;;  %v17590_v46 = vld [vmem:[#allocation31 + $0x2a0] ss:$16 sps:$4 sm:$0xff]  }
 0xf8e   :  { %11966 = vmatpush2.bf16.msra.mxu0 %v15631_v7  ;;  %v17565_v7 = vld [vmem:[#allocation31 + $0xe4] ss:$16 sps:$4 sm:$0xff]   ;;  %v17596_v3 = vld [vmem:[#allocation31 + $0x280] ss:$16 sps:$4 sm:$0xff]  }
 0xf8f   :  { %12009 = vmatpush2.bf16.msra.mxu1 %v15759_v42  ;;  %11967 = vmatprep.subr.bf16.mxu0 %v15624_v52  ;;  %v17580_v42 = vld [vmem:[#allocation31 + $0x2e4] ss:$16 sps:$4 sm:$0xff]   ;;  %v17563_v52 = vld [vmem:[#allocation31 + $0xe0] ss:$16 sps:$4 sm:$0xff]  }
 0xf90   :  { %12010 = vmatprep.subr.bf16.mxu1 %v15752_v43  ;;  %v19775_v43 = vld [vmem:[#allocation29] sm:$0xff]  ;;  %v17598_v13 = vld [vmem:[#allocation31 + $0x284] ss:$16 sps:$4 sm:$0xff]   ;;  %v17581_v19 = vld [vmem:[#allocation31 + $0x40] ss:$16 sps:$4 sm:$0xff]  }
 0xf91   :  { %v10376_v55 = vrot.slane %v19775_v43, %v18941_v8  ;;  %v17604_v37 = vld [vmem:[#allocation31 + $0x264] ss:$16 sps:$4 sm:$0xff]   ;;  %v17608_v12 = vld [vmem:[#allocation31 + $0x240] ss:$16 sps:$4 sm:$0xff]  }
 0xf92   :  { %11968 = vmatpush2.bf16.msra.mxu0 %v15623_v58  ;;  %v17610_v34 = vld [vmem:[#allocation31 + $0x244] ss:$16 sps:$4 sm:$0xff]  }
 0xf93   :  { %12011 = vmatpush2.bf16.msra.mxu1 %v15751_v22  ;;  %11969 = vmatprep.subr.bf16.mxu0 %v15616_v48  ;;  %v17566_v48 = vld [vmem:[#allocation31 + $0xc0] ss:$16 sps:$4 sm:$0xff]   ;;  %v17589_v1 = vld [vmem:[#allocation31 + $0x24] ss:$16 sps:$4 sm:$0xff]  }
 0xf94   :  { %12012 = vmatprep.subr.bf16.mxu1 %v15744_v44 }
 0xf96   :  { %11970 = vmatpush2.bf16.msra.mxu0 %v15615_v6  ;;  %v17592_v6 = vld [vmem:[#allocation31 + $0x2a4] ss:$16 sps:$4 sm:$0xff]  }
 0xf97   :  { %12013 = vmatpush2.bf16.msra.mxu1 %v15743_v33  ;;  %11971 = vmatprep.subr.bf16.mxu0 %v15608_v39  ;;  %v17569_v39 = vld [vmem:[#allocation31 + $0xa0] ss:$16 sps:$4 sm:$0xff]  }
 0xf98   :  { %12014 = vmatprep.subr.bf16.mxu1 %v15736_v63 }
 0xf9a   :  { %11972 = vmatpush2.bf16.msra.mxu0 %v15607_v47 }
 0xf9b   :  { %12015 = vmatpush2.bf16.msra.mxu1 %v15735_v31  ;;  %11973 = vmatprep.subr.bf16.mxu0 %v15600_v25  ;;  %v17572_v25 = vld [vmem:[#allocation31 + $0x80] ss:$16 sps:$4 sm:$0xff]  }
 0xf9c   :  { %12016 = vmatprep.subr.bf16.mxu1 %v15728_v15  ;;  %v17577_v15 = vld [vmem:[#allocation31 + $0x64] ss:$16 sps:$4 sm:$0xff]  }
 0xf9e   :  { %11974 = vmatpush2.bf16.msra.mxu0 %v15599_v5 }
 0xf9f   :  { %12017 = vmatpush2.bf16.msra.mxu1 %v15727_v20  ;;  %11975 = vmatprep.subr.bf16.mxu0 %v15592_v0  ;;  %v17575_v20 = vld [vmem:[#allocation31 + $0x60] ss:$16 sps:$4 sm:$0xff]   ;;  %v17583_v0 = vld [vmem:[#allocation31 + $0x44] ss:$16 sps:$4 sm:$0xff]  }
 0xfa0   :  { %12018 = vmatprep.subr.bf16.mxu1 %v15720_v23  ;;  %v17602_v23 = vld [vmem:[#allocation31 + $0x260] ss:$16 sps:$4 sm:$0xff]  }
 0xfa2   :  { %11976 = vmatpush2.bf16.msra.mxu0 %v15591_v35  ;;  %v17616_v35 = vld [vmem:[#allocation31 + $0x224] ss:$16 sps:$4 sm:$0xff]  }
 0xfa3   :  { %12019 = vmatpush2.bf16.msra.mxu1 %v15719_v9  ;;  %11977 = vmatprep.subr.bf16.mxu0 %v15584_v30  ;;  %v17587_v9 = vld [vmem:[#allocation31 + $0x20] ss:$16 sps:$4 sm:$0xff]   ;;  %v17595_v30 = vld [vmem:[#allocation31 + $0x4] ss:$16 sps:$4 sm:$0xff]  }
 0xfa4   :  { %12020 = vmatprep.subr.bf16.mxu1 %v15712_v17  ;;  %v17614_v17 = vld [vmem:[#allocation31 + $0x220] ss:$16 sps:$4 sm:$0xff]  }
 0xfa6   :  { %11978 = vmatpush2.bf16.msra.mxu0 %v15583_v10  ;;  %v17622_v10 = vld [vmem:[#allocation31 + $0x204] ss:$16 sps:$4 sm:$0xff]  }
 0xfa7   :  { %12021 = vmatpush2.bf16.msra.mxu1 %v15711_v56  ;;  %13615 = vmatprep.subr.bf16.mxu0 %v17565_v7  ;;  %v17593_v56 = vld [vmem:[#allocation31] ss:$16 sps:$4 sm:$0xff]   ;;  %v17601_v7 = vld [vmem:[#allocation31 + $0x1e4] ss:$16 sps:$4 sm:$0xff]  }
 0xfa8   :  { %13658 = vmatprep.subr.bf16.mxu1 %v17580_v42  ;;  %v17620_v42 = vld [vmem:[#allocation31 + $0x200] ss:$16 sps:$4 sm:$0xff]  }
 0xfa9   :  { %11980 = vmatmul.mubr.bf16.vlgmr.msra.gmra.mxu0 %v19749_v4  ;;  %v19780_v58 = vpop.f32.mrf.mxu0  ;;  %v19782_v22 = vpop.f32.mrf.mxu1 }
 0xfaa   :  { %12023 = vmatmul.mubr.bf16.vlgmr.msra.gmra.mxu1 %v19753_v11  ;;  %13616 = vmatpush1.bf16.msra.mxu0 %v17563_v52  ;;  %v17574_v11 = vld [vmem:[#allocation31 + $0x84] ss:$16 sps:$4 sm:$0xff]  }
 0xfab   :  { %v11725_v44 = vpop.f32.mrf.mxu0  ;;  %v11768_v24 = vpop.f32.mrf.mxu1  ;;  %13617 = vmatprep.subr.bf16.mxu0 %v17568_v59  ;;  %13659 = vmatpush1.bf16.msra.mxu1 %v17578_v53  ;;  %v17628_v52 = vld [vmem:[#allocation31 + $0x3e4] ss:$16 sps:$4 sm:$0xff]   ;;  %v17599_v59 = vld [vmem:[#allocation31 + $0x1e0] ss:$16 sps:$4 sm:$0xff]  }
 0xfac   :  { %v11726_v2 = vadd.f32 %v11725_v44, %v10376_v55  ;;  %13660 = vmatprep.subr.bf16.mxu1 %v17586_v61  ;;  %v17607_v53 = vld [vmem:[#allocation31 + $0x1c4] ss:$16 sps:$4 sm:$0xff]  }
 0xfad   :  { %v19785_v33 = vpop.f32.mrf.mxu0  ;;  %v19787_v4 = vpop.f32.mrf.mxu1  ;;  %v17634_v61 = vld [vmem:[#allocation31 + $0x3c4] ss:$16 sps:$4 sm:$0xff]  }
 0xfae   :  { %13618 = vmatpush1.bf16.msra.mxu0 %v17566_v48  ;;  %v11769_v60 = vadd.f32 %v11768_v24, %v11726_v2  ;;  %v17605_v48 = vld [vmem:[#allocation31 + $0x1c0] ss:$16 sps:$4 sm:$0xff]   ;;  %v17613_v44 = vld [vmem:[#allocation31 + $0x1a4] ss:$16 sps:$4 sm:$0xff]  }
 0xfaf   :  { %v11729_v63 = vpop.f32.mrf.mxu0  ;;  %13619 = vmatprep.subr.bf16.mxu0 %v17571_v14  ;;  %13661 = vmatpush1.bf16.msra.mxu1 %v17584_v21  ;;  %v11772_v47 = vpop.f32.mrf.mxu1  ;;  %v17632_v24 = vld [vmem:[#allocation31 + $0x3c0] ss:$16 sps:$4 sm:$0xff]   ;;  %v17640_v14 = vld [vmem:[#allocation31 + $0x3a4] ss:$16 sps:$4 sm:$0xff]  }
 0xfb0   :  { %v11730_v36 = vadd.f32 %v11729_v63, %v10376_v55  ;;  %13662 = vmatprep.subr.bf16.mxu1 %v17592_v6  ;;  %v12034_v27 = vmax.f32 %v11769_v60, 0.0  ;;  %v17626_v55 = vld [vmem:[#allocation31 + $0x3e0] ss:$16 sps:$4 sm:$0xff]   ;;  %v17619_v2 = vld [vmem:[#allocation31 + $0x184] ss:$16 sps:$4 sm:$0xff]  }
 0xfb1   :  { %v17611_v21 = vld [vmem:[#allocation31 + $0x1a0] ss:$16 sps:$4 sm:$0xff]   ;;  %v17649_v60 = vld [vmem:[#allocation31 + $0x364] ss:$16 sps:$4 sm:$0xff]  }
 0xfb2   :  { %v11773_v31 = vadd.f32 %v11772_v47, %v11730_v36  ;;  %13620 = vmatpush1.bf16.msra.mxu0 %v17569_v39  ;;  %v17638_v6 = vld [vmem:[#allocation31 + $0x3a0] ss:$16 sps:$4 sm:$0xff]   ;;  %v17646_v39 = vld [vmem:[#allocation31 + $0x384] ss:$16 sps:$4 sm:$0xff]  }
 0xfb3   :  { %13621 = vmatprep.subr.bf16.mxu0 %v17574_v11  ;;  %13663 = vmatpush1.bf16.msra.mxu1 %v17590_v46  ;;  %v17617_v63 = vld [vmem:[#allocation31 + $0x180] ss:$16 sps:$4 sm:$0xff]   ;;  %v17625_v11 = vld [vmem:[#allocation31 + $0x164] ss:$16 sps:$4 sm:$0xff]  }
 0xfb4   :  { %v12042_v16 = vmax.f32 %v11773_v31, 0.0  ;;  %13664 = vmatprep.subr.bf16.mxu1 %v17598_v13  ;;  %v17644_v46 = vld [vmem:[#allocation31 + $0x380] ss:$16 sps:$4 sm:$0xff]   ;;  %v17631_v13 = vld [vmem:[#allocation31 + $0x144] ss:$16 sps:$4 sm:$0xff]  }
 0xfb5   :  { %v17623_v36 = vld [vmem:[#allocation31 + $0x160] ss:$16 sps:$4 sm:$0xff]   ;;  %v17652_v31 = vld [vmem:[#allocation31 + $0x344] ss:$16 sps:$4 sm:$0xff]  }
 0xfb6   :  { %v19789_v5 = vpack.c.bf16 %v12042_v16, %v12034_v27  ;;  %13622 = vmatpush1.bf16.msra.mxu0 %v17572_v25  ;;  %v17647_v47 = vld [vmem:[#allocation31 + $0x360] ss:$16 sps:$4 sm:$0xff]   ;;  %v10372_v25 = vrot.slane %v19775_v43, %v18870_v29  ;;  %v17637_v27 = vld [vmem:[#allocation31 + $0x124] ss:$16 sps:$4 sm:$0xff]  }
 0xfb7   :  { %13623 = vmatprep.subr.bf16.mxu0 %v17577_v15  ;;  %13665 = vmatpush1.bf16.msra.mxu1 %v17596_v3  ;;  %v17629_v15 = vld [vmem:[#allocation31 + $0x140] ss:$16 sps:$4 sm:$0xff]  }
 0xfb8   :  { %13647 = vmatprep.mubr.bf16.mxu0 %v19789_v5  ;;  %13666 = vmatprep.subr.bf16.mxu1 %v17604_v37  ;;  %v11728_v3 = vadd.f32 %v19785_v33, %v10372_v25  ;;  %v17650_v16 = vld [vmem:[#allocation31 + $0x340] ss:$16 sps:$4 sm:$0xff]   ;;  %v17655_v37 = vld [vmem:[#allocation31 + $0x324] ss:$16 sps:$4 sm:$0xff]  }
 0xfba   :  { %13624 = vmatpush1.bf16.msra.mxu0 %v17575_v20  ;;  %v11724_v20 = vadd.f32 %v19780_v58, %v10372_v25  ;;  %v17709_v58 = vld [vmem:[#allocation31 + $0x6e4] ss:$16 sps:$4 sm:$0xff]  }
 0xfbb   :  { %13625 = vmatprep.subr.bf16.mxu0 %v17583_v0  ;;  %13667 = vmatpush1.bf16.msra.mxu1 %v17602_v23  ;;  %v17635_v0 = vld [vmem:[#allocation31 + $0x120] ss:$16 sps:$4 sm:$0xff]   ;;  %v11771_v23 = vadd.f32 %v19787_v4, %v11728_v3  ;;  %v17673_v25 = vld [vmem:[#allocation31 + $0x464] ss:$16 sps:$4 sm:$0xff]  }
 0xfbc   :  { %13668 = vmatprep.subr.bf16.mxu1 %v17610_v34  ;;  %v17643_v34 = vld [vmem:[#allocation31 + $0x104] ss:$16 sps:$4 sm:$0xff]   ;;  %v11767_v33 = vadd.f32 %v19782_v22, %v11724_v20  ;;  %v17659_v4 = vld [vmem:[#allocation31 + $0x4e0] ss:$16 sps:$4 sm:$0xff]   ;;  %v10384_v22 = vrot.slane %v19775_v43, %v18895_v50 }
 0xfbd   :  { %v17707_v20 = vld [vmem:[#allocation31 + $0x6e0] ss:$16 sps:$4 sm:$0xff]  }
 0xfbe   :  { %13626 = vmatpush1.bf16.msra.mxu0 %v17581_v19  ;;  %v17653_v19 = vld [vmem:[#allocation31 + $0x320] ss:$16 sps:$4 sm:$0xff]  }
 0xfbf   :  { %13627 = vmatprep.subr.bf16.mxu0 %v17589_v1  ;;  %13669 = vmatpush1.bf16.msra.mxu1 %v17608_v12  ;;  %v17658_v1 = vld [vmem:[#allocation31 + $0x304] ss:$16 sps:$4 sm:$0xff]   ;;  %v17641_v12 = vld [vmem:[#allocation31 + $0x100] ss:$16 sps:$4 sm:$0xff]  }
 0xfc0   :  { %13670 = vmatprep.subr.bf16.mxu1 %v17616_v35  ;;  %v12041_v35 = vmax.f32 %v11771_v23, 0.0  ;;  %v17676_v23 = vld [vmem:[#allocation31 + $0x444] ss:$16 sps:$4 sm:$0xff]  }
 0xfc2   :  { %13628 = vmatpush1.bf16.msra.mxu0 %v17587_v9  ;;  %v17656_v9 = vld [vmem:[#allocation31 + $0x300] ss:$16 sps:$4 sm:$0xff]  }
 0xfc3   :  { %13629 = vmatprep.subr.bf16.mxu0 %v17595_v30  ;;  %13671 = vmatpush1.bf16.msra.mxu1 %v17614_v17  ;;  %v17661_v30 = vld [vmem:[#allocation31 + $0x4e4] ss:$16 sps:$4 sm:$0xff]   ;;  %v12033_v17 = vmax.f32 %v11767_v33, 0.0 }
 0xfc4   :  { %13672 = vmatprep.subr.bf16.mxu1 %v17622_v10  ;;  %v17679_v33 = vld [vmem:[#allocation31 + $0x424] ss:$16 sps:$4 sm:$0xff]  }
 0xfc5   :  { %v19798_v10 = vpack.c.bf16 %v12041_v35, %v12033_v17  ;;  %v17677_v35 = vld [vmem:[#allocation31 + $0x420] ss:$16 sps:$4 sm:$0xff]  }
 0xfc6   :  { %13630 = vmatpush1.bf16.msra.mxu0 %v17593_v56  ;;  %v17664_v56 = vld [vmem:[#allocation31 + $0x4c4] ss:$16 sps:$4 sm:$0xff]   ;;  %v17680_v17 = vld [vmem:[#allocation31 + $0x400] ss:$16 sps:$4 sm:$0xff]  }
 0xfc7   :  { %13631 = vmatprep.subr.bf16.mxu0 %v17601_v7  ;;  %13673 = vmatpush1.bf16.msra.mxu1 %v17620_v42  ;;  %v10380_v7 = vrot.slane %v19775_v43, %v18892_v49 }
 0xfc8   :  { %13674 = vmatprep.subr.bf16.mxu1 %v17628_v52 }
 0xfca   :  { %13632 = vmatpush2.bf16.msra.mxu0 %v17599_v59  ;;  %v17662_v59 = vld [vmem:[#allocation31 + $0x4c0] ss:$16 sps:$4 sm:$0xff]  }
 0xfcb   :  { %13633 = vmatprep.subr.bf16.mxu0 %v17607_v53  ;;  %13675 = vmatpush2.bf16.msra.mxu1 %v17626_v55 }
 0xfcc   :  { %13676 = vmatprep.subr.bf16.mxu1 %v17634_v61  ;;  %v17667_v61 = vld [vmem:[#allocation31 + $0x4a4] ss:$16 sps:$4 sm:$0xff]  }
 0xfce   :  { %13634 = vmatpush2.bf16.msra.mxu0 %v17605_v48 }
 0xfcf   :  { %13635 = vmatprep.subr.bf16.mxu0 %v17613_v44  ;;  %13677 = vmatpush2.bf16.msra.mxu1 %v17632_v24 }
 0xfd0   :  { %13678 = vmatprep.subr.bf16.mxu1 %v17640_v14 }
 0xfd2   :  { %13636 = vmatpush2.bf16.msra.mxu0 %v17611_v21 }
 0xfd3   :  { %13637 = vmatprep.subr.bf16.mxu0 %v17619_v2  ;;  %13679 = vmatpush2.bf16.msra.mxu1 %v17638_v6  ;;  %v17665_v2 = vld [vmem:[#allocation31 + $0x4a0] ss:$16 sps:$4 sm:$0xff]  }
 0xfd4   :  { %13680 = vmatprep.subr.bf16.mxu1 %v17646_v39  ;;  %v17670_v39 = vld [vmem:[#allocation31 + $0x484] ss:$16 sps:$4 sm:$0xff]  }
 0xfd6   :  { %13638 = vmatpush2.bf16.msra.mxu0 %v17617_v63 }
 0xfd7   :  { %13639 = vmatprep.subr.bf16.mxu0 %v17625_v11  ;;  %13681 = vmatpush2.bf16.msra.mxu1 %v17644_v46 }
 0xfd8   :  { %13682 = vmatprep.subr.bf16.mxu1 %v17649_v60 }
 0xfda   :  { %13640 = vmatpush2.bf16.msra.mxu0 %v17623_v36 }
 0xfdb   :  { %13641 = vmatprep.subr.bf16.mxu0 %v17631_v13  ;;  %13683 = vmatpush2.bf16.msra.mxu1 %v17647_v47  ;;  %v17668_v47 = vld [vmem:[#allocation31 + $0x480] ss:$16 sps:$4 sm:$0xff]  }
 0xfdc   :  { %13684 = vmatprep.subr.bf16.mxu1 %v17652_v31 }
 0xfde   :  { %13642 = vmatpush2.bf16.msra.mxu0 %v17629_v15 }
 0xfdf   :  { %13643 = vmatprep.subr.bf16.mxu0 %v17637_v27  ;;  %13685 = vmatpush2.bf16.msra.mxu1 %v17650_v16 }
 0xfe0   :  { %13686 = vmatprep.subr.bf16.mxu1 %v17655_v37  ;;  %v17671_v37 = vld [vmem:[#allocation31 + $0x460] ss:$16 sps:$4 sm:$0xff]  }
 0xfe2   :  { %13644 = vmatpush2.bf16.msra.mxu0 %v17635_v0 }
 0xfe3   :  { %13645 = vmatprep.subr.bf16.mxu0 %v17643_v34  ;;  %13687 = vmatpush2.bf16.msra.mxu1 %v17653_v19  ;;  %v17715_v34 = vld [vmem:[#allocation31 + $0x6c4] ss:$16 sps:$4 sm:$0xff]   ;;  %v17674_v19 = vld [vmem:[#allocation31 + $0x440] ss:$16 sps:$4 sm:$0xff]  }
 0xfe4   :  { %13688 = vmatprep.subr.bf16.mxu1 %v17658_v1  ;;  %v17713_v1 = vld [vmem:[#allocation31 + $0x6c0] ss:$16 sps:$4 sm:$0xff]  }
 0xfe6   :  { %13646 = vmatpush2.bf16.msra.mxu0 %v17641_v12  ;;  %v17721_v12 = vld [vmem:[#allocation31 + $0x6a4] ss:$16 sps:$4 sm:$0xff]  }
 0xfe7   :  { %13689 = vmatpush2.bf16.msra.mxu1 %v17656_v9  ;;  %13701 = vmatprep.subr.bf16.mxu0 %v17661_v30  ;;  %v17719_v9 = vld [vmem:[#allocation31 + $0x6a0] ss:$16 sps:$4 sm:$0xff]   ;;  %v17682_v30 = vld [vmem:[#allocation31 + $0x404] ss:$16 sps:$4 sm:$0xff]  }
 0xfe8   :  { %13744 = vmatprep.subr.bf16.mxu1 %v17709_v58  ;;  %v17727_v58 = vld [vmem:[#allocation31 + $0x684] ss:$16 sps:$4 sm:$0xff]  }
 0xfe9   :  { %v11809_v42 = vpop.f32.mrf.mxu0  ;;  %v11852_v52 = vpop.f32.mrf.mxu1  ;;  %13648 = vmatmul.mubr.bf16.vlgmr.msra.gmra.mxu0 %v19798_v10 }
 0xfea   :  { %13702 = vmatpush1.bf16.msra.mxu0 %v17659_v4  ;;  %v11810_v44 = vadd.f32 %v11809_v42, %v10380_v7  ;;  %v17725_v4 = vld [vmem:[#allocation31 + $0x680] ss:$16 sps:$4 sm:$0xff]  }
 0xfeb   :  { %v11811_v53 = vpop.f32.mrf.mxu0  ;;  %v11854_v55 = vpop.f32.mrf.mxu1  ;;  %13703 = vmatprep.subr.bf16.mxu0 %v17664_v56  ;;  %v17685_v56 = vld [vmem:[#allocation31 + $0x5e4] ss:$16 sps:$4 sm:$0xff]   ;;  %v17731_v42 = vld [vmem:[#allocation31 + $0x660] ss:$16 sps:$4 sm:$0xff]  }
 0xfec   :  { %v11812_v48 = vadd.f32 %v11811_v53, %v10384_v22  ;;  %v11853_v60 = vadd.f32 %v11852_v52, %v11810_v44  ;;  %v17688_v52 = vld [vmem:[#allocation31 + $0x5c4] ss:$16 sps:$4 sm:$0xff]   ;;  %v17686_v53 = vld [vmem:[#allocation31 + $0x5c0] ss:$16 sps:$4 sm:$0xff]  }
 0xfed   :  { %v11813_v24 = vpop.f32.mrf.mxu0  ;;  %v11856_v14 = vpop.f32.mrf.mxu1  ;;  %v17689_v44 = vld [vmem:[#allocation31 + $0x5a0] ss:$16 sps:$4 sm:$0xff]  }
 0xfee   :  { %v11814_v21 = vadd.f32 %v11813_v24, %v10380_v7  ;;  %13704 = vmatpush1.bf16.msra.mxu0 %v17662_v59  ;;  %v11855_v63 = vadd.f32 %v11854_v55, %v11812_v48  ;;  %v12035_v27 = vmax.f32 %v11853_v60, 0.0  ;;  %v17683_v7 = vld [vmem:[#allocation31 + $0x5e0] ss:$16 sps:$4 sm:$0xff]   ;;  %v17739_v59 = vld [vmem:[#allocation31 + $0x644] ss:$16 sps:$4 sm:$0xff]  }
 0xfef   :  { %v11815_v6 = vpop.f32.mrf.mxu0  ;;  %13705 = vmatprep.subr.bf16.mxu0 %v17667_v61  ;;  %v11858_v36 = vpop.f32.mrf.mxu1  ;;  %v17737_v55 = vld [vmem:[#allocation31 + $0x640] ss:$16 sps:$4 sm:$0xff]   ;;  %v17691_v61 = vld [vmem:[#allocation31 + $0x5a4] ss:$16 sps:$4 sm:$0xff]  }
 0xff0   :  { %v11857_v11 = vadd.f32 %v11856_v14, %v11814_v21  ;;  %v11816_v46 = vadd.f32 %v11815_v6, %v10384_v22  ;;  %v12036_v15 = vmax.f32 %v11855_v63, 0.0  ;;  %v17733_v22 = vld [vmem:[#allocation31 + $0x664] ss:$16 sps:$4 sm:$0xff]   ;;  %v17743_v24 = vld [vmem:[#allocation31 + $0x620] ss:$16 sps:$4 sm:$0xff]  }
 0xff1   :  { %v17745_v48 = vld [vmem:[#allocation31 + $0x624] ss:$16 sps:$4 sm:$0xff]   ;;  %v17749_v6 = vld [vmem:[#allocation31 + $0x600] ss:$16 sps:$4 sm:$0xff]  }
 0xff2   :  { %v11859_v13 = vadd.f32 %v11858_v36, %v11816_v46  ;;  %13706 = vmatpush1.bf16.msra.mxu0 %v17665_v2  ;;  %v12043_v31 = vmax.f32 %v11857_v11, 0.0  ;;  %v17694_v14 = vld [vmem:[#allocation31 + $0x584] ss:$16 sps:$4 sm:$0xff]   ;;  %v17692_v2 = vld [vmem:[#allocation31 + $0x580] ss:$16 sps:$4 sm:$0xff]  }
 0xff3   :  { %13707 = vmatprep.subr.bf16.mxu0 %v17670_v39  ;;  %v17751_v21 = vld [vmem:[#allocation31 + $0x604] ss:$16 sps:$4 sm:$0xff]   ;;  %v17695_v11 = vld [vmem:[#allocation31 + $0x560] ss:$16 sps:$4 sm:$0xff]  }
 0xff4   :  { %v12044_v3 = vmax.f32 %v11859_v13, 0.0  ;;  %v19807_v0 = vpack.c.bf16 %v12043_v31, %v12035_v27  ;;  %v17697_v39 = vld [vmem:[#allocation31 + $0x564] ss:$16 sps:$4 sm:$0xff]   ;;  %v17755_v46 = vld [vmem:[#allocation31 + $0x7e0] ss:$16 sps:$4 sm:$0xff]  }
 0xff5   :  { %v17757_v63 = vld [vmem:[#allocation31 + $0x7e4] ss:$16 sps:$4 sm:$0xff]   ;;  %v17698_v13 = vld [vmem:[#allocation31 + $0x540] ss:$16 sps:$4 sm:$0xff]  }
 0xff6   :  { %v19805_v16 = vpack.c.bf16 %v12044_v3, %v12036_v15  ;;  %13708 = vmatpush1.bf16.msra.mxu0 %v17668_v47  ;;  %v17700_v60 = vld [vmem:[#allocation31 + $0x544] ss:$16 sps:$4 sm:$0xff]   ;;  %v17761_v47 = vld [vmem:[#allocation31 + $0x7c0] ss:$16 sps:$4 sm:$0xff]  }
 0xff7   :  { %13709 = vmatprep.subr.bf16.mxu0 %v17673_v25  ;;  %v17763_v36 = vld [vmem:[#allocation31 + $0x7c4] ss:$16 sps:$4 sm:$0xff]   ;;  %v17701_v15 = vld [vmem:[#allocation31 + $0x520] ss:$16 sps:$4 sm:$0xff]  }
 0xff8   :  { %13690 = vmatprep.mubr.bf16.mxu1 %v19805_v16  ;;  %v17703_v31 = vld [vmem:[#allocation31 + $0x524] ss:$16 sps:$4 sm:$0xff]   ;;  %v17767_v3 = vld [vmem:[#allocation31 + $0x7a0] ss:$16 sps:$4 sm:$0xff]  }
 0xff9   :  { %13691 = vmatmul.mubr.bf16.vlgmr.msra.gmra.mxu1 %v19807_v0  ;;  %v17769_v25 = vld [vmem:[#allocation31 + $0x7a4] ss:$16 sps:$4 sm:$0xff]  }
 0xffa   :  { %13710 = vmatpush1.bf16.msra.mxu0 %v17671_v37  ;;  %13745 = vmatpush1.bf16.msra.mxu1 %v17707_v20  ;;  %v17706_v27 = vld [vmem:[#allocation31 + $0x504] ss:$16 sps:$4 sm:$0xff]   ;;  %v17704_v20 = vld [vmem:[#allocation31 + $0x500] ss:$16 sps:$4 sm:$0xff]  }
 0xffb   :  { %13711 = vmatprep.subr.bf16.mxu0 %v17676_v23  ;;  %13746 = vmatprep.subr.bf16.mxu1 %v17715_v34  ;;  %v17775_v37 = vld [vmem:[#allocation31 + $0x784] ss:$16 sps:$4 sm:$0xff]   ;;  %v17773_v23 = vld [vmem:[#allocation31 + $0x780] ss:$16 sps:$4 sm:$0xff]   ;;  %v17712_v34 = vld [vmem:[#allocation31 + $0xec] ss:$16 sps:$4 sm:$0xff]  }
 0xffe   :  { %13712 = vmatpush1.bf16.msra.mxu0 %v17674_v19  ;;  %13747 = vmatpush1.bf16.msra.mxu1 %v17713_v1  ;;  %v17781_v19 = vld [vmem:[#allocation31 + $0x764] ss:$16 sps:$4 sm:$0xff]   ;;  %v17779_v1 = vld [vmem:[#allocation31 + $0x760] ss:$16 sps:$4 sm:$0xff]  }
 0xfff   :  { %13713 = vmatprep.subr.bf16.mxu0 %v17679_v33  ;;  %13748 = vmatprep.subr.bf16.mxu1 %v17721_v12  ;;  %v17787_v33 = vld [vmem:[#allocation31 + $0x744] ss:$16 sps:$4 sm:$0xff]   ;;  %v10392_v12 = vrot.slane %v19775_v43, %v18923_v26 }
0x1000   :  { %v17799_v26 = vld [vmem:[#allocation31 + $0x704] ss:$16 sps:$4 sm:$0xff]  }
0x1002   :  { %13714 = vmatpush1.bf16.msra.mxu0 %v17677_v35  ;;  %13749 = vmatpush1.bf16.msra.mxu1 %v17719_v9  ;;  %v10388_v35 = vrot.slane %v19775_v43, %v18919_v54 }
0x1003   :  { %13715 = vmatprep.subr.bf16.mxu0 %v17682_v30  ;;  %13750 = vmatprep.subr.bf16.mxu1 %v17727_v58  ;;  %v17785_v58 = vld [vmem:[#allocation31 + $0x740] ss:$16 sps:$4 sm:$0xff]  }
0x1006   :  { %13716 = vmatpush1.bf16.msra.mxu0 %v17680_v17  ;;  %13751 = vmatpush1.bf16.msra.mxu1 %v17725_v4  ;;  %v17793_v4 = vld [vmem:[#allocation31 + $0x724] ss:$16 sps:$4 sm:$0xff]  }
0x1007   :  { %13717 = vmatprep.subr.bf16.mxu0 %v17685_v56  ;;  %13752 = vmatprep.subr.bf16.mxu1 %v17733_v22 }
0x100a   :  { %13718 = vmatpush2.bf16.msra.mxu0 %v17683_v7  ;;  %13753 = vmatpush1.bf16.msra.mxu1 %v17731_v42 }
0x100b   :  { %13719 = vmatprep.subr.bf16.mxu0 %v17688_v52  ;;  %13754 = vmatprep.subr.bf16.mxu1 %v17739_v59 }
0x100e   :  { %13720 = vmatpush2.bf16.msra.mxu0 %v17686_v53  ;;  %13755 = vmatpush1.bf16.msra.mxu1 %v17737_v55  ;;  %v17791_v53 = vld [vmem:[#allocation31 + $0x720] ss:$16 sps:$4 sm:$0xff]  }
0x100f   :  { %13721 = vmatprep.subr.bf16.mxu0 %v17691_v61  ;;  %13756 = vmatprep.subr.bf16.mxu1 %v17745_v48 }
0x1012   :  { %13722 = vmatpush2.bf16.msra.mxu0 %v17689_v44  ;;  %13757 = vmatpush1.bf16.msra.mxu1 %v17743_v24 }
0x1013   :  { %13723 = vmatprep.subr.bf16.mxu0 %v17694_v14  ;;  %13758 = vmatprep.subr.bf16.mxu1 %v17751_v21  ;;  %v17797_v21 = vld [vmem:[#allocation31 + $0x700] ss:$16 sps:$4 sm:$0xff]  }
0x1016   :  { %13724 = vmatpush2.bf16.msra.mxu0 %v17692_v2  ;;  %13759 = vmatpush1.bf16.msra.mxu1 %v17749_v6  ;;  %v17805_v6 = vld [vmem:[#allocation31 + $0x2ec] ss:$16 sps:$4 sm:$0xff]  }
0x1017   :  { %13725 = vmatprep.subr.bf16.mxu0 %v17697_v39  ;;  %13760 = vmatprep.subr.bf16.mxu1 %v17757_v63 }
0x101a   :  { %13726 = vmatpush2.bf16.msra.mxu0 %v17695_v11  ;;  %13761 = vmatpush2.bf16.msra.mxu1 %v17755_v46 }
0x101b   :  { %13727 = vmatprep.subr.bf16.mxu0 %v17700_v60  ;;  %13762 = vmatprep.subr.bf16.mxu1 %v17763_v36  ;;  %v17710_v60 = vld [vmem:[#allocation31 + $0xe8] ss:$16 sps:$4 sm:$0xff]  }
0x101e   :  { %13728 = vmatpush2.bf16.msra.mxu0 %v17698_v13  ;;  %13763 = vmatpush2.bf16.msra.mxu1 %v17761_v47  ;;  %v17718_v13 = vld [vmem:[#allocation31 + $0xcc] ss:$16 sps:$4 sm:$0xff]   ;;  %v17716_v47 = vld [vmem:[#allocation31 + $0xc8] ss:$16 sps:$4 sm:$0xff]  }
0x101f   :  { %13729 = vmatprep.subr.bf16.mxu0 %v17703_v31  ;;  %13764 = vmatprep.subr.bf16.mxu1 %v17769_v25  ;;  %v17724_v31 = vld [vmem:[#allocation31 + $0xac] ss:$16 sps:$4 sm:$0xff]   ;;  %v17722_v25 = vld [vmem:[#allocation31 + $0xa8] ss:$16 sps:$4 sm:$0xff]  }
0x1022   :  { %13730 = vmatpush2.bf16.msra.mxu0 %v17701_v15  ;;  %13765 = vmatpush2.bf16.msra.mxu1 %v17767_v3  ;;  %v17730_v15 = vld [vmem:[#allocation31 + $0x8c] ss:$16 sps:$4 sm:$0xff]   ;;  %v17728_v3 = vld [vmem:[#allocation31 + $0x88] ss:$16 sps:$4 sm:$0xff]  }
0x1023   :  { %13731 = vmatprep.subr.bf16.mxu0 %v17706_v27  ;;  %13766 = vmatprep.subr.bf16.mxu1 %v17775_v37  ;;  %v17736_v27 = vld [vmem:[#allocation31 + $0x6c] ss:$16 sps:$4 sm:$0xff]   ;;  %v17734_v37 = vld [vmem:[#allocation31 + $0x68] ss:$16 sps:$4 sm:$0xff]  }
0x1026   :  { %13732 = vmatpush2.bf16.msra.mxu0 %v17704_v20  ;;  %13767 = vmatpush2.bf16.msra.mxu1 %v17773_v23  ;;  %v17742_v20 = vld [vmem:[#allocation31 + $0x4c] ss:$16 sps:$4 sm:$0xff]   ;;  %v17740_v23 = vld [vmem:[#allocation31 + $0x48] ss:$16 sps:$4 sm:$0xff]  }
0x1027   :  { %13787 = vmatprep.subr.bf16.mxu0 %v17712_v34  ;;  %13768 = vmatprep.subr.bf16.mxu1 %v17781_v19  ;;  %v17748_v34 = vld [vmem:[#allocation31 + $0x2c] ss:$16 sps:$4 sm:$0xff]  }
0x1028   :  { %v17754_v19 = vld [vmem:[#allocation31 + $0xc] ss:$16 sps:$4 sm:$0xff]  }
0x1029   :  { %v11895_v9 = vpop.f32.mrf.mxu0 }
0x102a   :  { %v11938_v30 = vpop.f32.mrf.mxu1  ;;  %13769 = vmatpush2.bf16.msra.mxu1 %v17779_v1  ;;  %v11896_v7 = vadd.f32 %v11895_v9, %v10388_v35  ;;  %v17752_v1 = vld [vmem:[#allocation31 + $0x8] ss:$16 sps:$4 sm:$0xff]  }
0x102b   :  { %v11897_v17 = vpop.f32.mrf.mxu0  ;;  %13770 = vmatprep.subr.bf16.mxu1 %v17787_v33  ;;  %v17760_v33 = vld [vmem:[#allocation31 + $0x1ec] ss:$16 sps:$4 sm:$0xff]   ;;  %v17764_v9 = vld [vmem:[#allocation31 + $0x1c8] ss:$16 sps:$4 sm:$0xff]  }
0x102c   :  { %v11898_v56 = vadd.f32 %v11897_v17, %v10392_v12  ;;  %v11940_v22 = vpop.f32.mrf.mxu1  ;;  %v11939_v44 = vadd.f32 %v11938_v30, %v11896_v7  ;;  %v17772_v30 = vld [vmem:[#allocation31 + $0x1ac] ss:$16 sps:$4 sm:$0xff]  }
0x102d   :  { %v11899_v42 = vpop.f32.mrf.mxu0  ;;  %v17778_v17 = vld [vmem:[#allocation31 + $0x18c] ss:$16 sps:$4 sm:$0xff]  }
0x102e   :  { %v11900_v52 = vadd.f32 %v11899_v42, %v10388_v35  ;;  %v11942_v59 = vpop.f32.mrf.mxu1  ;;  %13771 = vmatpush2.bf16.msra.mxu1 %v17785_v58  ;;  %v11941_v61 = vadd.f32 %v11940_v22, %v11898_v56  ;;  %v12037_v11 = vmax.f32 %v11939_v44, 0.0  ;;  %v17766_v35 = vld [vmem:[#allocation31 + $0x1cc] ss:$16 sps:$4 sm:$0xff]   ;;  %v17770_v58 = vld [vmem:[#allocation31 + $0x1a8] ss:$16 sps:$4 sm:$0xff]   ;;  %v10400_v42 = vrot.slane %v19775_v43, %v18958_v62 }
0x102f   :  { %v11901_v55 = vpop.f32.mrf.mxu0  ;;  %13772 = vmatprep.subr.bf16.mxu1 %v17793_v4  ;;  %v17776_v4 = vld [vmem:[#allocation31 + $0x188] ss:$16 sps:$4 sm:$0xff]   ;;  %v17784_v56 = vld [vmem:[#allocation31 + $0x16c] ss:$16 sps:$4 sm:$0xff]  }
0x1030   :  { %v11943_v54 = vadd.f32 %v11942_v59, %v11900_v52  ;;  %v11902_v48 = vadd.f32 %v11901_v55, %v10392_v12  ;;  %v11944_v24 = vpop.f32.mrf.mxu1  ;;  %v12038_v39 = vmax.f32 %v11941_v61, 0.0  ;;  %v17758_v12 = vld [vmem:[#allocation31 + $0x1e8] ss:$16 sps:$4 sm:$0xff]   ;;  %v17790_v7 = vld [vmem:[#allocation31 + $0x14c] ss:$16 sps:$4 sm:$0xff]   ;;  %v10396_v52 = vrot.slane %v19775_v43, %v18954_v38 }
0x1031   :  { %v17782_v22 = vld [vmem:[#allocation31 + $0x168] ss:$16 sps:$4 sm:$0xff]   ;;  %v17796_v61 = vld [vmem:[#allocation31 + $0x12c] ss:$16 sps:$4 sm:$0xff]  }
0x1032   :  { %v11945_v14 = vadd.f32 %v11944_v24, %v11902_v48  ;;  %13773 = vmatpush2.bf16.msra.mxu1 %v17791_v53  ;;  %v12045_v2 = vmax.f32 %v11943_v54, 0.0  ;;  %v17788_v55 = vld [vmem:[#allocation31 + $0x148] ss:$16 sps:$4 sm:$0xff]   ;;  %v17802_v62 = vld [vmem:[#allocation31 + $0x10c] ss:$16 sps:$4 sm:$0xff]  }
0x1033   :  { %13774 = vmatprep.subr.bf16.mxu1 %v17799_v26 }
0x1034   :  { %v12046_v63 = vmax.f32 %v11945_v14, 0.0  ;;  %v19817_v36 = vpack.c.bf16 %v12045_v2, %v12037_v11  ;;  %v17794_v2 = vld [vmem:[#allocation31 + $0x128] ss:$16 sps:$4 sm:$0xff]  }
0x1036   :  { %v19815_v46 = vpack.c.bf16 %v12046_v63, %v12038_v39  ;;  %13775 = vmatpush2.bf16.msra.mxu1 %v17797_v21 }
0x1037   :  { %13830 = vmatprep.subr.bf16.mxu1 %v17805_v6 }
0x1038   :  { %13733 = vmatprep.mubr.bf16.mxu0 %v19815_v46 }
0x1039   :  { %13734 = vmatmul.mubr.bf16.vlgmr.msra.gmra.mxu0 %v19817_v36 }
0x103a   :  { %13788 = vmatpush1.bf16.msra.mxu0 %v17710_v60  ;;  %13819 = vmatprep.mubr.bf16.mxu0 %v19789_v5  ;;  %v17746_v5 = vld [vmem:[#allocation31 + $0x28] ss:$16 sps:$4 sm:$0xff]  }
0x103b   :  { %13789 = vmatprep.subr.bf16.mxu0 %v17718_v13  ;;  %v17800_v13 = vld [vmem:[#allocation31 + $0x108] ss:$16 sps:$4 sm:$0xff]  }
0x103e   :  { %13790 = vmatpush1.bf16.msra.mxu0 %v17716_v47 }
0x103f   :  { %13791 = vmatprep.subr.bf16.mxu0 %v17724_v31  ;;  %v17808_v31 = vld [vmem:[#allocation31 + $0x4ec] ss:$16 sps:$4 sm:$0xff]  }
0x1042   :  { %13792 = vmatpush1.bf16.msra.mxu0 %v17722_v25 }
0x1043   :  { %13793 = vmatprep.subr.bf16.mxu0 %v17730_v15 }
0x1046   :  { %13794 = vmatpush1.bf16.msra.mxu0 %v17728_v3 }
0x1047   :  { %13795 = vmatprep.subr.bf16.mxu0 %v17736_v27 }
0x104a   :  { %13796 = vmatpush1.bf16.msra.mxu0 %v17734_v37  ;;  %v17803_v37 = vld [vmem:[#allocation31 + $0x2e8] ss:$16 sps:$4 sm:$0xff]  }
0x104b   :  { %13797 = vmatprep.subr.bf16.mxu0 %v17742_v20  ;;  %v17806_v20 = vld [vmem:[#allocation31 + $0x4e8] ss:$16 sps:$4 sm:$0xff]  }
0x104e   :  { %13798 = vmatpush1.bf16.msra.mxu0 %v17740_v23 }
0x104f   :  { %13799 = vmatprep.subr.bf16.mxu0 %v17748_v34  ;;  %v17811_v34 = vld [vmem:[#allocation31 + $0x2cc] ss:$16 sps:$4 sm:$0xff]  }
0x1052   :  { %13800 = vmatpush1.bf16.msra.mxu0 %v17746_v5  ;;  %v17814_v5 = vld [vmem:[#allocation31 + $0x4cc] ss:$16 sps:$4 sm:$0xff]  }
0x1053   :  { %13801 = vmatprep.subr.bf16.mxu0 %v17754_v19  ;;  %v17809_v19 = vld [vmem:[#allocation31 + $0x2c8] ss:$16 sps:$4 sm:$0xff]  }
0x1056   :  { %13802 = vmatpush1.bf16.msra.mxu0 %v17752_v1  ;;  %v17812_v1 = vld [vmem:[#allocation31 + $0x4c8] ss:$16 sps:$4 sm:$0xff]  }
0x1057   :  { %13803 = vmatprep.subr.bf16.mxu0 %v17760_v33  ;;  %v17817_v33 = vld [vmem:[#allocation31 + $0x2ac] ss:$16 sps:$4 sm:$0xff]  }
0x105a   :  { %13804 = vmatpush2.bf16.msra.mxu0 %v17758_v12  ;;  %v17820_v12 = vld [vmem:[#allocation31 + $0x4ac] ss:$16 sps:$4 sm:$0xff]  }
0x105b   :  { %13805 = vmatprep.subr.bf16.mxu0 %v17766_v35  ;;  %v17815_v35 = vld [vmem:[#allocation31 + $0x2a8] ss:$16 sps:$4 sm:$0xff]  }
0x105e   :  { %13806 = vmatpush2.bf16.msra.mxu0 %v17764_v9  ;;  %v17818_v9 = vld [vmem:[#allocation31 + $0x4a8] ss:$16 sps:$4 sm:$0xff]  }
0x105f   :  { %13807 = vmatprep.subr.bf16.mxu0 %v17772_v30  ;;  %v17826_v30 = vld [vmem:[#allocation31 + $0x48c] ss:$16 sps:$4 sm:$0xff]  }
0x1062   :  { %13808 = vmatpush2.bf16.msra.mxu0 %v17770_v58  ;;  %v17821_v58 = vld [vmem:[#allocation31 + $0x288] ss:$16 sps:$4 sm:$0xff]  }
0x1063   :  { %13809 = vmatprep.subr.bf16.mxu0 %v17778_v17  ;;  %v17824_v17 = vld [vmem:[#allocation31 + $0x488] ss:$16 sps:$4 sm:$0xff]  }
0x1066   :  { %13810 = vmatpush2.bf16.msra.mxu0 %v17776_v4  ;;  %v17827_v4 = vld [vmem:[#allocation31 + $0x268] ss:$16 sps:$4 sm:$0xff]  }
0x1067   :  { %13811 = vmatprep.subr.bf16.mxu0 %v17784_v56  ;;  %v17830_v56 = vld [vmem:[#allocation31 + $0x468] ss:$16 sps:$4 sm:$0xff]  }
0x1069   :  { %v11981_v59 = vpop.f32.mrf.mxu0 }
0x106a   :  { %v12024_v53 = vpop.f32.mrf.mxu1  ;;  %13812 = vmatpush2.bf16.msra.mxu0 %v17782_v22  ;;  %v11982_v44 = vadd.f32 %v11981_v59, %v10396_v52  ;;  %v17835_v22 = vld [vmem:[#allocation31 + $0x24c] ss:$16 sps:$4 sm:$0xff]  }
0x106b   :  { %v11983_v26 = vpop.f32.mrf.mxu0  ;;  %13813 = vmatprep.subr.bf16.mxu0 %v17790_v7  ;;  %v17838_v7 = vld [vmem:[#allocation31 + $0x44c] ss:$16 sps:$4 sm:$0xff]  }
0x106c   :  { %v11984_v54 = vadd.f32 %v11983_v26, %v10400_v42  ;;  %v12026_v48 = vpop.f32.mrf.mxu1  ;;  %v12025_v63 = vadd.f32 %v12024_v53, %v11982_v44  ;;  %v17841_v59 = vld [vmem:[#allocation31 + $0x22c] ss:$16 sps:$4 sm:$0xff]   ;;  %v17842_v26 = vld [vmem:[#allocation31 + $0x428] ss:$16 sps:$4 sm:$0xff]  }
0x106d   :  { %v11985_v24 = vpop.f32.mrf.mxu0  ;;  %v17844_v53 = vld [vmem:[#allocation31 + $0x42c] ss:$16 sps:$4 sm:$0xff]   ;;  %v17848_v44 = vld [vmem:[#allocation31 + $0x408] ss:$16 sps:$4 sm:$0xff]  }
0x106e   :  { %v11986_v14 = vadd.f32 %v11985_v24, %v10396_v52  ;;  %v12028_v21 = vpop.f32.mrf.mxu1  ;;  %13814 = vmatpush2.bf16.msra.mxu0 %v17788_v55  ;;  %v12027_v39 = vadd.f32 %v12026_v48, %v11984_v54  ;;  %v12039_v3 = vmax.f32 %v12025_v63, 0.0  ;;  %v17836_v52 = vld [vmem:[#allocation31 + $0x448] ss:$16 sps:$4 sm:$0xff]   ;;  %v17850_v54 = vld [vmem:[#allocation31 + $0x40c] ss:$16 sps:$4 sm:$0xff]  }
0x106f   :  { %v11987_v6 = vpop.f32.mrf.mxu0  ;;  %13815 = vmatprep.subr.bf16.mxu0 %v17796_v61  ;;  %v17839_v55 = vld [vmem:[#allocation31 + $0x228] ss:$16 sps:$4 sm:$0xff]   ;;  %v17847_v61 = vld [vmem:[#allocation31 + $0x20c] ss:$16 sps:$4 sm:$0xff]  }
0x1070   :  { %v12029_v38 = vadd.f32 %v12028_v21, %v11986_v14  ;;  %v11988_v43 = vadd.f32 %v11987_v6, %v10400_v42  ;;  %v12030_v11 = vpop.f32.mrf.mxu1  ;;  %v12040_v25 = vmax.f32 %v12027_v39, 0.0  ;;  %v17833_v42 = vld [vmem:[#allocation31 + $0x248] ss:$16 sps:$4 sm:$0xff]   ;;  %v17853_v24 = vld [vmem:[#allocation31 + $0x3ec] ss:$16 sps:$4 sm:$0xff]  }
0x1071   :  { %v17845_v48 = vld [vmem:[#allocation31 + $0x208] ss:$16 sps:$4 sm:$0xff]   ;;  %v17856_v14 = vld [vmem:[#allocation31 + $0x5ec] ss:$16 sps:$4 sm:$0xff]  }
0x1072   :  { %v12031_v60 = vadd.f32 %v12030_v11, %v11988_v43  ;;  %13816 = vmatpush2.bf16.msra.mxu0 %v17794_v2  ;;  %v12047_v47 = vmax.f32 %v12029_v38, 0.0  ;;  %v17851_v21 = vld [vmem:[#allocation31 + $0x3e8] ss:$16 sps:$4 sm:$0xff]   ;;  %v17859_v6 = vld [vmem:[#allocation31 + $0x3cc] ss:$16 sps:$4 sm:$0xff]  }
0x1073   :  { %13817 = vmatprep.subr.bf16.mxu0 %v17802_v62  ;;  %v17854_v2 = vld [vmem:[#allocation31 + $0x5e8] ss:$16 sps:$4 sm:$0xff]   ;;  %v17862_v62 = vld [vmem:[#allocation31 + $0x5cc] ss:$16 sps:$4 sm:$0xff]  }
0x1074   :  { %v12048_v15 = vmax.f32 %v12031_v60, 0.0  ;;  %v19828_v23 = vpack.c.bf16 %v12047_v47, %v12039_v3  ;;  %v17857_v39 = vld [vmem:[#allocation31 + $0x3c8] ss:$16 sps:$4 sm:$0xff]   ;;  %v17865_v43 = vld [vmem:[#allocation31 + $0x3ac] ss:$16 sps:$4 sm:$0xff]  }
0x1075   :  { %v17860_v38 = vld [vmem:[#allocation31 + $0x5c8] ss:$16 sps:$4 sm:$0xff]   ;;  %v17868_v63 = vld [vmem:[#allocation31 + $0x5ac] ss:$16 sps:$4 sm:$0xff]  }
0x1076   :  { %v19826_v27 = vpack.c.bf16 %v12048_v15, %v12040_v25  ;;  %13818 = vmatpush2.bf16.msra.mxu0 %v17800_v13  ;;  %v17863_v11 = vld [vmem:[#allocation31 + $0x3a8] ss:$16 sps:$4 sm:$0xff]   ;;  %v17871_v13 = vld [vmem:[#allocation31 + $0x38c] ss:$16 sps:$4 sm:$0xff]  }
0x1077   :  { %13873 = vmatprep.subr.bf16.mxu0 %v17808_v31  ;;  %v17866_v60 = vld [vmem:[#allocation31 + $0x5a8] ss:$16 sps:$4 sm:$0xff]   ;;  %v17874_v47 = vld [vmem:[#allocation31 + $0x58c] ss:$16 sps:$4 sm:$0xff]  }
0x1078   :  { %13776 = vmatprep.mubr.bf16.mxu1 %v19826_v27  ;;  %v17869_v31 = vld [vmem:[#allocation31 + $0x388] ss:$16 sps:$4 sm:$0xff]   ;;  %v17877_v15 = vld [vmem:[#allocation31 + $0x36c] ss:$16 sps:$4 sm:$0xff]  }
0x1079   :  { %13820 = vmatmul.mubr.bf16.vlgmr.msra.gmra.mxu0 %v19798_v10  ;;  %13777 = vmatmul.mubr.bf16.vlgmr.msra.gmra.mxu1 %v19828_v23  ;;  %v17823_v10 = vld [vmem:[#allocation31 + $0x28c] ss:$16 sps:$4 sm:$0xff]   ;;  %v17872_v25 = vld [vmem:[#allocation31 + $0x588] ss:$16 sps:$4 sm:$0xff]  }
0x107a   :  { %13831 = vmatpush1.bf16.msra.mxu1 %v17803_v37  ;;  %13874 = vmatpush1.bf16.msra.mxu0 %v17806_v20  ;;  %v17880_v3 = vld [vmem:[#allocation31 + $0x56c] ss:$16 sps:$4 sm:$0xff]   ;;  %v17875_v37 = vld [vmem:[#allocation31 + $0x368] ss:$16 sps:$4 sm:$0xff]  }
0x107b   :  { %13905 = vmatprep.mubr.bf16.mxu0 %v19815_v46  ;;  %13862 = vmatprep.mubr.bf16.mxu1 %v19805_v16  ;;  %v17829_v46 = vld [vmem:[#allocation31 + $0x26c] ss:$16 sps:$4 sm:$0xff]   ;;  %v17878_v20 = vld [vmem:[#allocation31 + $0x568] ss:$16 sps:$4 sm:$0xff]  }
0x107c   :  { %13832 = vmatprep.subr.bf16.mxu1 %v17811_v34  ;;  %13875 = vmatprep.subr.bf16.mxu0 %v17814_v5  ;;  %v17832_v16 = vld [vmem:[#allocation31 + $0x46c] ss:$16 sps:$4 sm:$0xff]  }
0x107d   :  { %v17883_v34 = vld [vmem:[#allocation31 + $0x34c] ss:$16 sps:$4 sm:$0xff]  }
0x107e   :  { %13833 = vmatpush1.bf16.msra.mxu1 %v17809_v19  ;;  %13876 = vmatpush1.bf16.msra.mxu0 %v17812_v1  ;;  %v17886_v5 = vld [vmem:[#allocation31 + $0x54c] ss:$16 sps:$4 sm:$0xff]   ;;  %v17881_v19 = vld [vmem:[#allocation31 + $0x348] ss:$16 sps:$4 sm:$0xff]  }
0x107f   :  { %13834 = vmatprep.subr.bf16.mxu1 %v17817_v33  ;;  %13877 = vmatprep.subr.bf16.mxu0 %v17820_v12  ;;  %v17884_v1 = vld [vmem:[#allocation31 + $0x548] ss:$16 sps:$4 sm:$0xff]   ;;  %v17889_v33 = vld [vmem:[#allocation31 + $0x32c] ss:$16 sps:$4 sm:$0xff]  }
0x1080   :  { %v17892_v12 = vld [vmem:[#allocation31 + $0x52c] ss:$16 sps:$4 sm:$0xff]  }
0x1082   :  { %13835 = vmatpush1.bf16.msra.mxu1 %v17815_v35  ;;  %13878 = vmatpush1.bf16.msra.mxu0 %v17818_v9  ;;  %v17887_v35 = vld [vmem:[#allocation31 + $0x328] ss:$16 sps:$4 sm:$0xff]  }
0x1083   :  { %13836 = vmatprep.subr.bf16.mxu1 %v17823_v10  ;;  %13879 = vmatprep.subr.bf16.mxu0 %v17826_v30  ;;  %v17890_v9 = vld [vmem:[#allocation31 + $0x528] ss:$16 sps:$4 sm:$0xff]   ;;  %v17895_v10 = vld [vmem:[#allocation31 + $0x30c] ss:$16 sps:$4 sm:$0xff]  }
0x1084   :  { %v17898_v30 = vld [vmem:[#allocation31 + $0x50c] ss:$16 sps:$4 sm:$0xff]  }
0x1086   :  { %13837 = vmatpush1.bf16.msra.mxu1 %v17821_v58  ;;  %13880 = vmatpush1.bf16.msra.mxu0 %v17824_v17  ;;  %v17893_v58 = vld [vmem:[#allocation31 + $0x308] ss:$16 sps:$4 sm:$0xff]  }
0x1087   :  { %13838 = vmatprep.subr.bf16.mxu1 %v17829_v46  ;;  %13881 = vmatprep.subr.bf16.mxu0 %v17832_v16  ;;  %v17896_v17 = vld [vmem:[#allocation31 + $0x508] ss:$16 sps:$4 sm:$0xff]   ;;  %v17901_v46 = vld [vmem:[#allocation31 + $0x6ec] ss:$16 sps:$4 sm:$0xff]  }
0x1088   :  { %v17899_v16 = vld [vmem:[#allocation31 + $0x6e8] ss:$16 sps:$4 sm:$0xff]  }
0x108a   :  { %13839 = vmatpush1.bf16.msra.mxu1 %v17827_v4  ;;  %13882 = vmatpush1.bf16.msra.mxu0 %v17830_v56  ;;  %v17904_v4 = vld [vmem:[#allocation31 + $0x6cc] ss:$16 sps:$4 sm:$0xff]   ;;  %v17902_v56 = vld [vmem:[#allocation31 + $0x6c8] ss:$16 sps:$4 sm:$0xff]  }
0x108b   :  { %13840 = vmatprep.subr.bf16.mxu1 %v17835_v22  ;;  %13883 = vmatprep.subr.bf16.mxu0 %v17838_v7  ;;  %v17907_v22 = vld [vmem:[#allocation31 + $0x6ac] ss:$16 sps:$4 sm:$0xff]   ;;  %v17905_v7 = vld [vmem:[#allocation31 + $0x6a8] ss:$16 sps:$4 sm:$0xff]  }
0x108e   :  { %13841 = vmatpush1.bf16.msra.mxu1 %v17833_v42  ;;  %13884 = vmatpush1.bf16.msra.mxu0 %v17836_v52  ;;  %v17910_v42 = vld [vmem:[#allocation31 + $0x68c] ss:$16 sps:$4 sm:$0xff]   ;;  %v17908_v52 = vld [vmem:[#allocation31 + $0x688] ss:$16 sps:$4 sm:$0xff]  }
0x108f   :  { %13842 = vmatprep.subr.bf16.mxu1 %v17841_v59  ;;  %13885 = vmatprep.subr.bf16.mxu0 %v17844_v53  ;;  %v17913_v59 = vld [vmem:[#allocation31 + $0x66c] ss:$16 sps:$4 sm:$0xff]   ;;  %v17911_v53 = vld [vmem:[#allocation31 + $0x668] ss:$16 sps:$4 sm:$0xff]  }
0x1092   :  { %13843 = vmatpush1.bf16.msra.mxu1 %v17839_v55  ;;  %13886 = vmatpush1.bf16.msra.mxu0 %v17842_v26  ;;  %v17919_v55 = vld [vmem:[#allocation31 + $0x62c] ss:$16 sps:$4 sm:$0xff]  }
0x1093   :  { %13844 = vmatprep.subr.bf16.mxu1 %v17847_v61  ;;  %13887 = vmatprep.subr.bf16.mxu0 %v17850_v54  ;;  %v17922_v26 = vld [vmem:[#allocation31 + $0x60c] ss:$16 sps:$4 sm:$0xff]   ;;  %v17920_v61 = vld [vmem:[#allocation31 + $0x608] ss:$16 sps:$4 sm:$0xff]  }
0x1094   :  { %v17925_v54 = vld [vmem:[#allocation31 + $0x7ec] ss:$16 sps:$4 sm:$0xff]  }
0x1096   :  { %13845 = vmatpush1.bf16.msra.mxu1 %v17845_v48  ;;  %13888 = vmatpush1.bf16.msra.mxu0 %v17848_v44  ;;  %v17923_v48 = vld [vmem:[#allocation31 + $0x7e8] ss:$16 sps:$4 sm:$0xff]   ;;  %v17928_v44 = vld [vmem:[#allocation31 + $0x7cc] ss:$16 sps:$4 sm:$0xff]  }
0x1097   :  { %13846 = vmatprep.subr.bf16.mxu1 %v17853_v24  ;;  %13889 = vmatprep.subr.bf16.mxu0 %v17856_v14  ;;  %v17926_v24 = vld [vmem:[#allocation31 + $0x7c8] ss:$16 sps:$4 sm:$0xff]   ;;  %v17931_v14 = vld [vmem:[#allocation31 + $0x7ac] ss:$16 sps:$4 sm:$0xff]  }
0x109a   :  { %13847 = vmatpush2.bf16.msra.mxu1 %v17851_v21  ;;  %13890 = vmatpush2.bf16.msra.mxu0 %v17854_v2  ;;  %v17929_v21 = vld [vmem:[#allocation31 + $0x7a8] ss:$16 sps:$4 sm:$0xff]   ;;  %v17934_v2 = vld [vmem:[#allocation31 + $0x78c] ss:$16 sps:$4 sm:$0xff]  }
0x109b   :  { %13848 = vmatprep.subr.bf16.mxu1 %v17859_v6  ;;  %13891 = vmatprep.subr.bf16.mxu0 %v17862_v62  ;;  %v17932_v6 = vld [vmem:[#allocation31 + $0x788] ss:$16 sps:$4 sm:$0xff]   ;;  %v17937_v62 = vld [vmem:[#allocation31 + $0x76c] ss:$16 sps:$4 sm:$0xff]  }
0x109e   :  { %13849 = vmatpush2.bf16.msra.mxu1 %v17857_v39  ;;  %13892 = vmatpush2.bf16.msra.mxu0 %v17860_v38  ;;  %v17935_v39 = vld [vmem:[#allocation31 + $0x768] ss:$16 sps:$4 sm:$0xff]   ;;  %v17940_v38 = vld [vmem:[#allocation31 + $0x74c] ss:$16 sps:$4 sm:$0xff]  }
0x109f   :  { %13850 = vmatprep.subr.bf16.mxu1 %v17865_v43  ;;  %13893 = vmatprep.subr.bf16.mxu0 %v17868_v63  ;;  %v17938_v43 = vld [vmem:[#allocation31 + $0x748] ss:$16 sps:$4 sm:$0xff]   ;;  %v17943_v63 = vld [vmem:[#allocation31 + $0x72c] ss:$16 sps:$4 sm:$0xff]  }
0x10a2   :  { %13851 = vmatpush2.bf16.msra.mxu1 %v17863_v11  ;;  %13894 = vmatpush2.bf16.msra.mxu0 %v17866_v60  ;;  %v17941_v11 = vld [vmem:[#allocation31 + $0x728] ss:$16 sps:$4 sm:$0xff]   ;;  %v17946_v60 = vld [vmem:[#allocation31 + $0x70c] ss:$16 sps:$4 sm:$0xff]  }
0x10a3   :  { %13852 = vmatprep.subr.bf16.mxu1 %v17871_v13  ;;  %13895 = vmatprep.subr.bf16.mxu0 %v17874_v47  ;;  %v17944_v13 = vld [vmem:[#allocation31 + $0x708] ss:$16 sps:$4 sm:$0xff]  }
0x10a6   :  { %13853 = vmatpush2.bf16.msra.mxu1 %v17869_v31  ;;  %13896 = vmatpush2.bf16.msra.mxu0 %v17872_v25 }
0x10a7   :  { %13854 = vmatprep.subr.bf16.mxu1 %v17877_v15  ;;  %13897 = vmatprep.subr.bf16.mxu0 %v17880_v3 }
0x10a9   :  { %v13649_v47 = vpop.f32.mrf.mxu0 }
0x10aa   :  { %13855 = vmatpush2.bf16.msra.mxu1 %v17875_v37  ;;  %13898 = vmatpush2.bf16.msra.mxu0 %v17878_v20 }
0x10ab   :  { %13856 = vmatprep.subr.bf16.mxu1 %v17883_v34  ;;  %13899 = vmatprep.subr.bf16.mxu0 %v17886_v5  ;;  %v13651_v31 = vpop.f32.mrf.mxu0 }
0x10ad   :  { %v13653_v25 = vpop.f32.mrf.mxu0 }
0x10ae   :  { %13857 = vmatpush2.bf16.msra.mxu1 %v17881_v19  ;;  %13900 = vmatpush2.bf16.msra.mxu0 %v17884_v1 }
0x10af   :  { %13858 = vmatprep.subr.bf16.mxu1 %v17889_v33  ;;  %13901 = vmatprep.subr.bf16.mxu0 %v17892_v12  ;;  %v13655_v3 = vpop.f32.mrf.mxu0 }
0x10b2   :  { %13859 = vmatpush2.bf16.msra.mxu1 %v17887_v35  ;;  %13902 = vmatpush2.bf16.msra.mxu0 %v17890_v9 }
0x10b3   :  { %13860 = vmatprep.subr.bf16.mxu1 %v17895_v10  ;;  %13903 = vmatprep.subr.bf16.mxu0 %v17898_v30 }
0x10b6   :  { %13861 = vmatpush2.bf16.msra.mxu1 %v17893_v58  ;;  %13904 = vmatpush2.bf16.msra.mxu0 %v17896_v17  ;;  %v12313_v58 = vld [vmem:[#allocation32] sm:$0xf] }
0x10b7   :  { %13916 = vmatprep.subr.bf16.mxu1 %v17901_v46  ;;  %v12318_v46 = vrot.slane %v12313_v58, %v18870_v29 }
0x10b9   :  { %13863 = vmatmul.mubr.bf16.vlgmr.msra.gmra.mxu1 %v19807_v0  ;;  %13906 = vmatmul.mubr.bf16.vlgmr.msra.gmra.mxu0 %v19817_v36  ;;  %v17916_v0 = vld [vmem:[#allocation31 + $0x64c] ss:$16 sps:$4 sm:$0xff]   ;;  %v17914_v36 = vld [vmem:[#allocation31 + $0x648] ss:$16 sps:$4 sm:$0xff]   ;;  %v13692_v15 = vpop.f32.mrf.mxu1 }
0x10ba   :  { %13917 = vmatpush1.bf16.msra.mxu1 %v17899_v16  ;;  %13948 = vmatprep.mubr.bf16.mxu1 %v19826_v27  ;;  %v17917_v27 = vld [vmem:[#allocation31 + $0x628] ss:$16 sps:$4 sm:$0xff]  }
0x10bb   :  { %13918 = vmatprep.subr.bf16.mxu1 %v17904_v4  ;;  %v13694_v37 = vpop.f32.mrf.mxu1 }
0x10bd   :  { %v13696_v34 = vpop.f32.mrf.mxu1 }
0x10be   :  { %13919 = vmatpush1.bf16.msra.mxu1 %v17902_v56 }
0x10bf   :  { %13920 = vmatprep.subr.bf16.mxu1 %v17907_v22  ;;  %v13698_v19 = vpop.f32.mrf.mxu1  ;;  %v12326_v22 = vrot.slane %v12313_v58, %v18892_v49 }
0x10c2   :  { %13921 = vmatpush1.bf16.msra.mxu1 %v17905_v7  ;;  %v13650_v7 = vadd.f32 %v13649_v47, %v12318_v46 }
0x10c3   :  { %13922 = vmatprep.subr.bf16.mxu1 %v17910_v42 }
0x10c6   :  { %13923 = vmatpush1.bf16.msra.mxu1 %v17908_v52 }
0x10c7   :  { %13924 = vmatprep.subr.bf16.mxu1 %v17913_v59 }
0x10ca   :  { %13925 = vmatpush1.bf16.msra.mxu1 %v17911_v53  ;;  %v12330_v53 = vrot.slane %v12313_v58, %v18895_v50 }
0x10cb   :  { %13926 = vmatprep.subr.bf16.mxu1 %v17916_v0  ;;  %v13693_v0 = vadd.f32 %v13692_v15, %v13650_v7 }
0x10ce   :  { %13927 = vmatpush1.bf16.msra.mxu1 %v17914_v36 }
0x10cf   :  { %13928 = vmatprep.subr.bf16.mxu1 %v17919_v55 }
0x10d2   :  { %13929 = vmatpush1.bf16.msra.mxu1 %v17917_v27 }
0x10d3   :  { %13930 = vmatprep.subr.bf16.mxu1 %v17922_v26 }
0x10d6   :  { %13931 = vmatpush1.bf16.msra.mxu1 %v17920_v61  ;;  %v13654_v61 = vadd.f32 %v13653_v25, %v12318_v46 }
0x10d7   :  { %13932 = vmatprep.subr.bf16.mxu1 %v17925_v54 }
0x10da   :  { %13933 = vmatpush2.bf16.msra.mxu1 %v17923_v48 }
0x10db   :  { %13934 = vmatprep.subr.bf16.mxu1 %v17928_v44 }
0x10de   :  { %13935 = vmatpush2.bf16.msra.mxu1 %v17926_v24 }
0x10df   :  { %13936 = vmatprep.subr.bf16.mxu1 %v17931_v14 }
0x10e2   :  { %13937 = vmatpush2.bf16.msra.mxu1 %v17929_v21 }
0x10e3   :  { %13938 = vmatprep.subr.bf16.mxu1 %v17934_v2  ;;  %v13697_v2 = vadd.f32 %v13696_v34, %v13654_v61 }
0x10e6   :  { %13939 = vmatpush2.bf16.msra.mxu1 %v17932_v6 }
0x10e7   :  { %13940 = vmatprep.subr.bf16.mxu1 %v17937_v62 }
0x10ea   :  { %13941 = vmatpush2.bf16.msra.mxu1 %v17935_v39 }
0x10eb   :  { %13942 = vmatprep.subr.bf16.mxu1 %v17940_v38 }
0x10ee   :  { %13943 = vmatpush2.bf16.msra.mxu1 %v17938_v43 }
0x10ef   :  { %13944 = vmatprep.subr.bf16.mxu1 %v17943_v63 }
0x10f2   :  { %13945 = vmatpush2.bf16.msra.mxu1 %v17941_v11 }
0x10f3   :  { %13946 = vmatprep.subr.bf16.mxu1 %v17946_v60 }
0x10f6   :  { %13947 = vmatpush2.bf16.msra.mxu1 %v17944_v13 }
0x10f9   :  { %13949 = vmatmul.mubr.bf16.vlgmr.msra.gmra.mxu1 %v19828_v23  ;;  %v13735_v20 = vpop.f32.mrf.mxu0  ;;  %v12322_v23 = vrot.slane %v12313_v58, %v18941_v8 }
0x10fa   :  { %v13736_v54 = vadd.f32 %v13735_v20, %v13693_v0 }
0x10fb   :  { %v13737_v5 = vpop.f32.mrf.mxu0  ;;  %v13652_v56 = vadd.f32 %v13651_v31, %v12322_v23  ;;  %v13656_v27 = vadd.f32 %v13655_v3, %v12322_v23 }
0x10fd   :  { %v13739_v1 = vpop.f32.mrf.mxu0  ;;  %v13695_v42 = vadd.f32 %v13694_v37, %v13652_v56  ;;  %v13699_v24 = vadd.f32 %v13698_v19, %v13656_v27 }
0x10fe   :  { %v13740_v63 = vadd.f32 %v13739_v1, %v13697_v2 }
0x10ff   :  { %v13741_v12 = vpop.f32.mrf.mxu0  ;;  %v13738_v36 = vadd.f32 %v13737_v5, %v13695_v42 }
0x1100   :  { %v13742_v39 = vadd.f32 %v13741_v12, %v13699_v24 }
0x1139   :  { %v13778_v33 = vpop.f32.mrf.mxu1  ;;  %v13821_v9 = vpop.f32.mrf.mxu0 }
0x113a   :  { %v13822_v26 = vadd.f32 %v13821_v9, %v12326_v22  ;;  %v13779_v6 = vadd.f32 %v13778_v33, %v13736_v54 }
0x113b   :  { %v13780_v35 = vpop.f32.mrf.mxu1  ;;  %v13823_v30 = vpop.f32.mrf.mxu0 }
0x113c   :  { %v13781_v48 = vadd.f32 %v13780_v35, %v13738_v36  ;;  %v13824_v14 = vadd.f32 %v13823_v30, %v12330_v53  ;;  %v13959_v15 = vadd.f32 %v13779_v6, %v19731_v40 }
0x113d   :  { %v13782_v10 = vpop.f32.mrf.mxu1  ;;  %v13825_v16 = vpop.f32.mrf.mxu0 }
0x113e   :  { %v13826_v38 = vadd.f32 %v13825_v16, %v12326_v22  ;;  %v13960_v11 = vadd.f32 %v13781_v48, %v19723_v32  ;;  %v13783_v3 = vadd.f32 %v13782_v10, %v13740_v63 }
0x113f   :  { %v13784_v17 = vpop.f32.mrf.mxu1  ;;  %v13827_v52 = vpop.f32.mrf.mxu0 }
0x1140   :  { %v13828_v13 = vadd.f32 %v13827_v52, %v12330_v53  ;;  %v13785_v47 = vadd.f32 %v13784_v17, %v13742_v39  ;;  %v13969_v33 = vadd.f32 %v13960_v11, %v13959_v15  ;;  %v13963_v30 = vadd.f32 %v13783_v3, %v19733_v45  ;;  %v17947_v45 = vld [vmem:[#allocation37 + $0x78] sm:$0xff]   ;;  %v17954_v3 = vld [vmem:[#allocation37 + $0xb0] sm:$0xff]  }
0x1141   :  { %v17948_v52 = vld [vmem:[#allocation37 + $0xf8] sm:$0xff]   ;;  %16122 = vmatprep.subr.bf16.mxu0 %v17947_v45 }
0x1142   :  { %v13964_v35 = vadd.f32 %v13785_v47, %v19725_v18  ;;  %16144 = vmatprep.subr.bf16.mxu1 %v17948_v52  ;;  %v17950_v47 = vld [vmem:[#allocation37 + $0xb8] sm:$0xff]  }
0x1143   :  { %16145 = vmatpush3.bf16.msra.mxu1 %v17950_v47 }
0x1179   :  { %v13864_v4 = vpop.f32.mrf.mxu1  ;;  %v13907_v55 = vpop.f32.mrf.mxu0 }
0x117a   :  { %v13865_v21 = vadd.f32 %v13864_v4, %v13822_v26  ;;  %v13974_v4 = vadd.f32 %v13964_v35, %v13963_v30 }
0x117b   :  { %v13866_v59 = vpop.f32.mrf.mxu1  ;;  %v13909_v62 = vpop.f32.mrf.mxu0 }
0x117c   :  { %v13867_v43 = vadd.f32 %v13866_v59, %v13824_v14  ;;  %v13908_v31 = vadd.f32 %v13907_v55, %v13865_v21 }
0x117d   :  { %v13868_v44 = vpop.f32.mrf.mxu1  ;;  %v13911_v37 = vpop.f32.mrf.mxu0 }
0x117e   :  { %v13869_v25 = vadd.f32 %v13868_v44, %v13826_v38  ;;  %v13910_v5 = vadd.f32 %v13909_v62, %v13867_v43 }
0x117f   :  { %v13870_v60 = vpop.f32.mrf.mxu1  ;;  %v13913_v58 = vpop.f32.mrf.mxu0 }
0x1180   :  { %v13871_v34 = vadd.f32 %v13870_v60, %v13828_v13  ;;  %v13912_v1 = vadd.f32 %v13911_v37, %v13869_v25  ;;  %v17949_v13 = vld [vmem:[#allocation37 + $0x38] sm:$0xff]   ;;  %v17952_v25 = vld [vmem:[#allocation37 + $0xf0] sm:$0xff]   ;;  %v17955_v37 = vld [vmem:[#allocation37 + $0x68] sm:$0xff]  }
0x1181   :  { %16123 = vmatpush3.bf16.msra.mxu0 %v17949_v13  ;;  %16146 = vmatprep.subr.bf16.mxu1 %v17952_v25 }
0x1182   :  { %v13914_v17 = vadd.f32 %v13913_v58, %v13871_v34  ;;  %16147 = vmatpush3.bf16.msra.mxu1 %v17954_v3  ;;  %v17958_v34 = vld [vmem:[#allocation37 + $0xa8] sm:$0xff]   ;;  %v17967_v58 = vld [vmem:[#allocation37 + $0x50] sm:$0xff]  }
0x11b9   :  { %v13950_v20 = vpop.f32.mrf.mxu1 }
0x11ba   :  { %v13951_v19 = vadd.f32 %v13950_v20, %v13908_v31  ;;  %v17951_v31 = vld [vmem:[#allocation37 + $0x70] sm:$0xff]   ;;  %v17956_v20 = vld [vmem:[#allocation37 + $0xe8] sm:$0xff]  }
0x11bb   :  { %v13952_v12 = vpop.f32.mrf.mxu1  ;;  %16124 = vmatprep.subr.bf16.mxu0 %v17951_v31  ;;  %16148 = vmatprep.subr.bf16.mxu1 %v17956_v20 }
0x11bc   :  { %v13961_v32 = vadd.f32 %v13951_v19, %v19735_v57  ;;  %v13953_v9 = vadd.f32 %v13952_v12, %v13910_v5  ;;  %v17957_v5 = vld [vmem:[#allocation37 + $0x28] sm:$0xff]   ;;  %v17959_v19 = vld [vmem:[#allocation37 + $0x60] sm:$0xff]   ;;  %16149 = vmatpush3.bf16.msra.mxu1 %v17958_v34 }
0x11bd   :  { %v13954_v23 = vpop.f32.mrf.mxu1  ;;  %v17961_v12 = vld [vmem:[#allocation37 + $0x20] sm:$0xff]  }
0x11be   :  { %v13962_v40 = vadd.f32 %v13953_v9, %v19727_v41  ;;  %v13955_v10 = vadd.f32 %v13954_v23, %v13912_v1  ;;  %v13970_v46 = vadd.f32 %v13969_v33, %v13961_v32  ;;  %v17960_v33 = vld [vmem:[#allocation37 + $0xe0] sm:$0xff]   ;;  %v17963_v1 = vld [vmem:[#allocation37 + $0x58] sm:$0xff]   ;;  %v17968_v23 = vld [vmem:[#allocation37 + $0xd0] sm:$0xff]  }
0x11bf   :  { %v13956_v16 = vpop.f32.mrf.mxu1  ;;  %16150 = vmatprep.subr.bf16.mxu1 %v17960_v33  ;;  %v17965_v9 = vld [vmem:[#allocation37 + $0x18] sm:$0xff]  }
0x11c0   :  { %v13965_v56 = vadd.f32 %v13955_v10, %v19737_v51  ;;  %v13957_v22 = vadd.f32 %v13956_v16, %v13914_v17  ;;  %v13971_v7 = vadd.f32 %v13970_v46, %v13962_v40  ;;  %v17969_v17 = vld [vmem:[#allocation37 + $0x10] sm:$0xff]   ;;  %v17971_v10 = vld [vmem:[#allocation37 + $0x48] sm:$0xff]  }
0x11c1   :  { %v17972_v46 = vld [vmem:[#allocation37 + $0xc8] sm:$0xff]  }
0x11c2   :  { %v13966_v18 = vadd.f32 %v13957_v22, %v19729_v28  ;;  %13972 = vadd.xlane.f32.xlu0 %v13971_v7  ;;  %v13975_v57 = vadd.f32 %v13974_v4, %v13965_v56  ;;  %v17973_v16 = vld [vmem:[#allocation37 + $0x8] sm:$0xff]   ;;  %v17976_v22 = vld [vmem:[#allocation37 + $0xc0] sm:$0xff]  }
0x11c3   :  { %v17974_v4 = vld [vmem:[#allocation37 + $0x88] sm:$0xff]   ;;  %v17977_v7 = vld [vmem:[#allocation37] sm:$0xff]  }
0x11c4   :  { %v13976_v42 = vadd.f32 %v13975_v57, %v13966_v18 }
0x11c6   :  { %13977 = vadd.xlane.f32.xlu1 %v13976_v42 }
0x124b   :  { %v13973_v59 = vpop.xlane.xlu0 %13972 }
0x124c   :  { %v13979_v41 = vmul.f32 0.001953125, %v13973_v59 }
0x124e   :  { %v19851_v53 = vsub.f32 %v13959_v15, %v13979_v41  ;;  %v19853_v0 = vsub.f32 %v13960_v11, %v13979_v41  ;;  %v19855_v36 = vsub.f32 %v13961_v32, %v13979_v41  ;;  %v19857_v55 = vsub.f32 %v13962_v40, %v13979_v41  ;;  %v17953_v15 = vld [vmem:[#allocation37 + $0x30] sm:$0xff]   ;;  %v17964_v32 = vld [vmem:[#allocation37 + $0xd8] sm:$0xff]  }
0x124f   :  { %v13978_v51 = vpop.xlane.xlu1 %13977  ;;  %16125 = vmatpush3.bf16.msra.mxu0 %v17953_v15  ;;  %v17970_v40 = vld [vmem:[#allocation37 + $0x90] sm:$0xff]  }
0x1250   :  { %v13980_v28 = vmul.f32 0.001953125, %v13978_v51  ;;  %v13989_v27 = vmul.f32 %v19851_v53, %v19851_v53  ;;  %v13990_v26 = vmul.f32 %v19853_v0, %v19853_v0  ;;  %v13991_v61 = vmul.f32 %v19855_v36, %v19855_v36  ;;  %16126 = vmatprep.subr.bf16.mxu0 %v17955_v37  ;;  %v13967_v51 = vld [vmem:[#allocation34] sm:$0xf] }
0x1251   :  { %v13992_v14 = vmul.f32 %v19857_v55, %v19857_v55 }
0x1252   :  { %v19865_v54 = vsub.f32 %v13963_v30, %v13980_v28  ;;  %v19867_v48 = vsub.f32 %v13964_v35, %v13980_v28  ;;  %v13997_v44 = vadd.f32 %v13990_v26, %v13989_v27  ;;  %v19869_v24 = vsub.f32 %v13965_v56, %v13980_v28  ;;  %v17962_v35 = vld [vmem:[#allocation37 + $0xa0] sm:$0xff]   ;;  %v17966_v30 = vld [vmem:[#allocation37 + $0x98] sm:$0xff]  }
0x1253   :  { %v19873_v2 = vsub.f32 %v13966_v18, %v13980_v28  ;;  %16127 = vmatpush3.bf16.msra.mxu0 %v17957_v5  ;;  %16151 = vmatpush3.bf16.msra.mxu1 %v17962_v35  ;;  %v17975_v56 = vld [vmem:[#allocation37 + $0x40] sm:$0xff]   ;;  %v13968_v27 = vld [vmem:[#allocation35] sm:$0xf] }
0x1254   :  { %v13998_v21 = vadd.f32 %v13997_v44, %v13991_v61  ;;  %v13993_v6 = vmul.f32 %v19865_v54, %v19865_v54  ;;  %v13994_v62 = vmul.f32 %v19867_v48, %v19867_v48  ;;  %v13995_v38 = vmul.f32 %v19869_v24, %v19869_v24  ;;  %16128 = vmatprep.subr.bf16.mxu0 %v17959_v19  ;;  %v17978_v18 = vld [vmem:[#allocation37 + $0x80] sm:$0xff]  }
0x1255   :  { %v13996_v63 = vmul.f32 %v19873_v2, %v19873_v2  ;;  %16152 = vmatprep.subr.bf16.mxu1 %v17964_v32  ;;  %v14029_v61 = vrot.slane %v13967_v51, %v18941_v8 }
0x1256   :  { %v13999_v39 = vadd.f32 %v13998_v21, %v13992_v14  ;;  %v14002_v43 = vadd.f32 %v13994_v62, %v13993_v6  ;;  %v14037_v14 = vrot.slane %v13967_v51, %v18895_v50  ;;  %v14025_v6 = vrot.slane %v13967_v51, %v18870_v29 }
0x1257   :  { %16129 = vmatpush3.bf16.msra.mxu0 %v17961_v12  ;;  %16153 = vmatpush3.bf16.msra.mxu1 %v17966_v30 }
0x1258   :  { %14000 = vadd.xlane.f32.xlu0 %v13999_v39  ;;  %v14003_v11 = vadd.f32 %v14002_v43, %v13995_v38  ;;  %16130 = vmatprep.subr.bf16.mxu0 %v17963_v1  ;;  %v14033_v39 = vrot.slane %v13967_v51, %v18892_v49  ;;  %v14058_v43 = vrot.slane %v13968_v27, %v18941_v8  ;;  %v16025_v1 = vld [vmem:[#allocation38] ss:$0 sm:$0xff] }
0x1259   :  { %16154 = vmatprep.subr.bf16.mxu1 %v17968_v23 }
0x125a   :  { %v14004_v60 = vadd.f32 %v14003_v11, %v13996_v63  ;;  %v14066_v63 = vrot.slane %v13968_v27, %v18895_v50  ;;  %v14062_v11 = vrot.slane %v13968_v27, %v18892_v49 }
0x125b   :  { %16131 = vmatpush3.bf16.msra.mxu0 %v17965_v9  ;;  %16155 = vmatpush3.bf16.msra.mxu1 %v17970_v40 }
0x125c   :  { %14005 = vadd.xlane.f32.xlu1 %v14004_v60  ;;  %16132 = vmatprep.subr.bf16.mxu0 %v17967_v58 }
0x125d   :  { %16156 = vmatprep.subr.bf16.mxu1 %v17972_v46 }
0x125f   :  { %16133 = vmatpush3.bf16.msra.mxu0 %v17969_v17  ;;  %16157 = vmatpush3.bf16.msra.mxu1 %v17974_v4 }
0x1260   :  { %16134 = vmatprep.subr.bf16.mxu0 %v17971_v10  ;;  %16158 = vmatprep.subr.bf16.mxu1 %v17976_v22 }
0x1263   :  { %16135 = vmatpush3.bf16.msra.mxu0 %v17973_v16  ;;  %16159 = vmatpush3.bf16.msra.mxu1 %v17978_v18 }
0x1264   :  { %16136 = vmatprep.subr.bf16.mxu0 %v17975_v56 }
0x1267   :  { %16137 = vmatpush3.bf16.msra.mxu0 %v17977_v7 }
0x12e1   :  { %v14001_v57 = vpop.xlane.xlu0 %14000 }
0x12e2   :  { %v14007_v42 = vmul.f32 0.001953125, %v14001_v57 }
0x12e4   :  { %v14009_v45 = vadd.f32 1e-06, %v14007_v42 }
0x12e5   :  { %v14006_v52 = vpop.xlane.xlu1 %14005 }
0x12e6   :  { %18051 = vrsqrt.f32 %v14009_v45  ;;  %v14008_v59 = vmul.f32 0.001953125, %v14006_v52 }
0x12e8   :  { %v14010_v41 = vadd.f32 1e-06, %v14008_v59 }
0x12ea   :  { %18053 = vrsqrt.f32 %v14010_v41 }
0x12f3   :  { %v18052_v28 = vpop.eup %18051 }
0x12f4   :  { %v14014_v26 = vmul.f32 %v18052_v28, %v19853_v0  ;;  %v14016_v44 = vmul.f32 %v18052_v28, %v19857_v55  ;;  %v14013_v21 = vmul.f32 %v18052_v28, %v19851_v53  ;;  %v14015_v62 = vmul.f32 %v18052_v28, %v19855_v36 }
0x12f5   :  { %v14054_v0 = vrot.slane %v13968_v27, %v18870_v29 }
0x12f6   :  { %v14043_v60 = vmul.f32 %v14029_v61, %v14014_v26  ;;  %v14045_v13 = vmul.f32 %v14037_v14, %v14016_v44  ;;  %v14042_v36 = vmul.f32 %v14025_v6, %v14013_v21  ;;  %v14044_v25 = vmul.f32 %v14033_v39, %v14015_v62 }
0x12f7   :  { %v18054_v38 = vpop.eup %18053 }
0x12f8   :  { %v14018_v55 = vmul.f32 %v18054_v38, %v19867_v48  ;;  %v14020_v53 = vmul.f32 %v18054_v38, %v19873_v2  ;;  %v14017_v47 = vmul.f32 %v18054_v38, %v19865_v54  ;;  %v14019_v31 = vmul.f32 %v18054_v38, %v19869_v24 }
0x12f9   :  { %v14072_v37 = vadd.f32 %v14058_v43, %v14043_v60  ;;  %v14074_v20 = vadd.f32 %v14066_v63, %v14045_v13  ;;  %v14071_v5 = vadd.f32 %v14054_v0, %v14042_v36  ;;  %v14073_v34 = vadd.f32 %v14062_v11, %v14044_v25 }
0x12fa   :  { %v14047_v15 = vmul.f32 %v14029_v61, %v14018_v55  ;;  %v14049_v8 = vmul.f32 %v14037_v14, %v14020_v53  ;;  %v14046_v3 = vmul.f32 %v14025_v6, %v14017_v47  ;;  %v14048_v50 = vmul.f32 %v14033_v39, %v14019_v31 }
0x12fc   :  { %v14076_v29 = vadd.f32 %v14058_v43, %v14047_v15  ;;  %v14078_v49 = vadd.f32 %v14066_v63, %v14049_v8  ;;  %v14075_v48 = vadd.f32 %v14054_v0, %v14046_v3  ;;  %v14077_v19 = vadd.f32 %v14062_v11, %v14048_v50 }
0x12fe   :  { %v14080_v2 = vpack.c.bf16 %v14076_v29, %v14072_v37  ;;  %v14082_v33 = vpack.c.bf16 %v14078_v49, %v14074_v20  ;;  %v14079_v12 = vpack.c.bf16 %v14075_v48, %v14071_v5  ;;  %v14081_v54 = vpack.c.bf16 %v14077_v19, %v14073_v34 }
0x1300   :  { %14378 = vmatprep.mubr.bf16.mxu0 %v14080_v2  ;;  %14419 = vmatprep.mubr.bf16.mxu1 %v14082_v33 }
0x1301   :  { %14379 = vmatmul.mubr.bf16.vlgmr.msra.gmra.mxu0 %v14079_v12  ;;  %14420 = vmatmul.mubr.bf16.vlgmr.msra.gmra.mxu1 %v14081_v54 }
0x13c1   :  { %v16138_v24 = vpop.f32.mrf.mxu0  ;;  %v16160_v35 = vpop.f32.mrf.mxu1 }
0x13c3   :  { %v16139_v32 = vpop.f32.mrf.mxu0  ;;  %v16161_v9 = vpop.f32.mrf.mxu1 }
0x13c4   :  { %v16140_v30 = vadd.f32 %v16139_v32, %v16138_v24  ;;  %v16162_v40 = vadd.f32 %v16161_v9, %v16160_v35 }
0x13c5   :  { %v16141_v58 = vpop.f32.mrf.mxu0  ;;  %v16163_v23 = vpop.f32.mrf.mxu1 }
0x13c6   :  { %v14381_v17 = vadd.f32 %v16140_v30, %v16025_v1 }
0x13c7   :  { %v16142_v10 = vpop.f32.mrf.mxu0  ;;  %v16164_v46 = vpop.f32.mrf.mxu1 }
0x13c8   :  { %v14422_v16 = vadd.f32 %v16162_v40, %v14381_v17  ;;  %v16143_v4 = vadd.f32 %v16142_v10, %v16141_v58  ;;  %v16165_v22 = vadd.f32 %v16164_v46, %v16163_v23 }
0x13ca   :  { %14428 = vst [vmem:[#allocation40] sm:$0xff] %v14422_v16  ;;  %v14384_v56 = vadd.f32 %v16143_v4, %v16025_v1 }
0x13cc   :  { %v14425_v7 = vadd.f32 %v16165_v22, %v14384_v56 }
0x13ce   :  { %14429 = vst [vmem:[#allocation40 + $0x8] sm:$0xff] %v14425_v7 }
0x13cf   :  { %18527 = shalt.err (!%p18524_p2)
}
0x13d0   :  { %s18601_s10 = smov 128   ;;  %s18602_s29 = smov 8  }
0x13d1   :  { %14441 = dma.vmem_to_hbm [thread:$0]  %s14436_s27, 256, %s19928_s26, [#allocation5], %s18601_s10, %s18601_s10, %s18602_s29  }
0x13d2   :  { %18564 = dma.done.wait [#allocation5], 256  }
0x13d3   :  { %18565 = vsyncadd [#allocation5], 4294967040 }
0x13d4   :  { %14449 = vsyncpa [#allocation4], 1 }
0x13d5   :  { %14450 = vsyncpa [#allocation8], 1 }
0x13d6   :  { %14451 = vsyncpa [#allocation11], 1 }
0x13d7   :  { %14452 = vsyncpa [#allocation14], 1 }
0x13d8   :  { %14453 = vsyncpa [#allocation17], 1 }
0x13d9   :  { %14454 = vsyncpa [#allocation20], 1 }
0x13da   :  { %14455 = vsyncpa [#allocation23], 1 }
0x13db   :  { %14456 = vsyncpa [#allocation27], 1 }
0x13dc   :  { %14457 = vsyncpa [#allocation30], 1 }
0x13dd   :  { %14458 = vsyncpa [#allocation33], 1 }
0x13de   :  { %14459 = vsyncpa [#allocation36], 1 }
0x13df   :  { %14460 = vsyncpa [#allocation39], 1 }
0x13e0   :  { %14461 = vsyncpa [#allocation5], 1 }
0x13e1   :  { %14462 = vsyncpa [#allocation6], 1 }

</bundles_post_ra>
